<compile_context>
chip_gen: v7x
topology: tpu7x:2x2x1
jax: 0.10.0
libtpu: 0.0.40
codegen_flags: <defaults>
</compile_context>

<pallas_src>
import jax
import jax.numpy as jnp
from jax.experimental import pallas as pl
from jax.experimental.pallas import tpu as pltpu

H = 128  # GRU hidden size (fixed by the PyTorch module)

_VMEM = pl.BlockSpec(memory_space=pltpu.MemorySpace.VMEM)
# Total resident footprint is ~7 MiB (bf16 MLP weights dominate) -> 32 MiB
# scoped VMEM leaves headroom on v5e/v6e and stays below v7x's 64 MiB.
_CPARAMS = pltpu.CompilerParams(vmem_limit_bytes=32 * 1024 * 1024)


# ----------------------------------------------------------------------------
# Fused 2-layer GRU kernel (h0 = 0, time-major input, lane-dense output)
# ----------------------------------------------------------------------------
def gru2_kernel(x_ref, w_ih0_ref, w_hh0_ref, b_ih0_ref, b_hh0_ref,
                w_ih1_ref, w_hh1_ref, b_ih1_ref, b_hh1_ref,
                out_ref, hT_ref, h0_all_ref):
    """x_ref: (T*Bp, D) time-major; out_ref: (Bp, T*H); hT_ref: (2, Bp, H).

    Weights are stored transposed vs. PyTorch ((in, 3H)), gate order [r, z, n].
    h0_all_ref: VMEM scratch (T*Bp, H) staging the layer-0 states so layer-1's
    input projection can be a single batched matmul.
    """
    TB = x_ref.shape[0]
    Bp = hT_ref.shape[1]
    T = TB // Bp

    # Hoist recurrence weights/biases out of the unrolled loops.
    w_hh0 = w_hh0_ref[...]
    b_hh0 = b_hh0_ref[...]
    w_hh1 = w_hh1_ref[...]
    b_hh1 = b_hh1_ref[...]

    def cell(xg, h, w_hh, b_hh):
        hg = jnp.dot(h, w_hh, preferred_element_type=jnp.float32) + b_hh
        r = jax.nn.sigmoid(xg[:, 0:H] + hg[:, 0:H])
        z = jax.nn.sigmoid(xg[:, H:2 * H] + hg[:, H:2 * H])
        n = jnp.tanh(xg[:, 2 * H:3 * H] + r * hg[:, 2 * H:3 * H])
        return (1.0 - z) * n + z * h

    # ---- Layer 0: batched input projection over all T steps, then recurrence.
    xg0_all = jnp.dot(x_ref[...], w_ih0_ref[...],
                      preferred_element_type=jnp.float32) + b_ih0_ref[...]
    h0 = jnp.zeros((Bp, H), dtype=jnp.float32)
    for t in range(T):  # T is small & static -> full unroll for LLO scheduling
        h0 = cell(xg0_all[t * Bp:(t + 1) * Bp, :], h0, w_hh0, b_hh0)
        h0_all_ref[t * Bp:(t + 1) * Bp, :] = h0

    # ---- Layer 1: batched input projection of all layer-0 states, recurrence.
    xg1_all = jnp.dot(h0_all_ref[...], w_ih1_ref[...],
                      preferred_element_type=jnp.float32) + b_ih1_ref[...]
    h1 = jnp.zeros((Bp, H), dtype=jnp.float32)
    for t in range(T):
        h1 = cell(xg1_all[t * Bp:(t + 1) * Bp, :], h1, w_hh1, b_hh1)
        out_ref[:, t * H:(t + 1) * H] = h1          # lane-dense, 128-aligned

    hT_ref[0] = h0
    hT_ref[1] = h1


def gru2_fused(x_tm, Bp, T, p):
    return pl.pallas_call(
        gru2_kernel,
        out_shape=(jax.ShapeDtypeStruct((Bp, T * H), jnp.float32),
                   jax.ShapeDtypeStruct((2, Bp, H), jnp.float32)),
        in_specs=[_VMEM] * 9,
        out_specs=(_VMEM, _VMEM),
        scratch_shapes=[pltpu.VMEM((T * Bp, H), jnp.float32)],
        compiler_params=_CPARAMS,
    )(x_tm,
      p["gru0_w_ih"], p["gru0_w_hh"], p["gru0_b_ih"], p["gru0_b_hh"],
      p["gru1_w_ih"], p["gru1_w_hh"], p["gru1_b_ih"], p["gru1_b_hh"])


# ----------------------------------------------------------------------------
# Fused MLP head kernel: lin1+ReLU, lin2, lin3+tanh, lin4(BN folded), head
# ----------------------------------------------------------------------------
def mlp_kernel(seq_ref, hn_ref, w1a_ref, w1b_ref, b1_ref, w2_ref, b2_ref,
               w3_ref, b3_ref, w4_ref, b4_ref, w5_ref, b5_ref, out_ref):
    # lin1 split across the two feature groups (avoids a 1280-wide concat);
    # Dropout is identity in eval mode.  bf16 operands, f32 accumulation.
    h = (jnp.dot(seq_ref[...].astype(jnp.bfloat16), w1a_ref[...],
                 preferred_element_type=jnp.float32)
         + jnp.dot(hn_ref[...].astype(jnp.bfloat16), w1b_ref[...],
                   preferred_element_type=jnp.float32)
         + b1_ref[...])
    h = jnp.maximum(h, 0.0)                                   # ReLU
    # lin2 (Dropout identity)
    h = jnp.dot(h.astype(jnp.bfloat16), w2_ref[...],
                preferred_element_type=jnp.float32) + b2_ref[...]
    # lin3 + tanh
    h = jnp.tanh(jnp.dot(h.astype(jnp.bfloat16), w3_ref[...],
                         preferred_element_type=jnp.float32) + b3_ref[...])
    # lin4 (eval-mode BatchNorm1d already folded into w4/b4 at build time)
    h = jnp.dot(h, w4_ref[...], preferred_element_type=jnp.float32) + b4_ref[...]
    # head (128 -> 1)
    out_ref[...] = jnp.dot(h, w5_ref[...],
                           preferred_element_type=jnp.float32) + b5_ref[...]


def mlp_fused(seq_feats, hn_feats, p):
    Bp = seq_feats.shape[0]
    return pl.pallas_call(
        mlp_kernel,
        out_shape=jax.ShapeDtypeStruct((Bp, 1), jnp.float32),
        in_specs=[_VMEM] * 13,
        out_specs=_VMEM,
        compiler_params=_CPARAMS,
    )(seq_feats, hn_feats,
      p["lin1_wa"], p["lin1_wb"], p["lin1_b"],
      p["lin2_w"], p["lin2_b"], p["lin3_w"], p["lin3_b"],
      p["lin4_w"], p["lin4_b"], p["head_w"], p["head_b"])


# ----------------------------------------------------------------------------
# Parameter construction (deterministic, PyTorch-like uniform init)
# ----------------------------------------------------------------------------
def init_params(key, dims_dict):
    T, D = dims_dict["input_shape"]
    lin_in = dims_dict["linear"]
    seq_feat = lin_in - 2 * H                      # = T * H
    ks = iter(jax.random.split(key, 24))

    def u(shape, fan):
        k = 1.0 / jnp.sqrt(jnp.float32(fan))
        return jax.random.uniform(next(ks), shape, jnp.float32, -k, k)

    p = {}
    # GRU (PyTorch init: U(-1/sqrt(H), 1/sqrt(H)) for all GRU params).
    # Layer 0: input D -> H ; layer 1: input H -> H.  Gate order [r, z, n].
    p["gru0_w_ih"] = u((D, 3 * H), H)
    p["gru0_w_hh"] = u((H, 3 * H), H)
    p["gru0_b_ih"] = u((1, 3 * H), H)
    p["gru0_b_hh"] = u((1, 3 * H), H)
    p["gru1_w_ih"] = u((H, 3 * H), H)
    p["gru1_w_hh"] = u((H, 3 * H), H)
    p["gru1_b_ih"] = u((1, 3 * H), H)
    p["gru1_b_hh"] = u((1, 3 * H), H)

    # Linear stack (weights stored (in, out)); big ones kept bf16 for MXU /
    # weight-streaming bandwidth (f32 accumulation in-kernel).
    lin1_w = u((lin_in, 1024), lin_in)
    p["lin1_wa"] = lin1_w[:seq_feat].astype(jnp.bfloat16)     # seq-feature part
    p["lin1_wb"] = lin1_w[seq_feat:].astype(jnp.bfloat16)     # hn-feature part
    p["lin1_b"] = u((1, 1024), lin_in)
    p["lin2_w"] = u((1024, 1024), 1024).astype(jnp.bfloat16)
    p["lin2_b"] = u((1, 1024), 1024)
    p["lin3_w"] = u((1024, 512), 1024).astype(jnp.bfloat16)
    p["lin3_b"] = u((1, 512), 1024)

    # Eval-mode BatchNorm1d(512) with fresh running stats, folded into lin4:
    #   y = ((x - mean)/sqrt(var+eps)*gamma + beta) @ W + b
    #     = x @ (scale[:,None] * W) + (shift @ W + b)
    lin4_w = u((512, 128), 512)
    lin4_b = u((1, 128), 512)
    gamma = jnp.ones((512,), jnp.float32)
    beta = jnp.zeros((512,), jnp.float32)
    run_mean = jnp.zeros((512,), jnp.float32)
    run_var = jnp.ones((512,), jnp.float32)
    eps = 1e-5
    scale = gamma / jnp.sqrt(run_var + eps)
    shift = beta - run_mean * scale
    p["lin4_w"] = scale[:, None] * lin4_w
    p["lin4_b"] = shift[None, :] @ lin4_w + lin4_b

    p["head_w"] = u((128, 1), 128)
    p["head_b"] = u((1, 1), 128)
    return p


# ----------------------------------------------------------------------------
# Forward pass (mirrors GRU2.forward, eval mode)
# ----------------------------------------------------------------------------
def forward(params, x, dims_dict, y=None):
    T, D = dims_dict["input_shape"]
    B = x.shape[0]
    Bp = ((B + 7) // 8) * 8                        # pad batch to f32 sublane group
    x = x.reshape(B, T, D).astype(jnp.float32)
    x_p = jnp.pad(x, ((0, Bp - B), (0, 0), (0, 0)))
    # Time-major (T*Bp, D): lets the kernel do the input projection of all
    # timesteps in one MXU matmul per layer.
    x_tm = jnp.transpose(x_p, (1, 0, 2)).reshape(T * Bp, D)

    # ---- fused 2-layer GRU (batch_first, h0 = 0) ----
    out_flat_p, hT_p = gru2_fused(x_tm, Bp, T, params)   # (Bp, T*H), (2, Bp, H)

    # torch does hn.reshape(hn.shape[1], -1), which mixes batch rows of the
    # (2, B, H) tensor — reproduced faithfully on the TRUE batch size.
    hn_flat = hT_p[:, :B, :].reshape(B, 2 * H)           # (B, 256)
    hn_flat_p = jnp.pad(hn_flat, ((0, Bp - B), (0, 0)))

    # ---- fused MLP head (lin1 split across the two feature groups) ----
    out = mlp_fused(out_flat_p, hn_flat_p, params)[:B]    # (B, 1)

    if y is None:
        return out
    # MSELoss (mean reduction) — tiny glue reduction in plain JAX.
    return jnp.mean((out - y) ** 2)


# ----------------------------------------------------------------------------
if __name__ == "__main__":
    B, T, D = 2, 8, 16
    dims_dict = {"input_shape": (T, D), "linear": T * H + 2 * H}  # 1280

    key = jax.random.PRNGKey(0)
    pkey, xkey = jax.random.split(key)
    params = init_params(pkey, dims_dict)
    x = jax.random.normal(xkey, (B, T * D), dtype=jnp.float32)

    fwd = jax.jit(lambda p, xx: forward(p, xx, dims_dict))
    out = jax.block_until_ready(fwd(params, x))
    assert out.shape == (B, 1), out.shape
    assert bool(jnp.all(jnp.isfinite(out)))
    print("KERNEL_OK")
</pallas_src>

<mosaic_0001>
module attributes {stable_mosaic.version = 11 : i64} {
  func.func @gru2_kernel(%arg0: memref<64x16xf32, #tpu.memory_space<vmem>>, %arg1: memref<16x384xf32, #tpu.memory_space<vmem>>, %arg2: memref<128x384xf32, #tpu.memory_space<vmem>>, %arg3: memref<1x384xf32, #tpu.memory_space<vmem>>, %arg4: memref<1x384xf32, #tpu.memory_space<vmem>>, %arg5: memref<128x384xf32, #tpu.memory_space<vmem>>, %arg6: memref<128x384xf32, #tpu.memory_space<vmem>>, %arg7: memref<1x384xf32, #tpu.memory_space<vmem>>, %arg8: memref<1x384xf32, #tpu.memory_space<vmem>>, %arg9: memref<8x1024xf32, #tpu.memory_space<vmem>>, %arg10: memref<2x8x128xf32, #tpu.memory_space<vmem>>, %arg11: memref<64x128xf32, #tpu.memory_space<vmem>>) attributes {dimension_semantics = [], scalar_prefetch = 0 : i64, scratch_operands = 1 : i64, tpu.core_type = #tpu.core_type<tc>} {
    %c0 = arith.constant 0 : index
    %c0_0 = arith.constant 0 : index
    %0 = vector.load %arg2[%c0, %c0_0] : memref<128x384xf32, #tpu.memory_space<vmem>>, vector<128x384xf32>
    %c0_1 = arith.constant 0 : index
    %c0_2 = arith.constant 0 : index
    %1 = vector.load %arg4[%c0_1, %c0_2] : memref<1x384xf32, #tpu.memory_space<vmem>>, vector<1x384xf32>
    %c0_3 = arith.constant 0 : index
    %c0_4 = arith.constant 0 : index
    %2 = vector.load %arg6[%c0_3, %c0_4] : memref<128x384xf32, #tpu.memory_space<vmem>>, vector<128x384xf32>
    %c0_5 = arith.constant 0 : index
    %c0_6 = arith.constant 0 : index
    %3 = vector.load %arg8[%c0_5, %c0_6] : memref<1x384xf32, #tpu.memory_space<vmem>>, vector<1x384xf32>
    %c0_7 = arith.constant 0 : index
    %c0_8 = arith.constant 0 : index
    %4 = vector.load %arg0[%c0_7, %c0_8] : memref<64x16xf32, #tpu.memory_space<vmem>>, vector<64x16xf32>
    %c0_9 = arith.constant 0 : index
    %c0_10 = arith.constant 0 : index
    %5 = vector.load %arg1[%c0_9, %c0_10] : memref<16x384xf32, #tpu.memory_space<vmem>>, vector<16x384xf32>
    %cst = arith.constant dense<0.000000e+00> : vector<64x384xf32>
    %6 = tpu.matmul %4, %5, %cst {dimension_numbers = #tpu.dot_dimension_numbers<[1], [0], [0], [1], [0, 0, 1, 1], [], []>} : vector<64x16xf32>, vector<16x384xf32>, vector<64x384xf32> -> vector<64x384xf32>
    %c0_11 = arith.constant 0 : index
    %c0_12 = arith.constant 0 : index
    %7 = vector.load %arg3[%c0_11, %c0_12] : memref<1x384xf32, #tpu.memory_space<vmem>>, vector<1x384xf32>
    %8 = vector.broadcast %7 : vector<1x384xf32> to vector<64x384xf32>
    %9 = arith.addf %6, %8 : vector<64x384xf32>
    %cst_13 = arith.constant 0.000000e+00 : f32
    %10 = vector.broadcast %cst_13 : f32 to vector<8x128xf32>
    %11 = vector.extract_strided_slice %9 {offsets = [0, 0], sizes = [8, 384], strides = [1, 1]} : vector<64x384xf32> to vector<8x384xf32>
    %cst_14 = arith.constant dense<0.000000e+00> : vector<8x384xf32>
    %12 = tpu.matmul %10, %0, %cst_14 {dimension_numbers = #tpu.dot_dimension_numbers<[1], [0], [0], [1], [0, 0, 1, 1], [], []>} : vector<8x128xf32>, vector<128x384xf32>, vector<8x384xf32> -> vector<8x384xf32>
    %13 = vector.broadcast %1 : vector<1x384xf32> to vector<8x384xf32>
    %14 = arith.addf %12, %13 : vector<8x384xf32>
    %15 = vector.extract_strided_slice %11 {offsets = [0, 0], sizes = [8, 128], strides = [1, 1]} : vector<8x384xf32> to vector<8x128xf32>
    %16 = vector.extract_strided_slice %14 {offsets = [0, 0], sizes = [8, 128], strides = [1, 1]} : vector<8x384xf32> to vector<8x128xf32>
    %17 = arith.addf %15, %16 : vector<8x128xf32>
    %18 = arith.negf %17 : vector<8x128xf32>
    %19 = math.exp %18 : vector<8x128xf32>
    %cst_15 = arith.constant 1.000000e+00 : f32
    %20 = vector.broadcast %cst_15 : f32 to vector<8x128xf32>
    %21 = arith.addf %20, %19 : vector<8x128xf32>
    %22 = arith.divf %20, %21 : vector<8x128xf32>
    %23 = vector.extract_strided_slice %11 {offsets = [0, 128], sizes = [8, 128], strides = [1, 1]} : vector<8x384xf32> to vector<8x128xf32>
    %24 = vector.extract_strided_slice %14 {offsets = [0, 128], sizes = [8, 128], strides = [1, 1]} : vector<8x384xf32> to vector<8x128xf32>
    %25 = arith.addf %23, %24 : vector<8x128xf32>
    %26 = arith.negf %25 : vector<8x128xf32>
    %27 = math.exp %26 : vector<8x128xf32>
    %cst_16 = arith.constant 1.000000e+00 : f32
    %28 = vector.broadcast %cst_16 : f32 to vector<8x128xf32>
    %29 = arith.addf %28, %27 : vector<8x128xf32>
    %30 = arith.divf %28, %29 : vector<8x128xf32>
    %31 = vector.extract_strided_slice %11 {offsets = [0, 256], sizes = [8, 128], strides = [1, 1]} : vector<8x384xf32> to vector<8x128xf32>
    %32 = vector.extract_strided_slice %14 {offsets = [0, 256], sizes = [8, 128], strides = [1, 1]} : vector<8x384xf32> to vector<8x128xf32>
    %33 = arith.mulf %22, %32 : vector<8x128xf32>
    %34 = arith.addf %31, %33 : vector<8x128xf32>
    %35 = math.tanh %34 : vector<8x128xf32>
    %cst_17 = arith.constant 1.000000e+00 : f32
    %36 = vector.broadcast %cst_17 : f32 to vector<8x128xf32>
    %37 = arith.subf %36, %30 : vector<8x128xf32>
    %38 = arith.mulf %37, %35 : vector<8x128xf32>
    %39 = arith.mulf %30, %10 : vector<8x128xf32>
    %40 = arith.addf %38, %39 : vector<8x128xf32>
    %c0_18 = arith.constant 0 : index
    %c0_19 = arith.constant 0 : index
    %41 = vector.load %arg11[%c0_18, %c0_19] : memref<64x128xf32, #tpu.memory_space<vmem>>, vector<8x128xf32>
    tpu.vector_store %arg11[%c0_18, %c0_19], %40 {strides = array<i32>} : memref<64x128xf32, #tpu.memory_space<vmem>>, vector<8x128xf32>,
    %42 = vector.extract_strided_slice %9 {offsets = [8, 0], sizes = [8, 384], strides = [1, 1]} : vector<64x384xf32> to vector<8x384xf32>
    %cst_20 = arith.constant dense<0.000000e+00> : vector<8x384xf32>
    %43 = tpu.matmul %40, %0, %cst_20 {dimension_numbers = #tpu.dot_dimension_numbers<[1], [0], [0], [1], [0, 0, 1, 1], [], []>} : vector<8x128xf32>, vector<128x384xf32>, vector<8x384xf32> -> vector<8x384xf32>
    %44 = vector.broadcast %1 : vector<1x384xf32> to vector<8x384xf32>
    %45 = arith.addf %43, %44 : vector<8x384xf32>
    %46 = vector.extract_strided_slice %42 {offsets = [0, 0], sizes = [8, 128], strides = [1, 1]} : vector<8x384xf32> to vector<8x128xf32>
    %47 = vector.extract_strided_slice %45 {offsets = [0, 0], sizes = [8, 128], strides = [1, 1]} : vector<8x384xf32> to vector<8x128xf32>
    %48 = arith.addf %46, %47 : vector<8x128xf32>
    %49 = arith.negf %48 : vector<8x128xf32>
    %50 = math.exp %49 : vector<8x128xf32>
    %cst_21 = arith.constant 1.000000e+00 : f32
    %51 = vector.broadcast %cst_21 : f32 to vector<8x128xf32>
    %52 = arith.addf %51, %50 : vector<8x128xf32>
    %53 = arith.divf %51, %52 : vector<8x128xf32>
    %54 = vector.extract_strided_slice %42 {offsets = [0, 128], sizes = [8, 128], strides = [1, 1]} : vector<8x384xf32> to vector<8x128xf32>
    %55 = vector.extract_strided_slice %45 {offsets = [0, 128], sizes = [8, 128], strides = [1, 1]} : vector<8x384xf32> to vector<8x128xf32>
    %56 = arith.addf %54, %55 : vector<8x128xf32>
    %57 = arith.negf %56 : vector<8x128xf32>
    %58 = math.exp %57 : vector<8x128xf32>
    %cst_22 = arith.constant 1.000000e+00 : f32
    %59 = vector.broadcast %cst_22 : f32 to vector<8x128xf32>
    %60 = arith.addf %59, %58 : vector<8x128xf32>
    %61 = arith.divf %59, %60 : vector<8x128xf32>
    %62 = vector.extract_strided_slice %42 {offsets = [0, 256], sizes = [8, 128], strides = [1, 1]} : vector<8x384xf32> to vector<8x128xf32>
    %63 = vector.extract_strided_slice %45 {offsets = [0, 256], sizes = [8, 128], strides = [1, 1]} : vector<8x384xf32> to vector<8x128xf32>
    %64 = arith.mulf %53, %63 : vector<8x128xf32>
    %65 = arith.addf %62, %64 : vector<8x128xf32>
    %66 = math.tanh %65 : vector<8x128xf32>
    %cst_23 = arith.constant 1.000000e+00 : f32
    %67 = vector.broadcast %cst_23 : f32 to vector<8x128xf32>
    %68 = arith.subf %67, %61 : vector<8x128xf32>
    %69 = arith.mulf %68, %66 : vector<8x128xf32>
    %70 = arith.mulf %61, %40 : vector<8x128xf32>
    %71 = arith.addf %69, %70 : vector<8x128xf32>
    %c8 = arith.constant 8 : index
    %c0_24 = arith.constant 0 : index
    %72 = vector.load %arg11[%c8, %c0_24] : memref<64x128xf32, #tpu.memory_space<vmem>>, vector<8x128xf32>
    tpu.vector_store %arg11[%c8, %c0_24], %71 {strides = array<i32>} : memref<64x128xf32, #tpu.memory_space<vmem>>, vector<8x128xf32>,
    %73 = vector.extract_strided_slice %9 {offsets = [16, 0], sizes = [8, 384], strides = [1, 1]} : vector<64x384xf32> to vector<8x384xf32>
    %cst_25 = arith.constant dense<0.000000e+00> : vector<8x384xf32>
    %74 = tpu.matmul %71, %0, %cst_25 {dimension_numbers = #tpu.dot_dimension_numbers<[1], [0], [0], [1], [0, 0, 1, 1], [], []>} : vector<8x128xf32>, vector<128x384xf32>, vector<8x384xf32> -> vector<8x384xf32>
    %75 = vector.broadcast %1 : vector<1x384xf32> to vector<8x384xf32>
    %76 = arith.addf %74, %75 : vector<8x384xf32>
    %77 = vector.extract_strided_slice %73 {offsets = [0, 0], sizes = [8, 128], strides = [1, 1]} : vector<8x384xf32> to vector<8x128xf32>
    %78 = vector.extract_strided_slice %76 {offsets = [0, 0], sizes = [8, 128], strides = [1, 1]} : vector<8x384xf32> to vector<8x128xf32>
    %79 = arith.addf %77, %78 : vector<8x128xf32>
    %80 = arith.negf %79 : vector<8x128xf32>
    %81 = math.exp %80 : vector<8x128xf32>
    %cst_26 = arith.constant 1.000000e+00 : f32
    %82 = vector.broadcast %cst_26 : f32 to vector<8x128xf32>
    %83 = arith.addf %82, %81 : vector<8x128xf32>
    %84 = arith.divf %82, %83 : vector<8x128xf32>
    %85 = vector.extract_strided_slice %73 {offsets = [0, 128], sizes = [8, 128], strides = [1, 1]} : vector<8x384xf32> to vector<8x128xf32>
    %86 = vector.extract_strided_slice %76 {offsets = [0, 128], sizes = [8, 128], strides = [1, 1]} : vector<8x384xf32> to vector<8x128xf32>
    %87 = arith.addf %85, %86 : vector<8x128xf32>
    %88 = arith.negf %87 : vector<8x128xf32>
    %89 = math.exp %88 : vector<8x128xf32>
    %cst_27 = arith.constant 1.000000e+00 : f32
    %90 = vector.broadcast %cst_27 : f32 to vector<8x128xf32>
    %91 = arith.addf %90, %89 : vector<8x128xf32>
    %92 = arith.divf %90, %91 : vector<8x128xf32>
    %93 = vector.extract_strided_slice %73 {offsets = [0, 256], sizes = [8, 128], strides = [1, 1]} : vector<8x384xf32> to vector<8x128xf32>
    %94 = vector.extract_strided_slice %76 {offsets = [0, 256], sizes = [8, 128], strides = [1, 1]} : vector<8x384xf32> to vector<8x128xf32>
    %95 = arith.mulf %84, %94 : vector<8x128xf32>
    %96 = arith.addf %93, %95 : vector<8x128xf32>
    %97 = math.tanh %96 : vector<8x128xf32>
    %cst_28 = arith.constant 1.000000e+00 : f32
    %98 = vector.broadcast %cst_28 : f32 to vector<8x128xf32>
    %99 = arith.subf %98, %92 : vector<8x128xf32>
    %100 = arith.mulf %99, %97 : vector<8x128xf32>
    %101 = arith.mulf %92, %71 : vector<8x128xf32>
    %102 = arith.addf %100, %101 : vector<8x128xf32>
    %c16 = arith.constant 16 : index
    %c0_29 = arith.constant 0 : index
    %103 = vector.load %arg11[%c16, %c0_29] : memref<64x128xf32, #tpu.memory_space<vmem>>, vector<8x128xf32>
    tpu.vector_store %arg11[%c16, %c0_29], %102 {strides = array<i32>} : memref<64x128xf32, #tpu.memory_space<vmem>>, vector<8x128xf32>,
    %104 = vector.extract_strided_slice %9 {offsets = [24, 0], sizes = [8, 384], strides = [1, 1]} : vector<64x384xf32> to vector<8x384xf32>
    %cst_30 = arith.constant dense<0.000000e+00> : vector<8x384xf32>
    %105 = tpu.matmul %102, %0, %cst_30 {dimension_numbers = #tpu.dot_dimension_numbers<[1], [0], [0], [1], [0, 0, 1, 1], [], []>} : vector<8x128xf32>, vector<128x384xf32>, vector<8x384xf32> -> vector<8x384xf32>
    %106 = vector.broadcast %1 : vector<1x384xf32> to vector<8x384xf32>
    %107 = arith.addf %105, %106 : vector<8x384xf32>
    %108 = vector.extract_strided_slice %104 {offsets = [0, 0], sizes = [8, 128], strides = [1, 1]} : vector<8x384xf32> to vector<8x128xf32>
    %109 = vector.extract_strided_slice %107 {offsets = [0, 0], sizes = [8, 128], strides = [1, 1]} : vector<8x384xf32> to vector<8x128xf32>
    %110 = arith.addf %108, %109 : vector<8x128xf32>
    %111 = arith.negf %110 : vector<8x128xf32>
    %112 = math.exp %111 : vector<8x128xf32>
    %cst_31 = arith.constant 1.000000e+00 : f32
    %113 = vector.broadcast %cst_31 : f32 to vector<8x128xf32>
    %114 = arith.addf %113, %112 : vector<8x128xf32>
    %115 = arith.divf %113, %114 : vector<8x128xf32>
    %116 = vector.extract_strided_slice %104 {offsets = [0, 128], sizes = [8, 128], strides = [1, 1]} : vector<8x384xf32> to vector<8x128xf32>
    %117 = vector.extract_strided_slice %107 {offsets = [0, 128], sizes = [8, 128], strides = [1, 1]} : vector<8x384xf32> to vector<8x128xf32>
    %118 = arith.addf %116, %117 : vector<8x128xf32>
    %119 = arith.negf %118 : vector<8x128xf32>
    %120 = math.exp %119 : vector<8x128xf32>
    %cst_32 = arith.constant 1.000000e+00 : f32
    %121 = vector.broadcast %cst_32 : f32 to vector<8x128xf32>
    %122 = arith.addf %121, %120 : vector<8x128xf32>
    %123 = arith.divf %121, %122 : vector<8x128xf32>
    %124 = vector.extract_strided_slice %104 {offsets = [0, 256], sizes = [8, 128], strides = [1, 1]} : vector<8x384xf32> to vector<8x128xf32>
    %125 = vector.extract_strided_slice %107 {offsets = [0, 256], sizes = [8, 128], strides = [1, 1]} : vector<8x384xf32> to vector<8x128xf32>
    %126 = arith.mulf %115, %125 : vector<8x128xf32>
    %127 = arith.addf %124, %126 : vector<8x128xf32>
    %128 = math.tanh %127 : vector<8x128xf32>
    %cst_33 = arith.constant 1.000000e+00 : f32
    %129 = vector.broadcast %cst_33 : f32 to vector<8x128xf32>
    %130 = arith.subf %129, %123 : vector<8x128xf32>
    %131 = arith.mulf %130, %128 : vector<8x128xf32>
    %132 = arith.mulf %123, %102 : vector<8x128xf32>
    %133 = arith.addf %131, %132 : vector<8x128xf32>
    %c24 = arith.constant 24 : index
    %c0_34 = arith.constant 0 : index
    %134 = vector.load %arg11[%c24, %c0_34] : memref<64x128xf32, #tpu.memory_space<vmem>>, vector<8x128xf32>
    tpu.vector_store %arg11[%c24, %c0_34], %133 {strides = array<i32>} : memref<64x128xf32, #tpu.memory_space<vmem>>, vector<8x128xf32>,
    %135 = vector.extract_strided_slice %9 {offsets = [32, 0], sizes = [8, 384], strides = [1, 1]} : vector<64x384xf32> to vector<8x384xf32>
    %cst_35 = arith.constant dense<0.000000e+00> : vector<8x384xf32>
    %136 = tpu.matmul %133, %0, %cst_35 {dimension_numbers = #tpu.dot_dimension_numbers<[1], [0], [0], [1], [0, 0, 1, 1], [], []>} : vector<8x128xf32>, vector<128x384xf32>, vector<8x384xf32> -> vector<8x384xf32>
    %137 = vector.broadcast %1 : vector<1x384xf32> to vector<8x384xf32>
    %138 = arith.addf %136, %137 : vector<8x384xf32>
    %139 = vector.extract_strided_slice %135 {offsets = [0, 0], sizes = [8, 128], strides = [1, 1]} : vector<8x384xf32> to vector<8x128xf32>
    %140 = vector.extract_strided_slice %138 {offsets = [0, 0], sizes = [8, 128], strides = [1, 1]} : vector<8x384xf32> to vector<8x128xf32>
    %141 = arith.addf %139, %140 : vector<8x128xf32>
    %142 = arith.negf %141 : vector<8x128xf32>
    %143 = math.exp %142 : vector<8x128xf32>
    %cst_36 = arith.constant 1.000000e+00 : f32
    %144 = vector.broadcast %cst_36 : f32 to vector<8x128xf32>
    %145 = arith.addf %144, %143 : vector<8x128xf32>
    %146 = arith.divf %144, %145 : vector<8x128xf32>
    %147 = vector.extract_strided_slice %135 {offsets = [0, 128], sizes = [8, 128], strides = [1, 1]} : vector<8x384xf32> to vector<8x128xf32>
    %148 = vector.extract_strided_slice %138 {offsets = [0, 128], sizes = [8, 128], strides = [1, 1]} : vector<8x384xf32> to vector<8x128xf32>
    %149 = arith.addf %147, %148 : vector<8x128xf32>
    %150 = arith.negf %149 : vector<8x128xf32>
    %151 = math.exp %150 : vector<8x128xf32>
    %cst_37 = arith.constant 1.000000e+00 : f32
    %152 = vector.broadcast %cst_37 : f32 to vector<8x128xf32>
    %153 = arith.addf %152, %151 : vector<8x128xf32>
    %154 = arith.divf %152, %153 : vector<8x128xf32>
    %155 = vector.extract_strided_slice %135 {offsets = [0, 256], sizes = [8, 128], strides = [1, 1]} : vector<8x384xf32> to vector<8x128xf32>
    %156 = vector.extract_strided_slice %138 {offsets = [0, 256], sizes = [8, 128], strides = [1, 1]} : vector<8x384xf32> to vector<8x128xf32>
    %157 = arith.mulf %146, %156 : vector<8x128xf32>
    %158 = arith.addf %155, %157 : vector<8x128xf32>
    %159 = math.tanh %158 : vector<8x128xf32>
    %cst_38 = arith.constant 1.000000e+00 : f32
    %160 = vector.broadcast %cst_38 : f32 to vector<8x128xf32>
    %161 = arith.subf %160, %154 : vector<8x128xf32>
    %162 = arith.mulf %161, %159 : vector<8x128xf32>
    %163 = arith.mulf %154, %133 : vector<8x128xf32>
    %164 = arith.addf %162, %163 : vector<8x128xf32>
    %c32 = arith.constant 32 : index
    %c0_39 = arith.constant 0 : index
    %165 = vector.load %arg11[%c32, %c0_39] : memref<64x128xf32, #tpu.memory_space<vmem>>, vector<8x128xf32>
    tpu.vector_store %arg11[%c32, %c0_39], %164 {strides = array<i32>} : memref<64x128xf32, #tpu.memory_space<vmem>>, vector<8x128xf32>,
    %166 = vector.extract_strided_slice %9 {offsets = [40, 0], sizes = [8, 384], strides = [1, 1]} : vector<64x384xf32> to vector<8x384xf32>
    %cst_40 = arith.constant dense<0.000000e+00> : vector<8x384xf32>
    %167 = tpu.matmul %164, %0, %cst_40 {dimension_numbers = #tpu.dot_dimension_numbers<[1], [0], [0], [1], [0, 0, 1, 1], [], []>} : vector<8x128xf32>, vector<128x384xf32>, vector<8x384xf32> -> vector<8x384xf32>
    %168 = vector.broadcast %1 : vector<1x384xf32> to vector<8x384xf32>
    %169 = arith.addf %167, %168 : vector<8x384xf32>
    %170 = vector.extract_strided_slice %166 {offsets = [0, 0], sizes = [8, 128], strides = [1, 1]} : vector<8x384xf32> to vector<8x128xf32>
    %171 = vector.extract_strided_slice %169 {offsets = [0, 0], sizes = [8, 128], strides = [1, 1]} : vector<8x384xf32> to vector<8x128xf32>
    %172 = arith.addf %170, %171 : vector<8x128xf32>
    %173 = arith.negf %172 : vector<8x128xf32>
    %174 = math.exp %173 : vector<8x128xf32>
    %cst_41 = arith.constant 1.000000e+00 : f32
    %175 = vector.broadcast %cst_41 : f32 to vector<8x128xf32>
    %176 = arith.addf %175, %174 : vector<8x128xf32>
    %177 = arith.divf %175, %176 : vector<8x128xf32>
    %178 = vector.extract_strided_slice %166 {offsets = [0, 128], sizes = [8, 128], strides = [1, 1]} : vector<8x384xf32> to vector<8x128xf32>
    %179 = vector.extract_strided_slice %169 {offsets = [0, 128], sizes = [8, 128], strides = [1, 1]} : vector<8x384xf32> to vector<8x128xf32>
    %180 = arith.addf %178, %179 : vector<8x128xf32>
    %181 = arith.negf %180 : vector<8x128xf32>
    %182 = math.exp %181 : vector<8x128xf32>
    %cst_42 = arith.constant 1.000000e+00 : f32
    %183 = vector.broadcast %cst_42 : f32 to vector<8x128xf32>
    %184 = arith.addf %183, %182 : vector<8x128xf32>
    %185 = arith.divf %183, %184 : vector<8x128xf32>
    %186 = vector.extract_strided_slice %166 {offsets = [0, 256], sizes = [8, 128], strides = [1, 1]} : vector<8x384xf32> to vector<8x128xf32>
    %187 = vector.extract_strided_slice %169 {offsets = [0, 256], sizes = [8, 128], strides = [1, 1]} : vector<8x384xf32> to vector<8x128xf32>
    %188 = arith.mulf %177, %187 : vector<8x128xf32>
    %189 = arith.addf %186, %188 : vector<8x128xf32>
    %190 = math.tanh %189 : vector<8x128xf32>
    %cst_43 = arith.constant 1.000000e+00 : f32
    %191 = vector.broadcast %cst_43 : f32 to vector<8x128xf32>
    %192 = arith.subf %191, %185 : vector<8x128xf32>
    %193 = arith.mulf %192, %190 : vector<8x128xf32>
    %194 = arith.mulf %185, %164 : vector<8x128xf32>
    %195 = arith.addf %193, %194 : vector<8x128xf32>
    %c40 = arith.constant 40 : index
    %c0_44 = arith.constant 0 : index
    %196 = vector.load %arg11[%c40, %c0_44] : memref<64x128xf32, #tpu.memory_space<vmem>>, vector<8x128xf32>
    tpu.vector_store %arg11[%c40, %c0_44], %195 {strides = array<i32>} : memref<64x128xf32, #tpu.memory_space<vmem>>, vector<8x128xf32>,
    %197 = vector.extract_strided_slice %9 {offsets = [48, 0], sizes = [8, 384], strides = [1, 1]} : vector<64x384xf32> to vector<8x384xf32>
    %cst_45 = arith.constant dense<0.000000e+00> : vector<8x384xf32>
    %198 = tpu.matmul %195, %0, %cst_45 {dimension_numbers = #tpu.dot_dimension_numbers<[1], [0], [0], [1], [0, 0, 1, 1], [], []>} : vector<8x128xf32>, vector<128x384xf32>, vector<8x384xf32> -> vector<8x384xf32>
    %199 = vector.broadcast %1 : vector<1x384xf32> to vector<8x384xf32>
    %200 = arith.addf %198, %199 : vector<8x384xf32>
    %201 = vector.extract_strided_slice %197 {offsets = [0, 0], sizes = [8, 128], strides = [1, 1]} : vector<8x384xf32> to vector<8x128xf32>
    %202 = vector.extract_strided_slice %200 {offsets = [0, 0], sizes = [8, 128], strides = [1, 1]} : vector<8x384xf32> to vector<8x128xf32>
    %203 = arith.addf %201, %202 : vector<8x128xf32>
    %204 = arith.negf %203 : vector<8x128xf32>
    %205 = math.exp %204 : vector<8x128xf32>
    %cst_46 = arith.constant 1.000000e+00 : f32
    %206 = vector.broadcast %cst_46 : f32 to vector<8x128xf32>
    %207 = arith.addf %206, %205 : vector<8x128xf32>
    %208 = arith.divf %206, %207 : vector<8x128xf32>
    %209 = vector.extract_strided_slice %197 {offsets = [0, 128], sizes = [8, 128], strides = [1, 1]} : vector<8x384xf32> to vector<8x128xf32>
    %210 = vector.extract_strided_slice %200 {offsets = [0, 128], sizes = [8, 128], strides = [1, 1]} : vector<8x384xf32> to vector<8x128xf32>
    %211 = arith.addf %209, %210 : vector<8x128xf32>
    %212 = arith.negf %211 : vector<8x128xf32>
    %213 = math.exp %212 : vector<8x128xf32>
    %cst_47 = arith.constant 1.000000e+00 : f32
    %214 = vector.broadcast %cst_47 : f32 to vector<8x128xf32>
    %215 = arith.addf %214, %213 : vector<8x128xf32>
    %216 = arith.divf %214, %215 : vector<8x128xf32>
    %217 = vector.extract_strided_slice %197 {offsets = [0, 256], sizes = [8, 128], strides = [1, 1]} : vector<8x384xf32> to vector<8x128xf32>
    %218 = vector.extract_strided_slice %200 {offsets = [0, 256], sizes = [8, 128], strides = [1, 1]} : vector<8x384xf32> to vector<8x128xf32>
    %219 = arith.mulf %208, %218 : vector<8x128xf32>
    %220 = arith.addf %217, %219 : vector<8x128xf32>
    %221 = math.tanh %220 : vector<8x128xf32>
    %cst_48 = arith.constant 1.000000e+00 : f32
    %222 = vector.broadcast %cst_48 : f32 to vector<8x128xf32>
    %223 = arith.subf %222, %216 : vector<8x128xf32>
    %224 = arith.mulf %223, %221 : vector<8x128xf32>
    %225 = arith.mulf %216, %195 : vector<8x128xf32>
    %226 = arith.addf %224, %225 : vector<8x128xf32>
    %c48 = arith.constant 48 : index
    %c0_49 = arith.constant 0 : index
    %227 = vector.load %arg11[%c48, %c0_49] : memref<64x128xf32, #tpu.memory_space<vmem>>, vector<8x128xf32>
    tpu.vector_store %arg11[%c48, %c0_49], %226 {strides = array<i32>} : memref<64x128xf32, #tpu.memory_space<vmem>>, vector<8x128xf32>,
    %228 = vector.extract_strided_slice %9 {offsets = [56, 0], sizes = [8, 384], strides = [1, 1]} : vector<64x384xf32> to vector<8x384xf32>
    %cst_50 = arith.constant dense<0.000000e+00> : vector<8x384xf32>
    %229 = tpu.matmul %226, %0, %cst_50 {dimension_numbers = #tpu.dot_dimension_numbers<[1], [0], [0], [1], [0, 0, 1, 1], [], []>} : vector<8x128xf32>, vector<128x384xf32>, vector<8x384xf32> -> vector<8x384xf32>
    %230 = vector.broadcast %1 : vector<1x384xf32> to vector<8x384xf32>
    %231 = arith.addf %229, %230 : vector<8x384xf32>
    %232 = vector.extract_strided_slice %228 {offsets = [0, 0], sizes = [8, 128], strides = [1, 1]} : vector<8x384xf32> to vector<8x128xf32>
    %233 = vector.extract_strided_slice %231 {offsets = [0, 0], sizes = [8, 128], strides = [1, 1]} : vector<8x384xf32> to vector<8x128xf32>
    %234 = arith.addf %232, %233 : vector<8x128xf32>
    %235 = arith.negf %234 : vector<8x128xf32>
    %236 = math.exp %235 : vector<8x128xf32>
    %cst_51 = arith.constant 1.000000e+00 : f32
    %237 = vector.broadcast %cst_51 : f32 to vector<8x128xf32>
    %238 = arith.addf %237, %236 : vector<8x128xf32>
    %239 = arith.divf %237, %238 : vector<8x128xf32>
    %240 = vector.extract_strided_slice %228 {offsets = [0, 128], sizes = [8, 128], strides = [1, 1]} : vector<8x384xf32> to vector<8x128xf32>
    %241 = vector.extract_strided_slice %231 {offsets = [0, 128], sizes = [8, 128], strides = [1, 1]} : vector<8x384xf32> to vector<8x128xf32>
    %242 = arith.addf %240, %241 : vector<8x128xf32>
    %243 = arith.negf %242 : vector<8x128xf32>
    %244 = math.exp %243 : vector<8x128xf32>
    %cst_52 = arith.constant 1.000000e+00 : f32
    %245 = vector.broadcast %cst_52 : f32 to vector<8x128xf32>
    %246 = arith.addf %245, %244 : vector<8x128xf32>
    %247 = arith.divf %245, %246 : vector<8x128xf32>
    %248 = vector.extract_strided_slice %228 {offsets = [0, 256], sizes = [8, 128], strides = [1, 1]} : vector<8x384xf32> to vector<8x128xf32>
    %249 = vector.extract_strided_slice %231 {offsets = [0, 256], sizes = [8, 128], strides = [1, 1]} : vector<8x384xf32> to vector<8x128xf32>
    %250 = arith.mulf %239, %249 : vector<8x128xf32>
    %251 = arith.addf %248, %250 : vector<8x128xf32>
    %252 = math.tanh %251 : vector<8x128xf32>
    %cst_53 = arith.constant 1.000000e+00 : f32
    %253 = vector.broadcast %cst_53 : f32 to vector<8x128xf32>
    %254 = arith.subf %253, %247 : vector<8x128xf32>
    %255 = arith.mulf %254, %252 : vector<8x128xf32>
    %256 = arith.mulf %247, %226 : vector<8x128xf32>
    %257 = arith.addf %255, %256 : vector<8x128xf32>
    %c56 = arith.constant 56 : index
    %c0_54 = arith.constant 0 : index
    %258 = vector.load %arg11[%c56, %c0_54] : memref<64x128xf32, #tpu.memory_space<vmem>>, vector<8x128xf32>
    tpu.vector_store %arg11[%c56, %c0_54], %257 {strides = array<i32>} : memref<64x128xf32, #tpu.memory_space<vmem>>, vector<8x128xf32>,
    %c0_55 = arith.constant 0 : index
    %c0_56 = arith.constant 0 : index
    %259 = vector.load %arg11[%c0_55, %c0_56] : memref<64x128xf32, #tpu.memory_space<vmem>>, vector<64x128xf32>
    %c0_57 = arith.constant 0 : index
    %c0_58 = arith.constant 0 : index
    %260 = vector.load %arg5[%c0_57, %c0_58] : memref<128x384xf32, #tpu.memory_space<vmem>>, vector<128x384xf32>
    %cst_59 = arith.constant dense<0.000000e+00> : vector<64x384xf32>
    %261 = tpu.matmul %259, %260, %cst_59 {dimension_numbers = #tpu.dot_dimension_numbers<[1], [0], [0], [1], [0, 0, 1, 1], [], []>} : vector<64x128xf32>, vector<128x384xf32>, vector<64x384xf32> -> vector<64x384xf32>
    %c0_60 = arith.constant 0 : index
    %c0_61 = arith.constant 0 : index
    %262 = vector.load %arg7[%c0_60, %c0_61] : memref<1x384xf32, #tpu.memory_space<vmem>>, vector<1x384xf32>
    %263 = vector.broadcast %262 : vector<1x384xf32> to vector<64x384xf32>
    %264 = arith.addf %261, %263 : vector<64x384xf32>
    %cst_62 = arith.constant 0.000000e+00 : f32
    %265 = vector.broadcast %cst_62 : f32 to vector<8x128xf32>
    %266 = vector.extract_strided_slice %264 {offsets = [0, 0], sizes = [8, 384], strides = [1, 1]} : vector<64x384xf32> to vector<8x384xf32>
    %cst_63 = arith.constant dense<0.000000e+00> : vector<8x384xf32>
    %267 = tpu.matmul %265, %2, %cst_63 {dimension_numbers = #tpu.dot_dimension_numbers<[1], [0], [0], [1], [0, 0, 1, 1], [], []>} : vector<8x128xf32>, vector<128x384xf32>, vector<8x384xf32> -> vector<8x384xf32>
    %268 = vector.broadcast %3 : vector<1x384xf32> to vector<8x384xf32>
    %269 = arith.addf %267, %268 : vector<8x384xf32>
    %270 = vector.extract_strided_slice %266 {offsets = [0, 0], sizes = [8, 128], strides = [1, 1]} : vector<8x384xf32> to vector<8x128xf32>
    %271 = vector.extract_strided_slice %269 {offsets = [0, 0], sizes = [8, 128], strides = [1, 1]} : vector<8x384xf32> to vector<8x128xf32>
    %272 = arith.addf %270, %271 : vector<8x128xf32>
    %273 = arith.negf %272 : vector<8x128xf32>
    %274 = math.exp %273 : vector<8x128xf32>
    %cst_64 = arith.constant 1.000000e+00 : f32
    %275 = vector.broadcast %cst_64 : f32 to vector<8x128xf32>
    %276 = arith.addf %275, %274 : vector<8x128xf32>
    %277 = arith.divf %275, %276 : vector<8x128xf32>
    %278 = vector.extract_strided_slice %266 {offsets = [0, 128], sizes = [8, 128], strides = [1, 1]} : vector<8x384xf32> to vector<8x128xf32>
    %279 = vector.extract_strided_slice %269 {offsets = [0, 128], sizes = [8, 128], strides = [1, 1]} : vector<8x384xf32> to vector<8x128xf32>
    %280 = arith.addf %278, %279 : vector<8x128xf32>
    %281 = arith.negf %280 : vector<8x128xf32>
    %282 = math.exp %281 : vector<8x128xf32>
    %cst_65 = arith.constant 1.000000e+00 : f32
    %283 = vector.broadcast %cst_65 : f32 to vector<8x128xf32>
    %284 = arith.addf %283, %282 : vector<8x128xf32>
    %285 = arith.divf %283, %284 : vector<8x128xf32>
    %286 = vector.extract_strided_slice %266 {offsets = [0, 256], sizes = [8, 128], strides = [1, 1]} : vector<8x384xf32> to vector<8x128xf32>
    %287 = vector.extract_strided_slice %269 {offsets = [0, 256], sizes = [8, 128], strides = [1, 1]} : vector<8x384xf32> to vector<8x128xf32>
    %288 = arith.mulf %277, %287 : vector<8x128xf32>
    %289 = arith.addf %286, %288 : vector<8x128xf32>
    %290 = math.tanh %289 : vector<8x128xf32>
    %cst_66 = arith.constant 1.000000e+00 : f32
    %291 = vector.broadcast %cst_66 : f32 to vector<8x128xf32>
    %292 = arith.subf %291, %285 : vector<8x128xf32>
    %293 = arith.mulf %292, %290 : vector<8x128xf32>
    %294 = arith.mulf %285, %265 : vector<8x128xf32>
    %295 = arith.addf %293, %294 : vector<8x128xf32>
    %c0_67 = arith.constant 0 : index
    %c0_68 = arith.constant 0 : index
    %296 = vector.load %arg9[%c0_67, %c0_68] : memref<8x1024xf32, #tpu.memory_space<vmem>>, vector<8x128xf32>
    tpu.vector_store %arg9[%c0_67, %c0_68], %295 {strides = array<i32>} : memref<8x1024xf32, #tpu.memory_space<vmem>>, vector<8x128xf32>,
    %297 = vector.extract_strided_slice %264 {offsets = [8, 0], sizes = [8, 384], strides = [1, 1]} : vector<64x384xf32> to vector<8x384xf32>
    %cst_69 = arith.constant dense<0.000000e+00> : vector<8x384xf32>
    %298 = tpu.matmul %295, %2, %cst_69 {dimension_numbers = #tpu.dot_dimension_numbers<[1], [0], [0], [1], [0, 0, 1, 1], [], []>} : vector<8x128xf32>, vector<128x384xf32>, vector<8x384xf32> -> vector<8x384xf32>
    %299 = vector.broadcast %3 : vector<1x384xf32> to vector<8x384xf32>
    %300 = arith.addf %298, %299 : vector<8x384xf32>
    %301 = vector.extract_strided_slice %297 {offsets = [0, 0], sizes = [8, 128], strides = [1, 1]} : vector<8x384xf32> to vector<8x128xf32>
    %302 = vector.extract_strided_slice %300 {offsets = [0, 0], sizes = [8, 128], strides = [1, 1]} : vector<8x384xf32> to vector<8x128xf32>
    %303 = arith.addf %301, %302 : vector<8x128xf32>
    %304 = arith.negf %303 : vector<8x128xf32>
    %305 = math.exp %304 : vector<8x128xf32>
    %cst_70 = arith.constant 1.000000e+00 : f32
    %306 = vector.broadcast %cst_70 : f32 to vector<8x128xf32>
    %307 = arith.addf %306, %305 : vector<8x128xf32>
    %308 = arith.divf %306, %307 : vector<8x128xf32>
    %309 = vector.extract_strided_slice %297 {offsets = [0, 128], sizes = [8, 128], strides = [1, 1]} : vector<8x384xf32> to vector<8x128xf32>
    %310 = vector.extract_strided_slice %300 {offsets = [0, 128], sizes = [8, 128], strides = [1, 1]} : vector<8x384xf32> to vector<8x128xf32>
    %311 = arith.addf %309, %310 : vector<8x128xf32>
    %312 = arith.negf %311 : vector<8x128xf32>
    %313 = math.exp %312 : vector<8x128xf32>
    %cst_71 = arith.constant 1.000000e+00 : f32
    %314 = vector.broadcast %cst_71 : f32 to vector<8x128xf32>
    %315 = arith.addf %314, %313 : vector<8x128xf32>
    %316 = arith.divf %314, %315 : vector<8x128xf32>
    %317 = vector.extract_strided_slice %297 {offsets = [0, 256], sizes = [8, 128], strides = [1, 1]} : vector<8x384xf32> to vector<8x128xf32>
    %318 = vector.extract_strided_slice %300 {offsets = [0, 256], sizes = [8, 128], strides = [1, 1]} : vector<8x384xf32> to vector<8x128xf32>
    %319 = arith.mulf %308, %318 : vector<8x128xf32>
    %320 = arith.addf %317, %319 : vector<8x128xf32>
    %321 = math.tanh %320 : vector<8x128xf32>
    %cst_72 = arith.constant 1.000000e+00 : f32
    %322 = vector.broadcast %cst_72 : f32 to vector<8x128xf32>
    %323 = arith.subf %322, %316 : vector<8x128xf32>
    %324 = arith.mulf %323, %321 : vector<8x128xf32>
    %325 = arith.mulf %316, %295 : vector<8x128xf32>
    %326 = arith.addf %324, %325 : vector<8x128xf32>
    %c0_73 = arith.constant 0 : index
    %c128 = arith.constant 128 : index
    %327 = vector.load %arg9[%c0_73, %c128] : memref<8x1024xf32, #tpu.memory_space<vmem>>, vector<8x128xf32>
    tpu.vector_store %arg9[%c0_73, %c128], %326 {strides = array<i32>} : memref<8x1024xf32, #tpu.memory_space<vmem>>, vector<8x128xf32>,
    %328 = vector.extract_strided_slice %264 {offsets = [16, 0], sizes = [8, 384], strides = [1, 1]} : vector<64x384xf32> to vector<8x384xf32>
    %cst_74 = arith.constant dense<0.000000e+00> : vector<8x384xf32>
    %329 = tpu.matmul %326, %2, %cst_74 {dimension_numbers = #tpu.dot_dimension_numbers<[1], [0], [0], [1], [0, 0, 1, 1], [], []>} : vector<8x128xf32>, vector<128x384xf32>, vector<8x384xf32> -> vector<8x384xf32>
    %330 = vector.broadcast %3 : vector<1x384xf32> to vector<8x384xf32>
    %331 = arith.addf %329, %330 : vector<8x384xf32>
    %332 = vector.extract_strided_slice %328 {offsets = [0, 0], sizes = [8, 128], strides = [1, 1]} : vector<8x384xf32> to vector<8x128xf32>
    %333 = vector.extract_strided_slice %331 {offsets = [0, 0], sizes = [8, 128], strides = [1, 1]} : vector<8x384xf32> to vector<8x128xf32>
    %334 = arith.addf %332, %333 : vector<8x128xf32>
    %335 = arith.negf %334 : vector<8x128xf32>
    %336 = math.exp %335 : vector<8x128xf32>
    %cst_75 = arith.constant 1.000000e+00 : f32
    %337 = vector.broadcast %cst_75 : f32 to vector<8x128xf32>
    %338 = arith.addf %337, %336 : vector<8x128xf32>
    %339 = arith.divf %337, %338 : vector<8x128xf32>
    %340 = vector.extract_strided_slice %328 {offsets = [0, 128], sizes = [8, 128], strides = [1, 1]} : vector<8x384xf32> to vector<8x128xf32>
    %341 = vector.extract_strided_slice %331 {offsets = [0, 128], sizes = [8, 128], strides = [1, 1]} : vector<8x384xf32> to vector<8x128xf32>
    %342 = arith.addf %340, %341 : vector<8x128xf32>
    %343 = arith.negf %342 : vector<8x128xf32>
    %344 = math.exp %343 : vector<8x128xf32>
    %cst_76 = arith.constant 1.000000e+00 : f32
    %345 = vector.broadcast %cst_76 : f32 to vector<8x128xf32>
    %346 = arith.addf %345, %344 : vector<8x128xf32>
    %347 = arith.divf %345, %346 : vector<8x128xf32>
    %348 = vector.extract_strided_slice %328 {offsets = [0, 256], sizes = [8, 128], strides = [1, 1]} : vector<8x384xf32> to vector<8x128xf32>
    %349 = vector.extract_strided_slice %331 {offsets = [0, 256], sizes = [8, 128], strides = [1, 1]} : vector<8x384xf32> to vector<8x128xf32>
    %350 = arith.mulf %339, %349 : vector<8x128xf32>
    %351 = arith.addf %348, %350 : vector<8x128xf32>
    %352 = math.tanh %351 : vector<8x128xf32>
    %cst_77 = arith.constant 1.000000e+00 : f32
    %353 = vector.broadcast %cst_77 : f32 to vector<8x128xf32>
    %354 = arith.subf %353, %347 : vector<8x128xf32>
    %355 = arith.mulf %354, %352 : vector<8x128xf32>
    %356 = arith.mulf %347, %326 : vector<8x128xf32>
    %357 = arith.addf %355, %356 : vector<8x128xf32>
    %c0_78 = arith.constant 0 : index
    %c256 = arith.constant 256 : index
    %358 = vector.load %arg9[%c0_78, %c256] : memref<8x1024xf32, #tpu.memory_space<vmem>>, vector<8x128xf32>
    tpu.vector_store %arg9[%c0_78, %c256], %357 {strides = array<i32>} : memref<8x1024xf32, #tpu.memory_space<vmem>>, vector<8x128xf32>,
    %359 = vector.extract_strided_slice %264 {offsets = [24, 0], sizes = [8, 384], strides = [1, 1]} : vector<64x384xf32> to vector<8x384xf32>
    %cst_79 = arith.constant dense<0.000000e+00> : vector<8x384xf32>
    %360 = tpu.matmul %357, %2, %cst_79 {dimension_numbers = #tpu.dot_dimension_numbers<[1], [0], [0], [1], [0, 0, 1, 1], [], []>} : vector<8x128xf32>, vector<128x384xf32>, vector<8x384xf32> -> vector<8x384xf32>
    %361 = vector.broadcast %3 : vector<1x384xf32> to vector<8x384xf32>
    %362 = arith.addf %360, %361 : vector<8x384xf32>
    %363 = vector.extract_strided_slice %359 {offsets = [0, 0], sizes = [8, 128], strides = [1, 1]} : vector<8x384xf32> to vector<8x128xf32>
    %364 = vector.extract_strided_slice %362 {offsets = [0, 0], sizes = [8, 128], strides = [1, 1]} : vector<8x384xf32> to vector<8x128xf32>
    %365 = arith.addf %363, %364 : vector<8x128xf32>
    %366 = arith.negf %365 : vector<8x128xf32>
    %367 = math.exp %366 : vector<8x128xf32>
    %cst_80 = arith.constant 1.000000e+00 : f32
    %368 = vector.broadcast %cst_80 : f32 to vector<8x128xf32>
    %369 = arith.addf %368, %367 : vector<8x128xf32>
    %370 = arith.divf %368, %369 : vector<8x128xf32>
    %371 = vector.extract_strided_slice %359 {offsets = [0, 128], sizes = [8, 128], strides = [1, 1]} : vector<8x384xf32> to vector<8x128xf32>
    %372 = vector.extract_strided_slice %362 {offsets = [0, 128], sizes = [8, 128], strides = [1, 1]} : vector<8x384xf32> to vector<8x128xf32>
    %373 = arith.addf %371, %372 : vector<8x128xf32>
    %374 = arith.negf %373 : vector<8x128xf32>
    %375 = math.exp %374 : vector<8x128xf32>
    %cst_81 = arith.constant 1.000000e+00 : f32
    %376 = vector.broadcast %cst_81 : f32 to vector<8x128xf32>
    %377 = arith.addf %376, %375 : vector<8x128xf32>
    %378 = arith.divf %376, %377 : vector<8x128xf32>
    %379 = vector.extract_strided_slice %359 {offsets = [0, 256], sizes = [8, 128], strides = [1, 1]} : vector<8x384xf32> to vector<8x128xf32>
    %380 = vector.extract_strided_slice %362 {offsets = [0, 256], sizes = [8, 128], strides = [1, 1]} : vector<8x384xf32> to vector<8x128xf32>
    %381 = arith.mulf %370, %380 : vector<8x128xf32>
    %382 = arith.addf %379, %381 : vector<8x128xf32>
    %383 = math.tanh %382 : vector<8x128xf32>
    %cst_82 = arith.constant 1.000000e+00 : f32
    %384 = vector.broadcast %cst_82 : f32 to vector<8x128xf32>
    %385 = arith.subf %384, %378 : vector<8x128xf32>
    %386 = arith.mulf %385, %383 : vector<8x128xf32>
    %387 = arith.mulf %378, %357 : vector<8x128xf32>
    %388 = arith.addf %386, %387 : vector<8x128xf32>
    %c0_83 = arith.constant 0 : index
    %c384 = arith.constant 384 : index
    %389 = vector.load %arg9[%c0_83, %c384] : memref<8x1024xf32, #tpu.memory_space<vmem>>, vector<8x128xf32>
    tpu.vector_store %arg9[%c0_83, %c384], %388 {strides = array<i32>} : memref<8x1024xf32, #tpu.memory_space<vmem>>, vector<8x128xf32>,
    %390 = vector.extract_strided_slice %264 {offsets = [32, 0], sizes = [8, 384], strides = [1, 1]} : vector<64x384xf32> to vector<8x384xf32>
    %cst_84 = arith.constant dense<0.000000e+00> : vector<8x384xf32>
    %391 = tpu.matmul %388, %2, %cst_84 {dimension_numbers = #tpu.dot_dimension_numbers<[1], [0], [0], [1], [0, 0, 1, 1], [], []>} : vector<8x128xf32>, vector<128x384xf32>, vector<8x384xf32> -> vector<8x384xf32>
    %392 = vector.broadcast %3 : vector<1x384xf32> to vector<8x384xf32>
    %393 = arith.addf %391, %392 : vector<8x384xf32>
    %394 = vector.extract_strided_slice %390 {offsets = [0, 0], sizes = [8, 128], strides = [1, 1]} : vector<8x384xf32> to vector<8x128xf32>
    %395 = vector.extract_strided_slice %393 {offsets = [0, 0], sizes = [8, 128], strides = [1, 1]} : vector<8x384xf32> to vector<8x128xf32>
    %396 = arith.addf %394, %395 : vector<8x128xf32>
    %397 = arith.negf %396 : vector<8x128xf32>
    %398 = math.exp %397 : vector<8x128xf32>
    %cst_85 = arith.constant 1.000000e+00 : f32
    %399 = vector.broadcast %cst_85 : f32 to vector<8x128xf32>
    %400 = arith.addf %399, %398 : vector<8x128xf32>
    %401 = arith.divf %399, %400 : vector<8x128xf32>
    %402 = vector.extract_strided_slice %390 {offsets = [0, 128], sizes = [8, 128], strides = [1, 1]} : vector<8x384xf32> to vector<8x128xf32>
    %403 = vector.extract_strided_slice %393 {offsets = [0, 128], sizes = [8, 128], strides = [1, 1]} : vector<8x384xf32> to vector<8x128xf32>
    %404 = arith.addf %402, %403 : vector<8x128xf32>
    %405 = arith.negf %404 : vector<8x128xf32>
    %406 = math.exp %405 : vector<8x128xf32>
    %cst_86 = arith.constant 1.000000e+00 : f32
    %407 = vector.broadcast %cst_86 : f32 to vector<8x128xf32>
    %408 = arith.addf %407, %406 : vector<8x128xf32>
    %409 = arith.divf %407, %408 : vector<8x128xf32>
    %410 = vector.extract_strided_slice %390 {offsets = [0, 256], sizes = [8, 128], strides = [1, 1]} : vector<8x384xf32> to vector<8x128xf32>
    %411 = vector.extract_strided_slice %393 {offsets = [0, 256], sizes = [8, 128], strides = [1, 1]} : vector<8x384xf32> to vector<8x128xf32>
    %412 = arith.mulf %401, %411 : vector<8x128xf32>
    %413 = arith.addf %410, %412 : vector<8x128xf32>
    %414 = math.tanh %413 : vector<8x128xf32>
    %cst_87 = arith.constant 1.000000e+00 : f32
    %415 = vector.broadcast %cst_87 : f32 to vector<8x128xf32>
    %416 = arith.subf %415, %409 : vector<8x128xf32>
    %417 = arith.mulf %416, %414 : vector<8x128xf32>
    %418 = arith.mulf %409, %388 : vector<8x128xf32>
    %419 = arith.addf %417, %418 : vector<8x128xf32>
    %c0_88 = arith.constant 0 : index
    %c512 = arith.constant 512 : index
    %420 = vector.load %arg9[%c0_88, %c512] : memref<8x1024xf32, #tpu.memory_space<vmem>>, vector<8x128xf32>
    tpu.vector_store %arg9[%c0_88, %c512], %419 {strides = array<i32>} : memref<8x1024xf32, #tpu.memory_space<vmem>>, vector<8x128xf32>,
    %421 = vector.extract_strided_slice %264 {offsets = [40, 0], sizes = [8, 384], strides = [1, 1]} : vector<64x384xf32> to vector<8x384xf32>
    %cst_89 = arith.constant dense<0.000000e+00> : vector<8x384xf32>
    %422 = tpu.matmul %419, %2, %cst_89 {dimension_numbers = #tpu.dot_dimension_numbers<[1], [0], [0], [1], [0, 0, 1, 1], [], []>} : vector<8x128xf32>, vector<128x384xf32>, vector<8x384xf32> -> vector<8x384xf32>
    %423 = vector.broadcast %3 : vector<1x384xf32> to vector<8x384xf32>
    %424 = arith.addf %422, %423 : vector<8x384xf32>
    %425 = vector.extract_strided_slice %421 {offsets = [0, 0], sizes = [8, 128], strides = [1, 1]} : vector<8x384xf32> to vector<8x128xf32>
    %426 = vector.extract_strided_slice %424 {offsets = [0, 0], sizes = [8, 128], strides = [1, 1]} : vector<8x384xf32> to vector<8x128xf32>
    %427 = arith.addf %425, %426 : vector<8x128xf32>
    %428 = arith.negf %427 : vector<8x128xf32>
    %429 = math.exp %428 : vector<8x128xf32>
    %cst_90 = arith.constant 1.000000e+00 : f32
    %430 = vector.broadcast %cst_90 : f32 to vector<8x128xf32>
    %431 = arith.addf %430, %429 : vector<8x128xf32>
    %432 = arith.divf %430, %431 : vector<8x128xf32>
    %433 = vector.extract_strided_slice %421 {offsets = [0, 128], sizes = [8, 128], strides = [1, 1]} : vector<8x384xf32> to vector<8x128xf32>
    %434 = vector.extract_strided_slice %424 {offsets = [0, 128], sizes = [8, 128], strides = [1, 1]} : vector<8x384xf32> to vector<8x128xf32>
    %435 = arith.addf %433, %434 : vector<8x128xf32>
    %436 = arith.negf %435 : vector<8x128xf32>
    %437 = math.exp %436 : vector<8x128xf32>
    %cst_91 = arith.constant 1.000000e+00 : f32
    %438 = vector.broadcast %cst_91 : f32 to vector<8x128xf32>
    %439 = arith.addf %438, %437 : vector<8x128xf32>
    %440 = arith.divf %438, %439 : vector<8x128xf32>
    %441 = vector.extract_strided_slice %421 {offsets = [0, 256], sizes = [8, 128], strides = [1, 1]} : vector<8x384xf32> to vector<8x128xf32>
    %442 = vector.extract_strided_slice %424 {offsets = [0, 256], sizes = [8, 128], strides = [1, 1]} : vector<8x384xf32> to vector<8x128xf32>
    %443 = arith.mulf %432, %442 : vector<8x128xf32>
    %444 = arith.addf %441, %443 : vector<8x128xf32>
    %445 = math.tanh %444 : vector<8x128xf32>
    %cst_92 = arith.constant 1.000000e+00 : f32
    %446 = vector.broadcast %cst_92 : f32 to vector<8x128xf32>
    %447 = arith.subf %446, %440 : vector<8x128xf32>
    %448 = arith.mulf %447, %445 : vector<8x128xf32>
    %449 = arith.mulf %440, %419 : vector<8x128xf32>
    %450 = arith.addf %448, %449 : vector<8x128xf32>
    %c0_93 = arith.constant 0 : index
    %c640 = arith.constant 640 : index
    %451 = vector.load %arg9[%c0_93, %c640] : memref<8x1024xf32, #tpu.memory_space<vmem>>, vector<8x128xf32>
    tpu.vector_store %arg9[%c0_93, %c640], %450 {strides = array<i32>} : memref<8x1024xf32, #tpu.memory_space<vmem>>, vector<8x128xf32>,
    %452 = vector.extract_strided_slice %264 {offsets = [48, 0], sizes = [8, 384], strides = [1, 1]} : vector<64x384xf32> to vector<8x384xf32>
    %cst_94 = arith.constant dense<0.000000e+00> : vector<8x384xf32>
    %453 = tpu.matmul %450, %2, %cst_94 {dimension_numbers = #tpu.dot_dimension_numbers<[1], [0], [0], [1], [0, 0, 1, 1], [], []>} : vector<8x128xf32>, vector<128x384xf32>, vector<8x384xf32> -> vector<8x384xf32>
    %454 = vector.broadcast %3 : vector<1x384xf32> to vector<8x384xf32>
    %455 = arith.addf %453, %454 : vector<8x384xf32>
    %456 = vector.extract_strided_slice %452 {offsets = [0, 0], sizes = [8, 128], strides = [1, 1]} : vector<8x384xf32> to vector<8x128xf32>
    %457 = vector.extract_strided_slice %455 {offsets = [0, 0], sizes = [8, 128], strides = [1, 1]} : vector<8x384xf32> to vector<8x128xf32>
    %458 = arith.addf %456, %457 : vector<8x128xf32>
    %459 = arith.negf %458 : vector<8x128xf32>
    %460 = math.exp %459 : vector<8x128xf32>
    %cst_95 = arith.constant 1.000000e+00 : f32
    %461 = vector.broadcast %cst_95 : f32 to vector<8x128xf32>
    %462 = arith.addf %461, %460 : vector<8x128xf32>
    %463 = arith.divf %461, %462 : vector<8x128xf32>
    %464 = vector.extract_strided_slice %452 {offsets = [0, 128], sizes = [8, 128], strides = [1, 1]} : vector<8x384xf32> to vector<8x128xf32>
    %465 = vector.extract_strided_slice %455 {offsets = [0, 128], sizes = [8, 128], strides = [1, 1]} : vector<8x384xf32> to vector<8x128xf32>
    %466 = arith.addf %464, %465 : vector<8x128xf32>
    %467 = arith.negf %466 : vector<8x128xf32>
    %468 = math.exp %467 : vector<8x128xf32>
    %cst_96 = arith.constant 1.000000e+00 : f32
    %469 = vector.broadcast %cst_96 : f32 to vector<8x128xf32>
    %470 = arith.addf %469, %468 : vector<8x128xf32>
    %471 = arith.divf %469, %470 : vector<8x128xf32>
    %472 = vector.extract_strided_slice %452 {offsets = [0, 256], sizes = [8, 128], strides = [1, 1]} : vector<8x384xf32> to vector<8x128xf32>
    %473 = vector.extract_strided_slice %455 {offsets = [0, 256], sizes = [8, 128], strides = [1, 1]} : vector<8x384xf32> to vector<8x128xf32>
    %474 = arith.mulf %463, %473 : vector<8x128xf32>
    %475 = arith.addf %472, %474 : vector<8x128xf32>
    %476 = math.tanh %475 : vector<8x128xf32>
    %cst_97 = arith.constant 1.000000e+00 : f32
    %477 = vector.broadcast %cst_97 : f32 to vector<8x128xf32>
    %478 = arith.subf %477, %471 : vector<8x128xf32>
    %479 = arith.mulf %478, %476 : vector<8x128xf32>
    %480 = arith.mulf %471, %450 : vector<8x128xf32>
    %481 = arith.addf %479, %480 : vector<8x128xf32>
    %c0_98 = arith.constant 0 : index
    %c768 = arith.constant 768 : index
    %482 = vector.load %arg9[%c0_98, %c768] : memref<8x1024xf32, #tpu.memory_space<vmem>>, vector<8x128xf32>
    tpu.vector_store %arg9[%c0_98, %c768], %481 {strides = array<i32>} : memref<8x1024xf32, #tpu.memory_space<vmem>>, vector<8x128xf32>,
    %483 = vector.extract_strided_slice %264 {offsets = [56, 0], sizes = [8, 384], strides = [1, 1]} : vector<64x384xf32> to vector<8x384xf32>
    %cst_99 = arith.constant dense<0.000000e+00> : vector<8x384xf32>
    %484 = tpu.matmul %481, %2, %cst_99 {dimension_numbers = #tpu.dot_dimension_numbers<[1], [0], [0], [1], [0, 0, 1, 1], [], []>} : vector<8x128xf32>, vector<128x384xf32>, vector<8x384xf32> -> vector<8x384xf32>
    %485 = vector.broadcast %3 : vector<1x384xf32> to vector<8x384xf32>
    %486 = arith.addf %484, %485 : vector<8x384xf32>
    %487 = vector.extract_strided_slice %483 {offsets = [0, 0], sizes = [8, 128], strides = [1, 1]} : vector<8x384xf32> to vector<8x128xf32>
    %488 = vector.extract_strided_slice %486 {offsets = [0, 0], sizes = [8, 128], strides = [1, 1]} : vector<8x384xf32> to vector<8x128xf32>
    %489 = arith.addf %487, %488 : vector<8x128xf32>
    %490 = arith.negf %489 : vector<8x128xf32>
    %491 = math.exp %490 : vector<8x128xf32>
    %cst_100 = arith.constant 1.000000e+00 : f32
    %492 = vector.broadcast %cst_100 : f32 to vector<8x128xf32>
    %493 = arith.addf %492, %491 : vector<8x128xf32>
    %494 = arith.divf %492, %493 : vector<8x128xf32>
    %495 = vector.extract_strided_slice %483 {offsets = [0, 128], sizes = [8, 128], strides = [1, 1]} : vector<8x384xf32> to vector<8x128xf32>
    %496 = vector.extract_strided_slice %486 {offsets = [0, 128], sizes = [8, 128], strides = [1, 1]} : vector<8x384xf32> to vector<8x128xf32>
    %497 = arith.addf %495, %496 : vector<8x128xf32>
    %498 = arith.negf %497 : vector<8x128xf32>
    %499 = math.exp %498 : vector<8x128xf32>
    %cst_101 = arith.constant 1.000000e+00 : f32
    %500 = vector.broadcast %cst_101 : f32 to vector<8x128xf32>
    %501 = arith.addf %500, %499 : vector<8x128xf32>
    %502 = arith.divf %500, %501 : vector<8x128xf32>
    %503 = vector.extract_strided_slice %483 {offsets = [0, 256], sizes = [8, 128], strides = [1, 1]} : vector<8x384xf32> to vector<8x128xf32>
    %504 = vector.extract_strided_slice %486 {offsets = [0, 256], sizes = [8, 128], strides = [1, 1]} : vector<8x384xf32> to vector<8x128xf32>
    %505 = arith.mulf %494, %504 : vector<8x128xf32>
    %506 = arith.addf %503, %505 : vector<8x128xf32>
    %507 = math.tanh %506 : vector<8x128xf32>
    %cst_102 = arith.constant 1.000000e+00 : f32
    %508 = vector.broadcast %cst_102 : f32 to vector<8x128xf32>
    %509 = arith.subf %508, %502 : vector<8x128xf32>
    %510 = arith.mulf %509, %507 : vector<8x128xf32>
    %511 = arith.mulf %502, %481 : vector<8x128xf32>
    %512 = arith.addf %510, %511 : vector<8x128xf32>
    %c0_103 = arith.constant 0 : index
    %c896 = arith.constant 896 : index
    %513 = vector.load %arg9[%c0_103, %c896] : memref<8x1024xf32, #tpu.memory_space<vmem>>, vector<8x128xf32>
    tpu.vector_store %arg9[%c0_103, %c896], %512 {strides = array<i32>} : memref<8x1024xf32, #tpu.memory_space<vmem>>, vector<8x128xf32>,
    %c0_104 = arith.constant 0 : index
    %c0_105 = arith.constant 0 : index
    %c0_106 = arith.constant 0 : index
    %514 = vector.load %arg10[%c0_104, %c0_105, %c0_106] : memref<2x8x128xf32, #tpu.memory_space<vmem>>, vector<1x8x128xf32>
    %515 = vector.shape_cast %514 : vector<1x8x128xf32> to vector<8x128xf32>
    %516 = vector.shape_cast %257 : vector<8x128xf32> to vector<1x8x128xf32>
    tpu.vector_store %arg10[%c0_104, %c0_105, %c0_106], %516 {strides = array<i32>} : memref<2x8x128xf32, #tpu.memory_space<vmem>>, vector<1x8x128xf32>,
    %c1 = arith.constant 1 : index
    %c0_107 = arith.constant 0 : index
    %c0_108 = arith.constant 0 : index
    %517 = vector.load %arg10[%c1, %c0_107, %c0_108] : memref<2x8x128xf32, #tpu.memory_space<vmem>>, vector<1x8x128xf32>
    %518 = vector.shape_cast %517 : vector<1x8x128xf32> to vector<8x128xf32>
    %519 = vector.shape_cast %512 : vector<8x128xf32> to vector<1x8x128xf32>
    tpu.vector_store %arg10[%c1, %c0_107, %c0_108], %519 {strides = array<i32>} : memref<2x8x128xf32, #tpu.memory_space<vmem>>, vector<1x8x128xf32>,
    return
  }
}

module attributes {stable_mosaic.version = 11 : i64} {
  func.func @mlp_kernel(%arg0: memref<8x1024xf32, #tpu.memory_space<vmem>>, %arg1: memref<8x256xf32, #tpu.memory_space<vmem>>, %arg2: memref<1024x1024xbf16, #tpu.memory_space<vmem>>, %arg3: memref<256x1024xbf16, #tpu.memory_space<vmem>>, %arg4: memref<1x1024xf32, #tpu.memory_space<vmem>>, %arg5: memref<1024x1024xbf16, #tpu.memory_space<vmem>>, %arg6: memref<1x1024xf32, #tpu.memory_space<vmem>>, %arg7: memref<1024x512xbf16, #tpu.memory_space<vmem>>, %arg8: memref<1x512xf32, #tpu.memory_space<vmem>>, %arg9: memref<512x128xf32, #tpu.memory_space<vmem>>, %arg10: memref<1x128xf32, #tpu.memory_space<vmem>>, %arg11: memref<128x1xf32, #tpu.memory_space<vmem>>, %arg12: memref<1x1xf32, #tpu.memory_space<vmem>>, %arg13: memref<8x1xf32, #tpu.memory_space<vmem>>) attributes {dimension_semantics = [], scalar_prefetch = 0 : i64, scratch_operands = 0 : i64, tpu.core_type = #tpu.core_type<tc>} {
    %c0 = arith.constant 0 : index
    %c0_0 = arith.constant 0 : index
    %0 = vector.load %arg0[%c0, %c0_0] : memref<8x1024xf32, #tpu.memory_space<vmem>>, vector<8x1024xf32>
    %1 = arith.truncf %0 : vector<8x1024xf32> to vector<8x1024xbf16>
    %c0_1 = arith.constant 0 : index
    %c0_2 = arith.constant 0 : index
    %2 = vector.load %arg2[%c0_1, %c0_2] : memref<1024x1024xbf16, #tpu.memory_space<vmem>>, vector<1024x1024xbf16>
    %cst = arith.constant dense<0.000000e+00> : vector<8x1024xf32>
    %3 = tpu.matmul %1, %2, %cst {dimension_numbers = #tpu.dot_dimension_numbers<[1], [0], [0], [1], [0, 0, 1, 1], [], []>} : vector<8x1024xbf16>, vector<1024x1024xbf16>, vector<8x1024xf32> -> vector<8x1024xf32>
    %c0_3 = arith.constant 0 : index
    %c0_4 = arith.constant 0 : index
    %4 = vector.load %arg1[%c0_3, %c0_4] : memref<8x256xf32, #tpu.memory_space<vmem>>, vector<8x256xf32>
    %5 = arith.truncf %4 : vector<8x256xf32> to vector<8x256xbf16>
    %c0_5 = arith.constant 0 : index
    %c0_6 = arith.constant 0 : index
    %6 = vector.load %arg3[%c0_5, %c0_6] : memref<256x1024xbf16, #tpu.memory_space<vmem>>, vector<256x1024xbf16>
    %cst_7 = arith.constant dense<0.000000e+00> : vector<8x1024xf32>
    %7 = tpu.matmul %5, %6, %cst_7 {dimension_numbers = #tpu.dot_dimension_numbers<[1], [0], [0], [1], [0, 0, 1, 1], [], []>} : vector<8x256xbf16>, vector<256x1024xbf16>, vector<8x1024xf32> -> vector<8x1024xf32>
    %8 = arith.addf %3, %7 : vector<8x1024xf32>
    %c0_8 = arith.constant 0 : index
    %c0_9 = arith.constant 0 : index
    %9 = vector.load %arg4[%c0_8, %c0_9] : memref<1x1024xf32, #tpu.memory_space<vmem>>, vector<1x1024xf32>
    %10 = vector.broadcast %9 : vector<1x1024xf32> to vector<8x1024xf32>
    %11 = arith.addf %8, %10 : vector<8x1024xf32>
    %cst_10 = arith.constant 0.000000e+00 : f32
    %12 = vector.broadcast %cst_10 : f32 to vector<8x1024xf32>
    %13 = arith.maximumf %11, %12 : vector<8x1024xf32>
    %14 = arith.truncf %13 : vector<8x1024xf32> to vector<8x1024xbf16>
    %c0_11 = arith.constant 0 : index
    %c0_12 = arith.constant 0 : index
    %15 = vector.load %arg5[%c0_11, %c0_12] : memref<1024x1024xbf16, #tpu.memory_space<vmem>>, vector<1024x1024xbf16>
    %cst_13 = arith.constant dense<0.000000e+00> : vector<8x1024xf32>
    %16 = tpu.matmul %14, %15, %cst_13 {dimension_numbers = #tpu.dot_dimension_numbers<[1], [0], [0], [1], [0, 0, 1, 1], [], []>} : vector<8x1024xbf16>, vector<1024x1024xbf16>, vector<8x1024xf32> -> vector<8x1024xf32>
    %c0_14 = arith.constant 0 : index
    %c0_15 = arith.constant 0 : index
    %17 = vector.load %arg6[%c0_14, %c0_15] : memref<1x1024xf32, #tpu.memory_space<vmem>>, vector<1x1024xf32>
    %18 = vector.broadcast %17 : vector<1x1024xf32> to vector<8x1024xf32>
    %19 = arith.addf %16, %18 : vector<8x1024xf32>
    %20 = arith.truncf %19 : vector<8x1024xf32> to vector<8x1024xbf16>
    %c0_16 = arith.constant 0 : index
    %c0_17 = arith.constant 0 : index
    %21 = vector.load %arg7[%c0_16, %c0_17] : memref<1024x512xbf16, #tpu.memory_space<vmem>>, vector<1024x512xbf16>
    %cst_18 = arith.constant dense<0.000000e+00> : vector<8x512xf32>
    %22 = tpu.matmul %20, %21, %cst_18 {dimension_numbers = #tpu.dot_dimension_numbers<[1], [0], [0], [1], [0, 0, 1, 1], [], []>} : vector<8x1024xbf16>, vector<1024x512xbf16>, vector<8x512xf32> -> vector<8x512xf32>
    %c0_19 = arith.constant 0 : index
    %c0_20 = arith.constant 0 : index
    %23 = vector.load %arg8[%c0_19, %c0_20] : memref<1x512xf32, #tpu.memory_space<vmem>>, vector<1x512xf32>
    %24 = vector.broadcast %23 : vector<1x512xf32> to vector<8x512xf32>
    %25 = arith.addf %22, %24 : vector<8x512xf32>
    %26 = math.tanh %25 : vector<8x512xf32>
    %c0_21 = arith.constant 0 : index
    %c0_22 = arith.constant 0 : index
    %27 = vector.load %arg9[%c0_21, %c0_22] : memref<512x128xf32, #tpu.memory_space<vmem>>, vector<512x128xf32>
    %cst_23 = arith.constant dense<0.000000e+00> : vector<8x128xf32>
    %28 = tpu.matmul %26, %27, %cst_23 {dimension_numbers = #tpu.dot_dimension_numbers<[1], [0], [0], [1], [0, 0, 1, 1], [], []>} : vector<8x512xf32>, vector<512x128xf32>, vector<8x128xf32> -> vector<8x128xf32>
    %c0_24 = arith.constant 0 : index
    %c0_25 = arith.constant 0 : index
    %29 = vector.load %arg10[%c0_24, %c0_25] : memref<1x128xf32, #tpu.memory_space<vmem>>, vector<1x128xf32>
    %30 = vector.broadcast %29 : vector<1x128xf32> to vector<8x128xf32>
    %31 = arith.addf %28, %30 : vector<8x128xf32>
    %c0_26 = arith.constant 0 : index
    %c0_27 = arith.constant 0 : index
    %32 = vector.load %arg11[%c0_26, %c0_27] : memref<128x1xf32, #tpu.memory_space<vmem>>, vector<128x1xf32>
    %cst_28 = arith.constant dense<0.000000e+00> : vector<8x1xf32>
    %33 = tpu.matmul %31, %32, %cst_28 {dimension_numbers = #tpu.dot_dimension_numbers<[1], [0], [0], [1], [0, 0, 1, 1], [], []>} : vector<8x128xf32>, vector<128x1xf32>, vector<8x1xf32> -> vector<8x1xf32>
    %c0_29 = arith.constant 0 : index
    %c0_30 = arith.constant 0 : index
    %34 = vector.load %arg12[%c0_29, %c0_30] : memref<1x1xf32, #tpu.memory_space<vmem>>, vector<1x1xf32>
    %35 = vector.broadcast %34 : vector<1x1xf32> to vector<8x1xf32>
    %36 = arith.addf %33, %35 : vector<8x1xf32>
    %c0_31 = arith.constant 0 : index
    %c0_32 = arith.constant 0 : index
    %37 = vector.load %arg13[%c0_31, %c0_32] : memref<8x1xf32, #tpu.memory_space<vmem>>, vector<8x1xf32>
    tpu.vector_store %arg13[%c0_31, %c0_32], %36 {strides = array<i32>} : memref<8x1xf32, #tpu.memory_space<vmem>>, vector<8x1xf32>,
    return
  }
}

</mosaic_0001>

<bundles_post_ra>
// kernel: _lambda_.2
= control target key start
LH: loop header
LB: loop body
LE: loop exit
PB: predicated region body
PF: predicated region fallthrough
CT: control target
= control target key end

     0   :  { %16 = vsyncpa [#allocation4], 0  ;;  %s7008_s0 = inlined_call_operand.vmem [shape: f32[64,16], index: 0, kind: input, shape index: {}]   ;;  %s7009_s1 = inlined_call_operand.hbm [shape: f32[16,384], index: 1, kind: input, shape index: {}]   ;;  %s7010_s2 = inlined_call_operand.hbm [shape: f32[128,384], index: 2, kind: input, shape index: {}]   ;;  %s7011_s3 = inlined_call_operand.hbm [shape: f32[1,384], index: 3, kind: input, shape index: {}]   ;;  %s7012_s4 = inlined_call_operand.hbm [shape: f32[1,384], index: 4, kind: input, shape index: {}]   ;;  %s7013_s5 = inlined_call_operand.hbm [shape: f32[128,384], index: 5, kind: input, shape index: {}]   ;;  %s7014_s6 = inlined_call_operand.hbm [shape: f32[128,384], index: 6, kind: input, shape index: {}]   ;;  %s7015_s7 = inlined_call_operand.hbm [shape: f32[1,384], index: 7, kind: input, shape index: {}]   ;;  %s7016_s8 = inlined_call_operand.hbm [shape: f32[1,384], index: 8, kind: input, shape index: {}]   ;;  %s7017_s9 = inlined_call_operand.vmem [shape: f32[8,1024], index: 9, kind: output, shape index: {0}]   ;;  %s7018_s10 = inlined_call_operand.vmem [shape: f32[2,8,128], index: 10, kind: output, shape index: {1}]  }
   0x1   :  { %17 = vsyncpa [#allocation6], 0 }
   0x2   :  { %18 = vsyncpa [#allocation9], 0 }
   0x3   :  { %19 = vsyncpa [#allocation12], 0 }
   0x4   :  { %20 = vsyncpa [#allocation15], 0  ;;  %s5852_s13 = smov [#allocation5]   ;;  %s5853_s15 = smov [#allocation8]  }
   0x5   :  { %s40_s14 = sshll.u32 %s5852_s13, 4  ;;  %s63_s16 = sshll.u32 %s5853_s15, 4  ;;  %s41_s14 = int_to_ptr.vmem [resolvable:$true] %s40_s14  ;;  %s5920_s16 = int_to_ptr.vmem [resolvable:$true] %s63_s16 }
   0x6   :  { %s5666_s19 = scalar_lea.hbm %s7010_s2, 6144 }
   0x7   :  { %p5667_p0 = scmp.ne.s32.totalorder %s7010_s2, %s5666_s19  ;;  %p5670_p1 = scmp.lt.u32.totalorder %s5666_s19, %s7010_s2 }
   0x9   :  { %p5672_p2 = pnand %p5670_p1, %p5667_p0 }
   0xb   :  { %5675 = shalt.err (!%p5672_p2)
}
   0xc   :  { %s5676_s24 = scalar_lea.vmem %s41_s14, 6144  ;;  %p5681_p4 = scmp.lt.s32.totalorder %s41_s14, %s41_s14 }
   0xd   :  { %p5677_p3 = scmp.ne.s32.totalorder %s41_s14, %s5676_s24  ;;  %p5682_p5 = scmp.lt.s32.totalorder %s5676_s24, %s5676_s24 }
   0xf   :  { %p5683_p6 = por %p5682_p5, %p5681_p4 }
  0x11   :  { %p5684_p7 = pnand %p5683_p6, %p5677_p3 }
  0x13   :  { %5687 = shalt.err (!%p5684_p7)
}
  0x14   :  { %s5854_s25 = smov 384   ;;  %s5855_s26 = smov 24  }
  0x15   :  { %46 = dma.hbm_to_vmem [thread:$0]  %s7010_s2, 6144, %s41_s14, [#allocation6], %s5854_s25, %s5854_s25, %s5855_s26  }
  0x16   :  { %s5688_s11 = scalar_lea.hbm %s7012_s4, 48 }
  0x17   :  { %p5689_p8 = scmp.ne.s32.totalorder %s7012_s4, %s5688_s11  ;;  %p5692_p9 = scmp.lt.u32.totalorder %s5688_s11, %s7012_s4 }
  0x19   :  { %p5694_p10 = pnand %p5692_p9, %p5689_p8 }
  0x1b   :  { %5697 = shalt.err (!%p5694_p10)
}
  0x1c   :  { %s5698_s18 = scalar_lea.vmem %s5920_s16, 48  ;;  %s5702_s2 = scalar_lea.vmem %s5920_s16, 64 }
  0x1d   :  { %p5699_p11 = scmp.ne.s32.totalorder %s5920_s16, %s5698_s18  ;;  %p5703_p12 = scmp.lt.s32.totalorder %s5920_s16, %s5920_s16 }
  0x1e   :  { %p5704_p13 = scmp.lt.s32.totalorder %s5702_s2, %s5698_s18 }
  0x20   :  { %p5705_p0 = por %p5704_p13, %p5703_p12 }
  0x22   :  { %p5706_p1 = pnand %p5705_p0, %p5699_p11 }
  0x24   :  { %5709 = shalt.err (!%p5706_p1)
}
  0x25   :  { %66 = dma.hbm_to_vmem [thread:$0]  %s7012_s4, 48, %s5920_s16, [#allocation9]  }
  0x26   :  { %s5856_s20 = smov [#allocation11]   ;;  %s5857_s22 = smov [#allocation3]  }
  0x27   :  { %s84_s21 = sshll.u32 %s5856_s20, 4  ;;  %s28_s23 = sshll.u32 %s5857_s22, 4  ;;  %s85_s21 = int_to_ptr.vmem [resolvable:$true] %s84_s21  ;;  %s5955_s23 = int_to_ptr.vmem [resolvable:$true] %s28_s23 }
  0x28   :  { %s5710_s28 = scalar_lea.hbm %s7014_s6, 6144 }
  0x29   :  { %p5711_p2 = scmp.ne.s32.totalorder %s7014_s6, %s5710_s28  ;;  %p5714_p3 = scmp.lt.u32.totalorder %s5710_s28, %s7014_s6 }
  0x2b   :  { %p5716_p4 = pnand %p5714_p3, %p5711_p2 }
  0x2d   :  { %5719 = shalt.err (!%p5716_p4)
}
  0x2e   :  { %s5720_s4 = scalar_lea.vmem %s85_s21, 6144  ;;  %p5725_p6 = scmp.lt.s32.totalorder %s85_s21, %s85_s21 }
  0x2f   :  { %p5721_p5 = scmp.ne.s32.totalorder %s85_s21, %s5720_s4  ;;  %p5726_p7 = scmp.lt.s32.totalorder %s5720_s4, %s5720_s4 }
  0x31   :  { %p5727_p8 = por %p5726_p7, %p5725_p6 }
  0x33   :  { %p5728_p9 = pnand %p5727_p8, %p5721_p5 }
  0x35   :  { %5731 = shalt.err (!%p5728_p9)
}
  0x36   :  { %90 = dma.hbm_to_vmem [thread:$0]  %s7014_s6, 6144, %s85_s21, [#allocation12], %s5854_s25, %s5854_s25, %s5855_s26  }
  0x37   :  { %s5732_s18 = scalar_lea.hbm %s7009_s1, 768 }
  0x38   :  { %p5733_p10 = scmp.ne.s32.totalorder %s7009_s1, %s5732_s18  ;;  %p5736_p11 = scmp.lt.u32.totalorder %s5732_s18, %s7009_s1 }
  0x3a   :  { %p5738_p12 = pnand %p5736_p11, %p5733_p10 }
  0x3c   :  { %5741 = shalt.err (!%p5738_p12)
}
  0x3d   :  { %s5742_s22 = scalar_lea.vmem %s5955_s23, 768  ;;  %p5747_p0 = scmp.lt.s32.totalorder %s5955_s23, %s5955_s23 }
  0x3e   :  { %p5743_p13 = scmp.ne.s32.totalorder %s5955_s23, %s5742_s22  ;;  %p5748_p1 = scmp.lt.s32.totalorder %s5742_s22, %s5742_s22 }
  0x40   :  { %p5749_p2 = por %p5748_p1, %p5747_p0 }
  0x42   :  { %p5750_p3 = pnand %p5749_p2, %p5743_p13 }
  0x44   :  { %5753 = shalt.err (!%p5750_p3)
}
  0x45   :  { %34 = dma.hbm_to_vmem [thread:$0]  %s7009_s1, 768, %s5955_s23, [#allocation4], %s5854_s25, %s5854_s25, %s5855_s26  }
  0x46   :  { %s5858_s24 = smov [#allocation7]   ;;  %s5859_s28 = smov [#allocation10]  }
  0x47   :  { %s53_s27 = sshll.u32 %s5858_s24, 4  ;;  %s72_s29 = sshll.u32 %s5859_s28, 4  ;;  %s54_s27 = int_to_ptr.vmem [resolvable:$true] %s53_s27  ;;  %s5992_s29 = int_to_ptr.vmem [resolvable:$true] %s72_s29 }
  0x48   :  { %s5754_s12 = scalar_lea.hbm %s7011_s3, 48 }
  0x49   :  { %p5755_p4 = scmp.ne.s32.totalorder %s7011_s3, %s5754_s12  ;;  %p5758_p5 = scmp.lt.u32.totalorder %s5754_s12, %s7011_s3 }
  0x4b   :  { %p5760_p6 = pnand %p5758_p5, %p5755_p4 }
  0x4d   :  { %5763 = shalt.err (!%p5760_p6)
}
  0x4e   :  { %s5764_s1 = scalar_lea.vmem %s54_s27, 48  ;;  %s5768_s23 = scalar_lea.vmem %s54_s27, 64 }
  0x4f   :  { %p5765_p7 = scmp.ne.s32.totalorder %s54_s27, %s5764_s1  ;;  %p5769_p8 = scmp.lt.s32.totalorder %s54_s27, %s54_s27 }
  0x50   :  { %p5770_p9 = scmp.lt.s32.totalorder %s5768_s23, %s5764_s1 }
  0x52   :  { %p5771_p10 = por %p5770_p9, %p5769_p8 }
  0x54   :  { %p5772_p11 = pnand %p5771_p10, %p5765_p7 }
  0x56   :  { %5775 = shalt.err (!%p5772_p11)
}
  0x57   :  { %56 = dma.hbm_to_vmem [thread:$0]  %s7011_s3, 48, %s54_s27, [#allocation6]  }
  0x58   :  { %s5776_s19 = scalar_lea.hbm %s7013_s5, 6144 }
  0x59   :  { %p5777_p12 = scmp.ne.s32.totalorder %s7013_s5, %s5776_s19  ;;  %p5780_p13 = scmp.lt.u32.totalorder %s5776_s19, %s7013_s5 }
  0x5b   :  { %p5782_p0 = pnand %p5780_p13, %p5777_p12 }
  0x5d   :  { %5785 = shalt.err (!%p5782_p0)
}
  0x5e   :  { %s5786_s24 = scalar_lea.vmem %s5992_s29, 6144  ;;  %p5791_p2 = scmp.lt.s32.totalorder %s5992_s29, %s5992_s29 }
  0x5f   :  { %p5787_p1 = scmp.ne.s32.totalorder %s5992_s29, %s5786_s24  ;;  %p5792_p3 = scmp.lt.s32.totalorder %s5786_s24, %s5786_s24 }
  0x61   :  { %p5793_p4 = por %p5792_p3, %p5791_p2 }
  0x63   :  { %p5794_p5 = pnand %p5793_p4, %p5787_p1 }
  0x65   :  { %5797 = shalt.err (!%p5794_p5)
}
  0x66   :  { %78 = dma.hbm_to_vmem [thread:$0]  %s7013_s5, 6144, %s5992_s29, [#allocation9], %s5854_s25, %s5854_s25, %s5855_s26  }
  0x67   :  { %s5860_s28 = smov [#allocation13]   ;;  %s5861_s11 = smov [#allocation14]  }
  0x68   :  { %s97_s30 = sshll.u32 %s5860_s28, 4  ;;  %s107_s12 = sshll.u32 %s5861_s11, 4  ;;  %s98_s30 = int_to_ptr.vmem [resolvable:$true] %s97_s30  ;;  %s108_s12 = int_to_ptr.vmem [resolvable:$true] %s107_s12 }
  0x69   :  { %s5798_s13 = scalar_lea.hbm %s7015_s7, 48 }
  0x6a   :  { %p5799_p6 = scmp.ne.s32.totalorder %s7015_s7, %s5798_s13  ;;  %p5802_p7 = scmp.lt.u32.totalorder %s5798_s13, %s7015_s7 }
  0x6c   :  { %p5804_p8 = pnand %p5802_p7, %p5799_p6 }
  0x6e   :  { %5807 = shalt.err (!%p5804_p8)
}
  0x6f   :  { %s5808_s5 = scalar_lea.vmem %s98_s30, 48  ;;  %s5812_s25 = scalar_lea.vmem %s98_s30, 64 }
  0x70   :  { %p5809_p9 = scmp.ne.s32.totalorder %s98_s30, %s5808_s5  ;;  %p5813_p10 = scmp.lt.s32.totalorder %s98_s30, %s98_s30 }
  0x71   :  { %p5814_p11 = scmp.lt.s32.totalorder %s5812_s25, %s5808_s5 }
  0x73   :  { %p5815_p12 = por %p5814_p11, %p5813_p10 }
  0x75   :  { %p5816_p13 = pnand %p5815_p12, %p5809_p9 }
  0x77   :  { %5819 = shalt.err (!%p5816_p13)
}
  0x78   :  { %100 = dma.hbm_to_vmem [thread:$0]  %s7015_s7, 48, %s98_s30, [#allocation12]  }
  0x79   :  { %s5820_s14 = scalar_lea.hbm %s7016_s8, 48 }
  0x7a   :  { %p5821_p0 = scmp.ne.s32.totalorder %s7016_s8, %s5820_s14  ;;  %p5824_p1 = scmp.lt.u32.totalorder %s5820_s14, %s7016_s8 }
  0x7c   :  { %p5826_p2 = pnand %p5824_p1, %p5821_p0 }
  0x7e   :  { %5829 = shalt.err (!%p5826_p2)
}
  0x7f   :  { %s5830_s21 = scalar_lea.vmem %s108_s12, 48  ;;  %s5834_s24 = scalar_lea.vmem %s108_s12, 64 }
  0x80   :  { %p5831_p3 = scmp.ne.s32.totalorder %s108_s12, %s5830_s21  ;;  %p5835_p4 = scmp.lt.s32.totalorder %s108_s12, %s108_s12 }
  0x81   :  { %p5836_p5 = scmp.lt.s32.totalorder %s5834_s24, %s5830_s21 }
  0x83   :  { %p5837_p6 = por %p5836_p5, %p5835_p4 }
  0x85   :  { %p5838_p7 = pnand %p5837_p6, %p5831_p3 }
  0x87   :  { %5841 = shalt.err (!%p5838_p7)
}
  0x88   :  { %110 = dma.hbm_to_vmem [thread:$0]  %s7016_s8, 48, %s108_s12, [#allocation15]  }
  0x89   :  { %5842 = dma.done.wait [#allocation4], 768  }
  0x8a   :  { %5843 = vsyncadd [#allocation4], 4294966528 }
  0x8b   :  { %5844 = dma.done.wait [#allocation6], 6192  }
  0x8c   :  { %5845 = vsyncadd [#allocation6], 4294961104 }
  0x8d   :  { %5846 = dma.done.wait [#allocation9], 6192  }
  0x8e   :  { %5847 = vsyncadd [#allocation9], 4294961104 }
  0x8f   :  { %5848 = dma.done.wait [#allocation12], 6192  }
  0x90   :  { %5849 = vsyncadd [#allocation12], 4294961104 }
  0x91   :  { %5850 = dma.done.wait [#allocation15], 48  }
  0x92   :  { %5851 = vsyncadd [#allocation15], 4294967248  ;;  %v5862_v0 = vmov 0.0   ;;  %v242_v1 = vld [vmem:[#allocation3 + $0x8] sm:$0xff]  ;;  %v245_v2 = vld [vmem:[#allocation3 + $0x20] sm:$0xff]  ;;  %vm264_vm0 = vcmask 130048  }
  0x93   :  { %353 = vmatprep.mubr.f32.mxu0 %v5862_v0  ;;  %v241_v3 = vld [vmem:[#allocation3] sm:$0xff]  ;;  %v4429_v4 = vpack.c.bf16 %v245_v2, %v242_v1  ;;  %v244_v5 = vld [vmem:[#allocation3 + $0x18] sm:$0xff]  ;;  %v139_v9 = vld [vmem:[#allocation5 + $0x20] sm:$0xff]  ;;  %v5863_v48 = vmov 0.0|0.0   ;;  %vm5864_vm1 = vmmov 0  }
  0x94   :  { %v233_v6 = vld [vmem:[%s7008_s0] sm:$0xff]  ;;  %v136_v7 = vld [vmem:[#allocation5 + $0x8] sm:$0xff]  ;;  %v4431_v8 = vpack.c.bf16 %v244_v5, %v241_v3  ;;  %v135_v10 = vld [vmem:[#allocation5] sm:$0xff] }
  0x95   :  { %v138_v11 = vld [vmem:[#allocation5 + $0x18] sm:$0xff]  ;;  %3813 = vmatprep.mubr.msk.f32.mxu1 %vm264_vm0, %v233_v6  ;;  %4430 = vmatprep.subr.bf16.mxu0 %v4429_v4  ;;  %v6055_v12 = vpack.c.bf16 %v139_v9, %v136_v7  ;;  %v145_v14 = vld [vmem:[#allocation5 + $0x50] sm:$0xff]  ;;  %v144_v18 = vld [vmem:[#allocation5 + $0x48] sm:$0xff] }
  0x96   :  { %v142_v13 = vld [vmem:[#allocation5 + $0x38] sm:$0xff]  ;;  %4432 = vmatpush1.bf16.msra.mxu0 %v4431_v8  ;;  %v6057_v15 = vpack.c.bf16 %v138_v11, %v135_v10  ;;  %v141_v17 = vld [vmem:[#allocation5 + $0x30] sm:$0xff]  ;;  %v148_v19 = vld [vmem:[#allocation5 + $0x68] sm:$0xff] }
  0x97   :  { %4438 = vmatprep.subr.bf16.mxu0 %v6055_v12  ;;  %v6060_v16 = vpack.c.bf16 %v145_v14, %v142_v13  ;;  %v151_v20 = vld [vmem:[#allocation5 + $0x80] sm:$0xff]  ;;  %v234_v21 = vld [vmem:[%s7008_s0 + $0x8] sm:$0xff]  ;;  %v6068_v22 = vpack.c.bf16 %v144_v18, %v141_v17  ;;  %v157_v27 = vld [vmem:[#allocation5 + $0xb0] sm:$0xff] }
  0x98   :  { %v6071_v23 = vpack.c.bf16 %v151_v20, %v148_v19  ;;  %v147_v24 = vld [vmem:[#allocation5 + $0x60] sm:$0xff]  ;;  %v150_v25 = vld [vmem:[#allocation5 + $0x78] sm:$0xff]  ;;  %v153_v34 = vld [vmem:[#allocation5 + $0x90] sm:$0xff] }
  0x99   :  { %3454 = vmatmul.mubr.msk.f32.vlgmr.msra.gmra.mrb[0].mxu0 %vm264_vm0, %v233_v6  ;;  %v154_v26 = vld [vmem:[#allocation5 + $0x98] sm:$0xff]  ;;  %v243_v28 = vld [vmem:[#allocation3 + $0x10] sm:$0xff]  ;;  %v6079_v31 = vpack.c.bf16 %v150_v25, %v147_v24  ;;  %v156_v35 = vld [vmem:[#allocation5 + $0xa8] sm:$0xff] }
  0x9a   :  { %4440 = vmatpush1.bf16.msra.mxu0 %v6057_v15  ;;  %359 = vmatprep.mubr.f32.mxu0 %v5862_v0  ;;  %v246_v29 = vld [vmem:[#allocation3 + $0x28] sm:$0xff]  ;;  %v235_v30 = vld [vmem:[%s7008_s0 + $0x10] sm:$0xff]  ;;  %v6082_v33 = vpack.c.bf16 %v157_v27, %v154_v26  ;;  %v137_v36 = vld [vmem:[#allocation5 + $0x10] sm:$0xff]  ;;  %v6092_v42 = vpack.c.bf16 %v156_v35, %v153_v34  ;;  %v249_v35 = vlaneseq }
  0x9b   :  { %4442 = vmatprep.subr.bf16.mxu0 %v6060_v16  ;;  %v4433_v32 = vpack.c.bf16 %v246_v29, %v243_v28  ;;  %v160_v37 = vld [vmem:[#allocation5 + $0xc8] sm:$0xff]  ;;  %v163_v38 = vld [vmem:[#allocation5 + $0xe0] sm:$0xff]  ;;  %v146_v44 = vld [vmem:[#allocation5 + $0x58] sm:$0xff] }
  0x9c   :  { %v140_v39 = vld [vmem:[#allocation5 + $0x28] sm:$0xff]  ;;  %v143_v43 = vld [vmem:[#allocation5 + $0x40] sm:$0xff]  ;;  %v6095_v45 = vpack.c.bf16 %v163_v38, %v160_v37  ;;  %v162_v47 = vld [vmem:[#allocation5 + $0xd8] sm:$0xff] }
  0x9d   :  { %3455 = vmatmul.mubr.msk.f32.gmra.mrb[2].mxu0 %vm264_vm0, %v234_v21  ;;  %4434 = vmatprep.subr.bf16.mxu1 %v4433_v32  ;;  %v6085_v40 = vpack.c.bf16 %v140_v39, %v137_v36  ;;  %v236_v41 = vld [vmem:[%s7008_s0 + $0x18] sm:$0xff]  ;;  %v159_v46 = vld [vmem:[#allocation5 + $0xc0] sm:$0xff]  ;;  %v166_v49 = vld [vmem:[#allocation5 + $0xf8] sm:$0xff]  ;;  %v6101_v51 = vpack.c.bf16 %v146_v44, %v143_v43  ;;  %v250_v36 = vshrl.u32 %v249_v35, 7 }
  0x9e   :  { %4444 = vmatpush1.bf16.msra.mxu0 %v6068_v22  ;;  %365 = vmatprep.mubr.f32.mxu0 %v5862_v0  ;;  %v169_v50 = vld [vmem:[#allocation5 + $0x110] sm:$0xff]  ;;  %v6108_v53 = vpack.c.bf16 %v162_v47, %v159_v46  ;;  %v152_v55 = vld [vmem:[#allocation5 + $0x88] sm:$0xff]  ;;  %v175_v60 = vld [vmem:[#allocation5 + $0x140] sm:$0xff] }
  0x9f   :  { %4446 = vmatprep.subr.bf16.mxu0 %v6071_v23  ;;  %4436 = vmatpush3.bf16.msra.mxu1 %v4433_v32  ;;  %v237_v52 = vld [vmem:[%s7008_s0 + $0x20] sm:$0xff]  ;;  %v6111_v56 = vpack.c.bf16 %v169_v50, %v166_v49  ;;  %v168_v58 = vld [vmem:[#allocation5 + $0x108] sm:$0xff]  ;;  %v238_v62 = vld [vmem:[%s7008_s0 + $0x28] sm:$0xff]  ;;  %v6220_v37 = vsub.s32 2, %v250_v36  ;;  %v6227_v50 = vsub.s32 0, %v250_v36 }
  0xa0   :  { %4469 = vmatprep.subr.bf16.mxu1 %v5863_v48  ;;  %v149_v54 = vld [vmem:[#allocation5 + $0x70] sm:$0xff]  ;;  %v172_v59 = vld [vmem:[#allocation5 + $0x128] sm:$0xff]  ;;  %v155_v1 = vld [vmem:[#allocation5 + $0xa0] sm:$0xff] }
  0xa1   :  { %3456 = vmatmul.mubr.msk.f32.gmra.mrb[4].mxu0 %vm264_vm0, %v235_v30  ;;  %v165_v57 = vld [vmem:[#allocation5 + $0xf0] sm:$0xff]  ;;  %v6117_v61 = vpack.c.bf16 %v152_v55, %v149_v54  ;;  %v158_v2 = vld [vmem:[#allocation5 + $0xb8] sm:$0xff]  ;;  %v6127_v3 = vpack.c.bf16 %v175_v60, %v172_v59  ;;  %v171_v4 = vld [vmem:[#allocation5 + $0x120] sm:$0xff]  ;;  %v6231_v55 = vsub.s32 1, %v250_v36 }
  0xa2   :  { %4448 = vmatpush1.bf16.msra.mxu0 %v6079_v31  ;;  %371 = vmatprep.mubr.f32.mxu0 %v5862_v0  ;;  %v6124_v63 = vpack.c.bf16 %v168_v58, %v165_v57  ;;  %v174_v5 = vld [vmem:[#allocation5 + $0x138] sm:$0xff]  ;;  %v181_v7 = vld [vmem:[#allocation5 + $0x170] sm:$0xff]  ;;  %v6133_v8 = vpack.c.bf16 %v158_v2, %v155_v1  ;;  %v239_v9 = vld [vmem:[%s7008_s0 + $0x30] sm:$0xff] }
  0xa3   :  { %4450 = vmatprep.subr.bf16.mxu0 %v6082_v33  ;;  %3814 = vmatmul.mubr.msk.f32.vlgmr.msra.gmra.mrb[0].mxu1 %vm264_vm0, %v234_v21  ;;  %v178_v6 = vld [vmem:[#allocation5 + $0x158] sm:$0xff]  ;;  %v6140_v10 = vpack.c.bf16 %v174_v5, %v171_v4  ;;  %v161_v11 = vld [vmem:[#allocation5 + $0xd0] sm:$0xff]  ;;  %v164_v13 = vld [vmem:[#allocation5 + $0xe8] sm:$0xff] }
  0xa4   :  { %4471 = vmatpush3.bf16.msra.mxu1 %v6085_v40  ;;  %3816 = vmatprep.mubr.msk.f32.mxu1 %vm264_vm0, %v235_v30  ;;  %v6143_v14 = vpack.c.bf16 %v181_v7, %v178_v6  ;;  %v177_v17 = vld [vmem:[#allocation5 + $0x150] sm:$0xff]  ;;  %v180_v18 = vld [vmem:[#allocation5 + $0x168] sm:$0xff]  ;;  %v6149_v19 = vpack.c.bf16 %v164_v13, %v161_v11  ;;  %v167_v24 = vld [vmem:[#allocation5 + $0x100] sm:$0xff] }
  0xa5   :  { %3457 = vmatmul.mubr.msk.f32.gmra.mrb[6].mxu0 %vm264_vm0, %v236_v41  ;;  %4472 = vmatprep.subr.bf16.mxu1 %v5863_v48  ;;  %v240_v20 = vld [vmem:[%s7008_s0 + $0x38] sm:$0xff]  ;;  %v6156_v21 = vpack.c.bf16 %v180_v18, %v177_v17  ;;  %v170_v25 = vld [vmem:[#allocation5 + $0x118] sm:$0xff]  ;;  %v173_v27 = vld [vmem:[#allocation5 + $0x130] sm:$0xff] }
  0xa6   :  { %4452 = vmatpush1.bf16.msra.mxu0 %v6092_v42  ;;  %377 = vmatprep.mubr.f32.mxu0 %v5862_v0  ;;  %v6163_v26 = vpack.c.bf16 %v170_v25, %v167_v24  ;;  %v176_v28 = vld [vmem:[#allocation5 + $0x148] sm:$0xff]  ;;  %v179_v30 = vld [vmem:[#allocation5 + $0x160] sm:$0xff]  ;;  %v182_v32 = vld [vmem:[#allocation5 + $0x178] sm:$0xff] }
  0xa7   :  { %4454 = vmatprep.subr.bf16.mxu0 %v6095_v45  ;;  %3817 = vmatmul.mubr.msk.f32.gmra.mrb[2].mxu1 %vm264_vm0, %v236_v41  ;;  %v6173_v29 = vpack.c.bf16 %v176_v28, %v173_v27  ;;  %v6182_v34 = vpack.c.bf16 %v182_v32, %v179_v30  ;;  %v247_v38 = vld [vmem:[#allocation7] sm:$0x7]  ;;  %v183_v54 = vld [vmem:[#allocation8] sm:$0x7] }
  0xa8   :  { %4474 = vmatpush3.bf16.msra.mxu1 %v6101_v51  ;;  %3819 = vmatprep.mubr.msk.f32.mxu1 %vm264_vm0, %v237_v52  ;;  %v260_v39 = vrot.slane %v247_v38, %v6220_v37  ;;  %v252_v57 = vrot.slane %v247_v38, %v6227_v50  ;;  %v511_v58 = vrot.slane %v183_v54, %v6227_v50 }
  0xa9   :  { %3458 = vmatmul.mubr.msk.f32.gmra.mrb[8].mxu0 %vm264_vm0, %v237_v52  ;;  %4475 = vmatprep.subr.bf16.mxu1 %v5863_v48  ;;  %v256_v60 = vrot.slane %v247_v38, %v6231_v55  ;;  %v6252_v36 = vrot.slane %v183_v54, %v6220_v37 }
  0xaa   :  { %4456 = vmatpush1.bf16.msra.mxu0 %v6108_v53  ;;  %383 = vmatprep.mubr.f32.mxu0 %v5862_v0  ;;  %v6239_v4 = vadd.f32 %v511_v58, %v252_v57 }
  0xab   :  { %4458 = vmatprep.subr.bf16.mxu0 %v6111_v56  ;;  %3820 = vmatmul.mubr.msk.f32.gmra.mrb[4].mxu1 %vm264_vm0, %v238_v62 }
  0xac   :  { %4477 = vmatpush3.bf16.msra.mxu1 %v6117_v61  ;;  %3822 = vmatprep.mubr.msk.f32.mxu1 %vm264_vm0, %v239_v9 }
  0xad   :  { %3459 = vmatmul.mubr.msk.f32.gmra.mrb[10].mxu0 %vm264_vm0, %v238_v62  ;;  %4478 = vmatprep.subr.bf16.mxu1 %v5863_v48  ;;  %v515_v62 = vrot.slane %v183_v54, %v6231_v55 }
  0xae   :  { %4460 = vmatpush1.bf16.msra.mxu0 %v6124_v63  ;;  %389 = vmatprep.mubr.f32.mxu0 %v5862_v0 }
  0xaf   :  { %4462 = vmatprep.subr.bf16.mxu0 %v6127_v3  ;;  %3823 = vmatmul.mubr.msk.f32.gmra.mrb[6].mxu1 %vm264_vm0, %v240_v20 }
  0xb0   :  { %4480 = vmatpush3.bf16.msra.mxu1 %v6133_v8  ;;  %3857 = vmatprep.mubr.msk.f32.mxu1 %vm5864_vm1, %v5862_v0 }
  0xb1   :  { %3460 = vmatmul.mubr.msk.f32.gmra.mrb[12].mxu0 %vm264_vm0, %v239_v9  ;;  %4481 = vmatprep.subr.bf16.mxu1 %v5863_v48  ;;  %v6243_v9 = vadd.f32 %v515_v62, %v256_v60 }
  0xb2   :  { %4464 = vmatpush1.bf16.msra.mxu0 %v6140_v10  ;;  %395 = vmatprep.mubr.f32.mxu0 %v5862_v0 }
  0xb3   :  { %4466 = vmatprep.subr.bf16.mxu0 %v6143_v14 }
  0xb4   :  { %4483 = vmatpush3.bf16.msra.mxu1 %v6149_v19 }
  0xb5   :  { %3461 = vmatmul.mubr.msk.f32.gmra.mrb[14].mxu0 %vm264_vm0, %v240_v20  ;;  %4484 = vmatprep.subr.bf16.mxu1 %v5863_v48 }
  0xb6   :  { %4468 = vmatpush1.bf16.msra.mxu0 %v6156_v21  ;;  %587 = vmatprep.mubr.f32.mxu0 %v5862_v0 }
  0xb7   :  { %4494 = vmatprep.subr.bf16.mxu0 %v6055_v12 }
  0xb8   :  { %4486 = vmatpush3.bf16.msra.mxu1 %v6163_v26 }
  0xb9   :  { %588 = vmatmul.mubr.f32.vlgmr.msra.gmra.mrb[0].mxu0 %v5862_v0  ;;  %4487 = vmatprep.subr.bf16.mxu1 %v5863_v48 }
  0xba   :  { %4496 = vmatpush1.bf16.msra.mxu0 %v6057_v15  ;;  %750 = vmatprep.mubr.f32.mxu0 %v5862_v0 }
  0xbb   :  { %4498 = vmatprep.subr.bf16.mxu0 %v6060_v16 }
  0xbc   :  { %4489 = vmatpush3.bf16.msra.mxu1 %v6173_v29 }
  0xbd   :  { %4490 = vmatprep.subr.bf16.mxu1 %v5863_v48 }
  0xbe   :  { %4500 = vmatpush1.bf16.msra.mxu0 %v6068_v22 }
  0xbf   :  { %4502 = vmatprep.subr.bf16.mxu0 %v6071_v23 }
  0xc0   :  { %4492 = vmatpush3.bf16.msra.mxu1 %v6182_v34 }
  0xc1   :  { %4525 = vmatprep.subr.bf16.mxu1 %v5863_v48 }
  0xc2   :  { %4504 = vmatpush1.bf16.msra.mxu0 %v6079_v31 }
  0xc3   :  { %3858 = vmatmul.mubr.f32.vlgmr.msra.gmra.mrb[8].mxu1 %v5862_v0  ;;  %4506 = vmatprep.subr.bf16.mxu0 %v6082_v33 }
  0xc4   :  { %4527 = vmatpush3.bf16.msra.mxu1 %v6085_v40  ;;  %3892 = vmatprep.mubr.msk.f32.mxu1 %vm5864_vm1, %v5862_v0 }
  0xc5   :  { %4528 = vmatprep.subr.bf16.mxu1 %v5863_v48 }
  0xc6   :  { %4508 = vmatpush1.bf16.msra.mxu0 %v6092_v42 }
  0xc7   :  { %4510 = vmatprep.subr.bf16.mxu0 %v6095_v45 }
  0xc8   :  { %4530 = vmatpush3.bf16.msra.mxu1 %v6101_v51 }
  0xc9   :  { %4531 = vmatprep.subr.bf16.mxu1 %v5863_v48 }
  0xca   :  { %4512 = vmatpush1.bf16.msra.mxu0 %v6108_v53 }
  0xcb   :  { %4514 = vmatprep.subr.bf16.mxu0 %v6111_v56 }
  0xcc   :  { %4533 = vmatpush3.bf16.msra.mxu1 %v6117_v61 }
  0xcd   :  { %4534 = vmatprep.subr.bf16.mxu1 %v5863_v48 }
  0xce   :  { %4516 = vmatpush1.bf16.msra.mxu0 %v6124_v63 }
  0xcf   :  { %4518 = vmatprep.subr.bf16.mxu0 %v6127_v3 }
  0xd0   :  { %4536 = vmatpush3.bf16.msra.mxu1 %v6133_v8 }
  0xd1   :  { %4537 = vmatprep.subr.bf16.mxu1 %v5863_v48 }
  0xd2   :  { %4520 = vmatpush1.bf16.msra.mxu0 %v6140_v10 }
  0xd3   :  { %4522 = vmatprep.subr.bf16.mxu0 %v6143_v14 }
  0xd4   :  { %4539 = vmatpush3.bf16.msra.mxu1 %v6149_v19 }
  0xd5   :  { %4540 = vmatprep.subr.bf16.mxu1 %v5863_v48 }
  0xd6   :  { %4524 = vmatpush1.bf16.msra.mxu0 %v6156_v21 }
  0xd7   :  { %4550 = vmatprep.subr.bf16.mxu0 %v6055_v12 }
  0xd8   :  { %4542 = vmatpush3.bf16.msra.mxu1 %v6163_v26 }
  0xd9   :  { %4543 = vmatprep.subr.bf16.mxu1 %v5863_v48 }
  0xdc   :  { %4545 = vmatpush3.bf16.msra.mxu1 %v6173_v29 }
  0xdd   :  { %4546 = vmatprep.subr.bf16.mxu1 %v5863_v48 }
  0xe0   :  { %4548 = vmatpush3.bf16.msra.mxu1 %v6182_v34 }
  0xe1   :  { %4581 = vmatprep.subr.bf16.mxu1 %v5863_v48 }
 0x176   :  { %v3815_v41 = vpop.f32.mrb[0].mxu1 }
 0x177   :  { %v6223_v43 = vadd.f32 %v3815_v41, %v260_v39  ;;  %v468_v44 = vpop.f32.mrb[1].mxu1 }
 0x178   :  { %v469_v57 = vadd.f32 %v468_v44, %v260_v39 }
 0x17a   :  { %v3818_v46 = vpop.f32.mrb[2].mxu1 }
 0x17b   :  { %v6225_v47 = vadd.f32 %v3818_v46, %v260_v39  ;;  %v478_v49 = vpop.f32.mrb[3].mxu1 }
 0x17c   :  { %v6229_v52 = vadd.f32 %v478_v49, %v260_v39 }
 0x17e   :  { %v3821_v59 = vpop.f32.mrb[4].mxu1 }
 0x17f   :  { %v6237_v1 = vadd.f32 %v3821_v59, %v260_v39  ;;  %v488_v2 = vpop.f32.mrb[5].mxu1 }
 0x180   :  { %v6241_v5 = vadd.f32 %v488_v2, %v260_v39 }
 0x182   :  { %v3824_v6 = vpop.f32.mrb[6].mxu1 }
 0x183   :  { %v6245_v11 = vadd.f32 %v3824_v6, %v260_v39  ;;  %v498_v13 = vpop.f32.mrb[7].mxu1 }
 0x184   :  { %v6248_v20 = vadd.f32 %v498_v13, %v260_v39 }
 0x18c   :  { %v589_v7 = vpop.f32.mrb[0].mxu0 }
 0x18d   :  { %v5398_v17 = vadd.f32 %v6239_v4, %v589_v7  ;;  %v591_v18 = vpop.f32.mrb[1].mxu0 }
 0x18e   :  { %v5400_v25 = vadd.f32 %v6243_v9, %v591_v18 }
 0x18f   :  { %v3470_v24 = vmul.f32 -1.442695, %v5398_v17 }
 0x190   :  { %v3471_v27 = vmul.f32 -1.442695, %v5400_v25 }
 0x191   :  { %5506 = vpow2.f32 %v3470_v24 }
 0x192   :  { %5508 = vpow2.f32 %v3471_v27 }
 0x196   :  { %v660_v28 = vpop.f32.mrb[8].mxu1 }
 0x197   :  { %v3859_v30 = vpop.f32.mrb[9].mxu1  ;;  %v661_v46 = vadd.f32 %v660_v28, %v6252_v36 }
 0x19b   :  { %v5507_v32 = vpop.eup %5506 }
 0x19c   :  { %v668_v35 = vadd.f32 1.0, %v5507_v32  ;;  %v5509_v38 = vpop.eup %5508 }
 0x19d   :  { %v675_v41 = vadd.f32 1.0, %v5509_v38 }
 0x19e   :  { %5510 = vrcp.f32 %v668_v35 }
 0x19f   :  { %5512 = vrcp.f32 %v675_v41 }
 0x1a8   :  { %v5511_v49 = vpop.eup %5510 }
 0x1a9   :  { %v678_v58 = vmul.f32 %v5511_v49, %v661_v46  ;;  %v5513_v60 = vpop.eup %5512 }
 0x1aa   :  { %v681_v62 = vsub.f32 1.0, %v5513_v60  ;;  %v683_v7 = vmul.f32 0.0, %v5513_v60 }
 0x1ab   :  { %v679_v59 = vadd.f32 %v678_v58, %v469_v57 }
 0x1ad   :  { %5514 = vtanh.f32 %v679_v59 }
 0x1b7   :  { %v5515_v2 = vpop.eup %5514 }
 0x1b8   :  { %v682_v6 = vmul.f32 %v5515_v2, %v681_v62 }
 0x1ba   :  { %v6255_v13 = vadd.f32 %v683_v7, %v682_v6 }
 0x1bc   :  { %751 = vmatmul.mubr.f32.vlgmr.msra.gmra.mrb[2].mxu0 %v6255_v13  ;;  %3893 = vmatmul.mubr.f32.vlgmr.msra.gmra.mrb[10].mxu1 %v6255_v13 }
 0x1bd   :  { %4552 = vmatpush1.bf16.msra.mxu0 %v6057_v15  ;;  %4583 = vmatpush3.bf16.msra.mxu1 %v6085_v40 }
 0x1be   :  { %4554 = vmatprep.subr.bf16.mxu0 %v6060_v16  ;;  %4584 = vmatprep.subr.bf16.mxu1 %v5863_v48 }
 0x1bf   :  { %913 = vmatprep.mubr.f32.mxu0 %v5862_v0  ;;  %3927 = vmatprep.mubr.msk.f32.mxu1 %vm5864_vm1, %v5862_v0 }
 0x1c1   :  { %4556 = vmatpush1.bf16.msra.mxu0 %v6068_v22  ;;  %4586 = vmatpush3.bf16.msra.mxu1 %v6101_v51 }
 0x1c2   :  { %4558 = vmatprep.subr.bf16.mxu0 %v6071_v23  ;;  %4587 = vmatprep.subr.bf16.mxu1 %v5863_v48 }
 0x1c5   :  { %4560 = vmatpush1.bf16.msra.mxu0 %v6079_v31  ;;  %4589 = vmatpush3.bf16.msra.mxu1 %v6117_v61 }
 0x1c6   :  { %4562 = vmatprep.subr.bf16.mxu0 %v6082_v33  ;;  %4590 = vmatprep.subr.bf16.mxu1 %v5863_v48 }
 0x1c9   :  { %4564 = vmatpush1.bf16.msra.mxu0 %v6092_v42  ;;  %4592 = vmatpush3.bf16.msra.mxu1 %v6133_v8 }
 0x1ca   :  { %4566 = vmatprep.subr.bf16.mxu0 %v6095_v45  ;;  %4593 = vmatprep.subr.bf16.mxu1 %v5863_v48 }
 0x1cd   :  { %4568 = vmatpush1.bf16.msra.mxu0 %v6108_v53  ;;  %4595 = vmatpush3.bf16.msra.mxu1 %v6149_v19 }
 0x1ce   :  { %4570 = vmatprep.subr.bf16.mxu0 %v6111_v56  ;;  %4596 = vmatprep.subr.bf16.mxu1 %v5863_v48 }
 0x1d1   :  { %4572 = vmatpush1.bf16.msra.mxu0 %v6124_v63  ;;  %4598 = vmatpush3.bf16.msra.mxu1 %v6163_v26 }
 0x1d2   :  { %4574 = vmatprep.subr.bf16.mxu0 %v6127_v3  ;;  %4599 = vmatprep.subr.bf16.mxu1 %v5863_v48 }
 0x1d5   :  { %4576 = vmatpush1.bf16.msra.mxu0 %v6140_v10  ;;  %4601 = vmatpush3.bf16.msra.mxu1 %v6173_v29 }
 0x1d6   :  { %4578 = vmatprep.subr.bf16.mxu0 %v6143_v14  ;;  %4602 = vmatprep.subr.bf16.mxu1 %v5863_v48 }
 0x1d9   :  { %4580 = vmatpush1.bf16.msra.mxu0 %v6156_v21  ;;  %4604 = vmatpush3.bf16.msra.mxu1 %v6182_v34 }
 0x1da   :  { %4606 = vmatprep.subr.bf16.mxu0 %v6055_v12  ;;  %4637 = vmatprep.subr.bf16.mxu1 %v5863_v48 }
 0x28f   :  { %v752_v39 = vpop.f32.mrb[2].mxu0  ;;  %v823_v44 = vpop.f32.mrb[10].mxu1 }
 0x290   :  { %v5402_v54 = vadd.f32 %v6239_v4, %v752_v39  ;;  %v754_v17 = vpop.f32.mrb[3].mxu0  ;;  %v3894_v18 = vpop.f32.mrb[11].mxu1  ;;  %v824_v38 = vadd.f32 %v823_v44, %v6252_v36 }
 0x291   :  { %v5404_v25 = vadd.f32 %v6243_v9, %v754_v17 }
 0x292   :  { %v3472_v24 = vmul.f32 -1.442695, %v5402_v54 }
 0x293   :  { %v3473_v27 = vmul.f32 -1.442695, %v5404_v25 }
 0x294   :  { %5516 = vpow2.f32 %v3472_v24 }
 0x295   :  { %5518 = vpow2.f32 %v3473_v27 }
 0x29e   :  { %v5517_v28 = vpop.eup %5516 }
 0x29f   :  { %v831_v30 = vadd.f32 1.0, %v5517_v28  ;;  %v5519_v32 = vpop.eup %5518 }
 0x2a0   :  { %v838_v35 = vadd.f32 1.0, %v5519_v32 }
 0x2a1   :  { %5520 = vrcp.f32 %v831_v30 }
 0x2a2   :  { %5522 = vrcp.f32 %v838_v35 }
 0x2ab   :  { %v5521_v41 = vpop.eup %5520 }
 0x2ac   :  { %v841_v46 = vmul.f32 %v5521_v41, %v824_v38  ;;  %v5523_v57 = vpop.eup %5522 }
 0x2ad   :  { %v844_v58 = vsub.f32 1.0, %v5523_v57  ;;  %v846_v62 = vmul.f32 %v5523_v57, %v6255_v13 }
 0x2ae   :  { %v842_v49 = vadd.f32 %v841_v46, %v6223_v43 }
 0x2b0   :  { %5524 = vtanh.f32 %v842_v49 }
 0x2ba   :  { %v5525_v59 = vpop.eup %5524 }
 0x2bb   :  { %v845_v60 = vmul.f32 %v5525_v59, %v844_v58 }
 0x2bd   :  { %v6299_v2 = vadd.f32 %v846_v62, %v845_v60 }
 0x2bf   :  { %914 = vmatmul.mubr.f32.vlgmr.msra.gmra.mrb[4].mxu0 %v6299_v2  ;;  %3928 = vmatmul.mubr.f32.vlgmr.msra.gmra.mrb[12].mxu1 %v6299_v2 }
 0x2c0   :  { %4608 = vmatpush1.bf16.msra.mxu0 %v6057_v15  ;;  %4639 = vmatpush3.bf16.msra.mxu1 %v6085_v40 }
 0x2c1   :  { %4610 = vmatprep.subr.bf16.mxu0 %v6060_v16  ;;  %4640 = vmatprep.subr.bf16.mxu1 %v5863_v48 }
 0x2c2   :  { %1076 = vmatprep.mubr.f32.mxu0 %v5862_v0  ;;  %3962 = vmatprep.mubr.msk.f32.mxu1 %vm5864_vm1, %v5862_v0 }
 0x2c4   :  { %4612 = vmatpush1.bf16.msra.mxu0 %v6068_v22  ;;  %4642 = vmatpush3.bf16.msra.mxu1 %v6101_v51 }
 0x2c5   :  { %4614 = vmatprep.subr.bf16.mxu0 %v6071_v23  ;;  %4643 = vmatprep.subr.bf16.mxu1 %v5863_v48 }
 0x2c8   :  { %4616 = vmatpush1.bf16.msra.mxu0 %v6079_v31  ;;  %4645 = vmatpush3.bf16.msra.mxu1 %v6117_v61 }
 0x2c9   :  { %4618 = vmatprep.subr.bf16.mxu0 %v6082_v33  ;;  %4646 = vmatprep.subr.bf16.mxu1 %v5863_v48 }
 0x2cc   :  { %4620 = vmatpush1.bf16.msra.mxu0 %v6092_v42  ;;  %4648 = vmatpush3.bf16.msra.mxu1 %v6133_v8 }
 0x2cd   :  { %4622 = vmatprep.subr.bf16.mxu0 %v6095_v45  ;;  %4649 = vmatprep.subr.bf16.mxu1 %v5863_v48 }
 0x2d0   :  { %4624 = vmatpush1.bf16.msra.mxu0 %v6108_v53  ;;  %4651 = vmatpush3.bf16.msra.mxu1 %v6149_v19 }
 0x2d1   :  { %4626 = vmatprep.subr.bf16.mxu0 %v6111_v56  ;;  %4652 = vmatprep.subr.bf16.mxu1 %v5863_v48 }
 0x2d4   :  { %4628 = vmatpush1.bf16.msra.mxu0 %v6124_v63  ;;  %4654 = vmatpush3.bf16.msra.mxu1 %v6163_v26 }
 0x2d5   :  { %4630 = vmatprep.subr.bf16.mxu0 %v6127_v3  ;;  %4655 = vmatprep.subr.bf16.mxu1 %v5863_v48 }
 0x2d8   :  { %4632 = vmatpush1.bf16.msra.mxu0 %v6140_v10  ;;  %4657 = vmatpush3.bf16.msra.mxu1 %v6173_v29 }
 0x2d9   :  { %4634 = vmatprep.subr.bf16.mxu0 %v6143_v14  ;;  %4658 = vmatprep.subr.bf16.mxu1 %v5863_v48 }
 0x2dc   :  { %4636 = vmatpush1.bf16.msra.mxu0 %v6156_v21  ;;  %4660 = vmatpush3.bf16.msra.mxu1 %v6182_v34 }
 0x2dd   :  { %4662 = vmatprep.subr.bf16.mxu0 %v6055_v12  ;;  %4693 = vmatprep.subr.bf16.mxu1 %v5863_v48 }
 0x392   :  { %v915_v43 = vpop.f32.mrb[4].mxu0  ;;  %v986_v6 = vpop.f32.mrb[12].mxu1 }
 0x393   :  { %v5406_v7 = vadd.f32 %v6239_v4, %v915_v43  ;;  %v917_v39 = vpop.f32.mrb[5].mxu0  ;;  %v3929_v44 = vpop.f32.mrb[13].mxu1  ;;  %v987_v30 = vadd.f32 %v986_v6, %v6252_v36 }
 0x394   :  { %v5408_v17 = vadd.f32 %v6243_v9, %v917_v39 }
 0x395   :  { %v3474_v54 = vmul.f32 -1.442695, %v5406_v7 }
 0x396   :  { %v3475_v18 = vmul.f32 -1.442695, %v5408_v17 }
 0x397   :  { %5526 = vpow2.f32 %v3474_v54 }
 0x398   :  { %5528 = vpow2.f32 %v3475_v18 }
 0x3a1   :  { %v5527_v24 = vpop.eup %5526 }
 0x3a2   :  { %v994_v25 = vadd.f32 1.0, %v5527_v24  ;;  %v5529_v27 = vpop.eup %5528 }
 0x3a3   :  { %v1001_v28 = vadd.f32 1.0, %v5529_v27 }
 0x3a4   :  { %5530 = vrcp.f32 %v994_v25 }
 0x3a5   :  { %5532 = vrcp.f32 %v1001_v28 }
 0x3ae   :  { %v5531_v32 = vpop.eup %5530 }
 0x3af   :  { %v1004_v35 = vmul.f32 %v5531_v32, %v987_v30  ;;  %v5533_v41 = vpop.eup %5532 }
 0x3b0   :  { %v1007_v46 = vsub.f32 1.0, %v5533_v41  ;;  %v1009_v58 = vmul.f32 %v5533_v41, %v6299_v2 }
 0x3b1   :  { %v1005_v38 = vadd.f32 %v1004_v35, %v6229_v52 }
 0x3b3   :  { %5534 = vtanh.f32 %v1005_v38 }
 0x3bd   :  { %v5535_v49 = vpop.eup %5534 }
 0x3be   :  { %v1008_v57 = vmul.f32 %v5535_v49, %v1007_v46 }
 0x3c0   :  { %v6343_v59 = vadd.f32 %v1009_v58, %v1008_v57 }
 0x3c2   :  { %1077 = vmatmul.mubr.f32.vlgmr.msra.gmra.mrb[6].mxu0 %v6343_v59  ;;  %3963 = vmatmul.mubr.f32.vlgmr.msra.gmra.mrb[14].mxu1 %v6343_v59 }
 0x3c3   :  { %4664 = vmatpush1.bf16.msra.mxu0 %v6057_v15  ;;  %4695 = vmatpush3.bf16.msra.mxu1 %v6085_v40 }
 0x3c4   :  { %4666 = vmatprep.subr.bf16.mxu0 %v6060_v16  ;;  %4696 = vmatprep.subr.bf16.mxu1 %v5863_v48 }
 0x3c5   :  { %1239 = vmatprep.mubr.f32.mxu0 %v5862_v0  ;;  %3997 = vmatprep.mubr.msk.f32.mxu1 %vm5864_vm1, %v5862_v0 }
 0x3c7   :  { %4668 = vmatpush1.bf16.msra.mxu0 %v6068_v22  ;;  %4698 = vmatpush3.bf16.msra.mxu1 %v6101_v51 }
 0x3c8   :  { %4670 = vmatprep.subr.bf16.mxu0 %v6071_v23  ;;  %4699 = vmatprep.subr.bf16.mxu1 %v5863_v48 }
 0x3cb   :  { %4672 = vmatpush1.bf16.msra.mxu0 %v6079_v31  ;;  %4701 = vmatpush3.bf16.msra.mxu1 %v6117_v61 }
 0x3cc   :  { %4674 = vmatprep.subr.bf16.mxu0 %v6082_v33  ;;  %4702 = vmatprep.subr.bf16.mxu1 %v5863_v48 }
 0x3cf   :  { %4676 = vmatpush1.bf16.msra.mxu0 %v6092_v42  ;;  %4704 = vmatpush3.bf16.msra.mxu1 %v6133_v8 }
 0x3d0   :  { %4678 = vmatprep.subr.bf16.mxu0 %v6095_v45  ;;  %4705 = vmatprep.subr.bf16.mxu1 %v5863_v48 }
 0x3d3   :  { %4680 = vmatpush1.bf16.msra.mxu0 %v6108_v53  ;;  %4707 = vmatpush3.bf16.msra.mxu1 %v6149_v19 }
 0x3d4   :  { %4682 = vmatprep.subr.bf16.mxu0 %v6111_v56  ;;  %4708 = vmatprep.subr.bf16.mxu1 %v5863_v48 }
 0x3d7   :  { %4684 = vmatpush1.bf16.msra.mxu0 %v6124_v63  ;;  %4710 = vmatpush3.bf16.msra.mxu1 %v6163_v26 }
 0x3d8   :  { %4686 = vmatprep.subr.bf16.mxu0 %v6127_v3  ;;  %4711 = vmatprep.subr.bf16.mxu1 %v5863_v48 }
 0x3db   :  { %4688 = vmatpush1.bf16.msra.mxu0 %v6140_v10  ;;  %4713 = vmatpush3.bf16.msra.mxu1 %v6173_v29 }
 0x3dc   :  { %4690 = vmatprep.subr.bf16.mxu0 %v6143_v14  ;;  %4714 = vmatprep.subr.bf16.mxu1 %v5863_v48 }
 0x3df   :  { %4692 = vmatpush1.bf16.msra.mxu0 %v6156_v21  ;;  %4716 = vmatpush3.bf16.msra.mxu1 %v6182_v34 }
 0x3e0   :  { %4718 = vmatprep.subr.bf16.mxu0 %v6055_v12  ;;  %4749 = vmatprep.subr.bf16.mxu1 %v5863_v48 }
 0x495   :  { %v1078_v52 = vpop.f32.mrb[6].mxu0  ;;  %v1149_v60 = vpop.f32.mrb[14].mxu1 }
 0x496   :  { %v5410_v62 = vadd.f32 %v6239_v4, %v1078_v52  ;;  %v1080_v43 = vpop.f32.mrb[7].mxu0  ;;  %v3964_v6 = vpop.f32.mrb[15].mxu1  ;;  %v1150_v25 = vadd.f32 %v1149_v60, %v6252_v36 }
 0x497   :  { %v5412_v39 = vadd.f32 %v6243_v9, %v1080_v43 }
 0x498   :  { %v3476_v7 = vmul.f32 -1.442695, %v5410_v62 }
 0x499   :  { %v3477_v44 = vmul.f32 -1.442695, %v5412_v39 }
 0x49a   :  { %5536 = vpow2.f32 %v3476_v7 }
 0x49b   :  { %5538 = vpow2.f32 %v3477_v44 }
 0x4a4   :  { %v5537_v54 = vpop.eup %5536 }
 0x4a5   :  { %v1157_v17 = vadd.f32 1.0, %v5537_v54  ;;  %v5539_v18 = vpop.eup %5538 }
 0x4a6   :  { %v1164_v24 = vadd.f32 1.0, %v5539_v18 }
 0x4a7   :  { %5540 = vrcp.f32 %v1157_v17 }
 0x4a8   :  { %5542 = vrcp.f32 %v1164_v24 }
 0x4b1   :  { %v5541_v27 = vpop.eup %5540 }
 0x4b2   :  { %v1167_v28 = vmul.f32 %v5541_v27, %v1150_v25  ;;  %v5543_v32 = vpop.eup %5542 }
 0x4b3   :  { %v1170_v35 = vsub.f32 1.0, %v5543_v32  ;;  %v1172_v46 = vmul.f32 %v5543_v32, %v6343_v59 }
 0x4b4   :  { %v1168_v30 = vadd.f32 %v1167_v28, %v6225_v47 }
 0x4b6   :  { %5544 = vtanh.f32 %v1168_v30 }
 0x4c0   :  { %v5545_v38 = vpop.eup %5544 }
 0x4c1   :  { %v1171_v41 = vmul.f32 %v5545_v38, %v1170_v35 }
 0x4c3   :  { %v6387_v49 = vadd.f32 %v1172_v46, %v1171_v41 }
 0x4c5   :  { %1240 = vmatmul.mubr.f32.vlgmr.msra.gmra.mrb[8].mxu0 %v6387_v49  ;;  %3998 = vmatmul.mubr.f32.vlgmr.msra.gmra.mrb[16].mxu1 %v6387_v49 }
 0x4c6   :  { %4720 = vmatpush1.bf16.msra.mxu0 %v6057_v15  ;;  %4751 = vmatpush3.bf16.msra.mxu1 %v6085_v40 }
 0x4c7   :  { %4722 = vmatprep.subr.bf16.mxu0 %v6060_v16  ;;  %4752 = vmatprep.subr.bf16.mxu1 %v5863_v48 }
 0x4c8   :  { %1402 = vmatprep.mubr.f32.mxu0 %v5862_v0  ;;  %4032 = vmatprep.mubr.msk.f32.mxu1 %vm5864_vm1, %v5862_v0 }
 0x4ca   :  { %4724 = vmatpush1.bf16.msra.mxu0 %v6068_v22  ;;  %4754 = vmatpush3.bf16.msra.mxu1 %v6101_v51 }
 0x4cb   :  { %4726 = vmatprep.subr.bf16.mxu0 %v6071_v23  ;;  %4755 = vmatprep.subr.bf16.mxu1 %v5863_v48 }
 0x4ce   :  { %4728 = vmatpush1.bf16.msra.mxu0 %v6079_v31  ;;  %4757 = vmatpush3.bf16.msra.mxu1 %v6117_v61 }
 0x4cf   :  { %4730 = vmatprep.subr.bf16.mxu0 %v6082_v33  ;;  %4758 = vmatprep.subr.bf16.mxu1 %v5863_v48 }
 0x4d2   :  { %4732 = vmatpush1.bf16.msra.mxu0 %v6092_v42  ;;  %4760 = vmatpush3.bf16.msra.mxu1 %v6133_v8 }
 0x4d3   :  { %4734 = vmatprep.subr.bf16.mxu0 %v6095_v45  ;;  %4761 = vmatprep.subr.bf16.mxu1 %v5863_v48 }
 0x4d6   :  { %4736 = vmatpush1.bf16.msra.mxu0 %v6108_v53  ;;  %4763 = vmatpush3.bf16.msra.mxu1 %v6149_v19 }
 0x4d7   :  { %4738 = vmatprep.subr.bf16.mxu0 %v6111_v56  ;;  %4764 = vmatprep.subr.bf16.mxu1 %v5863_v48 }
 0x4da   :  { %4740 = vmatpush1.bf16.msra.mxu0 %v6124_v63  ;;  %4766 = vmatpush3.bf16.msra.mxu1 %v6163_v26 }
 0x4db   :  { %4742 = vmatprep.subr.bf16.mxu0 %v6127_v3  ;;  %4767 = vmatprep.subr.bf16.mxu1 %v5863_v48 }
 0x4de   :  { %4744 = vmatpush1.bf16.msra.mxu0 %v6140_v10  ;;  %4769 = vmatpush3.bf16.msra.mxu1 %v6173_v29 }
 0x4df   :  { %4746 = vmatprep.subr.bf16.mxu0 %v6143_v14  ;;  %4770 = vmatprep.subr.bf16.mxu1 %v5863_v48 }
 0x4e2   :  { %4748 = vmatpush1.bf16.msra.mxu0 %v6156_v21  ;;  %4772 = vmatpush3.bf16.msra.mxu1 %v6182_v34 }
 0x4e3   :  { %4774 = vmatprep.subr.bf16.mxu0 %v6055_v12  ;;  %4805 = vmatprep.subr.bf16.mxu1 %v5863_v48 }
 0x598   :  { %v1241_v47 = vpop.f32.mrb[8].mxu0  ;;  %v1312_v57 = vpop.f32.mrb[16].mxu1 }
 0x599   :  { %v5414_v58 = vadd.f32 %v6239_v4, %v1241_v47  ;;  %v1243_v52 = vpop.f32.mrb[9].mxu0  ;;  %v3999_v60 = vpop.f32.mrb[17].mxu1  ;;  %v1313_v17 = vadd.f32 %v1312_v57, %v6252_v36 }
 0x59a   :  { %v5416_v43 = vadd.f32 %v6243_v9, %v1243_v52 }
 0x59b   :  { %v3478_v62 = vmul.f32 -1.442695, %v5414_v58 }
 0x59c   :  { %v3479_v6 = vmul.f32 -1.442695, %v5416_v43 }
 0x59d   :  { %5546 = vpow2.f32 %v3478_v62 }
 0x59e   :  { %5548 = vpow2.f32 %v3479_v6 }
 0x5a7   :  { %v5547_v7 = vpop.eup %5546 }
 0x5a8   :  { %v1320_v39 = vadd.f32 1.0, %v5547_v7  ;;  %v5549_v44 = vpop.eup %5548 }
 0x5a9   :  { %v1327_v54 = vadd.f32 1.0, %v5549_v44 }
 0x5aa   :  { %5550 = vrcp.f32 %v1320_v39 }
 0x5ab   :  { %5552 = vrcp.f32 %v1327_v54 }
 0x5b4   :  { %v5551_v18 = vpop.eup %5550 }
 0x5b5   :  { %v1330_v24 = vmul.f32 %v5551_v18, %v1313_v17  ;;  %v5553_v27 = vpop.eup %5552 }
 0x5b6   :  { %v1333_v28 = vsub.f32 1.0, %v5553_v27  ;;  %v1335_v35 = vmul.f32 %v5553_v27, %v6387_v49 }
 0x5b7   :  { %v1331_v25 = vadd.f32 %v1330_v24, %v6241_v5 }
 0x5b9   :  { %5554 = vtanh.f32 %v1331_v25 }
 0x5c3   :  { %v5555_v30 = vpop.eup %5554 }
 0x5c4   :  { %v1334_v32 = vmul.f32 %v5555_v30, %v1333_v28  ;;  %v1835_v30 = vld [vmem:[#allocation10] sm:$0xff] }
 0x5c6   :  { %v6431_v38 = vadd.f32 %v1335_v35, %v1334_v32  ;;  %v1838_v32 = vld [vmem:[#allocation10 + $0x18] sm:$0xff] }
 0x5c8   :  { %1403 = vmatmul.mubr.f32.vlgmr.msra.gmra.mrb[10].mxu0 %v6431_v38  ;;  %4033 = vmatmul.mubr.f32.vlgmr.msra.gmra.mrb[18].mxu1 %v6431_v38 }
 0x5c9   :  { %4776 = vmatpush1.bf16.msra.mxu0 %v6057_v15  ;;  %4807 = vmatpush3.bf16.msra.mxu1 %v6085_v40 }
 0x5ca   :  { %4778 = vmatprep.subr.bf16.mxu0 %v6060_v16  ;;  %4808 = vmatprep.subr.bf16.mxu1 %v5863_v48 }
 0x5cb   :  { %1565 = vmatprep.mubr.f32.mxu0 %v5862_v0  ;;  %4067 = vmatprep.mubr.msk.f32.mxu1 %vm5864_vm1, %v5862_v0 }
 0x5cd   :  { %4780 = vmatpush1.bf16.msra.mxu0 %v6068_v22  ;;  %4810 = vmatpush3.bf16.msra.mxu1 %v6101_v51 }
 0x5ce   :  { %4782 = vmatprep.subr.bf16.mxu0 %v6071_v23  ;;  %4811 = vmatprep.subr.bf16.mxu1 %v5863_v48 }
 0x5d1   :  { %4784 = vmatpush1.bf16.msra.mxu0 %v6079_v31  ;;  %4813 = vmatpush3.bf16.msra.mxu1 %v6117_v61 }
 0x5d2   :  { %4786 = vmatprep.subr.bf16.mxu0 %v6082_v33  ;;  %4814 = vmatprep.subr.bf16.mxu1 %v5863_v48 }
 0x5d5   :  { %4788 = vmatpush1.bf16.msra.mxu0 %v6092_v42  ;;  %4816 = vmatpush3.bf16.msra.mxu1 %v6133_v8 }
 0x5d6   :  { %4790 = vmatprep.subr.bf16.mxu0 %v6095_v45  ;;  %4817 = vmatprep.subr.bf16.mxu1 %v5863_v48 }
 0x5d9   :  { %4792 = vmatpush1.bf16.msra.mxu0 %v6108_v53  ;;  %4819 = vmatpush3.bf16.msra.mxu1 %v6149_v19 }
 0x5da   :  { %4794 = vmatprep.subr.bf16.mxu0 %v6111_v56  ;;  %4820 = vmatprep.subr.bf16.mxu1 %v5863_v48 }
 0x5dd   :  { %4796 = vmatpush1.bf16.msra.mxu0 %v6124_v63  ;;  %4822 = vmatpush3.bf16.msra.mxu1 %v6163_v26 }
 0x5de   :  { %4798 = vmatprep.subr.bf16.mxu0 %v6127_v3  ;;  %4823 = vmatprep.subr.bf16.mxu1 %v5863_v48 }
 0x5e1   :  { %4800 = vmatpush1.bf16.msra.mxu0 %v6140_v10  ;;  %4825 = vmatpush3.bf16.msra.mxu1 %v6173_v29 }
 0x5e2   :  { %4802 = vmatprep.subr.bf16.mxu0 %v6143_v14  ;;  %4826 = vmatprep.subr.bf16.mxu1 %v5863_v48 }
 0x5e5   :  { %4804 = vmatpush1.bf16.msra.mxu0 %v6156_v21  ;;  %4828 = vmatpush3.bf16.msra.mxu1 %v6182_v34 }
 0x5e6   :  { %4830 = vmatprep.subr.bf16.mxu0 %v6055_v12  ;;  %4861 = vmatprep.subr.bf16.mxu1 %v5863_v48 }
 0x69b   :  { %v1404_v5 = vpop.f32.mrb[10].mxu0  ;;  %v1475_v41 = vpop.f32.mrb[18].mxu1 }
 0x69c   :  { %v5418_v46 = vadd.f32 %v6239_v4, %v1404_v5  ;;  %v1406_v47 = vpop.f32.mrb[11].mxu0  ;;  %v4034_v57 = vpop.f32.mrb[19].mxu1  ;;  %v1476_v12 = vadd.f32 %v1475_v41, %v6252_v36  ;;  %v1842_v5 = vld [vmem:[#allocation10 + $0x38] sm:$0xff]  ;;  %v1845_v41 = vld [vmem:[#allocation10 + $0x50] sm:$0xff] }
 0x69d   :  { %v5420_v52 = vadd.f32 %v6243_v9, %v1406_v47  ;;  %v1843_v57 = vld [vmem:[#allocation10 + $0x40] sm:$0xff] }
 0x69e   :  { %v3480_v58 = vmul.f32 -1.442695, %v5418_v46 }
 0x69f   :  { %v3481_v60 = vmul.f32 -1.442695, %v5420_v52  ;;  %v4887_v52 = vpack.c.bf16 %v1838_v32, %v1835_v30  ;;  %v1865_v30 = vld [vmem:[#allocation10 + $0xf0] sm:$0xff]  ;;  %v1868_v32 = vld [vmem:[#allocation10 + $0x108] sm:$0xff] }
 0x6a0   :  { %5556 = vpow2.f32 %v3480_v58  ;;  %v1846_v58 = vld [vmem:[#allocation10 + $0x58] sm:$0xff] }
 0x6a1   :  { %5558 = vpow2.f32 %v3481_v60 }
 0x6aa   :  { %v5557_v62 = vpop.eup %5556 }
 0x6ab   :  { %v1483_v43 = vadd.f32 1.0, %v5557_v62  ;;  %v5559_v6 = vpop.eup %5558  ;;  %v4889_v62 = vpack.c.bf16 %v1845_v41, %v1842_v5  ;;  %v1875_v5 = vld [vmem:[#allocation10 + $0x140] sm:$0xff]  ;;  %v1873_v41 = vld [vmem:[#allocation10 + $0x130] sm:$0xff] }
 0x6ac   :  { %v1490_v7 = vadd.f32 1.0, %v5559_v6  ;;  %v1844_v6 = vld [vmem:[#allocation10 + $0x48] sm:$0xff] }
 0x6ad   :  { %5560 = vrcp.f32 %v1483_v43  ;;  %v1841_v43 = vld [vmem:[#allocation10 + $0x30] sm:$0xff] }
 0x6ae   :  { %5562 = vrcp.f32 %v1490_v7  ;;  %v4921_v7 = vpack.c.bf16 %v1846_v58, %v1843_v57 }
 0x6b7   :  { %v5561_v39 = vpop.eup %5560 }
 0x6b8   :  { %v1493_v44 = vmul.f32 %v5561_v39, %v1476_v12  ;;  %v5563_v17 = vpop.eup %5562  ;;  %v1851_v12 = vld [vmem:[#allocation10 + $0x80] sm:$0xff]  ;;  %v1849_v39 = vld [vmem:[#allocation10 + $0x70] sm:$0xff] }
 0x6b9   :  { %v1496_v18 = vsub.f32 1.0, %v5563_v17  ;;  %v1498_v27 = vmul.f32 %v5563_v17, %v6431_v38 }
 0x6ba   :  { %v1494_v54 = vadd.f32 %v1493_v44, %v6237_v1  ;;  %v1852_v44 = vld [vmem:[#allocation10 + $0x88] sm:$0xff] }
 0x6bc   :  { %5564 = vtanh.f32 %v1494_v54  ;;  %v4891_v54 = vpack.c.bf16 %v1844_v6, %v1841_v43  ;;  %v1878_v43 = vld [vmem:[#allocation10 + $0x158] sm:$0xff]  ;;  %v1881_v6 = vld [vmem:[#allocation10 + $0x170] sm:$0xff] }
 0x6c6   :  { %v5565_v24 = vpop.eup %5564 }
 0x6c7   :  { %v1497_v25 = vmul.f32 %v5565_v24, %v1496_v18  ;;  %v4925_v18 = vpack.c.bf16 %v1852_v44, %v1849_v39  ;;  %v1847_v24 = vld [vmem:[#allocation10 + $0x60] sm:$0xff]  ;;  %v4913_v39 = vpack.c.bf16 %v1881_v6, %v1878_v43  ;;  %v227_v6 = vld [vmem:[#allocation11 + $0x158] sm:$0xff] }
 0x6c9   :  { %v6475_v28 = vadd.f32 %v1498_v27, %v1497_v25  ;;  %v1850_v25 = vld [vmem:[#allocation10 + $0x78] sm:$0xff] }
 0x6ca   :  { %v1854_v27 = vld [vmem:[#allocation10 + $0x98] sm:$0xff] }
 0x6cb   :  { %1566 = vmatmul.mubr.f32.vlgmr.msra.gmra.mrb[12].mxu0 %v6475_v28  ;;  %4068 = vmatmul.mubr.f32.vlgmr.msra.gmra.mrb[20].mxu1 %v6475_v28 }
 0x6cc   :  { %4832 = vmatpush1.bf16.msra.mxu0 %v6057_v15  ;;  %4863 = vmatpush3.bf16.msra.mxu1 %v6085_v40  ;;  %v1836_v15 = vld [vmem:[#allocation10 + $0x8] sm:$0xff] }
 0x6cd   :  { %4834 = vmatprep.subr.bf16.mxu0 %v6060_v16  ;;  %4864 = vmatprep.subr.bf16.mxu1 %v5863_v48  ;;  %v1839_v16 = vld [vmem:[#allocation10 + $0x20] sm:$0xff] }
 0x6ce   :  { %1728 = vmatprep.mubr.f32.mxu0 %v5862_v0  ;;  %4102 = vmatprep.mubr.msk.f32.mxu1 %vm5864_vm1, %v5862_v0 }
 0x6d0   :  { %4836 = vmatpush1.bf16.msra.mxu0 %v6068_v22  ;;  %4866 = vmatpush3.bf16.msra.mxu1 %v6101_v51  ;;  %v1837_v22 = vld [vmem:[#allocation10 + $0x10] sm:$0xff] }
 0x6d1   :  { %4838 = vmatprep.subr.bf16.mxu0 %v6071_v23  ;;  %4867 = vmatprep.subr.bf16.mxu1 %v5863_v48  ;;  %v4885_v23 = vpack.c.bf16 %v1839_v16, %v1836_v15  ;;  %v1857_v15 = vld [vmem:[#allocation10 + $0xb0] sm:$0xff]  ;;  %v1855_v16 = vld [vmem:[#allocation10 + $0xa0] sm:$0xff] }
 0x6d4   :  { %4840 = vmatpush1.bf16.msra.mxu0 %v6079_v31  ;;  %4869 = vmatpush3.bf16.msra.mxu1 %v6117_v61  ;;  %v1840_v31 = vld [vmem:[#allocation10 + $0x28] sm:$0xff] }
 0x6d5   :  { %4842 = vmatprep.subr.bf16.mxu0 %v6082_v33  ;;  %4870 = vmatprep.subr.bf16.mxu1 %v5863_v48  ;;  %v4917_v33 = vpack.c.bf16 %v1840_v31, %v1837_v22  ;;  %v1858_v22 = vld [vmem:[#allocation10 + $0xb8] sm:$0xff]  ;;  %v4897_v31 = vpack.c.bf16 %v1857_v15, %v1854_v27  ;;  %v190_v15 = vld [vmem:[#allocation11 + $0x30] sm:$0xff] }
 0x6d8   :  { %4844 = vmatpush1.bf16.msra.mxu0 %v6092_v42  ;;  %4872 = vmatpush3.bf16.msra.mxu1 %v6133_v8 }
 0x6d9   :  { %4846 = vmatprep.subr.bf16.mxu0 %v6095_v45  ;;  %4873 = vmatprep.subr.bf16.mxu1 %v5863_v48 }
 0x6dc   :  { %4848 = vmatpush1.bf16.msra.mxu0 %v6108_v53  ;;  %4875 = vmatpush3.bf16.msra.mxu1 %v6149_v19 }
 0x6dd   :  { %4850 = vmatprep.subr.bf16.mxu0 %v6111_v56  ;;  %4876 = vmatprep.subr.bf16.mxu1 %v5863_v48 }
 0x6e0   :  { %4852 = vmatpush1.bf16.msra.mxu0 %v6124_v63  ;;  %4878 = vmatpush3.bf16.msra.mxu1 %v6163_v26 }
 0x6e1   :  { %4854 = vmatprep.subr.bf16.mxu0 %v6127_v3  ;;  %4879 = vmatprep.subr.bf16.mxu1 %v5863_v48 }
 0x6e4   :  { %4856 = vmatpush1.bf16.msra.mxu0 %v6140_v10  ;;  %4881 = vmatpush3.bf16.msra.mxu1 %v6173_v29 }
 0x6e5   :  { %4858 = vmatprep.subr.bf16.mxu0 %v6143_v14  ;;  %4882 = vmatprep.subr.bf16.mxu1 %v5863_v48 }
 0x6e8   :  { %4860 = vmatpush1.bf16.msra.mxu0 %v6156_v21  ;;  %4884 = vmatpush3.bf16.msra.mxu1 %v6182_v34 }
 0x6e9   :  { %4886 = vmatprep.subr.bf16.mxu0 %v4885_v23  ;;  %4918 = vmatprep.subr.bf16.mxu1 %v4917_v33  ;;  %v4895_v23 = vpack.c.bf16 %v1850_v25, %v1847_v24  ;;  %v184_v24 = vld [vmem:[#allocation11] sm:$0xff] }
 0x79e   :  { %v1567_v40 = vpop.f32.mrb[12].mxu0  ;;  %v1638_v42 = vpop.f32.mrb[20].mxu1 }
 0x79f   :  { %v5422_v45 = vadd.f32 %v6239_v4, %v1567_v40  ;;  %v1569_v51 = vpop.f32.mrb[13].mxu0  ;;  %v4069_v53 = vpop.f32.mrb[21].mxu1  ;;  %v1639_v19 = vadd.f32 %v1638_v42, %v6252_v36  ;;  %v1853_v40 = vld [vmem:[#allocation10 + $0x90] sm:$0xff]  ;;  %v1856_v42 = vld [vmem:[#allocation10 + $0xa8] sm:$0xff] }
 0x7a0   :  { %v5424_v61 = vadd.f32 %v6243_v9, %v1569_v51  ;;  %v1863_v51 = vld [vmem:[#allocation10 + $0xe0] sm:$0xff]  ;;  %v1861_v53 = vld [vmem:[#allocation10 + $0xd0] sm:$0xff] }
 0x7a1   :  { %v3482_v56 = vmul.f32 -1.442695, %v5422_v45  ;;  %v1860_v45 = vld [vmem:[#allocation10 + $0xc8] sm:$0xff] }
 0x7a2   :  { %v3483_v63 = vmul.f32 -1.442695, %v5424_v61  ;;  %v4899_v61 = vpack.c.bf16 %v1856_v42, %v1853_v40  ;;  %v196_v40 = vld [vmem:[#allocation11 + $0x60] sm:$0xff]  ;;  %v199_v42 = vld [vmem:[#allocation11 + $0x78] sm:$0xff] }
 0x7a3   :  { %5566 = vpow2.f32 %v3482_v56  ;;  %v1864_v56 = vld [vmem:[#allocation10 + $0xe8] sm:$0xff] }
 0x7a4   :  { %5568 = vpow2.f32 %v3483_v63  ;;  %v4901_v63 = vpack.c.bf16 %v1863_v51, %v1860_v45  ;;  %v6558_v45 = vpack.c.bf16 %v199_v42, %v196_v40  ;;  %v203_v51 = vld [vmem:[#allocation11 + $0x98] sm:$0xff] }
 0x7a5   :  { %v219_v40 = vld [vmem:[#allocation11 + $0x118] sm:$0xff] }
 0x7ad   :  { %v5567_v3 = vpop.eup %5566 }
 0x7ae   :  { %v1646_v8 = vadd.f32 1.0, %v5567_v3  ;;  %v5569_v10 = vpop.eup %5568  ;;  %v4933_v3 = vpack.c.bf16 %v1864_v56, %v1861_v53  ;;  %v206_v53 = vld [vmem:[#allocation11 + $0xb0] sm:$0xff] }
 0x7af   :  { %v1653_v14 = vadd.f32 1.0, %v5569_v10  ;;  %v1862_v10 = vld [vmem:[#allocation10 + $0xd8] sm:$0xff]  ;;  %v6562_v56 = vpack.c.bf16 %v206_v53, %v203_v51  ;;  %v222_v51 = vld [vmem:[#allocation11 + $0x130] sm:$0xff]  ;;  %v225_v53 = vld [vmem:[#allocation11 + $0x148] sm:$0xff] }
 0x7b0   :  { %5570 = vrcp.f32 %v1646_v8  ;;  %v1859_v8 = vld [vmem:[#allocation10 + $0xc0] sm:$0xff] }
 0x7b1   :  { %5572 = vrcp.f32 %v1653_v14  ;;  %v1866_v14 = vld [vmem:[#allocation10 + $0xf8] sm:$0xff] }
 0x7ba   :  { %v5571_v21 = vpop.eup %5570 }
 0x7bb   :  { %v1656_v26 = vmul.f32 %v5571_v21, %v1639_v19  ;;  %v5573_v34 = vpop.eup %5572  ;;  %v1869_v19 = vld [vmem:[#allocation10 + $0x110] sm:$0xff]  ;;  %v1867_v21 = vld [vmem:[#allocation10 + $0x100] sm:$0xff] }
 0x7bc   :  { %v1659_v1 = vsub.f32 1.0, %v5573_v34  ;;  %v1661_v47 = vmul.f32 %v5573_v34, %v6475_v28  ;;  %v4905_v34 = vpack.c.bf16 %v1869_v19, %v1866_v14  ;;  %v208_v19 = vld [vmem:[#allocation11 + $0xc0] sm:$0xff] }
 0x7bd   :  { %v1657_v29 = vadd.f32 %v1656_v26, %v6248_v20  ;;  %v1848_v20 = vld [vmem:[#allocation10 + $0x68] sm:$0xff]  ;;  %v1870_v26 = vld [vmem:[#allocation10 + $0x118] sm:$0xff] }
 0x7be   :  { %v4893_v17 = vpack.c.bf16 %v1851_v12, %v1848_v20  ;;  %v1879_v20 = vld [vmem:[#allocation10 + $0x160] sm:$0xff] }
 0x7bf   :  { %5574 = vtanh.f32 %v1657_v29  ;;  %v4903_v29 = vpack.c.bf16 %v1862_v10, %v1859_v8  ;;  %v209_v8 = vld [vmem:[#allocation11 + $0xc8] sm:$0xff]  ;;  %v212_v10 = vld [vmem:[#allocation11 + $0xe0] sm:$0xff] }
 0x7c0   :  { %v6568_v14 = vpack.c.bf16 %v212_v10, %v209_v8  ;;  %v231_v8 = vld [vmem:[#allocation11 + $0x178] sm:$0xff] }
 0x7c9   :  { %v5575_v35 = vpop.eup %5574 }
 0x7ca   :  { %v1660_v46 = vmul.f32 %v5575_v35, %v1659_v1  ;;  %v4937_v1 = vpack.c.bf16 %v1870_v26, %v1867_v21  ;;  %v1872_v35 = vld [vmem:[#allocation10 + $0x128] sm:$0xff]  ;;  %v211_v21 = vld [vmem:[#allocation11 + $0xd8] sm:$0xff] }
 0x7cb   :  { %v4909_v57 = vpack.c.bf16 %v1875_v5, %v1872_v35  ;;  %v6570_v26 = vpack.c.bf16 %v211_v21, %v208_v19  ;;  %v221_v5 = vld [vmem:[#allocation11 + $0x128] sm:$0xff] }
 0x7cc   :  { %v6517_v60 = vadd.f32 %v1661_v47, %v1660_v46  ;;  %v1876_v46 = vld [vmem:[#allocation10 + $0x148] sm:$0xff]  ;;  %v4907_v47 = vpack.c.bf16 %v1868_v32, %v1865_v30  ;;  %v214_v30 = vld [vmem:[#allocation11 + $0xf0] sm:$0xff] }
 0x7cd   :  { %v4941_v58 = vpack.c.bf16 %v1876_v46, %v1873_v41  ;;  %v217_v32 = vld [vmem:[#allocation11 + $0x108] sm:$0xff]  ;;  %v224_v41 = vld [vmem:[#allocation11 + $0x140] sm:$0xff] }
 0x7ce   :  { %1729 = vmatmul.mubr.f32.vlgmr.msra.gmra.mrb[14].mxu0 %v6517_v60  ;;  %4103 = vmatmul.mubr.f32.vlgmr.msra.gmra.mrb[22].mxu1 %v6517_v60  ;;  %v6576_v35 = vpack.c.bf16 %v217_v32, %v214_v30  ;;  %v220_v46 = vld [vmem:[#allocation11 + $0x120] sm:$0xff] }
 0x7cf   :  { %4888 = vmatpush1.bf16.msra.mxu0 %v4887_v52  ;;  %4920 = vmatpush3.bf16.msra.mxu1 %v4917_v33  ;;  %v4929_v33 = vpack.c.bf16 %v1858_v22, %v1855_v16  ;;  %v1871_v52 = vld [vmem:[#allocation10 + $0x120] sm:$0xff]  ;;  %v193_v16 = vld [vmem:[#allocation11 + $0x48] sm:$0xff] }
 0x7d0   :  { %4137 = vmatprep.mubr.f32.mxu1 %v6255_v13  ;;  %4890 = vmatprep.subr.bf16.mxu0 %v4889_v62  ;;  %v1874_v62 = vld [vmem:[#allocation10 + $0x138] sm:$0xff]  ;;  %v6552_v22 = vpack.c.bf16 %v193_v16, %v190_v15  ;;  %v210_v15 = vld [vmem:[#allocation11 + $0xd0] sm:$0xff]  ;;  %v213_v16 = vld [vmem:[#allocation11 + $0xe8] sm:$0xff] }
 0x7d1   :  { %4922 = vmatprep.subr.bf16.mxu1 %v4921_v7  ;;  %1964 = vmatprep.mubr.f32.mxu0 %v5862_v0  ;;  %v4911_v12 = vpack.c.bf16 %v1874_v62, %v1871_v52  ;;  %v189_v52 = vld [vmem:[#allocation11 + $0x28] sm:$0xff] }
 0x7d3   :  { %4892 = vmatpush1.bf16.msra.mxu0 %v4891_v54  ;;  %4924 = vmatpush3.bf16.msra.mxu1 %v4921_v7  ;;  %v1882_v7 = vld [vmem:[#allocation10 + $0x178] sm:$0xff]  ;;  %v1877_v54 = vld [vmem:[#allocation10 + $0x150] sm:$0xff] }
 0x7d4   :  { %4894 = vmatprep.subr.bf16.mxu0 %v4893_v17  ;;  %4926 = vmatprep.subr.bf16.mxu1 %v4925_v18  ;;  %v4945_v44 = vpack.c.bf16 %v1882_v7, %v1879_v20  ;;  %v1880_v17 = vld [vmem:[#allocation10 + $0x168] sm:$0xff]  ;;  %v230_v20 = vld [vmem:[#allocation11 + $0x170] sm:$0xff] }
 0x7d5   :  { %v6589_v7 = vpack.c.bf16 %v230_v20, %v227_v6 }
 0x7d7   :  { %4896 = vmatpush1.bf16.msra.mxu0 %v4895_v23  ;;  %4928 = vmatpush3.bf16.msra.mxu1 %v4925_v18  ;;  %v4915_v18 = vpack.c.bf16 %v1880_v17, %v1877_v54  ;;  %v197_v23 = vld [vmem:[#allocation11 + $0x68] sm:$0xff]  ;;  %v192_v54 = vld [vmem:[#allocation11 + $0x40] sm:$0xff]  ;;  %v195_v17 = vld [vmem:[#allocation11 + $0x58] sm:$0xff] }
 0x7d8   :  { %4898 = vmatprep.subr.bf16.mxu0 %v4897_v31  ;;  %4930 = vmatprep.subr.bf16.mxu1 %v4929_v33  ;;  %v200_v31 = vld [vmem:[#allocation11 + $0x80] sm:$0xff] }
 0x7db   :  { %4900 = vmatpush1.bf16.msra.mxu0 %v4899_v61  ;;  %4932 = vmatpush3.bf16.msra.mxu1 %v4929_v33  ;;  %v6556_v33 = vpack.c.bf16 %v200_v31, %v197_v23  ;;  %v202_v61 = vld [vmem:[#allocation11 + $0x90] sm:$0xff]  ;;  %v6608_v23 = vpack.c.bf16 %v213_v16, %v210_v15  ;;  %v216_v31 = vld [vmem:[#allocation11 + $0x100] sm:$0xff] }
 0x7dc   :  { %4902 = vmatprep.subr.bf16.mxu0 %v4901_v63  ;;  %4934 = vmatprep.subr.bf16.mxu1 %v4933_v3  ;;  %v205_v63 = vld [vmem:[#allocation11 + $0xa8] sm:$0xff]  ;;  %v6612_v42 = vpack.c.bf16 %v219_v40, %v216_v31  ;;  %v1883_v31 = vld [vmem:[#allocation13] sm:$0x7] }
 0x7dd   :  { %v1888_v40 = vrot.slane %v1883_v31, %v6227_v50 }
 0x7df   :  { %4904 = vmatpush1.bf16.msra.mxu0 %v4903_v29  ;;  %4936 = vmatpush3.bf16.msra.mxu1 %v4933_v3  ;;  %v6564_v3 = vpack.c.bf16 %v205_v63, %v202_v61  ;;  %v215_v29 = vld [vmem:[#allocation11 + $0xf8] sm:$0xff]  ;;  %v6616_v61 = vpack.c.bf16 %v225_v53, %v222_v51  ;;  %v228_v63 = vld [vmem:[#allocation11 + $0x160] sm:$0xff] }
 0x7e0   :  { %4906 = vmatprep.subr.bf16.mxu0 %v4905_v34  ;;  %4938 = vmatprep.subr.bf16.mxu1 %v4937_v1  ;;  %v218_v34 = vld [vmem:[#allocation11 + $0x110] sm:$0xff]  ;;  %v6620_v10 = vpack.c.bf16 %v231_v8, %v228_v63  ;;  %v1892_v63 = vrot.slane %v1883_v31, %v6231_v55 }
 0x7e3   :  { %4908 = vmatpush1.bf16.msra.mxu0 %v4907_v47  ;;  %4940 = vmatpush3.bf16.msra.mxu1 %v4937_v1  ;;  %v6574_v1 = vpack.c.bf16 %v218_v34, %v215_v29  ;;  %v6580_v47 = vpack.c.bf16 %v224_v41, %v221_v5 }
 0x7e4   :  { %4910 = vmatprep.subr.bf16.mxu0 %v4909_v57  ;;  %4942 = vmatprep.subr.bf16.mxu1 %v4941_v58  ;;  %v223_v57 = vld [vmem:[#allocation11 + $0x138] sm:$0xff] }
 0x7e5   :  { %v6582_v62 = vpack.c.bf16 %v223_v57, %v220_v46 }
 0x7e7   :  { %4912 = vmatpush1.bf16.msra.mxu0 %v4911_v12  ;;  %4944 = vmatpush3.bf16.msra.mxu1 %v4941_v58  ;;  %v186_v58 = vld [vmem:[#allocation11 + $0x10] sm:$0xff] }
 0x7e8   :  { %4914 = vmatprep.subr.bf16.mxu0 %v4913_v39  ;;  %4946 = vmatprep.subr.bf16.mxu1 %v4945_v44  ;;  %v6584_v43 = vpack.c.bf16 %v189_v52, %v186_v58  ;;  %v226_v12 = vld [vmem:[#allocation11 + $0x150] sm:$0xff]  ;;  %v229_v39 = vld [vmem:[#allocation11 + $0x168] sm:$0xff] }
 0x7eb   :  { %4916 = vmatpush1.bf16.msra.mxu0 %v4915_v18  ;;  %4948 = vmatpush3.bf16.msra.mxu1 %v4945_v44  ;;  %v6592_v44 = vpack.c.bf16 %v229_v39, %v226_v12  ;;  %v6595_v18 = vpack.c.bf16 %v195_v17, %v192_v54 }
 0x7ec   :  { %4981 = vmatprep.subr.bf16.mxu1 %v5863_v48 }
 0x7ee   :  { %1965 = vmatmul.mubr.f32.vlgmr.msra.gmra.mrb[16].mxu0 %v6255_v13  ;;  %4138 = vmatmul.mubr.f32.vlgmr.msra.gmra.mrb[24].mxu1 %v6299_v2  ;;  %v185_v13 = vld [vmem:[#allocation11 + $0x8] sm:$0xff] }
 0x7ef   :  { %4140 = vmatprep.mubr.f32.mxu1 %v6343_v59  ;;  %1970 = vmatprep.mubr.f32.mxu0 %v5862_v0 }
 0x7f0   :  { %4983 = vmatpush3.bf16.msra.mxu1 %v6584_v43 }
 0x7f1   :  { %4984 = vmatprep.subr.bf16.mxu1 %v5863_v48 }
 0x7f2   :  { %1971 = vmatmul.mubr.f32.gmra.mrb[18].mxu0 %v6299_v2  ;;  %4141 = vmatmul.mubr.f32.gmra.mrb[26].mxu1 %v6387_v49  ;;  %v188_v2 = vld [vmem:[#allocation11 + $0x20] sm:$0xff] }
 0x7f3   :  { %4143 = vmatprep.mubr.f32.mxu1 %v6431_v38  ;;  %1976 = vmatprep.mubr.f32.mxu0 %v5862_v0 }
 0x7f4   :  { %4986 = vmatpush3.bf16.msra.mxu1 %v6595_v18 }
 0x7f5   :  { %4987 = vmatprep.subr.bf16.mxu1 %v5863_v48 }
 0x7f6   :  { %1977 = vmatmul.mubr.f32.gmra.mrb[20].mxu0 %v6343_v59  ;;  %4144 = vmatmul.mubr.f32.gmra.mrb[28].mxu1 %v6475_v28  ;;  %v6544_v59 = vpack.c.bf16 %v188_v2, %v185_v13  ;;  %v198_v13 = vld [vmem:[#allocation11 + $0x70] sm:$0xff]  ;;  %v201_v2 = vld [vmem:[#allocation11 + $0x88] sm:$0xff] }
 0x7f7   :  { %4146 = vmatprep.mubr.f32.mxu1 %v6517_v60  ;;  %1982 = vmatprep.mubr.f32.mxu0 %v5862_v0 }
 0x7f8   :  { %4950 = vmatprep.subr.bf16.mxu0 %v6544_v59 }
 0x7fa   :  { %1983 = vmatmul.mubr.f32.gmra.mrb[22].mxu0 %v6387_v49  ;;  %v187_v49 = vld [vmem:[#allocation11 + $0x18] sm:$0xff] }
 0x7fb   :  { %1988 = vmatprep.mubr.f32.mxu0 %v5862_v0  ;;  %v6546_v25 = vpack.c.bf16 %v187_v49, %v184_v24  ;;  %v204_v24 = vld [vmem:[#allocation11 + $0xa0] sm:$0xff]  ;;  %v6601_v49 = vpack.c.bf16 %v201_v2, %v198_v13 }
 0x7fd   :  { %4952 = vmatpush1.bf16.msra.mxu0 %v6546_v25  ;;  %4989 = vmatpush3.bf16.msra.mxu1 %v6601_v49 }
 0x7fe   :  { %1989 = vmatmul.mubr.f32.gmra.mrb[24].mxu0 %v6431_v38  ;;  %v191_v38 = vld [vmem:[#allocation11 + $0x38] sm:$0xff]  ;;  %4990 = vmatprep.subr.bf16.mxu1 %v5863_v48 }
 0x7ff   :  { %1994 = vmatprep.mubr.f32.mxu0 %v5862_v0 }
 0x802   :  { %1995 = vmatmul.mubr.f32.gmra.mrb[26].mxu0 %v6475_v28  ;;  %v194_v28 = vld [vmem:[#allocation11 + $0x50] sm:$0xff] }
 0x803   :  { %2000 = vmatprep.mubr.f32.mxu0 %v5862_v0  ;;  %v6550_v27 = vpack.c.bf16 %v194_v28, %v191_v38  ;;  %v207_v38 = vld [vmem:[#allocation11 + $0xb8] sm:$0xff] }
 0x804   :  { %v6604_v28 = vpack.c.bf16 %v207_v38, %v204_v24 }
 0x805   :  { %4954 = vmatprep.subr.bf16.mxu0 %v6550_v27 }
 0x806   :  { %2001 = vmatmul.mubr.f32.gmra.mrb[28].mxu0 %v6517_v60  ;;  %4992 = vmatpush3.bf16.msra.mxu1 %v6604_v28 }
 0x807   :  { %2006 = vmatprep.mubr.f32.mxu0 %v5862_v0  ;;  %4956 = vmatpush1.bf16.msra.mxu0 %v6552_v22 }
 0x808   :  { %4958 = vmatprep.subr.bf16.mxu0 %v6556_v33  ;;  %4993 = vmatprep.subr.bf16.mxu1 %v5863_v48 }
 0x80a   :  { %4995 = vmatpush3.bf16.msra.mxu1 %v6608_v23 }
 0x80b   :  { %4960 = vmatpush1.bf16.msra.mxu0 %v6558_v45  ;;  %4996 = vmatprep.subr.bf16.mxu1 %v5863_v48 }
 0x80c   :  { %4962 = vmatprep.subr.bf16.mxu0 %v6562_v56 }
 0x80e   :  { %4998 = vmatpush3.bf16.msra.mxu1 %v6612_v42 }
 0x80f   :  { %4964 = vmatpush1.bf16.msra.mxu0 %v6564_v3  ;;  %4999 = vmatprep.subr.bf16.mxu1 %v5863_v48 }
 0x810   :  { %4966 = vmatprep.subr.bf16.mxu0 %v6568_v14 }
 0x812   :  { %5001 = vmatpush3.bf16.msra.mxu1 %v6616_v61 }
 0x813   :  { %4968 = vmatpush1.bf16.msra.mxu0 %v6570_v26  ;;  %5002 = vmatprep.subr.bf16.mxu1 %v5863_v48 }
 0x814   :  { %4970 = vmatprep.subr.bf16.mxu0 %v6574_v1 }
 0x816   :  { %5004 = vmatpush3.bf16.msra.mxu1 %v6620_v10 }
 0x817   :  { %4972 = vmatpush1.bf16.msra.mxu0 %v6576_v35  ;;  %5037 = vmatprep.subr.bf16.mxu1 %v5863_v48 }
 0x818   :  { %4974 = vmatprep.subr.bf16.mxu0 %v6580_v47 }
 0x81b   :  { %4976 = vmatpush1.bf16.msra.mxu0 %v6582_v62 }
 0x81c   :  { %4978 = vmatprep.subr.bf16.mxu0 %v6589_v7 }
 0x81f   :  { %4980 = vmatpush1.bf16.msra.mxu0 %v6592_v44 }
 0x820   :  { %5006 = vmatprep.subr.bf16.mxu0 %v6544_v59 }
 0x8a1   :  { %v1730_v19 = vpop.f32.mrb[14].mxu0  ;;  %v1801_v21 = vpop.f32.mrb[22].mxu1 }
 0x8a2   :  { %v5426_v29 = vadd.f32 %v6239_v4, %v1730_v19  ;;  %v1732_v34 = vpop.f32.mrb[15].mxu0  ;;  %v4104_v30 = vpop.f32.mrb[23].mxu1  ;;  %v1802_v6 = vadd.f32 %v1801_v21, %v6252_v36 }
 0x8a3   :  { %v5428_v5 = vadd.f32 %v6243_v9, %v1732_v34 }
 0x8a4   :  { %v3484_v32 = vmul.f32 -1.442695, %v5426_v29 }
 0x8a5   :  { %v3485_v41 = vmul.f32 -1.442695, %v5428_v5 }
 0x8a6   :  { %5576 = vpow2.f32 %v3484_v32 }
 0x8a7   :  { %5578 = vpow2.f32 %v3485_v41 }
 0x8b0   :  { %v5577_v46 = vpop.eup %5576 }
 0x8b1   :  { %v1809_v57 = vadd.f32 1.0, %v5577_v46  ;;  %v5579_v58 = vpop.eup %5578 }
 0x8b2   :  { %v1816_v52 = vadd.f32 1.0, %v5579_v58 }
 0x8b3   :  { %5580 = vrcp.f32 %v1809_v57 }
 0x8b4   :  { %5582 = vrcp.f32 %v1816_v52 }
 0x8bd   :  { %v5581_v20 = vpop.eup %5580 }
 0x8be   :  { %v1819_v12 = vmul.f32 %v5581_v20, %v1802_v6  ;;  %v5583_v13 = vpop.eup %5582  ;;  %v6703_v20 = vrot.slane %v1883_v31, %v6220_v37 }
 0x8bf   :  { %v1822_v36 = vsub.f32 1.0, %v5583_v13  ;;  %v1824_v16 = vmul.f32 %v5583_v13, %v6517_v60  ;;  %v232_v60 = vld [vmem:[#allocation14] sm:$0x7] }
 0x8c0   :  { %v1820_v4 = vadd.f32 %v1819_v12, %v6245_v11  ;;  %v2122_v51 = vrot.slane %v232_v60, %v6227_v50  ;;  %v2126_v8 = vrot.slane %v232_v60, %v6231_v55  ;;  %v6700_v52 = vrot.slane %v232_v60, %v6220_v37 }
 0x8c1   :  { %v6629_v39 = vpop.f32.mrb[24].mxu1 }
 0x8c2   :  { %5584 = vtanh.f32 %v1820_v4  ;;  %v6631_v54 = vpop.f32.mrb[25].mxu1  ;;  %v6693_v21 = vadd.f32 %v2122_v51, %v1888_v40  ;;  %v6695_v34 = vadd.f32 %v2126_v8, %v1892_v63 }
 0x8c5   :  { %v6633_v9 = vpop.f32.mrb[26].mxu1 }
 0x8c6   :  { %v6635_v17 = vpop.f32.mrb[27].mxu1 }
 0x8c9   :  { %v6637_v2 = vpop.f32.mrb[28].mxu1 }
 0x8ca   :  { %v6639_v24 = vpop.f32.mrb[29].mxu1 }
 0x8cc   :  { %v5585_v38 = vpop.eup %5584 }
 0x8cd   :  { %v1823_v15 = vmul.f32 %v5585_v38, %v1822_v36  ;;  %v2080_v36 = vadd.f32 %v6631_v54, %v6703_v20 }
 0x8cf   :  { %v1825_v11 = vadd.f32 %v1824_v16, %v1823_v15 }
 0x8d1   :  { %2007 = vmatmul.mubr.f32.gmra.mrb[30].mxu0 %v1825_v11  ;;  %3438 = vst [vmem:[%s7018_s10] sm:$0xff] %v1825_v11  ;;  %4147 = vmatmul.mubr.f32.gmra.mrb[30].mxu1 %v1825_v11 }
 0x8d2   :  { %2198 = vmatprep.mubr.f32.mxu0 %v5862_v0  ;;  %4181 = vmatprep.mubr.msk.f32.mxu1 %vm5864_vm1, %v5862_v0 }
 0x8d5   :  { %2199 = vmatmul.mubr.f32.vlgmr.msra.gmra.mrb[16].mxu0 %v5862_v0  ;;  %4182 = vmatmul.mubr.f32.vlgmr.msra.gmra.mrb[32].mxu1 %v5862_v0 }
 0x8d6   :  { %5008 = vmatpush1.bf16.msra.mxu0 %v6546_v25  ;;  %5039 = vmatpush3.bf16.msra.mxu1 %v6584_v43 }
 0x8d7   :  { %5010 = vmatprep.subr.bf16.mxu0 %v6550_v27  ;;  %5040 = vmatprep.subr.bf16.mxu1 %v5863_v48 }
 0x8d8   :  { %2361 = vmatprep.mubr.f32.mxu0 %v5862_v0  ;;  %4216 = vmatprep.mubr.msk.f32.mxu1 %vm5864_vm1, %v5862_v0 }
 0x8da   :  { %5012 = vmatpush1.bf16.msra.mxu0 %v6552_v22  ;;  %5042 = vmatpush3.bf16.msra.mxu1 %v6595_v18 }
 0x8db   :  { %5014 = vmatprep.subr.bf16.mxu0 %v6556_v33  ;;  %5043 = vmatprep.subr.bf16.mxu1 %v5863_v48 }
 0x8de   :  { %5016 = vmatpush1.bf16.msra.mxu0 %v6558_v45  ;;  %5045 = vmatpush3.bf16.msra.mxu1 %v6601_v49 }
 0x8df   :  { %5018 = vmatprep.subr.bf16.mxu0 %v6562_v56  ;;  %5046 = vmatprep.subr.bf16.mxu1 %v5863_v48 }
 0x8e2   :  { %5020 = vmatpush1.bf16.msra.mxu0 %v6564_v3  ;;  %5048 = vmatpush3.bf16.msra.mxu1 %v6604_v28 }
 0x8e3   :  { %5022 = vmatprep.subr.bf16.mxu0 %v6568_v14  ;;  %5049 = vmatprep.subr.bf16.mxu1 %v5863_v48 }
 0x8e6   :  { %5024 = vmatpush1.bf16.msra.mxu0 %v6570_v26  ;;  %5051 = vmatpush3.bf16.msra.mxu1 %v6608_v23 }
 0x8e7   :  { %5026 = vmatprep.subr.bf16.mxu0 %v6574_v1  ;;  %5052 = vmatprep.subr.bf16.mxu1 %v5863_v48 }
 0x8ea   :  { %5028 = vmatpush1.bf16.msra.mxu0 %v6576_v35  ;;  %5054 = vmatpush3.bf16.msra.mxu1 %v6612_v42 }
 0x8eb   :  { %5030 = vmatprep.subr.bf16.mxu0 %v6580_v47  ;;  %5055 = vmatprep.subr.bf16.mxu1 %v5863_v48 }
 0x8ee   :  { %5032 = vmatpush1.bf16.msra.mxu0 %v6582_v62  ;;  %5057 = vmatpush3.bf16.msra.mxu1 %v6616_v61 }
 0x8ef   :  { %5034 = vmatprep.subr.bf16.mxu0 %v6589_v7  ;;  %5058 = vmatprep.subr.bf16.mxu1 %v5863_v48 }
 0x8f2   :  { %5036 = vmatpush1.bf16.msra.mxu0 %v6592_v44  ;;  %5060 = vmatpush3.bf16.msra.mxu1 %v6620_v10 }
 0x8f3   :  { %5062 = vmatprep.subr.bf16.mxu0 %v6544_v59  ;;  %5093 = vmatprep.subr.bf16.mxu1 %v5863_v48 }
 0x9a4   :  { %v6687_v53 = vpop.f32.mrb[30].mxu1 }
 0x9a5   :  { %v6691_v19 = vpop.f32.mrb[31].mxu1 }
 0x9a8   :  { %v2200_v29 = vpop.f32.mrb[16].mxu0  ;;  %v2271_v30 = vpop.f32.mrb[32].mxu1 }
 0x9a9   :  { %v5430_v32 = vadd.f32 %v6693_v21, %v2200_v29  ;;  %v2202_v5 = vpop.f32.mrb[17].mxu0  ;;  %v4183_v41 = vpop.f32.mrb[33].mxu1  ;;  %v2272_v4 = vadd.f32 %v2271_v30, %v6700_v52 }
 0x9aa   :  { %v5432_v50 = vadd.f32 %v6695_v34, %v2202_v5 }
 0x9ab   :  { %v3486_v46 = vmul.f32 -1.442695, %v5430_v32 }
 0x9ac   :  { %v3487_v57 = vmul.f32 -1.442695, %v5432_v50 }
 0x9ad   :  { %5586 = vpow2.f32 %v3486_v46 }
 0x9ae   :  { %5588 = vpow2.f32 %v3487_v57 }
 0x9b7   :  { %v5587_v58 = vpop.eup %5586 }
 0x9b8   :  { %v2279_v55 = vadd.f32 1.0, %v5587_v58  ;;  %v5589_v6 = vpop.eup %5588 }
 0x9b9   :  { %v2286_v12 = vadd.f32 1.0, %v5589_v6  ;;  %v2085_v6 = vadd.f32 %v6629_v39, %v6703_v20 }
 0x9ba   :  { %5590 = vrcp.f32 %v2279_v55 }
 0x9bb   :  { %5592 = vrcp.f32 %v2286_v12 }
 0x9c4   :  { %v5591_v13 = vpop.eup %5590 }
 0x9c5   :  { %v2289_v38 = vmul.f32 %v5591_v13, %v2272_v4  ;;  %v5593_v16 = vpop.eup %5592 }
 0x9c6   :  { %v2292_v11 = vsub.f32 1.0, %v5593_v16  ;;  %v2294_v51 = vmul.f32 0.0, %v5593_v16 }
 0x9c7   :  { %v2290_v15 = vadd.f32 %v2289_v38, %v2080_v36 }
 0x9c9   :  { %5594 = vtanh.f32 %v2290_v15 }
 0x9d3   :  { %v5595_v40 = vpop.eup %5594 }
 0x9d4   :  { %v2293_v60 = vmul.f32 %v5595_v40, %v2292_v11 }
 0x9d6   :  { %v6708_v63 = vadd.f32 %v2294_v51, %v2293_v60 }
 0x9d8   :  { %2296 = vst [vmem:[%s7017_s9] sm:$0xff] %v6708_v63  ;;  %2362 = vmatmul.mubr.f32.vlgmr.msra.gmra.mrb[18].mxu0 %v6708_v63  ;;  %4217 = vmatmul.mubr.f32.vlgmr.msra.gmra.mrb[34].mxu1 %v6708_v63 }
 0x9d9   :  { %5064 = vmatpush1.bf16.msra.mxu0 %v6546_v25  ;;  %5095 = vmatpush3.bf16.msra.mxu1 %v6584_v43 }
 0x9da   :  { %5066 = vmatprep.subr.bf16.mxu0 %v6550_v27  ;;  %5096 = vmatprep.subr.bf16.mxu1 %v5863_v48 }
 0x9db   :  { %2524 = vmatprep.mubr.f32.mxu0 %v5862_v0  ;;  %4251 = vmatprep.mubr.msk.f32.mxu1 %vm5864_vm1, %v5862_v0 }
 0x9dd   :  { %5068 = vmatpush1.bf16.msra.mxu0 %v6552_v22  ;;  %5098 = vmatpush3.bf16.msra.mxu1 %v6595_v18 }
 0x9de   :  { %5070 = vmatprep.subr.bf16.mxu0 %v6556_v33  ;;  %5099 = vmatprep.subr.bf16.mxu1 %v5863_v48 }
 0x9e1   :  { %5072 = vmatpush1.bf16.msra.mxu0 %v6558_v45  ;;  %5101 = vmatpush3.bf16.msra.mxu1 %v6601_v49 }
 0x9e2   :  { %5074 = vmatprep.subr.bf16.mxu0 %v6562_v56  ;;  %5102 = vmatprep.subr.bf16.mxu1 %v5863_v48 }
 0x9e5   :  { %5076 = vmatpush1.bf16.msra.mxu0 %v6564_v3  ;;  %5104 = vmatpush3.bf16.msra.mxu1 %v6604_v28 }
 0x9e6   :  { %5078 = vmatprep.subr.bf16.mxu0 %v6568_v14  ;;  %5105 = vmatprep.subr.bf16.mxu1 %v5863_v48 }
 0x9e9   :  { %5080 = vmatpush1.bf16.msra.mxu0 %v6570_v26  ;;  %5107 = vmatpush3.bf16.msra.mxu1 %v6608_v23 }
 0x9ea   :  { %5082 = vmatprep.subr.bf16.mxu0 %v6574_v1  ;;  %5108 = vmatprep.subr.bf16.mxu1 %v5863_v48 }
 0x9ed   :  { %5084 = vmatpush1.bf16.msra.mxu0 %v6576_v35  ;;  %5110 = vmatpush3.bf16.msra.mxu1 %v6612_v42 }
 0x9ee   :  { %5086 = vmatprep.subr.bf16.mxu0 %v6580_v47  ;;  %5111 = vmatprep.subr.bf16.mxu1 %v5863_v48 }
 0x9f1   :  { %5088 = vmatpush1.bf16.msra.mxu0 %v6582_v62  ;;  %5113 = vmatpush3.bf16.msra.mxu1 %v6616_v61 }
 0x9f2   :  { %5090 = vmatprep.subr.bf16.mxu0 %v6589_v7  ;;  %5114 = vmatprep.subr.bf16.mxu1 %v5863_v48 }
 0x9f5   :  { %5092 = vmatpush1.bf16.msra.mxu0 %v6592_v44  ;;  %5116 = vmatpush3.bf16.msra.mxu1 %v6620_v10 }
 0x9f6   :  { %5118 = vmatprep.subr.bf16.mxu0 %v6544_v59  ;;  %5149 = vmatprep.subr.bf16.mxu1 %v5863_v48 }
 0xaab   :  { %v2363_v37 = vpop.f32.mrb[18].mxu0  ;;  %v2434_v54 = vpop.f32.mrb[34].mxu1 }
 0xaac   :  { %v5434_v31 = vadd.f32 %v6693_v21, %v2363_v37  ;;  %v2365_v8 = vpop.f32.mrb[19].mxu0  ;;  %v4218_v29 = vpop.f32.mrb[35].mxu1  ;;  %v2435_v58 = vadd.f32 %v2434_v54, %v6700_v52 }
 0xaad   :  { %v5436_v32 = vadd.f32 %v6695_v34, %v2365_v8 }
 0xaae   :  { %v3488_v30 = vmul.f32 -1.442695, %v5434_v31 }
 0xaaf   :  { %v3489_v5 = vmul.f32 -1.442695, %v5436_v32 }
 0xab0   :  { %5596 = vpow2.f32 %v3488_v30 }
 0xab1   :  { %5598 = vpow2.f32 %v3489_v5 }
 0xaba   :  { %v5597_v41 = vpop.eup %5596 }
 0xabb   :  { %v2442_v46 = vadd.f32 1.0, %v5597_v41  ;;  %v5599_v50 = vpop.eup %5598 }
 0xabc   :  { %v2449_v57 = vadd.f32 1.0, %v5599_v50 }
 0xabd   :  { %5600 = vrcp.f32 %v2442_v46  ;;  %v2090_v46 = vadd.f32 %v6635_v17, %v6703_v20 }
 0xabe   :  { %5602 = vrcp.f32 %v2449_v57 }
 0xac7   :  { %v5601_v55 = vpop.eup %5600 }
 0xac8   :  { %v2452_v12 = vmul.f32 %v5601_v55, %v2435_v58  ;;  %v5603_v13 = vpop.eup %5602 }
 0xac9   :  { %v2455_v36 = vsub.f32 1.0, %v5603_v13  ;;  %v2457_v16 = vmul.f32 %v5603_v13, %v6708_v63 }
 0xaca   :  { %v2453_v4 = vadd.f32 %v2452_v12, %v2085_v6 }
 0xacc   :  { %5604 = vtanh.f32 %v2453_v4 }
 0xad6   :  { %v5605_v38 = vpop.eup %5604 }
 0xad7   :  { %v2456_v15 = vmul.f32 %v5605_v38, %v2455_v36 }
 0xad9   :  { %v6757_v11 = vadd.f32 %v2457_v16, %v2456_v15 }
 0xadb   :  { %2459 = vst [vmem:[%s7017_s9 + $0x8] sm:$0xff] %v6757_v11  ;;  %2525 = vmatmul.mubr.f32.vlgmr.msra.gmra.mrb[20].mxu0 %v6757_v11  ;;  %4252 = vmatmul.mubr.f32.vlgmr.msra.gmra.mrb[36].mxu1 %v6757_v11 }
 0xadc   :  { %5120 = vmatpush1.bf16.msra.mxu0 %v6546_v25  ;;  %5151 = vmatpush3.bf16.msra.mxu1 %v6584_v43 }
 0xadd   :  { %5122 = vmatprep.subr.bf16.mxu0 %v6550_v27  ;;  %5152 = vmatprep.subr.bf16.mxu1 %v5863_v48 }
 0xade   :  { %2687 = vmatprep.mubr.f32.mxu0 %v5862_v0  ;;  %4286 = vmatprep.mubr.msk.f32.mxu1 %vm5864_vm1, %v5862_v0 }
 0xae0   :  { %5124 = vmatpush1.bf16.msra.mxu0 %v6552_v22  ;;  %5154 = vmatpush3.bf16.msra.mxu1 %v6595_v18 }
 0xae1   :  { %5126 = vmatprep.subr.bf16.mxu0 %v6556_v33  ;;  %5155 = vmatprep.subr.bf16.mxu1 %v5863_v48 }
 0xae4   :  { %5128 = vmatpush1.bf16.msra.mxu0 %v6558_v45  ;;  %5157 = vmatpush3.bf16.msra.mxu1 %v6601_v49 }
 0xae5   :  { %5130 = vmatprep.subr.bf16.mxu0 %v6562_v56  ;;  %5158 = vmatprep.subr.bf16.mxu1 %v5863_v48 }
 0xae8   :  { %5132 = vmatpush1.bf16.msra.mxu0 %v6564_v3  ;;  %5160 = vmatpush3.bf16.msra.mxu1 %v6604_v28 }
 0xae9   :  { %5134 = vmatprep.subr.bf16.mxu0 %v6568_v14  ;;  %5161 = vmatprep.subr.bf16.mxu1 %v5863_v48 }
 0xaec   :  { %5136 = vmatpush1.bf16.msra.mxu0 %v6570_v26  ;;  %5163 = vmatpush3.bf16.msra.mxu1 %v6608_v23 }
 0xaed   :  { %5138 = vmatprep.subr.bf16.mxu0 %v6574_v1  ;;  %5164 = vmatprep.subr.bf16.mxu1 %v5863_v48 }
 0xaf0   :  { %5140 = vmatpush1.bf16.msra.mxu0 %v6576_v35  ;;  %5166 = vmatpush3.bf16.msra.mxu1 %v6612_v42 }
 0xaf1   :  { %5142 = vmatprep.subr.bf16.mxu0 %v6580_v47  ;;  %5167 = vmatprep.subr.bf16.mxu1 %v5863_v48 }
 0xaf4   :  { %5144 = vmatpush1.bf16.msra.mxu0 %v6582_v62  ;;  %5169 = vmatpush3.bf16.msra.mxu1 %v6616_v61 }
 0xaf5   :  { %5146 = vmatprep.subr.bf16.mxu0 %v6589_v7  ;;  %5170 = vmatprep.subr.bf16.mxu1 %v5863_v48 }
 0xaf8   :  { %5148 = vmatpush1.bf16.msra.mxu0 %v6592_v44  ;;  %5172 = vmatpush3.bf16.msra.mxu1 %v6620_v10 }
 0xaf9   :  { %5174 = vmatprep.subr.bf16.mxu0 %v6544_v59  ;;  %5205 = vmatprep.subr.bf16.mxu1 %v5863_v48 }
 0xbae   :  { %v2526_v39 = vpop.f32.mrb[20].mxu0  ;;  %v2597_v40 = vpop.f32.mrb[36].mxu1 }
 0xbaf   :  { %v5438_v60 = vadd.f32 %v6693_v21, %v2526_v39  ;;  %v2528_v51 = vpop.f32.mrb[21].mxu0  ;;  %v4253_v63 = vpop.f32.mrb[37].mxu1  ;;  %v2598_v5 = vadd.f32 %v2597_v40, %v6700_v52 }
 0xbb0   :  { %v5440_v54 = vadd.f32 %v6695_v34, %v2528_v51 }
 0xbb1   :  { %v3490_v37 = vmul.f32 -1.442695, %v5438_v60 }
 0xbb2   :  { %v3491_v31 = vmul.f32 -1.442695, %v5440_v54 }
 0xbb3   :  { %5606 = vpow2.f32 %v3490_v37 }
 0xbb4   :  { %5608 = vpow2.f32 %v3491_v31 }
 0xbbd   :  { %v5607_v8 = vpop.eup %5606 }
 0xbbe   :  { %v2605_v29 = vadd.f32 1.0, %v5607_v8  ;;  %v5609_v30 = vpop.eup %5608  ;;  %v2095_v8 = vadd.f32 %v6633_v9, %v6703_v20 }
 0xbbf   :  { %v2612_v32 = vadd.f32 1.0, %v5609_v30 }
 0xbc0   :  { %5610 = vrcp.f32 %v2605_v29 }
 0xbc1   :  { %5612 = vrcp.f32 %v2612_v32 }
 0xbca   :  { %v5611_v41 = vpop.eup %5610 }
 0xbcb   :  { %v2615_v50 = vmul.f32 %v5611_v41, %v2598_v5  ;;  %v5613_v58 = vpop.eup %5612 }
 0xbcc   :  { %v2618_v55 = vsub.f32 1.0, %v5613_v58  ;;  %v2620_v4 = vmul.f32 %v5613_v58, %v6757_v11 }
 0xbcd   :  { %v2616_v57 = vadd.f32 %v2615_v50, %v2090_v46 }
 0xbcf   :  { %5614 = vtanh.f32 %v2616_v57 }
 0xbd9   :  { %v5615_v6 = vpop.eup %5614 }
 0xbda   :  { %v2619_v12 = vmul.f32 %v5615_v6, %v2618_v55 }
 0xbdc   :  { %v6806_v13 = vadd.f32 %v2620_v4, %v2619_v12 }
 0xbde   :  { %2622 = vst [vmem:[%s7017_s9 + $0x10] sm:$0xff] %v6806_v13  ;;  %2688 = vmatmul.mubr.f32.vlgmr.msra.gmra.mrb[22].mxu0 %v6806_v13  ;;  %4287 = vmatmul.mubr.f32.vlgmr.msra.gmra.mrb[38].mxu1 %v6806_v13 }
 0xbdf   :  { %5176 = vmatpush1.bf16.msra.mxu0 %v6546_v25  ;;  %5207 = vmatpush3.bf16.msra.mxu1 %v6584_v43 }
 0xbe0   :  { %5178 = vmatprep.subr.bf16.mxu0 %v6550_v27  ;;  %5208 = vmatprep.subr.bf16.mxu1 %v5863_v48 }
 0xbe1   :  { %2850 = vmatprep.mubr.f32.mxu0 %v5862_v0  ;;  %4321 = vmatprep.mubr.msk.f32.mxu1 %vm5864_vm1, %v5862_v0 }
 0xbe3   :  { %5180 = vmatpush1.bf16.msra.mxu0 %v6552_v22  ;;  %5210 = vmatpush3.bf16.msra.mxu1 %v6595_v18 }
 0xbe4   :  { %5182 = vmatprep.subr.bf16.mxu0 %v6556_v33  ;;  %5211 = vmatprep.subr.bf16.mxu1 %v5863_v48 }
 0xbe7   :  { %5184 = vmatpush1.bf16.msra.mxu0 %v6558_v45  ;;  %5213 = vmatpush3.bf16.msra.mxu1 %v6601_v49 }
 0xbe8   :  { %5186 = vmatprep.subr.bf16.mxu0 %v6562_v56  ;;  %5214 = vmatprep.subr.bf16.mxu1 %v5863_v48 }
 0xbeb   :  { %5188 = vmatpush1.bf16.msra.mxu0 %v6564_v3  ;;  %5216 = vmatpush3.bf16.msra.mxu1 %v6604_v28 }
 0xbec   :  { %5190 = vmatprep.subr.bf16.mxu0 %v6568_v14  ;;  %5217 = vmatprep.subr.bf16.mxu1 %v5863_v48 }
 0xbef   :  { %5192 = vmatpush1.bf16.msra.mxu0 %v6570_v26  ;;  %5219 = vmatpush3.bf16.msra.mxu1 %v6608_v23 }
 0xbf0   :  { %5194 = vmatprep.subr.bf16.mxu0 %v6574_v1  ;;  %5220 = vmatprep.subr.bf16.mxu1 %v5863_v48 }
 0xbf3   :  { %5196 = vmatpush1.bf16.msra.mxu0 %v6576_v35  ;;  %5222 = vmatpush3.bf16.msra.mxu1 %v6612_v42 }
 0xbf4   :  { %5198 = vmatprep.subr.bf16.mxu0 %v6580_v47  ;;  %5223 = vmatprep.subr.bf16.mxu1 %v5863_v48 }
 0xbf7   :  { %5200 = vmatpush1.bf16.msra.mxu0 %v6582_v62  ;;  %5225 = vmatpush3.bf16.msra.mxu1 %v6616_v61 }
 0xbf8   :  { %5202 = vmatprep.subr.bf16.mxu0 %v6589_v7  ;;  %5226 = vmatprep.subr.bf16.mxu1 %v5863_v48 }
 0xbfb   :  { %5204 = vmatpush1.bf16.msra.mxu0 %v6592_v44  ;;  %5228 = vmatpush3.bf16.msra.mxu1 %v6620_v10 }
 0xbfc   :  { %5230 = vmatprep.subr.bf16.mxu0 %v6544_v59  ;;  %5261 = vmatprep.subr.bf16.mxu1 %v5863_v48 }
 0xcb1   :  { %v2689_v17 = vpop.f32.mrb[22].mxu0  ;;  %v2760_v36 = vpop.f32.mrb[38].mxu1 }
 0xcb2   :  { %v5442_v38 = vadd.f32 %v6693_v21, %v2689_v17  ;;  %v2691_v15 = vpop.f32.mrb[23].mxu0  ;;  %v4288_v16 = vpop.f32.mrb[39].mxu1  ;;  %v2761_v54 = vadd.f32 %v2760_v36, %v6700_v52 }
 0xcb3   :  { %v5444_v39 = vadd.f32 %v6695_v34, %v2691_v15 }
 0xcb4   :  { %v3492_v11 = vmul.f32 -1.442695, %v5442_v38 }
 0xcb5   :  { %v3493_v40 = vmul.f32 -1.442695, %v5444_v39 }
 0xcb6   :  { %5616 = vpow2.f32 %v3492_v11 }
 0xcb7   :  { %5618 = vpow2.f32 %v3493_v40  ;;  %v2100_v40 = vadd.f32 %v6639_v24, %v6703_v20 }
 0xcc0   :  { %v5617_v60 = vpop.eup %5616 }
 0xcc1   :  { %v2768_v51 = vadd.f32 1.0, %v5617_v60  ;;  %v5619_v63 = vpop.eup %5618 }
 0xcc2   :  { %v2775_v37 = vadd.f32 1.0, %v5619_v63 }
 0xcc3   :  { %5620 = vrcp.f32 %v2768_v51 }
 0xcc4   :  { %5622 = vrcp.f32 %v2775_v37 }
 0xccd   :  { %v5621_v31 = vpop.eup %5620 }
 0xcce   :  { %v2778_v29 = vmul.f32 %v5621_v31, %v2761_v54  ;;  %v5623_v32 = vpop.eup %5622 }
 0xccf   :  { %v2781_v5 = vsub.f32 1.0, %v5623_v32  ;;  %v2783_v50 = vmul.f32 %v5623_v32, %v6806_v13 }
 0xcd0   :  { %v2779_v30 = vadd.f32 %v2778_v29, %v2095_v8 }
 0xcd2   :  { %5624 = vtanh.f32 %v2779_v30 }
 0xcdc   :  { %v5625_v41 = vpop.eup %5624 }
 0xcdd   :  { %v2782_v46 = vmul.f32 %v5625_v41, %v2781_v5 }
 0xcdf   :  { %v6855_v57 = vadd.f32 %v2783_v50, %v2782_v46 }
 0xce1   :  { %2785 = vst [vmem:[%s7017_s9 + $0x18] sm:$0xff] %v6855_v57  ;;  %2851 = vmatmul.mubr.f32.vlgmr.msra.gmra.mrb[24].mxu0 %v6855_v57  ;;  %4322 = vmatmul.mubr.f32.vlgmr.msra.gmra.mrb[40].mxu1 %v6855_v57 }
 0xce2   :  { %5232 = vmatpush1.bf16.msra.mxu0 %v6546_v25  ;;  %5263 = vmatpush3.bf16.msra.mxu1 %v6584_v43 }
 0xce3   :  { %5234 = vmatprep.subr.bf16.mxu0 %v6550_v27  ;;  %5264 = vmatprep.subr.bf16.mxu1 %v5863_v48 }
 0xce4   :  { %3013 = vmatprep.mubr.f32.mxu0 %v5862_v0  ;;  %4356 = vmatprep.mubr.msk.f32.mxu1 %vm5864_vm1, %v5862_v0 }
 0xce6   :  { %5236 = vmatpush1.bf16.msra.mxu0 %v6552_v22  ;;  %5266 = vmatpush3.bf16.msra.mxu1 %v6595_v18 }
 0xce7   :  { %5238 = vmatprep.subr.bf16.mxu0 %v6556_v33  ;;  %5267 = vmatprep.subr.bf16.mxu1 %v5863_v48 }
 0xcea   :  { %5240 = vmatpush1.bf16.msra.mxu0 %v6558_v45  ;;  %5269 = vmatpush3.bf16.msra.mxu1 %v6601_v49 }
 0xceb   :  { %5242 = vmatprep.subr.bf16.mxu0 %v6562_v56  ;;  %5270 = vmatprep.subr.bf16.mxu1 %v5863_v48 }
 0xcee   :  { %5244 = vmatpush1.bf16.msra.mxu0 %v6564_v3  ;;  %5272 = vmatpush3.bf16.msra.mxu1 %v6604_v28 }
 0xcef   :  { %5246 = vmatprep.subr.bf16.mxu0 %v6568_v14  ;;  %5273 = vmatprep.subr.bf16.mxu1 %v5863_v48 }
 0xcf2   :  { %5248 = vmatpush1.bf16.msra.mxu0 %v6570_v26  ;;  %5275 = vmatpush3.bf16.msra.mxu1 %v6608_v23 }
 0xcf3   :  { %5250 = vmatprep.subr.bf16.mxu0 %v6574_v1  ;;  %5276 = vmatprep.subr.bf16.mxu1 %v5863_v48 }
 0xcf6   :  { %5252 = vmatpush1.bf16.msra.mxu0 %v6576_v35  ;;  %5278 = vmatpush3.bf16.msra.mxu1 %v6612_v42 }
 0xcf7   :  { %5254 = vmatprep.subr.bf16.mxu0 %v6580_v47  ;;  %5279 = vmatprep.subr.bf16.mxu1 %v5863_v48 }
 0xcfa   :  { %5256 = vmatpush1.bf16.msra.mxu0 %v6582_v62  ;;  %5281 = vmatpush3.bf16.msra.mxu1 %v6616_v61 }
 0xcfb   :  { %5258 = vmatprep.subr.bf16.mxu0 %v6589_v7  ;;  %5282 = vmatprep.subr.bf16.mxu1 %v5863_v48 }
 0xcfe   :  { %5260 = vmatpush1.bf16.msra.mxu0 %v6592_v44  ;;  %5284 = vmatpush3.bf16.msra.mxu1 %v6620_v10 }
 0xcff   :  { %5286 = vmatprep.subr.bf16.mxu0 %v6544_v59  ;;  %5317 = vmatprep.subr.bf16.mxu1 %v5863_v48 }
 0xdb4   :  { %v2852_v9 = vpop.f32.mrb[24].mxu0  ;;  %v2923_v58 = vpop.f32.mrb[40].mxu1 }
 0xdb5   :  { %v5446_v55 = vadd.f32 %v6693_v21, %v2852_v9  ;;  %v2854_v6 = vpop.f32.mrb[25].mxu0  ;;  %v4323_v12 = vpop.f32.mrb[41].mxu1  ;;  %v2924_v11 = vadd.f32 %v2923_v58, %v6700_v52 }
 0xdb6   :  { %v5448_v13 = vadd.f32 %v6695_v34, %v2854_v6 }
 0xdb7   :  { %v3494_v4 = vmul.f32 -1.442695, %v5446_v55 }
 0xdb8   :  { %v3495_v17 = vmul.f32 -1.442695, %v5448_v13 }
 0xdb9   :  { %5626 = vpow2.f32 %v3494_v4  ;;  %v2105_v4 = vadd.f32 %v6637_v2, %v6703_v20 }
 0xdba   :  { %5628 = vpow2.f32 %v3495_v17 }
 0xdc3   :  { %v5627_v36 = vpop.eup %5626 }
 0xdc4   :  { %v2931_v38 = vadd.f32 1.0, %v5627_v36  ;;  %v5629_v15 = vpop.eup %5628 }
 0xdc5   :  { %v2938_v16 = vadd.f32 1.0, %v5629_v15 }
 0xdc6   :  { %5630 = vrcp.f32 %v2931_v38 }
 0xdc7   :  { %5632 = vrcp.f32 %v2938_v16 }
 0xdd0   :  { %v5631_v39 = vpop.eup %5630 }
 0xdd1   :  { %v2941_v60 = vmul.f32 %v5631_v39, %v2924_v11  ;;  %v5633_v63 = vpop.eup %5632 }
 0xdd2   :  { %v2944_v37 = vsub.f32 1.0, %v5633_v63  ;;  %v2946_v8 = vmul.f32 %v5633_v63, %v6855_v57 }
 0xdd3   :  { %v2942_v51 = vadd.f32 %v2941_v60, %v2100_v40 }
 0xdd5   :  { %5634 = vtanh.f32 %v2942_v51 }
 0xddf   :  { %v5635_v54 = vpop.eup %5634 }
 0xde0   :  { %v2945_v31 = vmul.f32 %v5635_v54, %v2944_v37 }
 0xde2   :  { %v6904_v29 = vadd.f32 %v2946_v8, %v2945_v31 }
 0xde4   :  { %2948 = vst [vmem:[%s7017_s9 + $0x20] sm:$0xff] %v6904_v29  ;;  %3014 = vmatmul.mubr.f32.vlgmr.msra.gmra.mrb[26].mxu0 %v6904_v29  ;;  %4357 = vmatmul.mubr.f32.vlgmr.msra.gmra.mrb[42].mxu1 %v6904_v29 }
 0xde5   :  { %5288 = vmatpush1.bf16.msra.mxu0 %v6546_v25  ;;  %5319 = vmatpush3.bf16.msra.mxu1 %v6584_v43 }
 0xde6   :  { %5290 = vmatprep.subr.bf16.mxu0 %v6550_v27  ;;  %5320 = vmatprep.subr.bf16.mxu1 %v5863_v48 }
 0xde7   :  { %3176 = vmatprep.mubr.f32.mxu0 %v5862_v0  ;;  %4391 = vmatprep.mubr.msk.f32.mxu1 %vm5864_vm1, %v5862_v0 }
 0xde9   :  { %5292 = vmatpush1.bf16.msra.mxu0 %v6552_v22  ;;  %5322 = vmatpush3.bf16.msra.mxu1 %v6595_v18 }
 0xdea   :  { %5294 = vmatprep.subr.bf16.mxu0 %v6556_v33  ;;  %5323 = vmatprep.subr.bf16.mxu1 %v5863_v48 }
 0xded   :  { %5296 = vmatpush1.bf16.msra.mxu0 %v6558_v45  ;;  %5325 = vmatpush3.bf16.msra.mxu1 %v6601_v49 }
 0xdee   :  { %5298 = vmatprep.subr.bf16.mxu0 %v6562_v56  ;;  %5326 = vmatprep.subr.bf16.mxu1 %v5863_v48 }
 0xdf1   :  { %5300 = vmatpush1.bf16.msra.mxu0 %v6564_v3  ;;  %5328 = vmatpush3.bf16.msra.mxu1 %v6604_v28 }
 0xdf2   :  { %5302 = vmatprep.subr.bf16.mxu0 %v6568_v14  ;;  %5329 = vmatprep.subr.bf16.mxu1 %v5863_v48 }
 0xdf5   :  { %5304 = vmatpush1.bf16.msra.mxu0 %v6570_v26  ;;  %5331 = vmatpush3.bf16.msra.mxu1 %v6608_v23 }
 0xdf6   :  { %5306 = vmatprep.subr.bf16.mxu0 %v6574_v1  ;;  %5332 = vmatprep.subr.bf16.mxu1 %v5863_v48 }
 0xdf9   :  { %5308 = vmatpush1.bf16.msra.mxu0 %v6576_v35  ;;  %5334 = vmatpush3.bf16.msra.mxu1 %v6612_v42 }
 0xdfa   :  { %5310 = vmatprep.subr.bf16.mxu0 %v6580_v47  ;;  %5335 = vmatprep.subr.bf16.mxu1 %v5863_v48 }
 0xdfd   :  { %5312 = vmatpush1.bf16.msra.mxu0 %v6582_v62  ;;  %5337 = vmatpush3.bf16.msra.mxu1 %v6616_v61 }
 0xdfe   :  { %5314 = vmatprep.subr.bf16.mxu0 %v6589_v7  ;;  %5338 = vmatprep.subr.bf16.mxu1 %v5863_v48 }
 0xe01   :  { %5316 = vmatpush1.bf16.msra.mxu0 %v6592_v44  ;;  %5340 = vmatpush3.bf16.msra.mxu1 %v6620_v10 }
 0xe02   :  { %5342 = vmatprep.subr.bf16.mxu0 %v6544_v59  ;;  %5373 = vmatprep.subr.bf16.mxu1 %v5863_v48 }
 0xeb7   :  { %v3015_v24 = vpop.f32.mrb[26].mxu0  ;;  %v3086_v30 = vpop.f32.mrb[42].mxu1 }
 0xeb8   :  { %v5450_v32 = vadd.f32 %v6693_v21, %v3015_v24  ;;  %v3017_v5 = vpop.f32.mrb[27].mxu0  ;;  %v4358_v41 = vpop.f32.mrb[43].mxu1  ;;  %v3087_v59 = vadd.f32 %v3086_v30, %v6700_v52  ;;  %v2115_v30 = vadd.f32 %v6687_v53, %v6703_v20 }
 0xeb9   :  { %v5452_v50 = vadd.f32 %v6695_v34, %v3017_v5 }
 0xeba   :  { %v3496_v46 = vmul.f32 -1.442695, %v5450_v32 }
 0xebb   :  { %v3497_v57 = vmul.f32 -1.442695, %v5452_v50 }
 0xebc   :  { %5636 = vpow2.f32 %v3496_v46 }
 0xebd   :  { %5638 = vpow2.f32 %v3497_v57 }
 0xec6   :  { %v5637_v9 = vpop.eup %5636 }
 0xec7   :  { %v3094_v58 = vadd.f32 1.0, %v5637_v9  ;;  %v5639_v55 = vpop.eup %5638 }
 0xec8   :  { %v3101_v6 = vadd.f32 1.0, %v5639_v55 }
 0xec9   :  { %5640 = vrcp.f32 %v3094_v58 }
 0xeca   :  { %5642 = vrcp.f32 %v3101_v6 }
 0xed3   :  { %v5641_v12 = vpop.eup %5640 }
 0xed4   :  { %v3104_v13 = vmul.f32 %v5641_v12, %v3087_v59  ;;  %v5643_v36 = vpop.eup %5642 }
 0xed5   :  { %v3107_v38 = vsub.f32 1.0, %v5643_v36  ;;  %v3109_v11 = vmul.f32 %v5643_v36, %v6904_v29 }
 0xed6   :  { %v3105_v17 = vadd.f32 %v3104_v13, %v2105_v4 }
 0xed8   :  { %5644 = vtanh.f32 %v3105_v17 }
 0xee2   :  { %v5645_v15 = vpop.eup %5644 }
 0xee3   :  { %v3108_v16 = vmul.f32 %v5645_v15, %v3107_v38 }
 0xee5   :  { %v3110_v39 = vadd.f32 %v3109_v11, %v3108_v16 }
 0xee7   :  { %3111 = vst [vmem:[%s7017_s9 + $0x28] sm:$0xff] %v3110_v39  ;;  %3177 = vmatmul.mubr.f32.vlgmr.msra.gmra.mrb[28].mxu0 %v3110_v39  ;;  %4392 = vmatmul.mubr.f32.vlgmr.msra.gmra.mrb[44].mxu1 %v3110_v39 }
 0xee8   :  { %5344 = vmatpush1.bf16.msra.mxu0 %v6546_v25  ;;  %5375 = vmatpush3.bf16.msra.mxu1 %v6584_v43 }
 0xee9   :  { %5346 = vmatprep.subr.bf16.mxu0 %v6550_v27  ;;  %5376 = vmatprep.subr.bf16.mxu1 %v5863_v48 }
 0xeea   :  { %3339 = vmatprep.mubr.f32.mxu0 %v5862_v0  ;;  %4426 = vmatprep.mubr.msk.f32.mxu1 %vm5864_vm1, %v5862_v0 }
 0xeec   :  { %5348 = vmatpush1.bf16.msra.mxu0 %v6552_v22  ;;  %5378 = vmatpush3.bf16.msra.mxu1 %v6595_v18 }
 0xeed   :  { %5350 = vmatprep.subr.bf16.mxu0 %v6556_v33  ;;  %5379 = vmatprep.subr.bf16.mxu1 %v5863_v48 }
 0xef0   :  { %5352 = vmatpush1.bf16.msra.mxu0 %v6558_v45  ;;  %5381 = vmatpush3.bf16.msra.mxu1 %v6601_v49 }
 0xef1   :  { %5354 = vmatprep.subr.bf16.mxu0 %v6562_v56  ;;  %5382 = vmatprep.subr.bf16.mxu1 %v5863_v48 }
 0xef4   :  { %5356 = vmatpush1.bf16.msra.mxu0 %v6564_v3  ;;  %5384 = vmatpush3.bf16.msra.mxu1 %v6604_v28 }
 0xef5   :  { %5358 = vmatprep.subr.bf16.mxu0 %v6568_v14  ;;  %5385 = vmatprep.subr.bf16.mxu1 %v5863_v48 }
 0xef8   :  { %5360 = vmatpush1.bf16.msra.mxu0 %v6570_v26  ;;  %5387 = vmatpush3.bf16.msra.mxu1 %v6608_v23 }
 0xef9   :  { %5362 = vmatprep.subr.bf16.mxu0 %v6574_v1  ;;  %5388 = vmatprep.subr.bf16.mxu1 %v5863_v48 }
 0xefc   :  { %5364 = vmatpush1.bf16.msra.mxu0 %v6576_v35  ;;  %5390 = vmatpush3.bf16.msra.mxu1 %v6612_v42 }
 0xefd   :  { %5366 = vmatprep.subr.bf16.mxu0 %v6580_v47  ;;  %5391 = vmatprep.subr.bf16.mxu1 %v5863_v48 }
 0xf00   :  { %5368 = vmatpush1.bf16.msra.mxu0 %v6582_v62  ;;  %5393 = vmatpush3.bf16.msra.mxu1 %v6616_v61  ;;  %v2110_v62 = vadd.f32 %v6691_v19, %v6703_v20 }
 0xf01   :  { %5370 = vmatprep.subr.bf16.mxu0 %v6589_v7  ;;  %5394 = vmatprep.subr.bf16.mxu1 %v5863_v48 }
 0xf04   :  { %5372 = vmatpush1.bf16.msra.mxu0 %v6592_v44  ;;  %5396 = vmatpush3.bf16.msra.mxu1 %v6620_v10 }
 0xfba   :  { %v3178_v0 = vpop.f32.mrb[28].mxu0  ;;  %v3249_v25 = vpop.f32.mrb[44].mxu1 }
 0xfbb   :  { %v5454_v27 = vadd.f32 %v6693_v21, %v3178_v0  ;;  %v3180_v22 = vpop.f32.mrb[29].mxu0  ;;  %v4393_v33 = vpop.f32.mrb[45].mxu1  ;;  %v3250_v35 = vadd.f32 %v3249_v25, %v6700_v52 }
 0xfbc   :  { %v5456_v56 = vadd.f32 %v6695_v34, %v3180_v22 }
 0xfbd   :  { %v3498_v45 = vmul.f32 -1.442695, %v5454_v27 }
 0xfbe   :  { %v3499_v3 = vmul.f32 -1.442695, %v5456_v56 }
 0xfbf   :  { %5646 = vpow2.f32 %v3498_v45 }
 0xfc0   :  { %5648 = vpow2.f32 %v3499_v3 }
 0xfc9   :  { %v5647_v14 = vpop.eup %5646 }
 0xfca   :  { %v3257_v26 = vadd.f32 1.0, %v5647_v14  ;;  %v5649_v48 = vpop.eup %5648 }
 0xfcb   :  { %v3264_v1 = vadd.f32 1.0, %v5649_v48 }
 0xfcc   :  { %5650 = vrcp.f32 %v3257_v26 }
 0xfcd   :  { %5652 = vrcp.f32 %v3264_v1 }
 0xfd6   :  { %v5651_v47 = vpop.eup %5650 }
 0xfd7   :  { %v3267_v43 = vmul.f32 %v5651_v47, %v3250_v35  ;;  %v5653_v44 = vpop.eup %5652 }
 0xfd8   :  { %v3270_v18 = vsub.f32 1.0, %v5653_v44  ;;  %v3272_v23 = vmul.f32 %v5653_v44, %v3110_v39 }
 0xfd9   :  { %v3268_v7 = vadd.f32 %v3267_v43, %v2110_v62 }
 0xfdb   :  { %5654 = vtanh.f32 %v3268_v7 }
 0xfe5   :  { %v5655_v49 = vpop.eup %5654 }
 0xfe6   :  { %v3271_v28 = vmul.f32 %v5655_v49, %v3270_v18 }
 0xfe8   :  { %v3273_v42 = vadd.f32 %v3272_v23, %v3271_v28 }
 0xfea   :  { %3274 = vst [vmem:[%s7017_s9 + $0x30] sm:$0xff] %v3273_v42  ;;  %3340 = vmatmul.mubr.f32.vlgmr.msra.gmra.mrb[30].mxu0 %v3273_v42  ;;  %4427 = vmatmul.mubr.f32.vlgmr.msra.gmra.mrb[46].mxu1 %v3273_v42 }
0x10bd   :  { %v3341_v61 = vpop.f32.mrb[30].mxu0  ;;  %v3412_v10 = vpop.f32.mrb[46].mxu1 }
0x10be   :  { %v5458_v2 = vadd.f32 %v6693_v21, %v3341_v61  ;;  %v3343_v19 = vpop.f32.mrb[31].mxu0  ;;  %v4428_v40 = vpop.f32.mrb[47].mxu1  ;;  %v3413_v29 = vadd.f32 %v3412_v10, %v6700_v52 }
0x10bf   :  { %v5460_v51 = vadd.f32 %v6695_v34, %v3343_v19 }
0x10c0   :  { %v3500_v60 = vmul.f32 -1.442695, %v5458_v2 }
0x10c1   :  { %v3501_v63 = vmul.f32 -1.442695, %v5460_v51 }
0x10c2   :  { %5656 = vpow2.f32 %v3500_v60 }
0x10c3   :  { %5658 = vpow2.f32 %v3501_v63 }
0x10cc   :  { %v5657_v37 = vpop.eup %5656 }
0x10cd   :  { %v3420_v54 = vadd.f32 1.0, %v5657_v37  ;;  %v5659_v31 = vpop.eup %5658 }
0x10ce   :  { %v3427_v8 = vadd.f32 1.0, %v5659_v31 }
0x10cf   :  { %5660 = vrcp.f32 %v3420_v54 }
0x10d0   :  { %5662 = vrcp.f32 %v3427_v8 }
0x10d9   :  { %v5661_v24 = vpop.eup %5660 }
0x10da   :  { %v3430_v21 = vmul.f32 %v5661_v24, %v3413_v29  ;;  %v5663_v5 = vpop.eup %5662 }
0x10db   :  { %v3433_v34 = vsub.f32 1.0, %v5663_v5  ;;  %v3435_v50 = vmul.f32 %v5663_v5, %v3273_v42 }
0x10dc   :  { %v3431_v32 = vadd.f32 %v3430_v21, %v2115_v30 }
0x10de   :  { %5664 = vtanh.f32 %v3431_v32 }
0x10e8   :  { %v5665_v41 = vpop.eup %5664 }
0x10e9   :  { %v3434_v46 = vmul.f32 %v5665_v41, %v3433_v34 }
0x10eb   :  { %v3436_v57 = vadd.f32 %v3435_v50, %v3434_v46 }
0x10ed   :  { %3437 = vst [vmem:[%s7017_s9 + $0x38] sm:$0xff] %v3436_v57  ;;  %3502 = vst [vmem:[%s7018_s10 + $0x8] sm:$0xff] %v3436_v57 }
0x10ee   :  { %3449 = vsyncpa [#allocation4], 1 }
0x10ef   :  { %3450 = vsyncpa [#allocation6], 1 }
0x10f0   :  { %3451 = vsyncpa [#allocation9], 1 }
0x10f1   :  { %3452 = vsyncpa [#allocation12], 1 }
0x10f2   :  { %3453 = vsyncpa [#allocation15], 1 }

// kernel: _lambda_.3
= control target key start
LH: loop header
LB: loop body
LE: loop exit
PB: predicated region body
PF: predicated region fallthrough
CT: control target
= control target key end

     0   :  { %s13776_s0 = inlined_call_operand.vmem [shape: f32[8,1024], index: 0, kind: input, shape index: {}]   ;;  %s13777_s1 = inlined_call_operand.vmem [shape: f32[8,256], index: 1, kind: input, shape index: {}]   ;;  %s13778_s2 = inlined_call_operand.hbm [shape: bf16[1024,1024], index: 2, kind: input, shape index: {}]   ;;  %s13779_s3 = inlined_call_operand.hbm [shape: bf16[256,1024], index: 3, kind: input, shape index: {}]   ;;  %s13780_s4 = inlined_call_operand.hbm [shape: f32[1,1024], index: 4, kind: input, shape index: {}]   ;;  %s13781_s5 = inlined_call_operand.hbm [shape: bf16[1024,1024], index: 5, kind: input, shape index: {}]   ;;  %s13782_s6 = inlined_call_operand.hbm [shape: f32[1,1024], index: 6, kind: input, shape index: {}]   ;;  %s13783_s7 = inlined_call_operand.hbm [shape: bf16[1024,512], index: 7, kind: input, shape index: {}]   ;;  %s13784_s8 = inlined_call_operand.hbm [shape: f32[1,512], index: 8, kind: input, shape index: {}]   ;;  %s13785_s9 = inlined_call_operand.hbm [shape: f32[512,128], index: 9, kind: input, shape index: {}]   ;;  %s13786_s10 = inlined_call_operand.hbm [shape: f32[1,128], index: 10, kind: input, shape index: {}]   ;;  %s13787_s11 = inlined_call_operand.vmem [shape: f32[128,1], index: 11, kind: input, shape index: {}]   ;;  %s13788_s12 = inlined_call_operand.<no memory space> [shape: f32[1,1], index: 12, kind: input, shape index: {}]   ;;  %s13789_s13 = inlined_call_operand.vmem [shape: f32[8,1], index: 13, kind: output, shape index: {}]  }
   0x1   :  { %v18_v0 = vstv %s13788_s12 }
   0x2   :  { %19 = vst [vmem:[#allocation2] sm:$0x1] %v18_v0 }
   0x3   :  { %20 = vsyncpa [#allocation4], 0 }
   0x4   :  { %21 = vsyncpa [#allocation6], 0 }
   0x5   :  { %22 = vsyncpa [#allocation9], 0 }
   0x6   :  { %23 = vsyncpa [#allocation12], 0 }
   0x7   :  { %24 = vsyncpa [#allocation15], 0  ;;  %s13213_s27 = smov [#allocation5]   ;;  %s13214_s29 = smov [#allocation8]  }
   0x8   :  { %s46_s28 = sshll.u32 %s13213_s27, 4  ;;  %s68_s30 = sshll.u32 %s13214_s29, 4  ;;  %s47_s28 = int_to_ptr.vmem [resolvable:$true] %s46_s28  ;;  %s13304_s30 = int_to_ptr.vmem [resolvable:$true] %s68_s30 }
   0x9   :  { %s13005_s16 = scalar_lea.hbm %s13779_s3, 16384 }
   0xa   :  { %p13006_p0 = scmp.ne.s32.totalorder %s13779_s3, %s13005_s16  ;;  %p13009_p1 = scmp.lt.u32.totalorder %s13005_s16, %s13779_s3 }
   0xc   :  { %p13011_p2 = pnand %p13009_p1, %p13006_p0 }
   0xe   :  { %13014 = shalt.err (!%p13011_p2)
}
   0xf   :  { %s13015_s20 = scalar_lea.vmem %s47_s28, 16384  ;;  %p13020_p4 = scmp.lt.s32.totalorder %s47_s28, %s47_s28 }
  0x10   :  { %p13016_p3 = scmp.ne.s32.totalorder %s47_s28, %s13015_s20  ;;  %p13021_p5 = scmp.lt.s32.totalorder %s13015_s20, %s13015_s20 }
  0x12   :  { %p13022_p6 = por %p13021_p5, %p13020_p4 }
  0x14   :  { %p13023_p7 = pnand %p13022_p6, %p13016_p3 }
  0x16   :  { %13026 = shalt.err (!%p13023_p7)
}
  0x17   :  { %s13215_s21 = smov 512   ;;  %s13216_s22 = smov 32  }
  0x18   :  { %52 = dma.hbm_to_vmem [thread:$0]  %s13779_s3, 16384, %s47_s28, [#allocation6], %s13215_s21, %s13215_s21, %s13216_s22  }
  0x19   :  { %s13027_s27 = scalar_lea.hbm %s13781_s5, 65536 }
  0x1a   :  { %p13028_p8 = scmp.ne.s32.totalorder %s13781_s5, %s13027_s27  ;;  %p13031_p9 = scmp.lt.u32.totalorder %s13027_s27, %s13781_s5 }
  0x1c   :  { %p13033_p10 = pnand %p13031_p9, %p13028_p8 }
  0x1e   :  { %13036 = shalt.err (!%p13033_p10)
}
  0x1f   :  { %s13037_s17 = scalar_lea.vmem %s13304_s30, 65536  ;;  %p13042_p12 = scmp.lt.s32.totalorder %s13304_s30, %s13304_s30 }
  0x20   :  { %p13038_p11 = scmp.ne.s32.totalorder %s13304_s30, %s13037_s17  ;;  %p13043_p13 = scmp.lt.s32.totalorder %s13037_s17, %s13037_s17 }
  0x22   :  { %p13044_p0 = por %p13043_p13, %p13042_p12 }
  0x24   :  { %p13045_p1 = pnand %p13044_p0, %p13038_p11 }
  0x26   :  { %13048 = shalt.err (!%p13045_p1)
}
  0x27   :  { %74 = dma.hbm_to_vmem [thread:$0]  %s13781_s5, 65536, %s13304_s30, [#allocation9], %s13215_s21, %s13215_s21, %s13216_s22  }
  0x28   :  { %s13217_s18 = smov [#allocation11]   ;;  %s13049_s23 = scalar_lea.hbm %s13783_s7, 32768 }
  0x29   :  { %s90_s12 = sshll.u32 %s13217_s18, 4  ;;  %p13050_p2 = scmp.ne.s32.totalorder %s13783_s7, %s13049_s23  ;;  %s91_s12 = int_to_ptr.vmem [resolvable:$true] %s90_s12 }
  0x2a   :  { %p13053_p3 = scmp.lt.u32.totalorder %s13049_s23, %s13783_s7 }
  0x2c   :  { %p13055_p4 = pnand %p13053_p3, %p13050_p2 }
  0x2e   :  { %13058 = shalt.err (!%p13055_p4)
}
  0x2f   :  { %s13059_s29 = scalar_lea.vmem %s91_s12, 32768  ;;  %p13064_p6 = scmp.lt.s32.totalorder %s91_s12, %s91_s12 }
  0x30   :  { %p13060_p5 = scmp.ne.s32.totalorder %s91_s12, %s13059_s29  ;;  %p13065_p7 = scmp.lt.s32.totalorder %s13059_s29, %s13059_s29 }
  0x32   :  { %p13066_p8 = por %p13065_p7, %p13064_p6 }
  0x34   :  { %p13067_p9 = pnand %p13066_p8, %p13060_p5 }
  0x36   :  { %13070 = shalt.err (!%p13067_p9)
}
  0x37   :  { %s13218_s5 = smov 256   ;;  %s13219_s30 = smov 16  }
  0x38   :  { %96 = dma.hbm_to_vmem [thread:$0]  %s13783_s7, 32768, %s91_s12, [#allocation12], %s13218_s5, %s13218_s5, %s13219_s30  }
  0x39   :  { %s13220_s16 = smov [#allocation14]   ;;  %s13071_s18 = scalar_lea.hbm %s13785_s9, 8192 }
  0x3a   :  { %s112_s17 = sshll.u32 %s13220_s16, 4  ;;  %p13072_p10 = scmp.ne.s32.totalorder %s13785_s9, %s13071_s18  ;;  %s113_s17 = int_to_ptr.vmem [resolvable:$true] %s112_s17 }
  0x3b   :  { %p13075_p11 = scmp.lt.u32.totalorder %s13071_s18, %s13785_s9 }
  0x3d   :  { %p13077_p12 = pnand %p13075_p11, %p13072_p10 }
  0x3f   :  { %13080 = shalt.err (!%p13077_p12)
}
  0x40   :  { %s13081_s25 = scalar_lea.vmem %s113_s17, 8192  ;;  %p13086_p0 = scmp.lt.s32.totalorder %s113_s17, %s113_s17 }
  0x41   :  { %p13082_p13 = scmp.ne.s32.totalorder %s113_s17, %s13081_s25  ;;  %p13087_p1 = scmp.lt.s32.totalorder %s13081_s25, %s13081_s25 }
  0x43   :  { %p13088_p2 = por %p13087_p1, %p13086_p0 }
  0x45   :  { %p13089_p3 = pnand %p13088_p2, %p13082_p13 }
  0x47   :  { %13092 = shalt.err (!%p13089_p3)
}
  0x48   :  { %s13221_s7 = smov 128   ;;  %s13222_s12 = smov 8  }
  0x49   :  { %118 = dma.hbm_to_vmem [thread:$0]  %s13785_s9, 8192, %s113_s17, [#allocation15], %s13221_s7, %s13221_s7, %s13222_s12  }
  0x4a   :  { %s13223_s29 = smov [#allocation3]   ;;  %s13224_s30 = smov [#allocation7]  }
  0x4b   :  { %s34_s5 = sshll.u32 %s13223_s29, 4  ;;  %s59_s14 = sshll.u32 %s13224_s30, 4  ;;  %s35_s5 = int_to_ptr.vmem [resolvable:$true] %s34_s5  ;;  %s60_s14 = int_to_ptr.vmem [resolvable:$true] %s59_s14 }
  0x4c   :  { %s13093_s3 = scalar_lea.hbm %s13778_s2, 65536 }
  0x4d   :  { %p13094_p4 = scmp.ne.s32.totalorder %s13778_s2, %s13093_s3  ;;  %p13097_p5 = scmp.lt.u32.totalorder %s13093_s3, %s13778_s2 }
  0x4f   :  { %p13099_p6 = pnand %p13097_p5, %p13094_p4 }
  0x51   :  { %13102 = shalt.err (!%p13099_p6)
}
  0x52   :  { %s13103_s9 = scalar_lea.vmem %s35_s5, 65536  ;;  %p13108_p8 = scmp.lt.s32.totalorder %s35_s5, %s35_s5 }
  0x53   :  { %p13104_p7 = scmp.ne.s32.totalorder %s35_s5, %s13103_s9  ;;  %p13109_p9 = scmp.lt.s32.totalorder %s13103_s9, %s13103_s9 }
  0x55   :  { %p13110_p10 = por %p13109_p9, %p13108_p8 }
  0x57   :  { %p13111_p11 = pnand %p13110_p10, %p13104_p7 }
  0x59   :  { %13114 = shalt.err (!%p13111_p11)
}
  0x5a   :  { %40 = dma.hbm_to_vmem [thread:$0]  %s13778_s2, 65536, %s35_s5, [#allocation4], %s13215_s21, %s13215_s21, %s13216_s22  }
  0x5b   :  { %s13115_s7 = scalar_lea.hbm %s13780_s4, 128 }
  0x5c   :  { %p13116_p12 = scmp.ne.s32.totalorder %s13780_s4, %s13115_s7  ;;  %p13119_p13 = scmp.lt.u32.totalorder %s13115_s7, %s13780_s4 }
  0x5e   :  { %p13121_p0 = pnand %p13119_p13, %p13116_p12 }
  0x60   :  { %13124 = shalt.err (!%p13121_p0)
}
  0x61   :  { %s13125_s30 = scalar_lea.vmem %s60_s14, 128  ;;  %p13130_p2 = scmp.lt.s32.totalorder %s60_s14, %s60_s14 }
  0x62   :  { %p13126_p1 = scmp.ne.s32.totalorder %s60_s14, %s13125_s30  ;;  %p13131_p3 = scmp.lt.s32.totalorder %s13125_s30, %s13125_s30 }
  0x64   :  { %p13132_p4 = por %p13131_p3, %p13130_p2 }
  0x66   :  { %p13133_p5 = pnand %p13132_p4, %p13126_p1 }
  0x68   :  { %13136 = shalt.err (!%p13133_p5)
}
  0x69   :  { %62 = dma.hbm_to_vmem [thread:$0]  %s13780_s4, 128, %s60_s14, [#allocation6]  }
  0x6a   :  { %s13225_s22 = smov [#allocation10]   ;;  %s13226_s15 = smov [#allocation13]  }
  0x6b   :  { %s81_s5 = sshll.u32 %s13225_s22, 4  ;;  %s103_s16 = sshll.u32 %s13226_s15, 4  ;;  %s82_s5 = int_to_ptr.vmem [resolvable:$true] %s81_s5  ;;  %s104_s16 = int_to_ptr.vmem [resolvable:$true] %s103_s16 }
  0x6c   :  { %s13137_s18 = scalar_lea.hbm %s13782_s6, 128 }
  0x6d   :  { %p13138_p6 = scmp.ne.s32.totalorder %s13782_s6, %s13137_s18  ;;  %p13141_p7 = scmp.lt.u32.totalorder %s13137_s18, %s13782_s6 }
  0x6f   :  { %p13143_p8 = pnand %p13141_p7, %p13138_p6 }
  0x71   :  { %13146 = shalt.err (!%p13143_p8)
}
  0x72   :  { %s13147_s4 = scalar_lea.vmem %s82_s5, 128  ;;  %p13152_p10 = scmp.lt.s32.totalorder %s82_s5, %s82_s5 }
  0x73   :  { %p13148_p9 = scmp.ne.s32.totalorder %s82_s5, %s13147_s4  ;;  %p13153_p11 = scmp.lt.s32.totalorder %s13147_s4, %s13147_s4 }
  0x75   :  { %p13154_p12 = por %p13153_p11, %p13152_p10 }
  0x77   :  { %p13155_p13 = pnand %p13154_p12, %p13148_p9 }
  0x79   :  { %13158 = shalt.err (!%p13155_p13)
}
  0x7a   :  { %84 = dma.hbm_to_vmem [thread:$0]  %s13782_s6, 128, %s82_s5, [#allocation9]  }
  0x7b   :  { %s13159_s7 = scalar_lea.hbm %s13784_s8, 64 }
  0x7c   :  { %p13160_p0 = scmp.ne.s32.totalorder %s13784_s8, %s13159_s7  ;;  %p13163_p1 = scmp.lt.u32.totalorder %s13159_s7, %s13784_s8 }
  0x7e   :  { %p13165_p2 = pnand %p13163_p1, %p13160_p0 }
  0x80   :  { %13168 = shalt.err (!%p13165_p2)
}
  0x81   :  { %s13169_s30 = scalar_lea.vmem %s104_s16, 64  ;;  %p13174_p4 = scmp.lt.s32.totalorder %s104_s16, %s104_s16 }
  0x82   :  { %p13170_p3 = scmp.ne.s32.totalorder %s104_s16, %s13169_s30  ;;  %p13175_p5 = scmp.lt.s32.totalorder %s13169_s30, %s13169_s30 }
  0x84   :  { %p13176_p6 = por %p13175_p5, %p13174_p4 }
  0x86   :  { %p13177_p7 = pnand %p13176_p6, %p13170_p3 }
  0x88   :  { %13180 = shalt.err (!%p13177_p7)
}
  0x89   :  { %106 = dma.hbm_to_vmem [thread:$0]  %s13784_s8, 64, %s104_s16, [#allocation12]  }
  0x8a   :  { %s13227_s21 = smov [#allocation16]   ;;  %s13181_s3 = scalar_lea.hbm %s13786_s10, 16 }
  0x8b   :  { %s125_s22 = sshll.u32 %s13227_s21, 4  ;;  %p13182_p8 = scmp.ne.s32.totalorder %s13786_s10, %s13181_s3  ;;  %s126_s22 = int_to_ptr.vmem [resolvable:$true] %s125_s22 }
  0x8c   :  { %p13185_p9 = scmp.lt.u32.totalorder %s13181_s3, %s13786_s10 }
  0x8e   :  { %p13187_p10 = pnand %p13185_p9, %p13182_p8 }
  0x90   :  { %13190 = shalt.err (!%p13187_p10)
}
  0x91   :  { %s13191_s9 = scalar_lea.vmem %s126_s22, 16  ;;  %s13195_s8 = scalar_lea.vmem %s126_s22, 32 }
  0x92   :  { %p13192_p11 = scmp.ne.s32.totalorder %s126_s22, %s13191_s9  ;;  %p13196_p12 = scmp.lt.s32.totalorder %s126_s22, %s126_s22 }
  0x93   :  { %p13197_p13 = scmp.lt.s32.totalorder %s13195_s8, %s13191_s9 }
  0x95   :  { %p13198_p0 = por %p13197_p13, %p13196_p12 }
  0x97   :  { %p13199_p1 = pnand %p13198_p0, %p13192_p11 }
  0x99   :  { %13202 = shalt.err (!%p13199_p1)
}
  0x9a   :  { %128 = dma.hbm_to_vmem [thread:$0]  %s13786_s10, 16, %s126_s22, [#allocation15]  }
  0x9b   :  { %13203 = dma.done.wait [#allocation4], 65536  }
  0x9c   :  { %13204 = vsyncadd [#allocation4], 4294901760 }
  0x9d   :  { %13205 = dma.done.wait [#allocation6], 16512  }
  0x9e   :  { %13206 = vsyncadd [#allocation6], 4294950784 }
  0x9f   :  { %13207 = dma.done.wait [#allocation9], 65664  }
  0xa0   :  { %13208 = vsyncadd [#allocation9], 4294901632 }
  0xa1   :  { %13209 = dma.done.wait [#allocation12], 32832  }
  0xa2   :  { %13210 = vsyncadd [#allocation12], 4294934464 }
  0xa3   :  { %13211 = dma.done.wait [#allocation15], 8208  }
  0xa4   :  { %13212 = vsyncadd [#allocation15], 4294959088  ;;  %v692_v1 = vld [vmem:[#allocation5] sm:$0xff]  ;;  %v693_v3 = vld [vmem:[#allocation5 + $0x8] sm:$0xff]  ;;  %vm13229_vm0 = vmmov 0   ;;  %vm10878_vm1 = vcmask 7168  }
  0xa5   :  { %v696_v2 = vld [vmem:[#allocation5 + $0x20] sm:$0xff]  ;;  %v697_v5 = vld [vmem:[#allocation5 + $0x28] sm:$0xff] }
  0xa6   :  { %v10890_v4 = vcombine.high %v692_v1, %v696_v2  ;;  %v10889_v6 = vcombine.low %v692_v1, %v696_v2  ;;  %v700_v7 = vld [vmem:[#allocation5 + $0x40] sm:$0xff]  ;;  %v10892_v9 = vcombine.high %v693_v3, %v697_v5  ;;  %v10891_v10 = vcombine.low %v693_v3, %v697_v5  ;;  %v701_v12 = vld [vmem:[#allocation5 + $0x48] sm:$0xff] }
  0xa7   :  { %v704_v8 = vld [vmem:[#allocation5 + $0x60] sm:$0xff]  ;;  %v705_v13 = vld [vmem:[#allocation5 + $0x68] sm:$0xff] }
  0xa8   :  { %v10898_v11 = vcombine.high %v700_v7, %v704_v8  ;;  %v708_v14 = vld [vmem:[#allocation5 + $0x80] sm:$0xff]  ;;  %1460 = vmatprep.subr.bf16.mxu0 %v10890_v4  ;;  %v10900_v15 = vcombine.high %v701_v12, %v705_v13  ;;  %v709_v17 = vld [vmem:[#allocation5 + $0x88] sm:$0xff]  ;;  %1501 = vmatprep.subr.bf16.mxu1 %v10892_v9  ;;  %v10897_v19 = vcombine.low %v700_v7, %v704_v8 }
  0xa9   :  { %v712_v16 = vld [vmem:[#allocation5 + $0xa0] sm:$0xff]  ;;  %v713_v18 = vld [vmem:[#allocation5 + $0xa8] sm:$0xff]  ;;  %1461 = vmatpush1.bf16.msra.mxu0 %v10889_v6  ;;  %1502 = vmatpush1.bf16.msra.mxu1 %v10891_v10  ;;  %v10899_v20 = vcombine.low %v701_v12, %v705_v13 }
  0xaa   :  { %1462 = vmatprep.subr.bf16.mxu0 %v10898_v11  ;;  %v10906_v21 = vcombine.high %v708_v14, %v712_v16  ;;  %1503 = vmatprep.subr.bf16.mxu1 %v10900_v15  ;;  %v10908_v22 = vcombine.high %v709_v17, %v713_v18  ;;  %v716_v23 = vld [vmem:[#allocation5 + $0xc0] sm:$0xff]  ;;  %v717_v25 = vld [vmem:[#allocation5 + $0xc8] sm:$0xff]  ;;  %v10905_v27 = vcombine.low %v708_v14, %v712_v16 }
  0xab   :  { %v720_v24 = vld [vmem:[#allocation5 + $0xe0] sm:$0xff]  ;;  %v721_v26 = vld [vmem:[#allocation5 + $0xe8] sm:$0xff]  ;;  %v10907_v28 = vcombine.low %v709_v17, %v713_v18 }
  0xac   :  { %v10914_v29 = vcombine.high %v716_v23, %v720_v24  ;;  %v10916_v30 = vcombine.high %v717_v25, %v721_v26  ;;  %v724_v31 = vld [vmem:[#allocation5 + $0x100] sm:$0xff]  ;;  %v725_v33 = vld [vmem:[#allocation5 + $0x108] sm:$0xff]  ;;  %v10913_v35 = vcombine.low %v716_v23, %v720_v24  ;;  %v10915_v36 = vcombine.low %v717_v25, %v721_v26 }
  0xad   :  { %1463 = vmatpush1.bf16.msra.mxu0 %v10897_v19  ;;  %1504 = vmatpush1.bf16.msra.mxu1 %v10899_v20  ;;  %v728_v32 = vld [vmem:[#allocation5 + $0x120] sm:$0xff]  ;;  %v729_v34 = vld [vmem:[#allocation5 + $0x128] sm:$0xff] }
  0xae   :  { %1464 = vmatprep.subr.bf16.mxu0 %v10906_v21  ;;  %1505 = vmatprep.subr.bf16.mxu1 %v10908_v22  ;;  %v10922_v37 = vcombine.high %v724_v31, %v728_v32  ;;  %v10924_v38 = vcombine.high %v725_v33, %v729_v34  ;;  %v732_v39 = vld [vmem:[#allocation5 + $0x140] sm:$0xff]  ;;  %v733_v41 = vld [vmem:[#allocation5 + $0x148] sm:$0xff]  ;;  %v10921_v43 = vcombine.low %v724_v31, %v728_v32 }
  0xaf   :  { %v736_v40 = vld [vmem:[#allocation5 + $0x160] sm:$0xff]  ;;  %v737_v42 = vld [vmem:[#allocation5 + $0x168] sm:$0xff]  ;;  %v10923_v44 = vcombine.low %v725_v33, %v729_v34 }
  0xb0   :  { %v10930_v45 = vcombine.high %v732_v39, %v736_v40  ;;  %v10932_v46 = vcombine.high %v733_v41, %v737_v42  ;;  %v740_v47 = vld [vmem:[#allocation5 + $0x180] sm:$0xff]  ;;  %v741_v49 = vld [vmem:[#allocation5 + $0x188] sm:$0xff]  ;;  %v10929_v51 = vcombine.low %v732_v39, %v736_v40  ;;  %v10931_v52 = vcombine.low %v733_v41, %v737_v42 }
  0xb1   :  { %1465 = vmatpush1.bf16.msra.mxu0 %v10905_v27  ;;  %1506 = vmatpush1.bf16.msra.mxu1 %v10907_v28  ;;  %v744_v48 = vld [vmem:[#allocation5 + $0x1a0] sm:$0xff]  ;;  %v745_v50 = vld [vmem:[#allocation5 + $0x1a8] sm:$0xff] }
  0xb2   :  { %1466 = vmatprep.subr.bf16.mxu0 %v10914_v29  ;;  %1507 = vmatprep.subr.bf16.mxu1 %v10916_v30  ;;  %v10938_v53 = vcombine.high %v740_v47, %v744_v48  ;;  %v689_v54 = vld [vmem:[%s13777_s1 + $0x8] sm:$0xff]  ;;  %v10940_v55 = vcombine.high %v741_v49, %v745_v50  ;;  %v10937_v61 = vcombine.low %v740_v47, %v744_v48 }
  0xb3   :  { %v748_v56 = vld [vmem:[#allocation5 + $0x1c0] sm:$0xff]  ;;  %v13431_v58 = vpack.c.bf16 %v689_v54, %v689_v54  ;;  %v749_v59 = vld [vmem:[#allocation5 + $0x1c8] sm:$0xff]  ;;  %v10939_v62 = vcombine.low %v741_v49, %v745_v50 }
  0xb4   :  { %v752_v57 = vld [vmem:[#allocation5 + $0x1e0] sm:$0xff]  ;;  %v753_v60 = vld [vmem:[#allocation5 + $0x1e8] sm:$0xff] }
  0xb5   :  { %1467 = vmatpush1.bf16.msra.mxu0 %v10913_v35  ;;  %1508 = vmatpush1.bf16.msra.mxu1 %v10915_v36  ;;  %v10946_v63 = vcombine.high %v748_v56, %v752_v57  ;;  %v10948_v0 = vcombine.high %v749_v59, %v753_v60  ;;  %v756_v1 = vld [vmem:[#allocation5 + $0x200] sm:$0xff]  ;;  %v757_v3 = vld [vmem:[#allocation5 + $0x208] sm:$0xff]  ;;  %v10945_v5 = vcombine.low %v748_v56, %v752_v57 }
  0xb6   :  { %1468 = vmatprep.subr.bf16.mxu0 %v10922_v37  ;;  %1509 = vmatprep.subr.bf16.mxu1 %v10924_v38  ;;  %v760_v2 = vld [vmem:[#allocation5 + $0x220] sm:$0xff]  ;;  %v761_v4 = vld [vmem:[#allocation5 + $0x228] sm:$0xff]  ;;  %v10947_v6 = vcombine.low %v749_v59, %v753_v60 }
  0xb7   :  { %1492 = vmatprep.mubr.bf16.mxu0 %v13431_v58  ;;  %1533 = vmatprep.mubr.bf16.mxu1 %v13431_v58  ;;  %v10954_v7 = vcombine.high %v756_v1, %v760_v2  ;;  %v10956_v8 = vcombine.high %v757_v3, %v761_v4  ;;  %v764_v9 = vld [vmem:[#allocation5 + $0x240] sm:$0xff]  ;;  %v765_v11 = vld [vmem:[#allocation5 + $0x248] sm:$0xff]  ;;  %v10953_v13 = vcombine.low %v756_v1, %v760_v2  ;;  %v694_v2 = vld [vmem:[#allocation5 + $0x10] sm:$0xff] }
  0xb8   :  { %v768_v10 = vld [vmem:[#allocation5 + $0x260] sm:$0xff]  ;;  %v769_v12 = vld [vmem:[#allocation5 + $0x268] sm:$0xff]  ;;  %v10955_v14 = vcombine.low %v757_v3, %v761_v4  ;;  %v698_v3 = vld [vmem:[#allocation5 + $0x30] sm:$0xff] }
  0xb9   :  { %1469 = vmatpush1.bf16.msra.mxu0 %v10921_v43  ;;  %1510 = vmatpush1.bf16.msra.mxu1 %v10923_v44  ;;  %v10962_v15 = vcombine.high %v764_v9, %v768_v10  ;;  %v10964_v16 = vcombine.high %v765_v11, %v769_v12  ;;  %v772_v17 = vld [vmem:[#allocation5 + $0x280] sm:$0xff]  ;;  %v773_v19 = vld [vmem:[#allocation5 + $0x288] sm:$0xff]  ;;  %v10961_v21 = vcombine.low %v764_v9, %v768_v10  ;;  %v695_v4 = vld [vmem:[#allocation5 + $0x18] sm:$0xff] }
  0xba   :  { %1470 = vmatprep.subr.bf16.mxu0 %v10930_v45  ;;  %1511 = vmatprep.subr.bf16.mxu1 %v10932_v46  ;;  %v776_v18 = vld [vmem:[#allocation5 + $0x2a0] sm:$0xff]  ;;  %v777_v20 = vld [vmem:[#allocation5 + $0x2a8] sm:$0xff]  ;;  %v10963_v22 = vcombine.low %v765_v11, %v769_v12  ;;  %v10894_v9 = vcombine.high %v694_v2, %v698_v3  ;;  %v702_v11 = vld [vmem:[#allocation5 + $0x50] sm:$0xff] }
  0xbb   :  { %v10970_v23 = vcombine.high %v772_v17, %v776_v18  ;;  %v10972_v24 = vcombine.high %v773_v19, %v777_v20  ;;  %v780_v25 = vld [vmem:[#allocation5 + $0x2c0] sm:$0xff]  ;;  %v781_v27 = vld [vmem:[#allocation5 + $0x2c8] sm:$0xff]  ;;  %v10969_v29 = vcombine.low %v772_v17, %v776_v18  ;;  %v10971_v30 = vcombine.low %v773_v19, %v777_v20  ;;  %v706_v12 = vld [vmem:[#allocation5 + $0x70] sm:$0xff] }
  0xbc   :  { %v784_v26 = vld [vmem:[#allocation5 + $0x2e0] sm:$0xff]  ;;  %v785_v28 = vld [vmem:[#allocation5 + $0x2e8] sm:$0xff]  ;;  %v10902_v18 = vcombine.high %v702_v11, %v706_v12  ;;  %v710_v20 = vld [vmem:[#allocation5 + $0x90] sm:$0xff] }
  0xbd   :  { %1471 = vmatpush1.bf16.msra.mxu0 %v10929_v51  ;;  %1512 = vmatpush1.bf16.msra.mxu1 %v10931_v52  ;;  %v10978_v31 = vcombine.high %v780_v25, %v784_v26  ;;  %v10980_v32 = vcombine.high %v781_v27, %v785_v28  ;;  %v788_v33 = vld [vmem:[#allocation5 + $0x300] sm:$0xff]  ;;  %v789_v35 = vld [vmem:[#allocation5 + $0x308] sm:$0xff]  ;;  %v10977_v37 = vcombine.low %v780_v25, %v784_v26 }
  0xbe   :  { %1472 = vmatprep.subr.bf16.mxu0 %v10938_v53  ;;  %1513 = vmatprep.subr.bf16.mxu1 %v10940_v55  ;;  %v792_v34 = vld [vmem:[#allocation5 + $0x320] sm:$0xff]  ;;  %v793_v36 = vld [vmem:[#allocation5 + $0x328] sm:$0xff]  ;;  %v10979_v38 = vcombine.low %v781_v27, %v785_v28  ;;  %v718_v27 = vld [vmem:[#allocation5 + $0xd0] sm:$0xff] }
  0xbf   :  { %v10986_v39 = vcombine.high %v788_v33, %v792_v34  ;;  %v10988_v40 = vcombine.high %v789_v35, %v793_v36  ;;  %v796_v41 = vld [vmem:[#allocation5 + $0x340] sm:$0xff]  ;;  %v797_v43 = vld [vmem:[#allocation5 + $0x348] sm:$0xff]  ;;  %v10985_v45 = vcombine.low %v788_v33, %v792_v34  ;;  %v10987_v46 = vcombine.low %v789_v35, %v793_v36  ;;  %v722_v28 = vld [vmem:[#allocation5 + $0xf0] sm:$0xff] }
  0xc0   :  { %v800_v42 = vld [vmem:[#allocation5 + $0x360] sm:$0xff]  ;;  %v801_v44 = vld [vmem:[#allocation5 + $0x368] sm:$0xff]  ;;  %v10918_v34 = vcombine.high %v718_v27, %v722_v28  ;;  %v726_v35 = vld [vmem:[#allocation5 + $0x110] sm:$0xff] }
  0xc1   :  { %1473 = vmatpush1.bf16.msra.mxu0 %v10937_v61  ;;  %1514 = vmatpush1.bf16.msra.mxu1 %v10939_v62  ;;  %v10994_v47 = vcombine.high %v796_v41, %v800_v42  ;;  %v10996_v48 = vcombine.high %v797_v43, %v801_v44  ;;  %v804_v49 = vld [vmem:[#allocation5 + $0x380] sm:$0xff]  ;;  %v805_v51 = vld [vmem:[#allocation5 + $0x388] sm:$0xff]  ;;  %v10993_v53 = vcombine.low %v796_v41, %v800_v42  ;;  %v730_v36 = vld [vmem:[#allocation5 + $0x130] sm:$0xff] }
  0xc2   :  { %1474 = vmatprep.subr.bf16.mxu0 %v10946_v63  ;;  %1515 = vmatprep.subr.bf16.mxu1 %v10948_v0  ;;  %v808_v50 = vld [vmem:[#allocation5 + $0x3a0] sm:$0xff]  ;;  %v809_v52 = vld [vmem:[#allocation5 + $0x3a8] sm:$0xff]  ;;  %v10995_v54 = vcombine.low %v797_v43, %v801_v44  ;;  %v10926_v42 = vcombine.high %v726_v35, %v730_v36  ;;  %v734_v43 = vld [vmem:[#allocation5 + $0x150] sm:$0xff] }
  0xc3   :  { %v11002_v55 = vcombine.high %v804_v49, %v808_v50  ;;  %v11004_v56 = vcombine.high %v805_v51, %v809_v52  ;;  %v812_v57 = vld [vmem:[#allocation5 + $0x3c0] sm:$0xff]  ;;  %v813_v60 = vld [vmem:[#allocation5 + $0x3c8] sm:$0xff]  ;;  %v11001_v62 = vcombine.low %v804_v49, %v808_v50  ;;  %v11003_v63 = vcombine.low %v805_v51, %v809_v52  ;;  %v735_v44 = vld [vmem:[#allocation5 + $0x158] sm:$0xff] }
  0xc4   :  { %v816_v59 = vld [vmem:[#allocation5 + $0x3e0] sm:$0xff]  ;;  %v817_v61 = vld [vmem:[#allocation5 + $0x3e8] sm:$0xff]  ;;  %v742_v50 = vld [vmem:[#allocation5 + $0x190] sm:$0xff] }
  0xc5   :  { %1475 = vmatpush1.bf16.msra.mxu0 %v10945_v5  ;;  %1516 = vmatpush1.bf16.msra.mxu1 %v10947_v6  ;;  %v11010_v0 = vcombine.high %v812_v57, %v816_v59  ;;  %v11012_v1 = vcombine.high %v813_v60, %v817_v61  ;;  %v699_v5 = vld [vmem:[#allocation5 + $0x38] sm:$0xff]  ;;  %v11009_v6 = vcombine.low %v812_v57, %v816_v59  ;;  %v746_v51 = vld [vmem:[#allocation5 + $0x1b0] sm:$0xff] }
  0xc6   :  { %1476 = vmatprep.subr.bf16.mxu0 %v10954_v7  ;;  %1517 = vmatprep.subr.bf16.mxu1 %v10956_v8  ;;  %v688_v7 = vld [vmem:[%s13777_s1] sm:$0xff]  ;;  %v11011_v8 = vcombine.low %v813_v60, %v817_v61  ;;  %v10896_v10 = vcombine.high %v695_v4, %v699_v5  ;;  %v10895_v17 = vcombine.low %v695_v4, %v699_v5  ;;  %v750_v59 = vld [vmem:[#allocation5 + $0x1d0] sm:$0xff] }
  0xc7   :  { %v743_v52 = vld [vmem:[#allocation5 + $0x198] sm:$0xff]  ;;  %v10942_v57 = vcombine.high %v742_v50, %v746_v51  ;;  %v754_v60 = vld [vmem:[#allocation5 + $0x1f0] sm:$0xff] }
  0xc8   :  { %v751_v61 = vld [vmem:[#allocation5 + $0x1d8] sm:$0xff]  ;;  %v762_v4 = vld [vmem:[#allocation5 + $0x230] sm:$0xff] }
  0xc9   :  { %1477 = vmatpush1.bf16.msra.mxu0 %v10953_v13  ;;  %1518 = vmatpush1.bf16.msra.mxu1 %v10955_v14  ;;  %v13438_v13 = vpack.c.bf16 %v688_v7, %v688_v7  ;;  %v703_v14 = vld [vmem:[#allocation5 + $0x58] sm:$0xff] }
  0xca   :  { %1478 = vmatprep.subr.bf16.mxu0 %v10962_v15  ;;  %1519 = vmatprep.subr.bf16.mxu1 %v10964_v16  ;;  %v707_v15 = vld [vmem:[#allocation5 + $0x78] sm:$0xff]  ;;  %v10893_v16 = vcombine.low %v694_v2, %v698_v3  ;;  %v10950_v2 = vcombine.high %v750_v59, %v754_v60  ;;  %v758_v3 = vld [vmem:[#allocation5 + $0x210] sm:$0xff] }
  0xcb   :  { %v10904_v19 = vcombine.high %v703_v14, %v707_v15  ;;  %v10903_v25 = vcombine.low %v703_v14, %v707_v15  ;;  %v759_v5 = vld [vmem:[#allocation5 + $0x218] sm:$0xff] }
  0xcc   :  { %v763_v7 = vld [vmem:[#allocation5 + $0x238] sm:$0xff] }
  0xcd   :  { %1479 = vmatpush1.bf16.msra.mxu0 %v10961_v21  ;;  %1520 = vmatpush1.bf16.msra.mxu1 %v10963_v22  ;;  %v714_v21 = vld [vmem:[#allocation5 + $0xb0] sm:$0xff]  ;;  %v711_v22 = vld [vmem:[#allocation5 + $0x98] sm:$0xff]  ;;  %v10960_v15 = vcombine.high %v759_v5, %v763_v7 }
  0xce   :  { %1480 = vmatprep.subr.bf16.mxu0 %v10970_v23  ;;  %1521 = vmatprep.subr.bf16.mxu1 %v10972_v24  ;;  %v715_v23 = vld [vmem:[#allocation5 + $0xb8] sm:$0xff]  ;;  %v10901_v24 = vcombine.low %v702_v11, %v706_v12  ;;  %v10910_v26 = vcombine.high %v710_v20, %v714_v21  ;;  %v766_v11 = vld [vmem:[#allocation5 + $0x250] sm:$0xff] }
  0xcf   :  { %v10911_v33 = vcombine.low %v711_v22, %v715_v23  ;;  %v770_v12 = vld [vmem:[#allocation5 + $0x270] sm:$0xff]  ;;  %v767_v14 = vld [vmem:[#allocation5 + $0x258] sm:$0xff] }
  0xd1   :  { %1481 = vmatpush1.bf16.msra.mxu0 %v10969_v29  ;;  %1522 = vmatpush1.bf16.msra.mxu1 %v10971_v30  ;;  %v719_v29 = vld [vmem:[#allocation5 + $0xd8] sm:$0xff]  ;;  %v10912_v30 = vcombine.high %v711_v22, %v715_v23 }
  0xd2   :  { %1482 = vmatprep.subr.bf16.mxu0 %v10978_v31  ;;  %1523 = vmatprep.subr.bf16.mxu1 %v10980_v32  ;;  %v723_v31 = vld [vmem:[#allocation5 + $0xf8] sm:$0xff]  ;;  %v10909_v32 = vcombine.low %v710_v20, %v714_v21  ;;  %v774_v20 = vld [vmem:[#allocation5 + $0x290] sm:$0xff] }
  0xd3   :  { %v10919_v41 = vcombine.low %v719_v29, %v723_v31  ;;  %v778_v21 = vld [vmem:[#allocation5 + $0x2b0] sm:$0xff]  ;;  %v775_v22 = vld [vmem:[#allocation5 + $0x298] sm:$0xff] }
  0xd5   :  { %1483 = vmatpush1.bf16.msra.mxu0 %v10977_v37  ;;  %1524 = vmatpush1.bf16.msra.mxu1 %v10979_v38  ;;  %v727_v37 = vld [vmem:[#allocation5 + $0x118] sm:$0xff]  ;;  %v10920_v38 = vcombine.high %v719_v29, %v723_v31  ;;  %v786_v29 = vld [vmem:[#allocation5 + $0x2f0] sm:$0xff] }
  0xd6   :  { %1484 = vmatprep.subr.bf16.mxu0 %v10986_v39  ;;  %1525 = vmatprep.subr.bf16.mxu1 %v10988_v40  ;;  %v731_v39 = vld [vmem:[#allocation5 + $0x138] sm:$0xff]  ;;  %v10917_v40 = vcombine.low %v718_v27, %v722_v28  ;;  %v10974_v27 = vcombine.high %v774_v20, %v778_v21  ;;  %v782_v28 = vld [vmem:[#allocation5 + $0x2d0] sm:$0xff] }
  0xd9   :  { %1485 = vmatpush1.bf16.msra.mxu0 %v10985_v45  ;;  %1526 = vmatpush1.bf16.msra.mxu1 %v10987_v46  ;;  %v10928_v45 = vcombine.high %v727_v37, %v731_v39  ;;  %v739_v46 = vld [vmem:[#allocation5 + $0x178] sm:$0xff] }
  0xda   :  { %1486 = vmatprep.subr.bf16.mxu0 %v10994_v47  ;;  %1527 = vmatprep.subr.bf16.mxu1 %v10996_v48  ;;  %v10925_v47 = vcombine.low %v726_v35, %v730_v36  ;;  %v10927_v48 = vcombine.low %v727_v37, %v731_v39  ;;  %v10982_v35 = vcombine.high %v782_v28, %v786_v29  ;;  %v790_v36 = vld [vmem:[#allocation5 + $0x310] sm:$0xff] }
  0xdb   :  { %v794_v37 = vld [vmem:[#allocation5 + $0x330] sm:$0xff] }
  0xdd   :  { %1487 = vmatpush1.bf16.msra.mxu0 %v10993_v53  ;;  %1528 = vmatpush1.bf16.msra.mxu1 %v10995_v54  ;;  %v10936_v53 = vcombine.high %v735_v44, %v739_v46  ;;  %v747_v54 = vld [vmem:[#allocation5 + $0x1b8] sm:$0xff] }
  0xde   :  { %1488 = vmatprep.subr.bf16.mxu0 %v11002_v55  ;;  %1529 = vmatprep.subr.bf16.mxu1 %v11004_v56  ;;  %v10935_v56 = vcombine.low %v735_v44, %v739_v46  ;;  %v802_v44 = vld [vmem:[#allocation5 + $0x370] sm:$0xff] }
  0xe1   :  { %1489 = vmatpush1.bf16.msra.mxu0 %v11001_v62  ;;  %1530 = vmatpush1.bf16.msra.mxu1 %v11003_v63  ;;  %v10944_v62 = vcombine.high %v743_v52, %v747_v54  ;;  %v755_v63 = vld [vmem:[#allocation5 + $0x1f8] sm:$0xff] }
  0xe2   :  { %1490 = vmatprep.subr.bf16.mxu0 %v11010_v0  ;;  %1531 = vmatprep.subr.bf16.mxu1 %v11012_v1  ;;  %v10941_v0 = vcombine.low %v742_v50, %v746_v51  ;;  %v10943_v1 = vcombine.low %v743_v52, %v747_v54  ;;  %v806_v51 = vld [vmem:[#allocation5 + $0x390] sm:$0xff] }
  0xe3   :  { %v810_v52 = vld [vmem:[#allocation5 + $0x3b0] sm:$0xff] }
  0xe5   :  { %1491 = vmatpush1.bf16.msra.mxu0 %v11009_v6  ;;  %1532 = vmatpush1.bf16.msra.mxu1 %v11011_v8  ;;  %v10952_v6 = vcombine.high %v751_v61, %v755_v63  ;;  %v10949_v8 = vcombine.low %v750_v59, %v754_v60  ;;  %v11006_v59 = vcombine.high %v806_v51, %v810_v52  ;;  %v814_v60 = vld [vmem:[#allocation5 + $0x3d0] sm:$0xff] }
  0xe6   :  { %1542 = vmatprep.subr.bf16.mxu0 %v10894_v9  ;;  %1583 = vmatprep.subr.bf16.mxu1 %v10896_v10  ;;  %v10951_v9 = vcombine.low %v751_v61, %v755_v63  ;;  %v10958_v10 = vcombine.high %v758_v3, %v762_v4  ;;  %v818_v61 = vld [vmem:[#allocation5 + $0x3f0] sm:$0xff] }
  0xe8   :  { %1493 = vmatmul.mubr.bf16.vlgmr.msra.gmra.mrb[0].mxu0 %v13438_v13  ;;  %1534 = vmatmul.mubr.bf16.vlgmr.msra.gmra.mrb[0].mxu1 %v13438_v13 }
  0xe9   :  { %1543 = vmatpush1.bf16.msra.mxu0 %v10893_v16  ;;  %1584 = vmatpush1.bf16.msra.mxu1 %v10895_v17  ;;  %v771_v16 = vld [vmem:[#allocation5 + $0x278] sm:$0xff]  ;;  %v10957_v17 = vcombine.low %v758_v3, %v762_v4  ;;  %v11014_v3 = vcombine.high %v814_v60, %v818_v61  ;;  %v176_v4 = vld [vmem:[#allocation3] sm:$0xff] }
  0xea   :  { %1544 = vmatprep.subr.bf16.mxu0 %v10902_v18  ;;  %1585 = vmatprep.subr.bf16.mxu1 %v10904_v19  ;;  %v10959_v18 = vcombine.low %v759_v5, %v763_v7  ;;  %v10966_v19 = vcombine.high %v766_v11, %v770_v12  ;;  %v10968_v23 = vcombine.high %v767_v14, %v771_v16  ;;  %v180_v5 = vld [vmem:[#allocation3 + $0x20] sm:$0xff] }
  0xeb   :  { %1574 = vmatprep.mubr.bf16.mxu0 %v13431_v58  ;;  %1615 = vmatprep.mubr.bf16.mxu1 %v13431_v58  ;;  %v738_v58 = vld [vmem:[#allocation5 + $0x170] sm:$0xff] }
  0xec   :  { %v10934_v49 = vcombine.high %v734_v43, %v738_v58  ;;  %v10933_v55 = vcombine.low %v734_v43, %v738_v58  ;;  %v10990_v43 = vcombine.high %v790_v36, %v794_v37  ;;  %v798_v58 = vld [vmem:[#allocation5 + $0x350] sm:$0xff] }
  0xed   :  { %1545 = vmatpush1.bf16.msra.mxu0 %v10901_v24  ;;  %1586 = vmatpush1.bf16.msra.mxu1 %v10903_v25  ;;  %v779_v24 = vld [vmem:[#allocation5 + $0x2b8] sm:$0xff]  ;;  %v10965_v25 = vcombine.low %v766_v11, %v770_v12  ;;  %v10998_v50 = vcombine.high %v798_v58, %v802_v44  ;;  %v11018_v12 = vcombine.high %v176_v4, %v180_v5 }
  0xee   :  { %1546 = vmatprep.subr.bf16.mxu0 %v10910_v26  ;;  %1587 = vmatprep.subr.bf16.mxu1 %v10912_v30  ;;  %v10967_v26 = vcombine.low %v767_v14, %v771_v16  ;;  %v783_v30 = vld [vmem:[#allocation5 + $0x2d8] sm:$0xff]  ;;  %v10976_v31 = vcombine.high %v775_v22, %v779_v24  ;;  %v188_v14 = vld [vmem:[#allocation3 + $0x60] sm:$0xff] }
  0xef   :  { %v316_v16 = vld [vmem:[#allocation3 + $0x460] sm:$0xff] }
  0xf1   :  { %1547 = vmatpush1.bf16.msra.mxu0 %v10909_v32  ;;  %1588 = vmatpush1.bf16.msra.mxu1 %v10911_v33  ;;  %v787_v32 = vld [vmem:[#allocation5 + $0x2f8] sm:$0xff]  ;;  %v10973_v33 = vcombine.low %v774_v20, %v778_v21 }
  0xf2   :  { %1548 = vmatprep.subr.bf16.mxu0 %v10918_v34  ;;  %1589 = vmatprep.subr.bf16.mxu1 %v10920_v38  ;;  %v10975_v34 = vcombine.low %v775_v22, %v779_v24  ;;  %v791_v38 = vld [vmem:[#allocation5 + $0x318] sm:$0xff]  ;;  %v10984_v39 = vcombine.high %v783_v30, %v787_v32  ;;  %v192_v24 = vld [vmem:[#allocation3 + $0x80] sm:$0xff] }
  0xf3   :  { %v163_v20 = vld [vmem:[%s13776_s0 + $0x18] sm:$0xff] }
  0xf5   :  { %1549 = vmatpush1.bf16.msra.mxu0 %v10917_v40  ;;  %1590 = vmatpush1.bf16.msra.mxu1 %v10919_v41  ;;  %v795_v40 = vld [vmem:[#allocation5 + $0x338] sm:$0xff]  ;;  %v10981_v41 = vcombine.low %v782_v28, %v786_v29  ;;  %v324_v28 = vld [vmem:[#allocation3 + $0x4a0] sm:$0xff]  ;;  %v13453_v29 = vpack.c.bf16 %v163_v20, %v163_v20 }
  0xf6   :  { %1550 = vmatprep.subr.bf16.mxu0 %v10926_v42  ;;  %1591 = vmatprep.subr.bf16.mxu1 %v10928_v45  ;;  %v10983_v42 = vcombine.low %v783_v30, %v787_v32  ;;  %v799_v45 = vld [vmem:[#allocation5 + $0x358] sm:$0xff]  ;;  %v10992_v46 = vcombine.high %v791_v38, %v795_v40 }
  0xf9   :  { %1551 = vmatpush1.bf16.msra.mxu0 %v10925_v47  ;;  %1592 = vmatpush1.bf16.msra.mxu1 %v10927_v48  ;;  %v803_v47 = vld [vmem:[#allocation5 + $0x378] sm:$0xff]  ;;  %v10989_v48 = vcombine.low %v790_v36, %v794_v37  ;;  %v332_v37 = vld [vmem:[#allocation3 + $0x4e0] sm:$0xff] }
  0xfa   :  { %1552 = vmatprep.subr.bf16.mxu0 %v10934_v49  ;;  %1593 = vmatprep.subr.bf16.mxu1 %v10936_v53  ;;  %v10991_v49 = vcombine.low %v791_v38, %v795_v40  ;;  %v807_v53 = vld [vmem:[#allocation5 + $0x398] sm:$0xff]  ;;  %v11000_v54 = vcombine.high %v799_v45, %v803_v47  ;;  %v208_v40 = vld [vmem:[#allocation3 + $0x100] sm:$0xff] }
  0xfd   :  { %1553 = vmatpush1.bf16.msra.mxu0 %v10933_v55  ;;  %1594 = vmatpush1.bf16.msra.mxu1 %v10935_v56  ;;  %v811_v55 = vld [vmem:[#allocation5 + $0x3b8] sm:$0xff]  ;;  %v10997_v56 = vcombine.low %v798_v58, %v802_v44  ;;  %v340_v58 = vld [vmem:[#allocation3 + $0x520] sm:$0xff] }
  0xfe   :  { %1554 = vmatprep.subr.bf16.mxu0 %v10942_v57  ;;  %1595 = vmatprep.subr.bf16.mxu1 %v10944_v62  ;;  %v10999_v57 = vcombine.low %v799_v45, %v803_v47  ;;  %v815_v62 = vld [vmem:[#allocation5 + $0x3d8] sm:$0xff]  ;;  %v11008_v63 = vcombine.high %v807_v53, %v811_v55  ;;  %v216_v47 = vld [vmem:[#allocation3 + $0x140] sm:$0xff] }
 0x101   :  { %1555 = vmatpush1.bf16.msra.mxu0 %v10941_v0  ;;  %1596 = vmatpush1.bf16.msra.mxu1 %v10943_v1  ;;  %v819_v0 = vld [vmem:[#allocation5 + $0x3f8] sm:$0xff]  ;;  %v11005_v1 = vcombine.low %v806_v51, %v810_v52  ;;  %v348_v51 = vld [vmem:[#allocation3 + $0x560] sm:$0xff] }
 0x102   :  { %1556 = vmatprep.subr.bf16.mxu0 %v10950_v2  ;;  %1597 = vmatprep.subr.bf16.mxu1 %v10952_v6  ;;  %v11007_v2 = vcombine.low %v807_v53, %v811_v55  ;;  %v304_v6 = vld [vmem:[#allocation3 + $0x400] sm:$0xff]  ;;  %v11016_v7 = vcombine.high %v815_v62, %v819_v0  ;;  %v11015_v11 = vcombine.low %v815_v62, %v819_v0 }
 0x103   :  { %v224_v55 = vld [vmem:[#allocation3 + $0x180] sm:$0xff] }
 0x104   :  { %v232_v0 = vld [vmem:[#allocation3 + $0x1c0] sm:$0xff] }
 0x105   :  { %1557 = vmatpush1.bf16.msra.mxu0 %v10949_v8  ;;  %1598 = vmatpush1.bf16.msra.mxu1 %v10951_v9  ;;  %v308_v8 = vld [vmem:[#allocation3 + $0x420] sm:$0xff]  ;;  %v11013_v9 = vcombine.low %v814_v60, %v818_v61 }
 0x106   :  { %1558 = vmatprep.subr.bf16.mxu0 %v10958_v10  ;;  %1599 = vmatprep.subr.bf16.mxu1 %v10960_v15  ;;  %v184_v10 = vld [vmem:[#allocation3 + $0x40] sm:$0xff]  ;;  %v11145_v21 = vcombine.low %v304_v6, %v308_v8 }
 0x107   :  { %v312_v15 = vld [vmem:[#allocation3 + $0x440] sm:$0xff]  ;;  %v11026_v22 = vcombine.high %v184_v10, %v188_v14  ;;  %v11025_v30 = vcombine.low %v184_v10, %v188_v14 }
 0x108   :  { %v356_v60 = vld [vmem:[#allocation3 + $0x5a0] sm:$0xff] }
 0x109   :  { %1559 = vmatpush1.bf16.msra.mxu0 %v10957_v17  ;;  %1600 = vmatpush1.bf16.msra.mxu1 %v10959_v18  ;;  %v11146_v17 = vcombine.high %v304_v6, %v308_v8  ;;  %v161_v18 = vld [vmem:[%s13776_s0 + $0x8] sm:$0xff] }
 0x10a   :  { %1560 = vmatprep.subr.bf16.mxu0 %v10966_v19  ;;  %1601 = vmatprep.subr.bf16.mxu1 %v10968_v23  ;;  %v11017_v19 = vcombine.low %v176_v4, %v180_v5  ;;  %v11154_v23 = vcombine.high %v312_v15, %v316_v16  ;;  %v364_v4 = vld [vmem:[#allocation3 + $0x5e0] sm:$0xff] }
 0x10b   :  { %v240_v8 = vld [vmem:[#allocation3 + $0x200] sm:$0xff] }
 0x10c   :  { %v368_v10 = vld [vmem:[#allocation3 + $0x600] sm:$0xff] }
 0x10d   :  { %1561 = vmatpush1.bf16.msra.mxu0 %v10965_v25  ;;  %1602 = vmatpush1.bf16.msra.mxu1 %v10967_v26  ;;  %v196_v25 = vld [vmem:[#allocation3 + $0xa0] sm:$0xff] }
 0x10e   :  { %1562 = vmatprep.subr.bf16.mxu0 %v10974_v27  ;;  %1603 = vmatprep.subr.bf16.mxu1 %v10976_v31  ;;  %v320_v26 = vld [vmem:[#allocation3 + $0x480] sm:$0xff]  ;;  %v13450_v27 = vpack.c.bf16 %v161_v18, %v161_v18  ;;  %v11153_v31 = vcombine.low %v312_v15, %v316_v16  ;;  %v11034_v32 = vcombine.high %v192_v24, %v196_v25 }
 0x10f   :  { %v11162_v36 = vcombine.high %v320_v26, %v324_v28  ;;  %v11033_v38 = vcombine.low %v192_v24, %v196_v25  ;;  %v252_v18 = vld [vmem:[#allocation3 + $0x260] sm:$0xff] }
 0x110   :  { %v256_v25 = vld [vmem:[#allocation3 + $0x280] sm:$0xff] }
 0x111   :  { %1563 = vmatpush1.bf16.msra.mxu0 %v10973_v33  ;;  %1604 = vmatpush1.bf16.msra.mxu1 %v10975_v34  ;;  %v200_v33 = vld [vmem:[#allocation3 + $0xc0] sm:$0xff] }
 0x112   :  { %1564 = vmatprep.subr.bf16.mxu0 %v10982_v35  ;;  %1605 = vmatprep.subr.bf16.mxu1 %v10984_v39  ;;  %v204_v34 = vld [vmem:[#allocation3 + $0xe0] sm:$0xff] }
 0x113   :  { %v328_v35 = vld [vmem:[#allocation3 + $0x4c0] sm:$0xff]  ;;  %v11042_v39 = vcombine.high %v200_v33, %v204_v34  ;;  %v11041_v44 = vcombine.low %v200_v33, %v204_v34 }
 0x114   :  { %v11169_v45 = vcombine.low %v328_v35, %v332_v37 }
 0x115   :  { %1565 = vmatpush1.bf16.msra.mxu0 %v10981_v41  ;;  %1606 = vmatpush1.bf16.msra.mxu1 %v10983_v42  ;;  %v212_v41 = vld [vmem:[#allocation3 + $0x120] sm:$0xff] }
 0x116   :  { %1566 = vmatprep.subr.bf16.mxu0 %v10990_v43  ;;  %1607 = vmatprep.subr.bf16.mxu1 %v10992_v46  ;;  %v336_v42 = vld [vmem:[#allocation3 + $0x500] sm:$0xff]  ;;  %v11170_v43 = vcombine.high %v328_v35, %v332_v37  ;;  %v11050_v46 = vcombine.high %v208_v40, %v212_v41  ;;  %v11049_v52 = vcombine.low %v208_v40, %v212_v41 }
 0x117   :  { %v11177_v53 = vcombine.low %v336_v42, %v340_v58  ;;  %v264_v35 = vld [vmem:[#allocation3 + $0x2c0] sm:$0xff] }
 0x118   :  { %v392_v37 = vld [vmem:[#allocation3 + $0x6c0] sm:$0xff] }
 0x119   :  { %1567 = vmatpush1.bf16.msra.mxu0 %v10989_v48  ;;  %1608 = vmatpush1.bf16.msra.mxu1 %v10991_v49  ;;  %v220_v48 = vld [vmem:[#allocation3 + $0x160] sm:$0xff] }
 0x11a   :  { %1568 = vmatprep.subr.bf16.mxu0 %v10998_v50  ;;  %1609 = vmatprep.subr.bf16.mxu1 %v11000_v54  ;;  %v344_v49 = vld [vmem:[#allocation3 + $0x540] sm:$0xff]  ;;  %v11178_v50 = vcombine.high %v336_v42, %v340_v58  ;;  %v11058_v54 = vcombine.high %v216_v47, %v220_v48  ;;  %v11057_v61 = vcombine.low %v216_v47, %v220_v48 }
 0x11b   :  { %v11185_v62 = vcombine.low %v344_v49, %v348_v51  ;;  %v272_v42 = vld [vmem:[#allocation3 + $0x300] sm:$0xff] }
 0x11c   :  { %v400_v58 = vld [vmem:[#allocation3 + $0x700] sm:$0xff] }
 0x11d   :  { %1569 = vmatpush1.bf16.msra.mxu0 %v10997_v56  ;;  %1610 = vmatpush1.bf16.msra.mxu1 %v10999_v57  ;;  %v228_v56 = vld [vmem:[#allocation3 + $0x1a0] sm:$0xff] }
 0x11e   :  { %1570 = vmatprep.subr.bf16.mxu0 %v11006_v59  ;;  %1611 = vmatprep.subr.bf16.mxu1 %v11008_v63  ;;  %v352_v57 = vld [vmem:[#allocation3 + $0x580] sm:$0xff]  ;;  %v11186_v59 = vcombine.high %v344_v49, %v348_v51  ;;  %v11066_v63 = vcombine.high %v224_v55, %v228_v56  ;;  %v11065_v5 = vcombine.low %v224_v55, %v228_v56 }
 0x11f   :  { %v11193_v6 = vcombine.low %v352_v57, %v356_v60  ;;  %v280_v49 = vld [vmem:[#allocation3 + $0x340] sm:$0xff] }
 0x120   :  { %v408_v51 = vld [vmem:[#allocation3 + $0x740] sm:$0xff] }
 0x121   :  { %1571 = vmatpush1.bf16.msra.mxu0 %v11005_v1  ;;  %1612 = vmatpush1.bf16.msra.mxu1 %v11007_v2  ;;  %v236_v1 = vld [vmem:[#allocation3 + $0x1e0] sm:$0xff] }
 0x122   :  { %1572 = vmatprep.subr.bf16.mxu0 %v11014_v3  ;;  %1613 = vmatprep.subr.bf16.mxu1 %v11016_v7  ;;  %v360_v2 = vld [vmem:[#allocation3 + $0x5c0] sm:$0xff]  ;;  %v11194_v3 = vcombine.high %v352_v57, %v356_v60  ;;  %v11074_v7 = vcombine.high %v232_v0, %v236_v1  ;;  %v11073_v14 = vcombine.low %v232_v0, %v236_v1 }
 0x123   :  { %v11201_v15 = vcombine.low %v360_v2, %v364_v4  ;;  %v288_v57 = vld [vmem:[#allocation3 + $0x380] sm:$0xff] }
 0x124   :  { %v416_v60 = vld [vmem:[#allocation3 + $0x780] sm:$0xff] }
 0x125   :  { %1573 = vmatpush1.bf16.msra.mxu0 %v11013_v9  ;;  %1614 = vmatpush1.bf16.msra.mxu1 %v11015_v11  ;;  %v244_v9 = vld [vmem:[#allocation3 + $0x220] sm:$0xff]  ;;  %v11202_v11 = vcombine.high %v360_v2, %v364_v4 }
 0x126   :  { %4184 = vmatprep.subr.bf16.mxu0 %v11018_v12  ;;  %4225 = vmatprep.subr.bf16.mxu1 %v11146_v17  ;;  %v372_v12 = vld [vmem:[#allocation3 + $0x620] sm:$0xff]  ;;  %v11082_v16 = vcombine.high %v240_v8, %v244_v9 }
 0x127   :  { %v248_v17 = vld [vmem:[#allocation3 + $0x240] sm:$0xff]  ;;  %v11210_v20 = vcombine.high %v368_v10, %v372_v12 }
 0x128   :  { %1575 = vmatmul.mubr.bf16.vlgmr.msra.gmra.mrb[4].mxu0 %v13438_v13  ;;  %1616 = vmatmul.mubr.bf16.vlgmr.msra.gmra.mrb[4].mxu1 %v13438_v13  ;;  %v11161_v13 = vcombine.low %v320_v26, %v324_v28  ;;  %v11090_v24 = vcombine.high %v248_v17, %v252_v18  ;;  %v260_v26 = vld [vmem:[#allocation3 + $0x2a0] sm:$0xff] }
 0x129   :  { %4185 = vmatpush1.bf16.msra.mxu0 %v11017_v19  ;;  %4226 = vmatpush1.bf16.msra.mxu1 %v11145_v21  ;;  %v376_v19 = vld [vmem:[#allocation3 + $0x640] sm:$0xff]  ;;  %v11098_v34 = vcombine.high %v256_v25, %v260_v26 }
 0x12a   :  { %4186 = vmatprep.subr.bf16.mxu0 %v11026_v22  ;;  %4227 = vmatprep.subr.bf16.mxu1 %v11154_v23  ;;  %v380_v21 = vld [vmem:[#allocation3 + $0x660] sm:$0xff]  ;;  %v11081_v22 = vcombine.low %v240_v8, %v244_v9  ;;  %v11209_v23 = vcombine.low %v368_v10, %v372_v12 }
 0x12b   :  { %4216 = vmatprep.mubr.bf16.mxu0 %v13450_v27  ;;  %4257 = vmatprep.mubr.bf16.mxu1 %v13453_v29  ;;  %v384_v28 = vld [vmem:[#allocation3 + $0x680] sm:$0xff]  ;;  %v11217_v33 = vcombine.low %v376_v19, %v380_v21 }
 0x12c   :  { %v296_v2 = vld [vmem:[#allocation3 + $0x3c0] sm:$0xff] }
 0x12d   :  { %4187 = vmatpush1.bf16.msra.mxu0 %v11025_v30  ;;  %4228 = vmatpush1.bf16.msra.mxu1 %v11153_v31  ;;  %v11218_v30 = vcombine.high %v376_v19, %v380_v21  ;;  %v388_v31 = vld [vmem:[#allocation3 + $0x6a0] sm:$0xff] }
 0x12e   :  { %4188 = vmatprep.subr.bf16.mxu0 %v11034_v32  ;;  %4229 = vmatprep.subr.bf16.mxu1 %v11162_v36  ;;  %v11089_v32 = vcombine.low %v248_v17, %v252_v18  ;;  %v268_v36 = vld [vmem:[#allocation3 + $0x2e0] sm:$0xff]  ;;  %v11225_v40 = vcombine.low %v384_v28, %v388_v31  ;;  %v162_v17 = vld [vmem:[%s13776_s0 + $0x10] sm:$0xff] }
 0x12f   :  { %v11106_v41 = vcombine.high %v264_v35, %v268_v36  ;;  %v424_v4 = vld [vmem:[#allocation3 + $0x7c0] sm:$0xff] }
 0x130   :  { %v432_v10 = vld [vmem:[#allocation3 + $0x800] sm:$0xff] }
 0x131   :  { %4189 = vmatpush1.bf16.msra.mxu0 %v11033_v38  ;;  %4230 = vmatpush1.bf16.msra.mxu1 %v11161_v13  ;;  %v11226_v38 = vcombine.high %v384_v28, %v388_v31  ;;  %v396_v13 = vld [vmem:[#allocation3 + $0x6e0] sm:$0xff]  ;;  %v167_v28 = vld [vmem:[%s13776_s0 + $0x38] sm:$0xff] }
 0x132   :  { %4190 = vmatprep.subr.bf16.mxu0 %v11042_v39  ;;  %4231 = vmatprep.subr.bf16.mxu1 %v11170_v43  ;;  %v11097_v39 = vcombine.low %v256_v25, %v260_v26  ;;  %v276_v43 = vld [vmem:[#allocation3 + $0x320] sm:$0xff]  ;;  %v11233_v47 = vcombine.low %v392_v37, %v396_v13 }
 0x133   :  { %v11114_v48 = vcombine.high %v272_v42, %v276_v43  ;;  %v560_v12 = vld [vmem:[#allocation3 + $0xc00] sm:$0xff] }
 0x134   :  { %v440_v19 = vld [vmem:[#allocation3 + $0x840] sm:$0xff] }
 0x135   :  { %4191 = vmatpush1.bf16.msra.mxu0 %v11041_v44  ;;  %4232 = vmatpush1.bf16.msra.mxu1 %v11169_v45  ;;  %v11234_v44 = vcombine.high %v392_v37, %v396_v13  ;;  %v404_v45 = vld [vmem:[#allocation3 + $0x720] sm:$0xff] }
 0x136   :  { %4192 = vmatprep.subr.bf16.mxu0 %v11050_v46  ;;  %4233 = vmatprep.subr.bf16.mxu1 %v11178_v50  ;;  %v11105_v46 = vcombine.low %v264_v35, %v268_v36  ;;  %v284_v50 = vld [vmem:[#allocation3 + $0x360] sm:$0xff]  ;;  %v11241_v55 = vcombine.low %v400_v58, %v404_v45 }
 0x137   :  { %v11122_v56 = vcombine.high %v280_v49, %v284_v50  ;;  %v165_v25 = vld [vmem:[%s13776_s0 + $0x28] sm:$0xff] }
 0x138   :  { %v448_v35 = vld [vmem:[#allocation3 + $0x880] sm:$0xff] }
 0x139   :  { %4193 = vmatpush1.bf16.msra.mxu0 %v11049_v52  ;;  %4234 = vmatpush1.bf16.msra.mxu1 %v11177_v53  ;;  %v11242_v52 = vcombine.high %v400_v58, %v404_v45  ;;  %v412_v53 = vld [vmem:[#allocation3 + $0x760] sm:$0xff] }
 0x13a   :  { %4194 = vmatprep.subr.bf16.mxu0 %v11058_v54  ;;  %4235 = vmatprep.subr.bf16.mxu1 %v11186_v59  ;;  %v11113_v54 = vcombine.low %v272_v42, %v276_v43  ;;  %v292_v59 = vld [vmem:[#allocation3 + $0x3a0] sm:$0xff]  ;;  %v11249_v0 = vcombine.low %v408_v51, %v412_v53 }
 0x13b   :  { %v11130_v1 = vcombine.high %v288_v57, %v292_v59  ;;  %v452_v36 = vld [vmem:[#allocation3 + $0x8a0] sm:$0xff] }
 0x13c   :  { %v576_v37 = vld [vmem:[#allocation3 + $0xc80] sm:$0xff]  ;;  %v11290_v43 = vcombine.high %v448_v35, %v452_v36 }
 0x13d   :  { %4195 = vmatpush1.bf16.msra.mxu0 %v11057_v61  ;;  %4236 = vmatpush1.bf16.msra.mxu1 %v11185_v62  ;;  %v11250_v61 = vcombine.high %v408_v51, %v412_v53  ;;  %v420_v62 = vld [vmem:[#allocation3 + $0x7a0] sm:$0xff] }
 0x13e   :  { %4196 = vmatprep.subr.bf16.mxu0 %v11066_v63  ;;  %4237 = vmatprep.subr.bf16.mxu1 %v11194_v3  ;;  %v11121_v63 = vcombine.low %v280_v49, %v284_v50  ;;  %v300_v3 = vld [vmem:[#allocation3 + $0x3e0] sm:$0xff]  ;;  %v11257_v8 = vcombine.low %v416_v60, %v420_v62 }
 0x13f   :  { %v11138_v9 = vcombine.high %v296_v2, %v300_v3  ;;  %v11137_v18 = vcombine.low %v296_v2, %v300_v3  ;;  %v580_v13 = vld [vmem:[#allocation3 + $0xca0] sm:$0xff] }
 0x140   :  { %v11418_v58 = vcombine.high %v576_v37, %v580_v13  ;;  %v460_v45 = vld [vmem:[#allocation3 + $0x8e0] sm:$0xff]  ;;  %v11417_v49 = vcombine.low %v576_v37, %v580_v13 }
 0x141   :  { %4197 = vmatpush1.bf16.msra.mxu0 %v11065_v5  ;;  %4238 = vmatpush1.bf16.msra.mxu1 %v11193_v6  ;;  %v11258_v5 = vcombine.high %v416_v60, %v420_v62  ;;  %v428_v6 = vld [vmem:[#allocation3 + $0x7e0] sm:$0xff] }
 0x142   :  { %4198 = vmatprep.subr.bf16.mxu0 %v11074_v7  ;;  %4239 = vmatprep.subr.bf16.mxu1 %v11202_v11  ;;  %v11129_v7 = vcombine.low %v288_v57, %v292_v59  ;;  %v436_v11 = vld [vmem:[#allocation3 + $0x820] sm:$0xff]  ;;  %v11265_v21 = vcombine.low %v424_v4, %v428_v6 }
 0x143   :  { %v11273_v31 = vcombine.low %v432_v10, %v436_v11  ;;  %v468_v53 = vld [vmem:[#allocation3 + $0x920] sm:$0xff] }
 0x144   :  { %v476_v62 = vld [vmem:[#allocation3 + $0x960] sm:$0xff] }
 0x145   :  { %4199 = vmatpush1.bf16.msra.mxu0 %v11073_v14  ;;  %4240 = vmatpush1.bf16.msra.mxu1 %v11201_v15  ;;  %v11266_v14 = vcombine.high %v424_v4, %v428_v6  ;;  %v160_v15 = vld [vmem:[%s13776_s0] sm:$0xff] }
 0x146   :  { %4200 = vmatprep.subr.bf16.mxu0 %v11082_v16  ;;  %4241 = vmatprep.subr.bf16.mxu1 %v11210_v20  ;;  %v564_v16 = vld [vmem:[#allocation3 + $0xc20] sm:$0xff] }
 0x147   :  { %v444_v20 = vld [vmem:[#allocation3 + $0x860] sm:$0xff]  ;;  %v11402_v26 = vcombine.high %v560_v12, %v564_v16 }
 0x148   :  { %v484_v6 = vld [vmem:[#allocation3 + $0x9a0] sm:$0xff] }
 0x149   :  { %4201 = vmatpush1.bf16.msra.mxu0 %v11081_v22  ;;  %4242 = vmatpush1.bf16.msra.mxu1 %v11209_v23  ;;  %v11274_v22 = vcombine.high %v432_v10, %v436_v11  ;;  %v568_v23 = vld [vmem:[#allocation3 + $0xc40] sm:$0xff] }
 0x14a   :  { %4202 = vmatprep.subr.bf16.mxu0 %v11090_v24  ;;  %4243 = vmatprep.subr.bf16.mxu1 %v11218_v30  ;;  %v572_v24 = vld [vmem:[#allocation3 + $0xc60] sm:$0xff]  ;;  %v13470_v30 = vpack.c.bf16 %v160_v15, %v160_v15 }
 0x14b   :  { %v11409_v42 = vcombine.low %v568_v23, %v572_v24  ;;  %v492_v15 = vld [vmem:[#allocation3 + $0x9e0] sm:$0xff] }
 0x14c   :  { %v636_v37 = vld [vmem:[#allocation3 + $0xe60] sm:$0xff] }
 0x14d   :  { %4203 = vmatpush1.bf16.msra.mxu0 %v11089_v32  ;;  %4244 = vmatpush1.bf16.msra.mxu1 %v11217_v33  ;;  %v13472_v32 = vpack.c.bf16 %v162_v17, %v162_v17  ;;  %v11401_v33 = vcombine.low %v560_v12, %v564_v16  ;;  %v616_v16 = vld [vmem:[#allocation3 + $0xdc0] sm:$0xff] }
 0x14e   :  { %4204 = vmatprep.subr.bf16.mxu0 %v11098_v34  ;;  %4245 = vmatprep.subr.bf16.mxu1 %v11226_v38  ;;  %v11282_v34 = vcombine.high %v440_v19, %v444_v20  ;;  %v11410_v38 = vcombine.high %v568_v23, %v572_v24  ;;  %v620_v17 = vld [vmem:[#allocation3 + $0xde0] sm:$0xff] }
 0x14f   :  { %v500_v23 = vld [vmem:[#allocation3 + $0xa20] sm:$0xff] }
 0x150   :  { %v624_v24 = vld [vmem:[#allocation3 + $0xe00] sm:$0xff] }
 0x151   :  { %4205 = vmatpush1.bf16.msra.mxu0 %v11097_v39  ;;  %4246 = vmatpush1.bf16.msra.mxu1 %v11225_v40  ;;  %v13474_v39 = vpack.c.bf16 %v165_v25, %v165_v25  ;;  %v13477_v40 = vpack.c.bf16 %v167_v28, %v167_v28  ;;  %v628_v25 = vld [vmem:[#allocation3 + $0xe20] sm:$0xff]  ;;  %v11457_v28 = vcombine.low %v616_v16, %v620_v17 }
 0x152   :  { %4206 = vmatprep.subr.bf16.mxu0 %v11106_v41  ;;  %4247 = vmatprep.subr.bf16.mxu1 %v11234_v44  ;;  %v11281_v41 = vcombine.low %v440_v19, %v444_v20  ;;  %v456_v44 = vld [vmem:[#allocation3 + $0x8c0] sm:$0xff]  ;;  %v11465_v13 = vcombine.low %v624_v24, %v628_v25 }
 0x153   :  { %v11298_v50 = vcombine.high %v456_v44, %v460_v45 }
 0x155   :  { %4207 = vmatpush1.bf16.msra.mxu0 %v11105_v46  ;;  %4248 = vmatpush1.bf16.msra.mxu1 %v11233_v47  ;;  %v584_v46 = vld [vmem:[#allocation3 + $0xcc0] sm:$0xff] }
 0x156   :  { %4208 = vmatprep.subr.bf16.mxu0 %v11114_v48  ;;  %4249 = vmatprep.subr.bf16.mxu1 %v11242_v52  ;;  %v588_v47 = vld [vmem:[#allocation3 + $0xce0] sm:$0xff]  ;;  %v11289_v48 = vcombine.low %v448_v35, %v452_v36 }
 0x157   :  { %v11426_v51 = vcombine.high %v584_v46, %v588_v47  ;;  %v464_v52 = vld [vmem:[#allocation3 + $0x900] sm:$0xff]  ;;  %v11425_v57 = vcombine.low %v584_v46, %v588_v47 }
 0x158   :  { %v11306_v59 = vcombine.high %v464_v52, %v468_v53  ;;  %v508_v35 = vld [vmem:[#allocation3 + $0xa60] sm:$0xff] }
 0x159   :  { %4209 = vmatpush1.bf16.msra.mxu0 %v11113_v54  ;;  %4250 = vmatpush1.bf16.msra.mxu1 %v11241_v55  ;;  %v592_v54 = vld [vmem:[#allocation3 + $0xd00] sm:$0xff] }
 0x15a   :  { %4210 = vmatprep.subr.bf16.mxu0 %v11122_v56  ;;  %4251 = vmatprep.subr.bf16.mxu1 %v11250_v61  ;;  %v596_v55 = vld [vmem:[#allocation3 + $0xd20] sm:$0xff]  ;;  %v11297_v56 = vcombine.low %v456_v44, %v460_v45 }
 0x15b   :  { %v11434_v60 = vcombine.high %v592_v54, %v596_v55  ;;  %v472_v61 = vld [vmem:[#allocation3 + $0x940] sm:$0xff]  ;;  %v11433_v2 = vcombine.low %v592_v54, %v596_v55 }
 0x15c   :  { %v11314_v3 = vcombine.high %v472_v61, %v476_v62  ;;  %v632_v36 = vld [vmem:[#allocation3 + $0xe40] sm:$0xff] }
 0x15d   :  { %4211 = vmatpush1.bf16.msra.mxu0 %v11121_v63  ;;  %4252 = vmatpush1.bf16.msra.mxu1 %v11249_v0  ;;  %v600_v63 = vld [vmem:[#allocation3 + $0xd40] sm:$0xff]  ;;  %v11473_v47 = vcombine.low %v632_v36, %v636_v37 }
 0x15e   :  { %4212 = vmatprep.subr.bf16.mxu0 %v11130_v1  ;;  %4253 = vmatprep.subr.bf16.mxu1 %v11258_v5  ;;  %v604_v0 = vld [vmem:[#allocation3 + $0xd60] sm:$0xff]  ;;  %v11305_v1 = vcombine.low %v464_v52, %v468_v53 }
 0x15f   :  { %v11442_v4 = vcombine.high %v600_v63, %v604_v0  ;;  %v480_v5 = vld [vmem:[#allocation3 + $0x980] sm:$0xff]  ;;  %v11441_v10 = vcombine.low %v600_v63, %v604_v0 }
 0x160   :  { %v11322_v11 = vcombine.high %v480_v5, %v484_v6  ;;  %v640_v44 = vld [vmem:[#allocation3 + $0xe80] sm:$0xff] }
 0x161   :  { %4213 = vmatpush1.bf16.msra.mxu0 %v11129_v7  ;;  %4254 = vmatpush1.bf16.msra.mxu1 %v11257_v8  ;;  %v608_v7 = vld [vmem:[#allocation3 + $0xd80] sm:$0xff] }
 0x162   :  { %4214 = vmatprep.subr.bf16.mxu0 %v11138_v9  ;;  %4255 = vmatprep.subr.bf16.mxu1 %v11266_v14  ;;  %v612_v8 = vld [vmem:[#allocation3 + $0xda0] sm:$0xff]  ;;  %v11313_v9 = vcombine.low %v472_v61, %v476_v62 }
 0x163   :  { %v11450_v12 = vcombine.high %v608_v7, %v612_v8  ;;  %v488_v14 = vld [vmem:[#allocation3 + $0x9c0] sm:$0xff]  ;;  %v11449_v19 = vcombine.low %v608_v7, %v612_v8 }
 0x164   :  { %v11330_v20 = vcombine.high %v488_v14, %v492_v15  ;;  %v644_v45 = vld [vmem:[#allocation3 + $0xea0] sm:$0xff] }
 0x165   :  { %4215 = vmatpush1.bf16.msra.mxu0 %v11137_v18  ;;  %4256 = vmatpush1.bf16.msra.mxu1 %v11265_v21  ;;  %v11321_v18 = vcombine.low %v480_v5, %v484_v6  ;;  %v11458_v21 = vcombine.high %v616_v16, %v620_v17  ;;  %v648_v52 = vld [vmem:[#allocation3 + $0xec0] sm:$0xff]  ;;  %v11481_v55 = vcombine.low %v640_v44, %v644_v45 }
 0x166   :  { %4266 = vmatprep.subr.bf16.mxu0 %v11274_v22  ;;  %4307 = vmatprep.subr.bf16.mxu1 %v11402_v26  ;;  %v496_v22 = vld [vmem:[#allocation3 + $0xa00] sm:$0xff]  ;;  %v11329_v26 = vcombine.low %v488_v14, %v492_v15 }
 0x167   :  { %v652_v53 = vld [vmem:[#allocation3 + $0xee0] sm:$0xff] }
 0x168   :  { %4217 = vmatmul.mubr.bf16.vlgmr.msra.gmra.mrb[8].mxu0 %v13470_v30  ;;  %4258 = vmatmul.mubr.bf16.vlgmr.msra.gmra.mrb[8].mxu1 %v13472_v32  ;;  %v656_v61 = vld [vmem:[#allocation3 + $0xf00] sm:$0xff]  ;;  %v11489_v0 = vcombine.low %v648_v52, %v652_v53 }
 0x169   :  { %4267 = vmatpush1.bf16.msra.mxu0 %v11273_v31  ;;  %4308 = vmatpush1.bf16.msra.mxu1 %v11401_v33  ;;  %v11338_v31 = vcombine.high %v496_v22, %v500_v23  ;;  %v11466_v33 = vcombine.high %v624_v24, %v628_v25  ;;  %v660_v62 = vld [vmem:[#allocation3 + $0xf20] sm:$0xff] }
 0x16a   :  { %4268 = vmatprep.subr.bf16.mxu0 %v11282_v34  ;;  %4309 = vmatprep.subr.bf16.mxu1 %v11410_v38  ;;  %v504_v34 = vld [vmem:[#allocation3 + $0xa40] sm:$0xff]  ;;  %v11337_v38 = vcombine.low %v496_v22, %v500_v23  ;;  %v11497_v8 = vcombine.low %v656_v61, %v660_v62 }
 0x16b   :  { %4298 = vmatprep.mubr.bf16.mxu0 %v13474_v39  ;;  %4339 = vmatprep.mubr.bf16.mxu1 %v13477_v40  ;;  %v11345_v46 = vcombine.low %v504_v34, %v508_v35  ;;  %v664_v5 = vld [vmem:[#allocation3 + $0xf40] sm:$0xff] }
 0x16c   :  { %v668_v6 = vld [vmem:[#allocation3 + $0xf60] sm:$0xff] }
 0x16d   :  { %4269 = vmatpush1.bf16.msra.mxu0 %v11281_v41  ;;  %4310 = vmatpush1.bf16.msra.mxu1 %v11409_v42  ;;  %v11346_v41 = vcombine.high %v504_v34, %v508_v35  ;;  %v11474_v42 = vcombine.high %v632_v36, %v636_v37  ;;  %v672_v14 = vld [vmem:[#allocation3 + $0xf80] sm:$0xff]  ;;  %v11505_v17 = vcombine.low %v664_v5, %v668_v6  ;;  %v305_v34 = vld [vmem:[#allocation3 + $0x408] sm:$0xff] }
 0x16e   :  { %4270 = vmatprep.subr.bf16.mxu0 %v11290_v43  ;;  %4311 = vmatprep.subr.bf16.mxu1 %v11418_v58  ;;  %v512_v43 = vld [vmem:[#allocation3 + $0xa80] sm:$0xff]  ;;  %v309_v35 = vld [vmem:[#allocation3 + $0x428] sm:$0xff] }
 0x16f   :  { %v516_v58 = vld [vmem:[#allocation3 + $0xaa0] sm:$0xff] }
 0x170   :  { %v11353_v54 = vcombine.low %v512_v43, %v516_v58  ;;  %v676_v15 = vld [vmem:[#allocation3 + $0xfa0] sm:$0xff] }
 0x171   :  { %4271 = vmatpush1.bf16.msra.mxu0 %v11289_v48  ;;  %4312 = vmatpush1.bf16.msra.mxu1 %v11417_v49  ;;  %v11354_v48 = vcombine.high %v512_v43, %v516_v58  ;;  %v11482_v49 = vcombine.high %v640_v44, %v644_v45  ;;  %v680_v22 = vld [vmem:[#allocation3 + $0xfc0] sm:$0xff]  ;;  %v11513_v25 = vcombine.low %v672_v14, %v676_v15  ;;  %v185_v43 = vld [vmem:[#allocation3 + $0x48] sm:$0xff] }
 0x172   :  { %4272 = vmatprep.subr.bf16.mxu0 %v11298_v50  ;;  %4313 = vmatprep.subr.bf16.mxu1 %v11426_v51  ;;  %v520_v50 = vld [vmem:[#allocation3 + $0xac0] sm:$0xff]  ;;  %v189_v58 = vld [vmem:[#allocation3 + $0x68] sm:$0xff] }
 0x173   :  { %v524_v51 = vld [vmem:[#allocation3 + $0xae0] sm:$0xff]  ;;  %v313_v45 = vld [vmem:[#allocation3 + $0x448] sm:$0xff] }
 0x174   :  { %v11361_v63 = vcombine.low %v520_v50, %v524_v51  ;;  %v684_v23 = vld [vmem:[#allocation3 + $0xfe0] sm:$0xff] }
 0x175   :  { %4273 = vmatpush1.bf16.msra.mxu0 %v11297_v56  ;;  %4314 = vmatpush1.bf16.msra.mxu1 %v11425_v57  ;;  %v11362_v56 = vcombine.high %v520_v50, %v524_v51  ;;  %v11490_v57 = vcombine.high %v648_v52, %v652_v53  ;;  %v164_v37 = vld [vmem:[%s13776_s0 + $0x20] sm:$0xff]  ;;  %v11028_v50 = vcombine.high %v185_v43, %v189_v58  ;;  %v193_v52 = vld [vmem:[#allocation3 + $0x88] sm:$0xff] }
 0x176   :  { %4274 = vmatprep.subr.bf16.mxu0 %v11306_v59  ;;  %4315 = vmatprep.subr.bf16.mxu1 %v11434_v60  ;;  %v528_v59 = vld [vmem:[#allocation3 + $0xb00] sm:$0xff]  ;;  %v13488_v44 = vpack.c.bf16 %v164_v37, %v164_v37  ;;  %v197_v53 = vld [vmem:[#allocation3 + $0xa8] sm:$0xff] }
 0x177   :  { %v532_v60 = vld [vmem:[#allocation3 + $0xb20] sm:$0xff] }
 0x178   :  { %v11369_v7 = vcombine.low %v528_v59, %v532_v60 }
 0x179   :  { %4275 = vmatpush1.bf16.msra.mxu0 %v11305_v1  ;;  %4316 = vmatpush1.bf16.msra.mxu1 %v11433_v2  ;;  %v11370_v1 = vcombine.high %v528_v59, %v532_v60  ;;  %v11498_v2 = vcombine.high %v656_v61, %v660_v62  ;;  %v11036_v59 = vcombine.high %v193_v52, %v197_v53  ;;  %v201_v61 = vld [vmem:[#allocation3 + $0xc8] sm:$0xff] }
 0x17a   :  { %4276 = vmatprep.subr.bf16.mxu0 %v11314_v3  ;;  %4317 = vmatprep.subr.bf16.mxu1 %v11442_v4  ;;  %v536_v3 = vld [vmem:[#allocation3 + $0xb40] sm:$0xff]  ;;  %v205_v62 = vld [vmem:[#allocation3 + $0xe8] sm:$0xff] }
 0x17b   :  { %v540_v4 = vld [vmem:[#allocation3 + $0xb60] sm:$0xff] }
 0x17c   :  { %v11377_v16 = vcombine.low %v536_v3, %v540_v4 }
 0x17d   :  { %4277 = vmatpush1.bf16.msra.mxu0 %v11313_v9  ;;  %4318 = vmatpush1.bf16.msra.mxu1 %v11441_v10  ;;  %v11378_v9 = vcombine.high %v536_v3, %v540_v4  ;;  %v11506_v10 = vcombine.high %v664_v5, %v668_v6  ;;  %v11044_v3 = vcombine.high %v201_v61, %v205_v62  ;;  %v209_v5 = vld [vmem:[#allocation3 + $0x108] sm:$0xff] }
 0x17e   :  { %4278 = vmatprep.subr.bf16.mxu0 %v11322_v11  ;;  %4319 = vmatprep.subr.bf16.mxu1 %v11450_v12  ;;  %v544_v11 = vld [vmem:[#allocation3 + $0xb80] sm:$0xff]  ;;  %v213_v6 = vld [vmem:[#allocation3 + $0x128] sm:$0xff] }
 0x17f   :  { %v548_v12 = vld [vmem:[#allocation3 + $0xba0] sm:$0xff] }
 0x180   :  { %v11385_v24 = vcombine.low %v544_v11, %v548_v12 }
 0x181   :  { %4279 = vmatpush1.bf16.msra.mxu0 %v11321_v18  ;;  %4320 = vmatpush1.bf16.msra.mxu1 %v11449_v19  ;;  %v11386_v18 = vcombine.high %v544_v11, %v548_v12  ;;  %v11514_v19 = vcombine.high %v672_v14, %v676_v15  ;;  %v11052_v11 = vcombine.high %v209_v5, %v213_v6  ;;  %v217_v14 = vld [vmem:[#allocation3 + $0x148] sm:$0xff] }
 0x182   :  { %4280 = vmatprep.subr.bf16.mxu0 %v11330_v20  ;;  %4321 = vmatprep.subr.bf16.mxu1 %v11458_v21  ;;  %v552_v20 = vld [vmem:[#allocation3 + $0xbc0] sm:$0xff]  ;;  %v221_v15 = vld [vmem:[#allocation3 + $0x168] sm:$0xff] }
 0x183   :  { %v556_v21 = vld [vmem:[#allocation3 + $0xbe0] sm:$0xff] }
 0x184   :  { %v11393_v36 = vcombine.low %v552_v20, %v556_v21 }
 0x185   :  { %4281 = vmatpush1.bf16.msra.mxu0 %v11329_v26  ;;  %4322 = vmatpush1.bf16.msra.mxu1 %v11457_v28  ;;  %v11394_v26 = vcombine.high %v552_v20, %v556_v21  ;;  %v11522_v28 = vcombine.high %v680_v22, %v684_v23  ;;  %v11060_v20 = vcombine.high %v217_v14, %v221_v15 }
 0x186   :  { %4282 = vmatprep.subr.bf16.mxu0 %v11338_v31  ;;  %4323 = vmatprep.subr.bf16.mxu1 %v11466_v33  ;;  %v177_v31 = vld [vmem:[#allocation3 + $0x8] sm:$0xff] }
 0x187   :  { %v181_v33 = vld [vmem:[#allocation3 + $0x28] sm:$0xff] }
 0x189   :  { %4283 = vmatpush1.bf16.msra.mxu0 %v11337_v38  ;;  %4324 = vmatpush1.bf16.msra.mxu1 %v11465_v13  ;;  %v11521_v38 = vcombine.low %v680_v22, %v684_v23  ;;  %v11020_v13 = vcombine.high %v177_v31, %v181_v33  ;;  %v225_v22 = vld [vmem:[#allocation3 + $0x188] sm:$0xff] }
 0x18a   :  { %4284 = vmatprep.subr.bf16.mxu0 %v11346_v41  ;;  %4325 = vmatprep.subr.bf16.mxu1 %v11474_v42  ;;  %v166_v41 = vld [vmem:[%s13776_s0 + $0x30] sm:$0xff]  ;;  %v11148_v42 = vcombine.high %v305_v34, %v309_v35 }
 0x18b   :  { %v229_v23 = vld [vmem:[#allocation3 + $0x1a8] sm:$0xff] }
 0x18d   :  { %4285 = vmatpush1.bf16.msra.mxu0 %v11345_v46  ;;  %4326 = vmatpush1.bf16.msra.mxu1 %v11473_v47  ;;  %v317_v46 = vld [vmem:[#allocation3 + $0x468] sm:$0xff]  ;;  %v11019_v47 = vcombine.low %v177_v31, %v181_v33  ;;  %v11068_v31 = vcombine.high %v225_v22, %v229_v23 }
 0x18e   :  { %4286 = vmatprep.subr.bf16.mxu0 %v11354_v48  ;;  %4327 = vmatprep.subr.bf16.mxu1 %v11482_v49  ;;  %v13490_v48 = vpack.c.bf16 %v166_v41, %v166_v41  ;;  %v11147_v49 = vcombine.low %v305_v34, %v309_v35  ;;  %v11156_v51 = vcombine.high %v313_v45, %v317_v46  ;;  %v233_v35 = vld [vmem:[#allocation3 + $0x1c8] sm:$0xff] }
 0x191   :  { %4287 = vmatpush1.bf16.msra.mxu0 %v11353_v54  ;;  %4328 = vmatpush1.bf16.msra.mxu1 %v11481_v55  ;;  %v321_v54 = vld [vmem:[#allocation3 + $0x488] sm:$0xff] }
 0x192   :  { %4288 = vmatprep.subr.bf16.mxu0 %v11362_v56  ;;  %4329 = vmatprep.subr.bf16.mxu1 %v11490_v57  ;;  %v325_v55 = vld [vmem:[#allocation3 + $0x4a8] sm:$0xff]  ;;  %v11027_v56 = vcombine.low %v185_v43, %v189_v58  ;;  %v11155_v57 = vcombine.low %v313_v45, %v317_v46  ;;  %v11067_v43 = vcombine.low %v225_v22, %v229_v23 }
 0x193   :  { %v11164_v60 = vcombine.high %v321_v54, %v325_v55  ;;  %v273_v22 = vld [vmem:[#allocation3 + $0x308] sm:$0xff] }
 0x194   :  { %v277_v23 = vld [vmem:[#allocation3 + $0x328] sm:$0xff] }
 0x195   :  { %4289 = vmatpush1.bf16.msra.mxu0 %v11361_v63  ;;  %4330 = vmatpush1.bf16.msra.mxu1 %v11489_v0  ;;  %v329_v63 = vld [vmem:[#allocation3 + $0x4c8] sm:$0xff] }
 0x196   :  { %4290 = vmatprep.subr.bf16.mxu0 %v11370_v1  ;;  %4331 = vmatprep.subr.bf16.mxu1 %v11498_v2  ;;  %v333_v0 = vld [vmem:[#allocation3 + $0x4e8] sm:$0xff]  ;;  %v11035_v1 = vcombine.low %v193_v52, %v197_v53  ;;  %v11163_v2 = vcombine.low %v321_v54, %v325_v55 }
 0x197   :  { %v11172_v4 = vcombine.high %v329_v63, %v333_v0  ;;  %v245_v52 = vld [vmem:[#allocation3 + $0x228] sm:$0xff] }
 0x198   :  { %v369_v54 = vld [vmem:[#allocation3 + $0x608] sm:$0xff] }
 0x199   :  { %4291 = vmatpush1.bf16.msra.mxu0 %v11369_v7  ;;  %4332 = vmatpush1.bf16.msra.mxu1 %v11497_v8  ;;  %v337_v7 = vld [vmem:[#allocation3 + $0x508] sm:$0xff] }
 0x19a   :  { %4292 = vmatprep.subr.bf16.mxu0 %v11378_v9  ;;  %4333 = vmatprep.subr.bf16.mxu1 %v11506_v10  ;;  %v341_v8 = vld [vmem:[#allocation3 + $0x528] sm:$0xff]  ;;  %v11043_v9 = vcombine.low %v201_v61, %v205_v62  ;;  %v11171_v10 = vcombine.low %v329_v63, %v333_v0 }
 0x19b   :  { %v11180_v12 = vcombine.high %v337_v7, %v341_v8  ;;  %v373_v55 = vld [vmem:[#allocation3 + $0x628] sm:$0xff] }
 0x19c   :  { %v249_v61 = vld [vmem:[#allocation3 + $0x248] sm:$0xff] }
 0x19d   :  { %4293 = vmatpush1.bf16.msra.mxu0 %v11377_v16  ;;  %4334 = vmatpush1.bf16.msra.mxu1 %v11505_v17  ;;  %v345_v16 = vld [vmem:[#allocation3 + $0x548] sm:$0xff] }
 0x19e   :  { %4294 = vmatprep.subr.bf16.mxu0 %v11386_v18  ;;  %4335 = vmatprep.subr.bf16.mxu1 %v11514_v19  ;;  %v349_v17 = vld [vmem:[#allocation3 + $0x568] sm:$0xff]  ;;  %v11051_v18 = vcombine.low %v209_v5, %v213_v6  ;;  %v11179_v19 = vcombine.low %v337_v7, %v341_v8 }
 0x19f   :  { %v11188_v21 = vcombine.high %v345_v16, %v349_v17  ;;  %v253_v62 = vld [vmem:[#allocation3 + $0x268] sm:$0xff] }
 0x1a0   :  { %v377_v63 = vld [vmem:[#allocation3 + $0x648] sm:$0xff] }
 0x1a1   :  { %4295 = vmatpush1.bf16.msra.mxu0 %v11385_v24  ;;  %4336 = vmatpush1.bf16.msra.mxu1 %v11513_v25  ;;  %v353_v24 = vld [vmem:[#allocation3 + $0x588] sm:$0xff] }
 0x1a2   :  { %4296 = vmatprep.subr.bf16.mxu0 %v11394_v26  ;;  %4337 = vmatprep.subr.bf16.mxu1 %v11522_v28  ;;  %v357_v25 = vld [vmem:[#allocation3 + $0x5a8] sm:$0xff]  ;;  %v11059_v26 = vcombine.low %v217_v14, %v221_v15  ;;  %v11187_v28 = vcombine.low %v345_v16, %v349_v17 }
 0x1a3   :  { %v11196_v34 = vcombine.high %v353_v24, %v357_v25  ;;  %v11195_v46 = vcombine.low %v353_v24, %v357_v25  ;;  %v381_v0 = vld [vmem:[#allocation3 + $0x668] sm:$0xff] }
 0x1a4   :  { %v257_v5 = vld [vmem:[#allocation3 + $0x288] sm:$0xff] }
 0x1a5   :  { %4297 = vmatpush1.bf16.msra.mxu0 %v11393_v36  ;;  %4338 = vmatpush1.bf16.msra.mxu1 %v11521_v38  ;;  %v237_v36 = vld [vmem:[#allocation3 + $0x1e8] sm:$0xff] }
 0x1a6   :  { %4348 = vmatprep.subr.bf16.mxu0 %v11020_v13  ;;  %4389 = vmatprep.subr.bf16.mxu1 %v11148_v42  ;;  %v361_v38 = vld [vmem:[#allocation3 + $0x5c8] sm:$0xff] }
 0x1a7   :  { %v365_v13 = vld [vmem:[#allocation3 + $0x5e8] sm:$0xff] }
 0x1a8   :  { %4299 = vmatmul.mubr.bf16.vlgmr.msra.gmra.mrb[12].mxu0 %v13488_v44  ;;  %4340 = vmatmul.mubr.bf16.vlgmr.msra.gmra.mrb[12].mxu1 %v13490_v48  ;;  %v261_v6 = vld [vmem:[#allocation3 + $0x2a8] sm:$0xff] }
 0x1a9   :  { %4349 = vmatpush1.bf16.msra.mxu0 %v11019_v47  ;;  %4390 = vmatpush1.bf16.msra.mxu1 %v11147_v49  ;;  %v11076_v47 = vcombine.high %v233_v35, %v237_v36  ;;  %v385_v7 = vld [vmem:[#allocation3 + $0x688] sm:$0xff] }
 0x1aa   :  { %4350 = vmatprep.subr.bf16.mxu0 %v11028_v50  ;;  %4391 = vmatprep.subr.bf16.mxu1 %v11156_v51  ;;  %v11204_v50 = vcombine.high %v361_v38, %v365_v13  ;;  %v241_v51 = vld [vmem:[#allocation3 + $0x208] sm:$0xff] }
 0x1ab   :  { %4380 = vmatprep.mubr.bf16.mxu0 %v13450_v27  ;;  %4421 = vmatprep.mubr.bf16.mxu1 %v13453_v29  ;;  %v389_v8 = vld [vmem:[#allocation3 + $0x6a8] sm:$0xff] }
 0x1ac   :  { %v265_v14 = vld [vmem:[#allocation3 + $0x2c8] sm:$0xff] }
 0x1ad   :  { %4351 = vmatpush1.bf16.msra.mxu0 %v11027_v56  ;;  %4392 = vmatpush1.bf16.msra.mxu1 %v11155_v57  ;;  %v11075_v56 = vcombine.low %v233_v35, %v237_v36  ;;  %v11203_v57 = vcombine.low %v361_v38, %v365_v13  ;;  %v269_v15 = vld [vmem:[#allocation3 + $0x2e8] sm:$0xff] }
 0x1ae   :  { %4352 = vmatprep.subr.bf16.mxu0 %v11036_v59  ;;  %4393 = vmatprep.subr.bf16.mxu1 %v11164_v60  ;;  %v11084_v59 = vcombine.high %v241_v51, %v245_v52  ;;  %v11212_v60 = vcombine.high %v369_v54, %v373_v55  ;;  %v393_v16 = vld [vmem:[#allocation3 + $0x6c8] sm:$0xff] }
 0x1af   :  { %v397_v17 = vld [vmem:[#allocation3 + $0x6e8] sm:$0xff] }
 0x1b0   :  { %v401_v24 = vld [vmem:[#allocation3 + $0x708] sm:$0xff] }
 0x1b1   :  { %4353 = vmatpush1.bf16.msra.mxu0 %v11035_v1  ;;  %4394 = vmatpush1.bf16.msra.mxu1 %v11163_v2  ;;  %v11083_v1 = vcombine.low %v241_v51, %v245_v52  ;;  %v11211_v2 = vcombine.low %v369_v54, %v373_v55  ;;  %v405_v25 = vld [vmem:[#allocation3 + $0x728] sm:$0xff] }
 0x1b2   :  { %4354 = vmatprep.subr.bf16.mxu0 %v11044_v3  ;;  %4395 = vmatprep.subr.bf16.mxu1 %v11172_v4  ;;  %v11092_v3 = vcombine.high %v249_v61, %v253_v62  ;;  %v11220_v4 = vcombine.high %v377_v63, %v381_v0  ;;  %v281_v35 = vld [vmem:[#allocation3 + $0x348] sm:$0xff] }
 0x1b3   :  { %v285_v36 = vld [vmem:[#allocation3 + $0x368] sm:$0xff] }
 0x1b4   :  { %v409_v38 = vld [vmem:[#allocation3 + $0x748] sm:$0xff]  ;;  %v11123_v52 = vcombine.low %v281_v35, %v285_v36 }
 0x1b5   :  { %4355 = vmatpush1.bf16.msra.mxu0 %v11043_v9  ;;  %4396 = vmatpush1.bf16.msra.mxu1 %v11171_v10  ;;  %v11091_v9 = vcombine.low %v249_v61, %v253_v62  ;;  %v11219_v10 = vcombine.low %v377_v63, %v381_v0  ;;  %v413_v13 = vld [vmem:[#allocation3 + $0x768] sm:$0xff] }
 0x1b6   :  { %4356 = vmatprep.subr.bf16.mxu0 %v11052_v11  ;;  %4397 = vmatprep.subr.bf16.mxu1 %v11180_v12  ;;  %v11100_v11 = vcombine.high %v257_v5, %v261_v6  ;;  %v11228_v12 = vcombine.high %v385_v7, %v389_v8  ;;  %v421_v51 = vld [vmem:[#allocation3 + $0x7a8] sm:$0xff] }
 0x1b9   :  { %4357 = vmatpush1.bf16.msra.mxu0 %v11051_v18  ;;  %4398 = vmatpush1.bf16.msra.mxu1 %v11179_v19  ;;  %v11099_v18 = vcombine.low %v257_v5, %v261_v6  ;;  %v11227_v19 = vcombine.low %v385_v7, %v389_v8 }
 0x1ba   :  { %4358 = vmatprep.subr.bf16.mxu0 %v11060_v20  ;;  %4399 = vmatprep.subr.bf16.mxu1 %v11188_v21  ;;  %v11108_v20 = vcombine.high %v265_v14, %v269_v15  ;;  %v11236_v21 = vcombine.high %v393_v16, %v397_v17 }
 0x1bb   :  { %v13496_v33 = vpop.f32.mrb[0].mxu0  ;;  %v13500_v41 = vpop.f32.mrb[0].mxu1 }
 0x1bc   :  { %v13498_v37 = vpop.f32.mrb[1].mxu0  ;;  %v13502_v58 = vpop.f32.mrb[1].mxu1 }
 0x1bd   :  { %v1498_v42 = vpop.f32.mrb[2].mxu0  ;;  %4359 = vmatpush1.bf16.msra.mxu0 %v11059_v26  ;;  %4400 = vmatpush1.bf16.msra.mxu1 %v11187_v28  ;;  %v1539_v49 = vpop.f32.mrb[2].mxu1  ;;  %v11107_v26 = vcombine.low %v265_v14, %v269_v15  ;;  %v11235_v28 = vcombine.low %v393_v16, %v397_v17 }
 0x1be   :  { %v1499_v45 = vpop.f32.mrb[3].mxu0  ;;  %4360 = vmatprep.subr.bf16.mxu0 %v11068_v31  ;;  %4401 = vmatprep.subr.bf16.mxu1 %v11196_v34  ;;  %v1540_v53 = vpop.f32.mrb[3].mxu1  ;;  %v11116_v31 = vcombine.high %v273_v22, %v277_v23  ;;  %v11244_v34 = vcombine.high %v401_v24, %v405_v25  ;;  %v11115_v42 = vcombine.low %v273_v22, %v277_v23  ;;  %v293_v49 = vld [vmem:[#allocation3 + $0x3a8] sm:$0xff] }
 0x1bf   :  { %v11124_v45 = vcombine.high %v281_v35, %v285_v36  ;;  %v11251_v53 = vcombine.low %v409_v38, %v413_v13 }
 0x1c1   :  { %4361 = vmatpush1.bf16.msra.mxu0 %v11067_v43  ;;  %4402 = vmatpush1.bf16.msra.mxu1 %v11195_v46  ;;  %v11243_v43 = vcombine.low %v401_v24, %v405_v25  ;;  %v11252_v46 = vcombine.high %v409_v38, %v413_v13 }
 0x1c2   :  { %4362 = vmatprep.subr.bf16.mxu0 %v11076_v47  ;;  %4403 = vmatprep.subr.bf16.mxu1 %v11204_v50  ;;  %v289_v47 = vld [vmem:[#allocation3 + $0x388] sm:$0xff] }
 0x1c3   :  { %v417_v50 = vld [vmem:[#allocation3 + $0x788] sm:$0xff]  ;;  %v11132_v54 = vcombine.high %v289_v47, %v293_v49  ;;  %v11131_v61 = vcombine.low %v289_v47, %v293_v49 }
 0x1c4   :  { %v11260_v55 = vcombine.high %v417_v50, %v421_v51  ;;  %v11259_v62 = vcombine.low %v417_v50, %v421_v51 }
 0x1c5   :  { %4363 = vmatpush1.bf16.msra.mxu0 %v11075_v56  ;;  %4404 = vmatpush1.bf16.msra.mxu1 %v11203_v57  ;;  %v297_v56 = vld [vmem:[#allocation3 + $0x3c8] sm:$0xff] }
 0x1c6   :  { %4364 = vmatprep.subr.bf16.mxu0 %v11084_v59  ;;  %4405 = vmatprep.subr.bf16.mxu1 %v11212_v60  ;;  %v301_v57 = vld [vmem:[#allocation3 + $0x3e8] sm:$0xff] }
 0x1c7   :  { %v425_v59 = vld [vmem:[#allocation3 + $0x7c8] sm:$0xff]  ;;  %v11140_v63 = vcombine.high %v297_v56, %v301_v57  ;;  %v11139_v5 = vcombine.low %v297_v56, %v301_v57 }
 0x1c8   :  { %v429_v60 = vld [vmem:[#allocation3 + $0x7e8] sm:$0xff] }
 0x1c9   :  { %4365 = vmatpush1.bf16.msra.mxu0 %v11083_v1  ;;  %4406 = vmatpush1.bf16.msra.mxu1 %v11211_v2  ;;  %v11268_v0 = vcombine.high %v425_v59, %v429_v60  ;;  %v433_v1 = vld [vmem:[#allocation3 + $0x808] sm:$0xff]  ;;  %v11267_v6 = vcombine.low %v425_v59, %v429_v60 }
 0x1ca   :  { %4366 = vmatprep.subr.bf16.mxu0 %v11092_v3  ;;  %4407 = vmatprep.subr.bf16.mxu1 %v11220_v4  ;;  %v437_v2 = vld [vmem:[#allocation3 + $0x828] sm:$0xff] }
 0x1cb   :  { %v561_v3 = vld [vmem:[#allocation3 + $0xc08] sm:$0xff]  ;;  %v11276_v7 = vcombine.high %v433_v1, %v437_v2  ;;  %v11275_v14 = vcombine.low %v433_v1, %v437_v2 }
 0x1cc   :  { %v565_v4 = vld [vmem:[#allocation3 + $0xc28] sm:$0xff] }
 0x1cd   :  { %4367 = vmatpush1.bf16.msra.mxu0 %v11091_v9  ;;  %4408 = vmatpush1.bf16.msra.mxu1 %v11219_v10  ;;  %v11404_v8 = vcombine.high %v561_v3, %v565_v4  ;;  %v441_v9 = vld [vmem:[#allocation3 + $0x848] sm:$0xff]  ;;  %v11403_v15 = vcombine.low %v561_v3, %v565_v4 }
 0x1ce   :  { %4368 = vmatprep.subr.bf16.mxu0 %v11100_v11  ;;  %4409 = vmatprep.subr.bf16.mxu1 %v11228_v12  ;;  %v445_v10 = vld [vmem:[#allocation3 + $0x868] sm:$0xff] }
 0x1cf   :  { %v569_v11 = vld [vmem:[#allocation3 + $0xc48] sm:$0xff]  ;;  %v11284_v16 = vcombine.high %v441_v9, %v445_v10  ;;  %v11283_v22 = vcombine.low %v441_v9, %v445_v10 }
 0x1d0   :  { %v573_v12 = vld [vmem:[#allocation3 + $0xc68] sm:$0xff] }
 0x1d1   :  { %4369 = vmatpush1.bf16.msra.mxu0 %v11099_v18  ;;  %4410 = vmatpush1.bf16.msra.mxu1 %v11227_v19  ;;  %v11412_v17 = vcombine.high %v569_v11, %v573_v12  ;;  %v449_v18 = vld [vmem:[#allocation3 + $0x888] sm:$0xff]  ;;  %v11411_v23 = vcombine.low %v569_v11, %v573_v12 }
 0x1d2   :  { %4370 = vmatprep.subr.bf16.mxu0 %v11108_v20  ;;  %4411 = vmatprep.subr.bf16.mxu1 %v11236_v21  ;;  %v453_v19 = vld [vmem:[#allocation3 + $0x8a8] sm:$0xff] }
 0x1d3   :  { %v577_v20 = vld [vmem:[#allocation3 + $0xc88] sm:$0xff]  ;;  %v11292_v24 = vcombine.high %v449_v18, %v453_v19  ;;  %v11291_v35 = vcombine.low %v449_v18, %v453_v19 }
 0x1d4   :  { %v581_v21 = vld [vmem:[#allocation3 + $0xca8] sm:$0xff] }
 0x1d5   :  { %4371 = vmatpush1.bf16.msra.mxu0 %v11107_v26  ;;  %4412 = vmatpush1.bf16.msra.mxu1 %v11235_v28  ;;  %v11420_v25 = vcombine.high %v577_v20, %v581_v21  ;;  %v457_v26 = vld [vmem:[#allocation3 + $0x8c8] sm:$0xff]  ;;  %v11419_v36 = vcombine.low %v577_v20, %v581_v21 }
 0x1d6   :  { %4372 = vmatprep.subr.bf16.mxu0 %v11116_v31  ;;  %4413 = vmatprep.subr.bf16.mxu1 %v11244_v34  ;;  %v461_v28 = vld [vmem:[#allocation3 + $0x8e8] sm:$0xff] }
 0x1d7   :  { %v585_v31 = vld [vmem:[#allocation3 + $0xcc8] sm:$0xff]  ;;  %v11300_v38 = vcombine.high %v457_v26, %v461_v28  ;;  %v11299_v47 = vcombine.low %v457_v26, %v461_v28 }
 0x1d8   :  { %v589_v34 = vld [vmem:[#allocation3 + $0xce8] sm:$0xff] }
 0x1d9   :  { %4373 = vmatpush1.bf16.msra.mxu0 %v11115_v42  ;;  %4414 = vmatpush1.bf16.msra.mxu1 %v11243_v43  ;;  %v11428_v13 = vcombine.high %v585_v31, %v589_v34  ;;  %v465_v42 = vld [vmem:[#allocation3 + $0x908] sm:$0xff]  ;;  %v11427_v49 = vcombine.low %v585_v31, %v589_v34 }
 0x1da   :  { %4374 = vmatprep.subr.bf16.mxu0 %v11124_v45  ;;  %4415 = vmatprep.subr.bf16.mxu1 %v11252_v46  ;;  %v469_v43 = vld [vmem:[#allocation3 + $0x928] sm:$0xff] }
 0x1db   :  { %v593_v45 = vld [vmem:[#allocation3 + $0xd08] sm:$0xff]  ;;  %v11308_v50 = vcombine.high %v465_v42, %v469_v43  ;;  %v11307_v56 = vcombine.low %v465_v42, %v469_v43 }
 0x1dc   :  { %v597_v46 = vld [vmem:[#allocation3 + $0xd28] sm:$0xff] }
 0x1dd   :  { %4375 = vmatpush1.bf16.msra.mxu0 %v11123_v52  ;;  %4416 = vmatpush1.bf16.msra.mxu1 %v11251_v53  ;;  %v11436_v51 = vcombine.high %v593_v45, %v597_v46  ;;  %v473_v52 = vld [vmem:[#allocation3 + $0x948] sm:$0xff]  ;;  %v11435_v57 = vcombine.low %v593_v45, %v597_v46 }
 0x1de   :  { %4376 = vmatprep.subr.bf16.mxu0 %v11132_v54  ;;  %4417 = vmatprep.subr.bf16.mxu1 %v11260_v55  ;;  %v477_v53 = vld [vmem:[#allocation3 + $0x968] sm:$0xff] }
 0x1df   :  { %v601_v54 = vld [vmem:[#allocation3 + $0xd48] sm:$0xff]  ;;  %v11316_v59 = vcombine.high %v473_v52, %v477_v53  ;;  %v11315_v1 = vcombine.low %v473_v52, %v477_v53 }
 0x1e0   :  { %v605_v55 = vld [vmem:[#allocation3 + $0xd68] sm:$0xff] }
 0x1e1   :  { %4377 = vmatpush1.bf16.msra.mxu0 %v11131_v61  ;;  %4418 = vmatpush1.bf16.msra.mxu1 %v11259_v62  ;;  %v11444_v60 = vcombine.high %v601_v54, %v605_v55  ;;  %v481_v61 = vld [vmem:[#allocation3 + $0x988] sm:$0xff]  ;;  %v11443_v2 = vcombine.low %v601_v54, %v605_v55 }
 0x1e2   :  { %4378 = vmatprep.subr.bf16.mxu0 %v11140_v63  ;;  %4419 = vmatprep.subr.bf16.mxu1 %v11268_v0  ;;  %v485_v62 = vld [vmem:[#allocation3 + $0x9a8] sm:$0xff] }
 0x1e3   :  { %v609_v63 = vld [vmem:[#allocation3 + $0xd88] sm:$0xff]  ;;  %v11324_v3 = vcombine.high %v481_v61, %v485_v62 }
 0x1e4   :  { %v613_v0 = vld [vmem:[#allocation3 + $0xda8] sm:$0xff] }
 0x1e5   :  { %4379 = vmatpush1.bf16.msra.mxu0 %v11139_v5  ;;  %4420 = vmatpush1.bf16.msra.mxu1 %v11267_v6  ;;  %v11452_v5 = vcombine.high %v609_v63, %v613_v0  ;;  %v489_v6 = vld [vmem:[#allocation3 + $0x9c8] sm:$0xff] }
 0x1e6   :  { %4430 = vmatprep.subr.bf16.mxu0 %v11276_v7  ;;  %4471 = vmatprep.subr.bf16.mxu1 %v11404_v8  ;;  %v493_v7 = vld [vmem:[#allocation3 + $0x9e8] sm:$0xff] }
 0x1e7   :  { %v617_v9 = vld [vmem:[#allocation3 + $0xdc8] sm:$0xff]  ;;  %v11332_v18 = vcombine.high %v489_v6, %v493_v7  ;;  %v11331_v26 = vcombine.low %v489_v6, %v493_v7 }
 0x1e8   :  { %4381 = vmatmul.mubr.bf16.vlgmr.msra.gmra.mrb[16].mxu0 %v13470_v30  ;;  %4422 = vmatmul.mubr.bf16.vlgmr.msra.gmra.mrb[16].mxu1 %v13472_v32  ;;  %v621_v10 = vld [vmem:[#allocation3 + $0xde8] sm:$0xff] }
 0x1e9   :  { %4431 = vmatpush1.bf16.msra.mxu0 %v11275_v14  ;;  %4472 = vmatpush1.bf16.msra.mxu1 %v11403_v15  ;;  %v11323_v14 = vcombine.low %v481_v61, %v485_v62  ;;  %v11460_v20 = vcombine.high %v617_v9, %v621_v10  ;;  %v497_v21 = vld [vmem:[#allocation3 + $0xa08] sm:$0xff]  ;;  %v11459_v28 = vcombine.low %v617_v9, %v621_v10 }
 0x1ea   :  { %4432 = vmatprep.subr.bf16.mxu0 %v11284_v16  ;;  %4473 = vmatprep.subr.bf16.mxu1 %v11412_v17  ;;  %v11451_v17 = vcombine.low %v609_v63, %v613_v0 }
 0x1eb   :  { %4462 = vmatprep.mubr.bf16.mxu0 %v13474_v39  ;;  %4503 = vmatprep.mubr.bf16.mxu1 %v13477_v40 }
 0x1ed   :  { %4433 = vmatpush1.bf16.msra.mxu0 %v11283_v22  ;;  %4474 = vmatpush1.bf16.msra.mxu1 %v11411_v23  ;;  %v501_v22 = vld [vmem:[#allocation3 + $0xa28] sm:$0xff] }
 0x1ee   :  { %4434 = vmatprep.subr.bf16.mxu0 %v11292_v24  ;;  %4475 = vmatprep.subr.bf16.mxu1 %v11420_v25  ;;  %v625_v24 = vld [vmem:[#allocation3 + $0xe08] sm:$0xff]  ;;  %v11340_v31 = vcombine.high %v497_v21, %v501_v22  ;;  %v11339_v42 = vcombine.low %v497_v21, %v501_v22 }
 0x1ef   :  { %v629_v25 = vld [vmem:[#allocation3 + $0xe28] sm:$0xff] }
 0x1f0   :  { %v11468_v34 = vcombine.high %v625_v24, %v629_v25  ;;  %v11467_v43 = vcombine.low %v625_v24, %v629_v25  ;;  %v545_v22 = vld [vmem:[#allocation3 + $0xb88] sm:$0xff] }
 0x1f1   :  { %4435 = vmatpush1.bf16.msra.mxu0 %v11291_v35  ;;  %4476 = vmatpush1.bf16.msra.mxu1 %v11419_v36  ;;  %v505_v35 = vld [vmem:[#allocation3 + $0xa48] sm:$0xff] }
 0x1f2   :  { %4436 = vmatprep.subr.bf16.mxu0 %v11300_v38  ;;  %4477 = vmatprep.subr.bf16.mxu1 %v11428_v13  ;;  %v509_v36 = vld [vmem:[#allocation3 + $0xa68] sm:$0xff] }
 0x1f3   :  { %v633_v38 = vld [vmem:[#allocation3 + $0xe48] sm:$0xff]  ;;  %v11348_v45 = vcombine.high %v505_v35, %v509_v36  ;;  %v11347_v52 = vcombine.low %v505_v35, %v509_v36 }
 0x1f4   :  { %v637_v13 = vld [vmem:[#allocation3 + $0xe68] sm:$0xff] }
 0x1f5   :  { %4437 = vmatpush1.bf16.msra.mxu0 %v11299_v47  ;;  %4478 = vmatpush1.bf16.msra.mxu1 %v11427_v49  ;;  %v11476_v46 = vcombine.high %v633_v38, %v637_v13  ;;  %v513_v47 = vld [vmem:[#allocation3 + $0xa88] sm:$0xff]  ;;  %v11475_v53 = vcombine.low %v633_v38, %v637_v13 }
 0x1f6   :  { %4438 = vmatprep.subr.bf16.mxu0 %v11308_v50  ;;  %4479 = vmatprep.subr.bf16.mxu1 %v11436_v51  ;;  %v517_v49 = vld [vmem:[#allocation3 + $0xaa8] sm:$0xff] }
 0x1f7   :  { %v641_v50 = vld [vmem:[#allocation3 + $0xe88] sm:$0xff]  ;;  %v11356_v54 = vcombine.high %v513_v47, %v517_v49  ;;  %v11355_v61 = vcombine.low %v513_v47, %v517_v49  ;;  %v178_v47 = vld [vmem:[#allocation3 + $0x10] sm:$0xff] }
 0x1f8   :  { %v645_v51 = vld [vmem:[#allocation3 + $0xea8] sm:$0xff]  ;;  %v182_v49 = vld [vmem:[#allocation3 + $0x30] sm:$0xff] }
 0x1f9   :  { %4439 = vmatpush1.bf16.msra.mxu0 %v11307_v56  ;;  %4480 = vmatpush1.bf16.msra.mxu1 %v11435_v57  ;;  %v11484_v55 = vcombine.high %v641_v50, %v645_v51  ;;  %v521_v56 = vld [vmem:[#allocation3 + $0xac8] sm:$0xff]  ;;  %v11483_v62 = vcombine.low %v641_v50, %v645_v51  ;;  %v306_v50 = vld [vmem:[#allocation3 + $0x410] sm:$0xff] }
 0x1fa   :  { %4440 = vmatprep.subr.bf16.mxu0 %v11316_v59  ;;  %4481 = vmatprep.subr.bf16.mxu1 %v11444_v60  ;;  %v525_v57 = vld [vmem:[#allocation3 + $0xae8] sm:$0xff]  ;;  %v310_v51 = vld [vmem:[#allocation3 + $0x430] sm:$0xff] }
 0x1fb   :  { %v13508_v4 = vpop.f32.mrb[4].mxu0  ;;  %v13512_v11 = vpop.f32.mrb[4].mxu1  ;;  %v649_v59 = vld [vmem:[#allocation3 + $0xec8] sm:$0xff]  ;;  %v11364_v63 = vcombine.high %v521_v56, %v525_v57  ;;  %v11363_v6 = vcombine.low %v521_v56, %v525_v57  ;;  %v186_v56 = vld [vmem:[#allocation3 + $0x50] sm:$0xff] }
 0x1fc   :  { %v13510_v8 = vpop.f32.mrb[5].mxu0  ;;  %v13514_v15 = vpop.f32.mrb[5].mxu1  ;;  %v653_v60 = vld [vmem:[#allocation3 + $0xee8] sm:$0xff]  ;;  %v190_v57 = vld [vmem:[#allocation3 + $0x70] sm:$0xff] }
 0x1fd   :  { %v1580_v12 = vpop.f32.mrb[6].mxu0  ;;  %4441 = vmatpush1.bf16.msra.mxu0 %v11315_v1  ;;  %4482 = vmatpush1.bf16.msra.mxu1 %v11443_v2  ;;  %v1621_v19 = vpop.f32.mrb[6].mxu1  ;;  %v11492_v0 = vcombine.high %v649_v59, %v653_v60  ;;  %v529_v1 = vld [vmem:[#allocation3 + $0xb08] sm:$0xff]  ;;  %v11491_v7 = vcombine.low %v649_v59, %v653_v60  ;;  %v314_v59 = vld [vmem:[#allocation3 + $0x450] sm:$0xff] }
 0x1fe   :  { %v1581_v16 = vpop.f32.mrb[7].mxu0  ;;  %4442 = vmatprep.subr.bf16.mxu0 %v11324_v3  ;;  %4483 = vmatprep.subr.bf16.mxu1 %v11452_v5  ;;  %v1622_v23 = vpop.f32.mrb[7].mxu1  ;;  %v533_v2 = vld [vmem:[#allocation3 + $0xb28] sm:$0xff]  ;;  %v318_v60 = vld [vmem:[#allocation3 + $0x470] sm:$0xff] }
 0x1ff   :  { %v657_v3 = vld [vmem:[#allocation3 + $0xf08] sm:$0xff]  ;;  %v11372_v9 = vcombine.high %v529_v1, %v533_v2 }
 0x200   :  { %v661_v5 = vld [vmem:[#allocation3 + $0xf28] sm:$0xff] }
 0x201   :  { %4443 = vmatpush1.bf16.msra.mxu0 %v11323_v14  ;;  %4484 = vmatpush1.bf16.msra.mxu1 %v11451_v17  ;;  %v11500_v10 = vcombine.high %v657_v3, %v661_v5  ;;  %v537_v12 = vld [vmem:[#allocation3 + $0xb48] sm:$0xff]  ;;  %v11499_v19 = vcombine.low %v657_v3, %v661_v5  ;;  %v322_v3 = vld [vmem:[#allocation3 + $0x490] sm:$0xff] }
 0x202   :  { %4444 = vmatprep.subr.bf16.mxu0 %v11332_v18  ;;  %4485 = vmatprep.subr.bf16.mxu1 %v11460_v20  ;;  %v541_v14 = vld [vmem:[#allocation3 + $0xb68] sm:$0xff]  ;;  %v11371_v18 = vcombine.low %v529_v1, %v533_v2  ;;  %v194_v1 = vld [vmem:[#allocation3 + $0x90] sm:$0xff] }
 0x203   :  { %v665_v16 = vld [vmem:[#allocation3 + $0xf48] sm:$0xff]  ;;  %v11380_v20 = vcombine.high %v537_v12, %v541_v14  ;;  %v198_v2 = vld [vmem:[#allocation3 + $0xb0] sm:$0xff] }
 0x204   :  { %v669_v17 = vld [vmem:[#allocation3 + $0xf68] sm:$0xff]  ;;  %v326_v5 = vld [vmem:[#allocation3 + $0x4b0] sm:$0xff] }
 0x205   :  { %4445 = vmatpush1.bf16.msra.mxu0 %v11331_v26  ;;  %4486 = vmatpush1.bf16.msra.mxu1 %v11459_v28  ;;  %v11508_v21 = vcombine.high %v665_v16, %v669_v17  ;;  %v549_v23 = vld [vmem:[#allocation3 + $0xba8] sm:$0xff]  ;;  %v11379_v26 = vcombine.low %v537_v12, %v541_v14  ;;  %v11507_v28 = vcombine.low %v665_v16, %v669_v17  ;;  %v202_v12 = vld [vmem:[#allocation3 + $0xd0] sm:$0xff] }
 0x206   :  { %4446 = vmatprep.subr.bf16.mxu0 %v11340_v31  ;;  %4487 = vmatprep.subr.bf16.mxu1 %v11468_v34  ;;  %v673_v24 = vld [vmem:[#allocation3 + $0xf88] sm:$0xff]  ;;  %v11388_v31 = vcombine.high %v545_v22, %v549_v23  ;;  %v206_v14 = vld [vmem:[#allocation3 + $0xf0] sm:$0xff] }
 0x207   :  { %v677_v25 = vld [vmem:[#allocation3 + $0xfa8] sm:$0xff]  ;;  %v330_v16 = vld [vmem:[#allocation3 + $0x4d0] sm:$0xff] }
 0x208   :  { %v11516_v34 = vcombine.high %v673_v24, %v677_v25  ;;  %v553_v35 = vld [vmem:[#allocation3 + $0xbc8] sm:$0xff]  ;;  %v334_v17 = vld [vmem:[#allocation3 + $0x4f0] sm:$0xff] }
 0x209   :  { %4447 = vmatpush1.bf16.msra.mxu0 %v11339_v42  ;;  %4488 = vmatpush1.bf16.msra.mxu1 %v11467_v43  ;;  %v557_v36 = vld [vmem:[#allocation3 + $0xbe8] sm:$0xff]  ;;  %v11387_v42 = vcombine.low %v545_v22, %v549_v23  ;;  %v11515_v43 = vcombine.low %v673_v24, %v677_v25  ;;  %v210_v22 = vld [vmem:[#allocation3 + $0x110] sm:$0xff] }
 0x20a   :  { %4448 = vmatprep.subr.bf16.mxu0 %v11348_v45  ;;  %4489 = vmatprep.subr.bf16.mxu1 %v11476_v46  ;;  %v681_v38 = vld [vmem:[#allocation3 + $0xfc8] sm:$0xff]  ;;  %v11396_v45 = vcombine.high %v553_v35, %v557_v36  ;;  %v214_v23 = vld [vmem:[#allocation3 + $0x130] sm:$0xff] }
 0x20b   :  { %v685_v13 = vld [vmem:[#allocation3 + $0xfe8] sm:$0xff]  ;;  %v338_v24 = vld [vmem:[#allocation3 + $0x510] sm:$0xff] }
 0x20c   :  { %v11524_v46 = vcombine.high %v681_v38, %v685_v13  ;;  %v342_v25 = vld [vmem:[#allocation3 + $0x530] sm:$0xff] }
 0x20d   :  { %4449 = vmatpush1.bf16.msra.mxu0 %v11347_v52  ;;  %4490 = vmatpush1.bf16.msra.mxu1 %v11475_v53  ;;  %v11395_v52 = vcombine.low %v553_v35, %v557_v36  ;;  %v11523_v53 = vcombine.low %v681_v38, %v685_v13  ;;  %v218_v35 = vld [vmem:[#allocation3 + $0x150] sm:$0xff] }
 0x20e   :  { %4450 = vmatprep.subr.bf16.mxu0 %v11356_v54  ;;  %4491 = vmatprep.subr.bf16.mxu1 %v11484_v55  ;;  %v11022_v54 = vcombine.high %v178_v47, %v182_v49  ;;  %v11150_v55 = vcombine.high %v306_v50, %v310_v51  ;;  %v222_v36 = vld [vmem:[#allocation3 + $0x170] sm:$0xff] }
 0x20f   :  { %v346_v38 = vld [vmem:[#allocation3 + $0x550] sm:$0xff] }
 0x210   :  { %v350_v13 = vld [vmem:[#allocation3 + $0x570] sm:$0xff] }
 0x211   :  { %4451 = vmatpush1.bf16.msra.mxu0 %v11355_v61  ;;  %4492 = vmatpush1.bf16.msra.mxu1 %v11483_v62  ;;  %v11021_v61 = vcombine.low %v178_v47, %v182_v49  ;;  %v11149_v62 = vcombine.low %v306_v50, %v310_v51  ;;  %v226_v47 = vld [vmem:[#allocation3 + $0x190] sm:$0xff] }
 0x212   :  { %4452 = vmatprep.subr.bf16.mxu0 %v11364_v63  ;;  %4493 = vmatprep.subr.bf16.mxu1 %v11492_v0  ;;  %v11030_v63 = vcombine.high %v186_v56, %v190_v57  ;;  %v11158_v0 = vcombine.high %v314_v59, %v318_v60  ;;  %v230_v49 = vld [vmem:[#allocation3 + $0x1b0] sm:$0xff] }
 0x213   :  { %v354_v50 = vld [vmem:[#allocation3 + $0x590] sm:$0xff] }
 0x214   :  { %v358_v51 = vld [vmem:[#allocation3 + $0x5b0] sm:$0xff] }
 0x215   :  { %4453 = vmatpush1.bf16.msra.mxu0 %v11363_v6  ;;  %4494 = vmatpush1.bf16.msra.mxu1 %v11491_v7  ;;  %v11029_v6 = vcombine.low %v186_v56, %v190_v57  ;;  %v11157_v7 = vcombine.low %v314_v59, %v318_v60  ;;  %v11198_v56 = vcombine.high %v354_v50, %v358_v51  ;;  %v234_v57 = vld [vmem:[#allocation3 + $0x1d0] sm:$0xff] }
 0x216   :  { %4454 = vmatprep.subr.bf16.mxu0 %v11372_v9  ;;  %4495 = vmatprep.subr.bf16.mxu1 %v11500_v10  ;;  %v11038_v9 = vcombine.high %v194_v1, %v198_v2  ;;  %v11166_v10 = vcombine.high %v322_v3, %v326_v5  ;;  %v238_v59 = vld [vmem:[#allocation3 + $0x1f0] sm:$0xff] }
 0x219   :  { %4455 = vmatpush1.bf16.msra.mxu0 %v11371_v18  ;;  %4496 = vmatpush1.bf16.msra.mxu1 %v11499_v19  ;;  %v11037_v18 = vcombine.low %v194_v1, %v198_v2  ;;  %v11165_v19 = vcombine.low %v322_v3, %v326_v5  ;;  %v11069_v5 = vcombine.low %v226_v47, %v230_v49 }
 0x21a   :  { %4456 = vmatprep.subr.bf16.mxu0 %v11380_v20  ;;  %4497 = vmatprep.subr.bf16.mxu1 %v11508_v21  ;;  %v11046_v20 = vcombine.high %v202_v12, %v206_v14  ;;  %v11174_v21 = vcombine.high %v330_v16, %v334_v17 }
 0x21d   :  { %4457 = vmatpush1.bf16.msra.mxu0 %v11379_v26  ;;  %4498 = vmatpush1.bf16.msra.mxu1 %v11507_v28  ;;  %v11045_v26 = vcombine.low %v202_v12, %v206_v14  ;;  %v11173_v28 = vcombine.low %v330_v16, %v334_v17  ;;  %v242_v16 = vld [vmem:[#allocation3 + $0x210] sm:$0xff] }
 0x21e   :  { %4458 = vmatprep.subr.bf16.mxu0 %v11388_v31  ;;  %4499 = vmatprep.subr.bf16.mxu1 %v11516_v34  ;;  %v11054_v31 = vcombine.high %v210_v22, %v214_v23  ;;  %v11182_v34 = vcombine.high %v338_v24, %v342_v25  ;;  %v246_v17 = vld [vmem:[#allocation3 + $0x230] sm:$0xff] }
 0x221   :  { %4459 = vmatpush1.bf16.msra.mxu0 %v11387_v42  ;;  %4500 = vmatpush1.bf16.msra.mxu1 %v11515_v43  ;;  %v11053_v42 = vcombine.low %v210_v22, %v214_v23  ;;  %v11181_v43 = vcombine.low %v338_v24, %v342_v25  ;;  %v11086_v22 = vcombine.high %v242_v16, %v246_v17  ;;  %v250_v24 = vld [vmem:[#allocation3 + $0x250] sm:$0xff] }
 0x222   :  { %4460 = vmatprep.subr.bf16.mxu0 %v11396_v45  ;;  %4501 = vmatprep.subr.bf16.mxu1 %v11524_v46  ;;  %v11062_v45 = vcombine.high %v218_v35, %v222_v36  ;;  %v11190_v46 = vcombine.high %v346_v38, %v350_v13  ;;  %v254_v25 = vld [vmem:[#allocation3 + $0x270] sm:$0xff] }
 0x225   :  { %4461 = vmatpush1.bf16.msra.mxu0 %v11395_v52  ;;  %4502 = vmatpush1.bf16.msra.mxu1 %v11523_v53  ;;  %v11061_v52 = vcombine.low %v218_v35, %v222_v36  ;;  %v11189_v53 = vcombine.low %v346_v38, %v350_v13  ;;  %v11094_v35 = vcombine.high %v250_v24, %v254_v25  ;;  %v258_v38 = vld [vmem:[#allocation3 + $0x290] sm:$0xff] }
 0x226   :  { %4512 = vmatprep.subr.bf16.mxu0 %v11022_v54  ;;  %4553 = vmatprep.subr.bf16.mxu1 %v11150_v55  ;;  %v11070_v54 = vcombine.high %v226_v47, %v230_v49  ;;  %v262_v13 = vld [vmem:[#allocation3 + $0x2b0] sm:$0xff] }
 0x227   :  { %v11102_v47 = vcombine.high %v258_v38, %v262_v13 }
 0x228   :  { %4463 = vmatmul.mubr.bf16.vlgmr.msra.gmra.mrb[20].mxu0 %v13488_v44  ;;  %4504 = vmatmul.mubr.bf16.vlgmr.msra.gmra.mrb[20].mxu1 %v13490_v48 }
 0x229   :  { %4513 = vmatpush1.bf16.msra.mxu0 %v11021_v61  ;;  %4554 = vmatpush1.bf16.msra.mxu1 %v11149_v62 }
 0x22a   :  { %4514 = vmatprep.subr.bf16.mxu0 %v11030_v63  ;;  %4555 = vmatprep.subr.bf16.mxu1 %v11158_v0  ;;  %v362_v63 = vld [vmem:[#allocation3 + $0x5d0] sm:$0xff] }
 0x22b   :  { %4544 = vmatprep.mubr.bf16.mxu0 %v13450_v27  ;;  %4585 = vmatprep.mubr.bf16.mxu1 %v13453_v29  ;;  %v366_v0 = vld [vmem:[#allocation3 + $0x5f0] sm:$0xff] }
 0x22d   :  { %4515 = vmatpush1.bf16.msra.mxu0 %v11029_v6  ;;  %4556 = vmatpush1.bf16.msra.mxu1 %v11157_v7 }
 0x22e   :  { %4516 = vmatprep.subr.bf16.mxu0 %v11038_v9  ;;  %4557 = vmatprep.subr.bf16.mxu1 %v11166_v10  ;;  %v11197_v9 = vcombine.low %v354_v50, %v358_v51  ;;  %v11078_v10 = vcombine.high %v234_v57, %v238_v59  ;;  %v266_v50 = vld [vmem:[#allocation3 + $0x2d0] sm:$0xff] }
 0x22f   :  { %v270_v51 = vld [vmem:[#allocation3 + $0x2f0] sm:$0xff] }
 0x231   :  { %4517 = vmatpush1.bf16.msra.mxu0 %v11037_v18  ;;  %4558 = vmatpush1.bf16.msra.mxu1 %v11165_v19  ;;  %v374_v19 = vld [vmem:[#allocation3 + $0x630] sm:$0xff] }
 0x232   :  { %4518 = vmatprep.subr.bf16.mxu0 %v11046_v20  ;;  %4559 = vmatprep.subr.bf16.mxu1 %v11174_v21  ;;  %v11077_v20 = vcombine.low %v234_v57, %v238_v59  ;;  %v11205_v21 = vcombine.low %v362_v63, %v366_v0  ;;  %v274_v59 = vld [vmem:[#allocation3 + $0x310] sm:$0xff] }
 0x235   :  { %4519 = vmatpush1.bf16.msra.mxu0 %v11045_v26  ;;  %4560 = vmatpush1.bf16.msra.mxu1 %v11173_v28  ;;  %v378_v26 = vld [vmem:[#allocation3 + $0x650] sm:$0xff] }
 0x236   :  { %4520 = vmatprep.subr.bf16.mxu0 %v11054_v31  ;;  %4561 = vmatprep.subr.bf16.mxu1 %v11182_v34  ;;  %v382_v28 = vld [vmem:[#allocation3 + $0x670] sm:$0xff]  ;;  %v11085_v31 = vcombine.low %v242_v16, %v246_v17 }
 0x237   :  { %v11222_v36 = vcombine.high %v378_v26, %v382_v28  ;;  %v290_v17 = vld [vmem:[#allocation3 + $0x390] sm:$0xff] }
 0x239   :  { %4521 = vmatpush1.bf16.msra.mxu0 %v11053_v42  ;;  %4562 = vmatpush1.bf16.msra.mxu1 %v11181_v43  ;;  %v386_v42 = vld [vmem:[#allocation3 + $0x690] sm:$0xff] }
 0x23a   :  { %4522 = vmatprep.subr.bf16.mxu0 %v11062_v45  ;;  %4563 = vmatprep.subr.bf16.mxu1 %v11190_v46  ;;  %v390_v43 = vld [vmem:[#allocation3 + $0x6b0] sm:$0xff]  ;;  %v11093_v45 = vcombine.low %v250_v24, %v254_v25  ;;  %v11221_v46 = vcombine.low %v378_v26, %v382_v28 }
 0x23b   :  { %v4218_v55 = vpop.f32.mrb[8].mxu0  ;;  %v4259_v62 = vpop.f32.mrb[8].mxu1  ;;  %v11230_v49 = vcombine.high %v386_v42, %v390_v43  ;;  %v298_v24 = vld [vmem:[#allocation3 + $0x3d0] sm:$0xff] }
 0x23c   :  { %v4219_v60 = vadd.f32 %v4218_v55, %v13496_v33  ;;  %v4220_v61 = vpop.f32.mrb[9].mxu0  ;;  %v4261_v3 = vpop.f32.mrb[9].mxu1  ;;  %v11206_v33 = vcombine.high %v362_v63, %v366_v0  ;;  %v11229_v55 = vcombine.low %v386_v42, %v390_v43  ;;  %v11109_v63 = vcombine.low %v266_v50, %v270_v51  ;;  %v302_v25 = vld [vmem:[#allocation3 + $0x3f0] sm:$0xff] }
 0x23d   :  { %v4221_v1 = vadd.f32 %v4220_v61, %v13498_v37  ;;  %v4222_v2 = vpop.f32.mrb[10].mxu0  ;;  %4523 = vmatpush1.bf16.msra.mxu0 %v11061_v52  ;;  %4564 = vmatpush1.bf16.msra.mxu1 %v11189_v53  ;;  %v4263_v12 = vpop.f32.mrb[10].mxu1  ;;  %v370_v37 = vld [vmem:[#allocation3 + $0x610] sm:$0xff] }
 0x23e   :  { %v13522_v6 = vadd.f32 %v4259_v62, %v4219_v60  ;;  %v4223_v7 = vpop.f32.mrb[11].mxu0  ;;  %4524 = vmatprep.subr.bf16.mxu0 %v11070_v54  ;;  %4565 = vmatprep.subr.bf16.mxu1 %v11198_v56  ;;  %v4264_v18 = vpop.f32.mrb[11].mxu1  ;;  %v11214_v23 = vcombine.high %v370_v37, %v374_v19  ;;  %v11213_v34 = vcombine.low %v370_v37, %v374_v19  ;;  %v394_v52 = vld [vmem:[#allocation3 + $0x6d0] sm:$0xff] }
 0x23f   :  { %v13524_v14 = vadd.f32 %v4261_v3, %v4221_v1  ;;  %v398_v53 = vld [vmem:[#allocation3 + $0x6f0] sm:$0xff]  ;;  %v11101_v54 = vcombine.low %v258_v38, %v262_v13  ;;  %v11110_v56 = vcombine.high %v266_v50, %v270_v51 }
 0x240   :  { %v11238_v57 = vcombine.high %v394_v52, %v398_v53  ;;  %v278_v60 = vld [vmem:[#allocation3 + $0x330] sm:$0xff]  ;;  %v11237_v0 = vcombine.low %v394_v52, %v398_v53 }
 0x241   :  { %4525 = vmatpush1.bf16.msra.mxu0 %v11069_v5  ;;  %4566 = vmatpush1.bf16.msra.mxu1 %v11197_v9  ;;  %v402_v61 = vld [vmem:[#allocation3 + $0x710] sm:$0xff]  ;;  %v11118_v1 = vcombine.high %v274_v59, %v278_v60 }
 0x242   :  { %4526 = vmatprep.subr.bf16.mxu0 %v11078_v10  ;;  %4567 = vmatprep.subr.bf16.mxu1 %v11206_v33  ;;  %v406_v62 = vld [vmem:[#allocation3 + $0x730] sm:$0xff]  ;;  %v11117_v10 = vcombine.low %v274_v59, %v278_v60 }
 0x243   :  { %v11246_v2 = vcombine.high %v402_v61, %v406_v62  ;;  %v282_v3 = vld [vmem:[#allocation3 + $0x350] sm:$0xff]  ;;  %v11245_v12 = vcombine.low %v402_v61, %v406_v62 }
 0x244   :  { %v286_v5 = vld [vmem:[#allocation3 + $0x370] sm:$0xff] }
 0x245   :  { %4527 = vmatpush1.bf16.msra.mxu0 %v11077_v20  ;;  %4568 = vmatpush1.bf16.msra.mxu1 %v11205_v21  ;;  %v410_v7 = vld [vmem:[#allocation3 + $0x750] sm:$0xff]  ;;  %v11126_v33 = vcombine.high %v282_v3, %v286_v5  ;;  %v11125_v20 = vcombine.low %v282_v3, %v286_v5 }
 0x246   :  { %4528 = vmatprep.subr.bf16.mxu0 %v11086_v22  ;;  %4569 = vmatprep.subr.bf16.mxu1 %v11214_v23  ;;  %v414_v9 = vld [vmem:[#allocation3 + $0x770] sm:$0xff] }
 0x247   :  { %v11254_v16 = vcombine.high %v410_v7, %v414_v9  ;;  %v294_v18 = vld [vmem:[#allocation3 + $0x3b0] sm:$0xff]  ;;  %v11253_v21 = vcombine.low %v410_v7, %v414_v9 }
 0x248   :  { %v418_v37 = vld [vmem:[#allocation3 + $0x790] sm:$0xff]  ;;  %v11134_v22 = vcombine.high %v290_v17, %v294_v18 }
 0x249   :  { %4529 = vmatpush1.bf16.msra.mxu0 %v11085_v31  ;;  %4570 = vmatpush1.bf16.msra.mxu1 %v11213_v34  ;;  %v422_v19 = vld [vmem:[#allocation3 + $0x7b0] sm:$0xff]  ;;  %v11133_v31 = vcombine.low %v290_v17, %v294_v18 }
 0x24a   :  { %4530 = vmatprep.subr.bf16.mxu0 %v11094_v35  ;;  %4571 = vmatprep.subr.bf16.mxu1 %v11222_v36  ;;  %v11262_v23 = vcombine.high %v418_v37, %v422_v19  ;;  %v426_v26 = vld [vmem:[#allocation3 + $0x7d0] sm:$0xff]  ;;  %v11261_v34 = vcombine.low %v418_v37, %v422_v19  ;;  %v11142_v35 = vcombine.high %v298_v24, %v302_v25 }
 0x24b   :  { %v430_v28 = vld [vmem:[#allocation3 + $0x7f0] sm:$0xff] }
 0x24c   :  { %v11270_v36 = vcombine.high %v426_v26, %v430_v28  ;;  %v434_v38 = vld [vmem:[#allocation3 + $0x810] sm:$0xff] }
 0x24d   :  { %4531 = vmatpush1.bf16.msra.mxu0 %v11093_v45  ;;  %4572 = vmatpush1.bf16.msra.mxu1 %v11221_v46  ;;  %v438_v13 = vld [vmem:[#allocation3 + $0x830] sm:$0xff]  ;;  %v11141_v45 = vcombine.low %v298_v24, %v302_v25  ;;  %v11269_v46 = vcombine.low %v426_v26, %v430_v28 }
 0x24e   :  { %4532 = vmatprep.subr.bf16.mxu0 %v11102_v47  ;;  %4573 = vmatprep.subr.bf16.mxu1 %v11230_v49  ;;  %v562_v42 = vld [vmem:[#allocation3 + $0xc10] sm:$0xff]  ;;  %v11278_v47 = vcombine.high %v434_v38, %v438_v13 }
 0x24f   :  { %v566_v43 = vld [vmem:[#allocation3 + $0xc30] sm:$0xff] }
 0x250   :  { %v11406_v49 = vcombine.high %v562_v42, %v566_v43  ;;  %v442_v50 = vld [vmem:[#allocation3 + $0x850] sm:$0xff] }
 0x251   :  { %4533 = vmatpush1.bf16.msra.mxu0 %v11101_v54  ;;  %4574 = vmatpush1.bf16.msra.mxu1 %v11229_v55  ;;  %v446_v51 = vld [vmem:[#allocation3 + $0x870] sm:$0xff]  ;;  %v11277_v54 = vcombine.low %v434_v38, %v438_v13  ;;  %v11405_v55 = vcombine.low %v562_v42, %v566_v43 }
 0x252   :  { %4534 = vmatprep.subr.bf16.mxu0 %v11110_v56  ;;  %4575 = vmatprep.subr.bf16.mxu1 %v11238_v57  ;;  %v570_v52 = vld [vmem:[#allocation3 + $0xc50] sm:$0xff]  ;;  %v11286_v56 = vcombine.high %v442_v50, %v446_v51 }
 0x253   :  { %v574_v53 = vld [vmem:[#allocation3 + $0xc70] sm:$0xff] }
 0x254   :  { %v11414_v57 = vcombine.high %v570_v52, %v574_v53  ;;  %v450_v59 = vld [vmem:[#allocation3 + $0x890] sm:$0xff] }
 0x255   :  { %4535 = vmatpush1.bf16.msra.mxu0 %v11109_v63  ;;  %4576 = vmatpush1.bf16.msra.mxu1 %v11237_v0  ;;  %v454_v60 = vld [vmem:[#allocation3 + $0x8b0] sm:$0xff]  ;;  %v11285_v63 = vcombine.low %v442_v50, %v446_v51  ;;  %v11413_v0 = vcombine.low %v570_v52, %v574_v53 }
 0x256   :  { %4536 = vmatprep.subr.bf16.mxu0 %v11118_v1  ;;  %4577 = vmatprep.subr.bf16.mxu1 %v11246_v2  ;;  %v578_v61 = vld [vmem:[#allocation3 + $0xc90] sm:$0xff]  ;;  %v11294_v1 = vcombine.high %v450_v59, %v454_v60 }
 0x257   :  { %v582_v62 = vld [vmem:[#allocation3 + $0xcb0] sm:$0xff] }
 0x258   :  { %v11422_v2 = vcombine.high %v578_v61, %v582_v62  ;;  %v458_v3 = vld [vmem:[#allocation3 + $0x8d0] sm:$0xff] }
 0x259   :  { %4537 = vmatpush1.bf16.msra.mxu0 %v11117_v10  ;;  %4578 = vmatpush1.bf16.msra.mxu1 %v11245_v12  ;;  %v462_v5 = vld [vmem:[#allocation3 + $0x8f0] sm:$0xff]  ;;  %v11293_v10 = vcombine.low %v450_v59, %v454_v60  ;;  %v11421_v12 = vcombine.low %v578_v61, %v582_v62 }
 0x25a   :  { %4538 = vmatprep.subr.bf16.mxu0 %v11126_v33  ;;  %4579 = vmatprep.subr.bf16.mxu1 %v11254_v16  ;;  %v586_v7 = vld [vmem:[#allocation3 + $0xcd0] sm:$0xff]  ;;  %v11302_v33 = vcombine.high %v458_v3, %v462_v5 }
 0x25b   :  { %v590_v9 = vld [vmem:[#allocation3 + $0xcf0] sm:$0xff] }
 0x25c   :  { %v11430_v16 = vcombine.high %v586_v7, %v590_v9  ;;  %v466_v17 = vld [vmem:[#allocation3 + $0x910] sm:$0xff] }
 0x25d   :  { %4539 = vmatpush1.bf16.msra.mxu0 %v11125_v20  ;;  %4580 = vmatpush1.bf16.msra.mxu1 %v11253_v21  ;;  %v470_v18 = vld [vmem:[#allocation3 + $0x930] sm:$0xff]  ;;  %v11301_v20 = vcombine.low %v458_v3, %v462_v5  ;;  %v11429_v21 = vcombine.low %v586_v7, %v590_v9 }
 0x25e   :  { %4540 = vmatprep.subr.bf16.mxu0 %v11134_v22  ;;  %4581 = vmatprep.subr.bf16.mxu1 %v11262_v23  ;;  %v594_v37 = vld [vmem:[#allocation3 + $0xd10] sm:$0xff]  ;;  %v11310_v22 = vcombine.high %v466_v17, %v470_v18 }
 0x25f   :  { %v598_v19 = vld [vmem:[#allocation3 + $0xd30] sm:$0xff] }
 0x260   :  { %v11438_v23 = vcombine.high %v594_v37, %v598_v19  ;;  %v474_v24 = vld [vmem:[#allocation3 + $0x950] sm:$0xff] }
 0x261   :  { %4541 = vmatpush1.bf16.msra.mxu0 %v11133_v31  ;;  %4582 = vmatpush1.bf16.msra.mxu1 %v11261_v34  ;;  %v478_v25 = vld [vmem:[#allocation3 + $0x970] sm:$0xff]  ;;  %v11309_v31 = vcombine.low %v466_v17, %v470_v18  ;;  %v11437_v34 = vcombine.low %v594_v37, %v598_v19 }
 0x262   :  { %4542 = vmatprep.subr.bf16.mxu0 %v11142_v35  ;;  %4583 = vmatprep.subr.bf16.mxu1 %v11270_v36  ;;  %v602_v26 = vld [vmem:[#allocation3 + $0xd50] sm:$0xff]  ;;  %v11318_v35 = vcombine.high %v474_v24, %v478_v25 }
 0x263   :  { %v606_v28 = vld [vmem:[#allocation3 + $0xd70] sm:$0xff] }
 0x264   :  { %v11446_v36 = vcombine.high %v602_v26, %v606_v28  ;;  %v482_v38 = vld [vmem:[#allocation3 + $0x990] sm:$0xff] }
 0x265   :  { %4543 = vmatpush1.bf16.msra.mxu0 %v11141_v45  ;;  %4584 = vmatpush1.bf16.msra.mxu1 %v11269_v46  ;;  %v486_v13 = vld [vmem:[#allocation3 + $0x9b0] sm:$0xff]  ;;  %v11317_v45 = vcombine.low %v474_v24, %v478_v25  ;;  %v11445_v46 = vcombine.low %v602_v26, %v606_v28 }
 0x266   :  { %4594 = vmatprep.subr.bf16.mxu0 %v11278_v47  ;;  %4635 = vmatprep.subr.bf16.mxu1 %v11406_v49  ;;  %v610_v42 = vld [vmem:[#allocation3 + $0xd90] sm:$0xff]  ;;  %v11326_v47 = vcombine.high %v482_v38, %v486_v13  ;;  %v11325_v62 = vcombine.low %v482_v38, %v486_v13 }
 0x267   :  { %v614_v43 = vld [vmem:[#allocation3 + $0xdb0] sm:$0xff] }
 0x268   :  { %4545 = vmatmul.mubr.bf16.vlgmr.msra.gmra.mrb[24].mxu0 %v13470_v30  ;;  %4586 = vmatmul.mubr.bf16.vlgmr.msra.gmra.mrb[24].mxu1 %v13472_v32  ;;  %v11454_v50 = vcombine.high %v610_v42, %v614_v43  ;;  %v490_v51 = vld [vmem:[#allocation3 + $0x9d0] sm:$0xff] }
 0x269   :  { %4595 = vmatpush1.bf16.msra.mxu0 %v11277_v54  ;;  %4636 = vmatpush1.bf16.msra.mxu1 %v11405_v55  ;;  %v494_v52 = vld [vmem:[#allocation3 + $0x9f0] sm:$0xff] }
 0x26a   :  { %4596 = vmatprep.subr.bf16.mxu0 %v11286_v56  ;;  %4637 = vmatprep.subr.bf16.mxu1 %v11414_v57  ;;  %v618_v56 = vld [vmem:[#allocation3 + $0xdd0] sm:$0xff] }
 0x26b   :  { %4626 = vmatprep.mubr.bf16.mxu0 %v13474_v39  ;;  %4667 = vmatprep.mubr.bf16.mxu1 %v13477_v40  ;;  %v622_v57 = vld [vmem:[#allocation3 + $0xdf0] sm:$0xff] }
 0x26c   :  { %v498_v7 = vld [vmem:[#allocation3 + $0xa10] sm:$0xff] }
 0x26d   :  { %4597 = vmatpush1.bf16.msra.mxu0 %v11285_v63  ;;  %4638 = vmatpush1.bf16.msra.mxu1 %v11413_v0  ;;  %v502_v9 = vld [vmem:[#allocation3 + $0xa30] sm:$0xff] }
 0x26e   :  { %4598 = vmatprep.subr.bf16.mxu0 %v11294_v1  ;;  %4639 = vmatprep.subr.bf16.mxu1 %v11422_v2  ;;  %v11453_v1 = vcombine.low %v610_v42, %v614_v43  ;;  %v11334_v2 = vcombine.high %v490_v51, %v494_v52  ;;  %v11342_v17 = vcombine.high %v498_v7, %v502_v9  ;;  %v506_v37 = vld [vmem:[#allocation3 + $0xa50] sm:$0xff] }
 0x26f   :  { %v510_v19 = vld [vmem:[#allocation3 + $0xa70] sm:$0xff] }
 0x270   :  { %v11350_v24 = vcombine.high %v506_v37, %v510_v19  ;;  %v514_v26 = vld [vmem:[#allocation3 + $0xa90] sm:$0xff] }
 0x271   :  { %4599 = vmatpush1.bf16.msra.mxu0 %v11293_v10  ;;  %4640 = vmatpush1.bf16.msra.mxu1 %v11421_v12  ;;  %v630_v12 = vld [vmem:[#allocation3 + $0xe30] sm:$0xff] }
 0x272   :  { %4600 = vmatprep.subr.bf16.mxu0 %v11302_v33  ;;  %4641 = vmatprep.subr.bf16.mxu1 %v11430_v16  ;;  %v11333_v33 = vcombine.low %v490_v51, %v494_v52  ;;  %v11461_v16 = vcombine.low %v618_v56, %v622_v57  ;;  %v518_v28 = vld [vmem:[#allocation3 + $0xab0] sm:$0xff] }
 0x273   :  { %v11358_v38 = vcombine.high %v514_v26, %v518_v28  ;;  %v522_v42 = vld [vmem:[#allocation3 + $0xad0] sm:$0xff] }
 0x274   :  { %v526_v43 = vld [vmem:[#allocation3 + $0xaf0] sm:$0xff] }
 0x275   :  { %4601 = vmatpush1.bf16.msra.mxu0 %v11301_v20  ;;  %4642 = vmatpush1.bf16.msra.mxu1 %v11429_v21  ;;  %v634_v20 = vld [vmem:[#allocation3 + $0xe50] sm:$0xff] }
 0x276   :  { %4602 = vmatprep.subr.bf16.mxu0 %v11310_v22  ;;  %4643 = vmatprep.subr.bf16.mxu1 %v11438_v23  ;;  %v638_v21 = vld [vmem:[#allocation3 + $0xe70] sm:$0xff]  ;;  %v11341_v22 = vcombine.low %v498_v7, %v502_v9 }
 0x277   :  { %v11478_v25 = vcombine.high %v634_v20, %v638_v21  ;;  %v530_v52 = vld [vmem:[#allocation3 + $0xb10] sm:$0xff] }
 0x278   :  { %v546_v9 = vld [vmem:[#allocation3 + $0xb90] sm:$0xff] }
 0x279   :  { %4603 = vmatpush1.bf16.msra.mxu0 %v11309_v31  ;;  %4644 = vmatpush1.bf16.msra.mxu1 %v11437_v34  ;;  %v642_v31 = vld [vmem:[#allocation3 + $0xe90] sm:$0xff] }
 0x27a   :  { %4604 = vmatprep.subr.bf16.mxu0 %v11318_v35  ;;  %4645 = vmatprep.subr.bf16.mxu1 %v11446_v36  ;;  %v646_v34 = vld [vmem:[#allocation3 + $0xeb0] sm:$0xff]  ;;  %v11349_v35 = vcombine.low %v506_v37, %v510_v19  ;;  %v11477_v36 = vcombine.low %v634_v20, %v638_v21 }
 0x27b   :  { %v4300_v49 = vpop.f32.mrb[12].mxu0  ;;  %v4341_v55 = vpop.f32.mrb[12].mxu1  ;;  %v11486_v13 = vcombine.high %v642_v31, %v646_v34  ;;  %v554_v37 = vld [vmem:[#allocation3 + $0xbd0] sm:$0xff] }
 0x27c   :  { %v4301_v53 = vadd.f32 %v4300_v49, %v13522_v6  ;;  %v4302_v54 = vpop.f32.mrb[13].mxu0  ;;  %v4343_v61 = vpop.f32.mrb[13].mxu1  ;;  %v11462_v6 = vcombine.high %v618_v56, %v622_v57  ;;  %v11485_v49 = vcombine.low %v642_v31, %v646_v34  ;;  %v11365_v56 = vcombine.low %v522_v42, %v526_v43  ;;  %v558_v19 = vld [vmem:[#allocation3 + $0xbf0] sm:$0xff]  ;;  %v307_v31 = vld [vmem:[#allocation3 + $0x418] sm:$0xff] }
 0x27d   :  { %v4303_v59 = vadd.f32 %v4302_v54, %v13524_v14  ;;  %v4304_v60 = vpop.f32.mrb[14].mxu0  ;;  %4605 = vmatpush1.bf16.msra.mxu0 %v11317_v45  ;;  %4646 = vmatpush1.bf16.msra.mxu1 %v11445_v46  ;;  %v4345_v3 = vpop.f32.mrb[14].mxu1  ;;  %v626_v14 = vld [vmem:[#allocation3 + $0xe10] sm:$0xff]  ;;  %v311_v34 = vld [vmem:[#allocation3 + $0x438] sm:$0xff] }
 0x27e   :  { %v13532_v63 = vadd.f32 %v4341_v55, %v4301_v53  ;;  %v4305_v0 = vpop.f32.mrb[15].mxu0  ;;  %4606 = vmatprep.subr.bf16.mxu0 %v11326_v47  ;;  %4647 = vmatprep.subr.bf16.mxu1 %v11454_v50  ;;  %v4346_v10 = vpop.f32.mrb[15].mxu1  ;;  %v11470_v18 = vcombine.high %v626_v14, %v630_v12  ;;  %v11469_v23 = vcombine.low %v626_v14, %v630_v12  ;;  %v650_v45 = vld [vmem:[#allocation3 + $0xed0] sm:$0xff] }
 0x27f   :  { %v13534_v5 = vadd.f32 %v4343_v61, %v4303_v59  ;;  %v654_v46 = vld [vmem:[#allocation3 + $0xef0] sm:$0xff]  ;;  %v11357_v47 = vcombine.low %v514_v26, %v518_v28  ;;  %v11366_v50 = vcombine.high %v522_v42, %v526_v43  ;;  %v179_v26 = vld [vmem:[#allocation3 + $0x18] sm:$0xff] }
 0x280   :  { %v11494_v51 = vcombine.high %v650_v45, %v654_v46  ;;  %v534_v53 = vld [vmem:[#allocation3 + $0xb30] sm:$0xff]  ;;  %v11493_v57 = vcombine.low %v650_v45, %v654_v46  ;;  %v183_v28 = vld [vmem:[#allocation3 + $0x38] sm:$0xff] }
 0x281   :  { %4607 = vmatpush1.bf16.msra.mxu0 %v11325_v62  ;;  %4648 = vmatpush1.bf16.msra.mxu1 %v11453_v1  ;;  %v658_v54 = vld [vmem:[#allocation3 + $0xf10] sm:$0xff]  ;;  %v11374_v59 = vcombine.high %v530_v52, %v534_v53  ;;  %v187_v42 = vld [vmem:[#allocation3 + $0x58] sm:$0xff] }
 0x282   :  { %4608 = vmatprep.subr.bf16.mxu0 %v11334_v2  ;;  %4649 = vmatprep.subr.bf16.mxu1 %v11462_v6  ;;  %v662_v55 = vld [vmem:[#allocation3 + $0xf30] sm:$0xff]  ;;  %v11373_v2 = vcombine.low %v530_v52, %v534_v53  ;;  %v191_v43 = vld [vmem:[#allocation3 + $0x78] sm:$0xff] }
 0x283   :  { %v11502_v60 = vcombine.high %v658_v54, %v662_v55  ;;  %v538_v61 = vld [vmem:[#allocation3 + $0xb50] sm:$0xff]  ;;  %v11501_v3 = vcombine.low %v658_v54, %v662_v55  ;;  %v315_v45 = vld [vmem:[#allocation3 + $0x458] sm:$0xff] }
 0x284   :  { %v542_v62 = vld [vmem:[#allocation3 + $0xb70] sm:$0xff]  ;;  %v319_v46 = vld [vmem:[#allocation3 + $0x478] sm:$0xff] }
 0x285   :  { %4609 = vmatpush1.bf16.msra.mxu0 %v11333_v33  ;;  %4650 = vmatpush1.bf16.msra.mxu1 %v11461_v16  ;;  %v666_v0 = vld [vmem:[#allocation3 + $0xf50] sm:$0xff]  ;;  %v11382_v6 = vcombine.high %v538_v61, %v542_v62  ;;  %v11381_v33 = vcombine.low %v538_v61, %v542_v62  ;;  %v195_v52 = vld [vmem:[#allocation3 + $0x98] sm:$0xff] }
 0x286   :  { %4610 = vmatprep.subr.bf16.mxu0 %v11342_v17  ;;  %4651 = vmatprep.subr.bf16.mxu1 %v11470_v18  ;;  %v670_v1 = vld [vmem:[#allocation3 + $0xf70] sm:$0xff]  ;;  %v199_v53 = vld [vmem:[#allocation3 + $0xb8] sm:$0xff] }
 0x287   :  { %v11510_v7 = vcombine.high %v666_v0, %v670_v1  ;;  %v550_v10 = vld [vmem:[#allocation3 + $0xbb0] sm:$0xff]  ;;  %v11509_v16 = vcombine.low %v666_v0, %v670_v1  ;;  %v323_v54 = vld [vmem:[#allocation3 + $0x498] sm:$0xff] }
 0x288   :  { %v674_v14 = vld [vmem:[#allocation3 + $0xf90] sm:$0xff]  ;;  %v11390_v17 = vcombine.high %v546_v9, %v550_v10  ;;  %v327_v55 = vld [vmem:[#allocation3 + $0x4b8] sm:$0xff] }
 0x289   :  { %4611 = vmatpush1.bf16.msra.mxu0 %v11341_v22  ;;  %4652 = vmatpush1.bf16.msra.mxu1 %v11469_v23  ;;  %v678_v12 = vld [vmem:[#allocation3 + $0xfb0] sm:$0xff]  ;;  %v11389_v22 = vcombine.low %v546_v9, %v550_v10  ;;  %v203_v61 = vld [vmem:[#allocation3 + $0xd8] sm:$0xff] }
 0x28a   :  { %4612 = vmatprep.subr.bf16.mxu0 %v11350_v24  ;;  %4653 = vmatprep.subr.bf16.mxu1 %v11478_v25  ;;  %v11518_v18 = vcombine.high %v674_v14, %v678_v12  ;;  %v682_v20 = vld [vmem:[#allocation3 + $0xfd0] sm:$0xff]  ;;  %v11517_v23 = vcombine.low %v674_v14, %v678_v12  ;;  %v11398_v24 = vcombine.high %v554_v37, %v558_v19  ;;  %v207_v62 = vld [vmem:[#allocation3 + $0xf8] sm:$0xff] }
 0x28b   :  { %v686_v21 = vld [vmem:[#allocation3 + $0xff0] sm:$0xff]  ;;  %v331_v0 = vld [vmem:[#allocation3 + $0x4d8] sm:$0xff] }
 0x28c   :  { %v11526_v25 = vcombine.high %v682_v20, %v686_v21  ;;  %v335_v1 = vld [vmem:[#allocation3 + $0x4f8] sm:$0xff] }
 0x28d   :  { %4613 = vmatpush1.bf16.msra.mxu0 %v11349_v35  ;;  %4654 = vmatpush1.bf16.msra.mxu1 %v11477_v36  ;;  %v11397_v35 = vcombine.low %v554_v37, %v558_v19  ;;  %v11525_v36 = vcombine.low %v682_v20, %v686_v21  ;;  %v211_v9 = vld [vmem:[#allocation3 + $0x118] sm:$0xff] }
 0x28e   :  { %4614 = vmatprep.subr.bf16.mxu0 %v11358_v38  ;;  %4655 = vmatprep.subr.bf16.mxu1 %v11486_v13  ;;  %v11024_v38 = vcombine.high %v179_v26, %v183_v28  ;;  %v11152_v13 = vcombine.high %v307_v31, %v311_v34  ;;  %v215_v10 = vld [vmem:[#allocation3 + $0x138] sm:$0xff] }
 0x28f   :  { %v339_v14 = vld [vmem:[#allocation3 + $0x518] sm:$0xff]  ;;  %v11055_v20 = vcombine.low %v211_v9, %v215_v10 }
 0x290   :  { %v343_v12 = vld [vmem:[#allocation3 + $0x538] sm:$0xff] }
 0x291   :  { %4615 = vmatpush1.bf16.msra.mxu0 %v11357_v47  ;;  %4656 = vmatpush1.bf16.msra.mxu1 %v11485_v49  ;;  %v11023_v47 = vcombine.low %v179_v26, %v183_v28  ;;  %v11151_v49 = vcombine.low %v307_v31, %v311_v34  ;;  %v347_v37 = vld [vmem:[#allocation3 + $0x558] sm:$0xff]  ;;  %v11183_v21 = vcombine.low %v339_v14, %v343_v12 }
 0x292   :  { %4616 = vmatprep.subr.bf16.mxu0 %v11366_v50  ;;  %4657 = vmatprep.subr.bf16.mxu1 %v11494_v51  ;;  %v11032_v50 = vcombine.high %v187_v42, %v191_v43  ;;  %v11160_v51 = vcombine.high %v315_v45, %v319_v46  ;;  %v351_v19 = vld [vmem:[#allocation3 + $0x578] sm:$0xff] }
 0x293   :  { %v355_v26 = vld [vmem:[#allocation3 + $0x598] sm:$0xff]  ;;  %v11191_v34 = vcombine.low %v347_v37, %v351_v19 }
 0x294   :  { %v359_v28 = vld [vmem:[#allocation3 + $0x5b8] sm:$0xff] }
 0x295   :  { %4617 = vmatpush1.bf16.msra.mxu0 %v11365_v56  ;;  %4658 = vmatpush1.bf16.msra.mxu1 %v11493_v57  ;;  %v11031_v56 = vcombine.low %v187_v42, %v191_v43  ;;  %v11159_v57 = vcombine.low %v315_v45, %v319_v46  ;;  %v239_v42 = vld [vmem:[#allocation3 + $0x1f8] sm:$0xff] }
 0x296   :  { %4618 = vmatprep.subr.bf16.mxu0 %v11374_v59  ;;  %4659 = vmatprep.subr.bf16.mxu1 %v11502_v60  ;;  %v11040_v59 = vcombine.high %v195_v52, %v199_v53  ;;  %v11168_v60 = vcombine.high %v323_v54, %v327_v55 }
 0x299   :  { %4619 = vmatpush1.bf16.msra.mxu0 %v11373_v2  ;;  %4660 = vmatpush1.bf16.msra.mxu1 %v11501_v3  ;;  %v11039_v2 = vcombine.low %v195_v52, %v199_v53  ;;  %v11167_v3 = vcombine.low %v323_v54, %v327_v55 }
 0x29a   :  { %4620 = vmatprep.subr.bf16.mxu0 %v11382_v6  ;;  %4661 = vmatprep.subr.bf16.mxu1 %v11510_v7  ;;  %v11048_v6 = vcombine.high %v203_v61, %v207_v62  ;;  %v11176_v7 = vcombine.high %v331_v0, %v335_v1 }
 0x29d   :  { %4621 = vmatpush1.bf16.msra.mxu0 %v11381_v33  ;;  %4662 = vmatpush1.bf16.msra.mxu1 %v11509_v16  ;;  %v11047_v33 = vcombine.low %v203_v61, %v207_v62  ;;  %v11056_v16 = vcombine.high %v211_v9, %v215_v10  ;;  %v243_v61 = vld [vmem:[#allocation3 + $0x218] sm:$0xff] }
 0x29e   :  { %4622 = vmatprep.subr.bf16.mxu0 %v11390_v17  ;;  %4663 = vmatprep.subr.bf16.mxu1 %v11518_v18  ;;  %v219_v17 = vld [vmem:[#allocation3 + $0x158] sm:$0xff] }
 0x29f   :  { %v223_v18 = vld [vmem:[#allocation3 + $0x178] sm:$0xff] }
 0x2a0   :  { %v11063_v31 = vcombine.low %v219_v17, %v223_v18  ;;  %v247_v62 = vld [vmem:[#allocation3 + $0x238] sm:$0xff] }
 0x2a1   :  { %4623 = vmatpush1.bf16.msra.mxu0 %v11389_v22  ;;  %4664 = vmatpush1.bf16.msra.mxu1 %v11517_v23  ;;  %v11064_v22 = vcombine.high %v219_v17, %v223_v18  ;;  %v11192_v23 = vcombine.high %v347_v37, %v351_v19  ;;  %v251_v9 = vld [vmem:[#allocation3 + $0x258] sm:$0xff] }
 0x2a2   :  { %4624 = vmatprep.subr.bf16.mxu0 %v11398_v24  ;;  %4665 = vmatprep.subr.bf16.mxu1 %v11526_v25  ;;  %v227_v24 = vld [vmem:[#allocation3 + $0x198] sm:$0xff] }
 0x2a3   :  { %v231_v25 = vld [vmem:[#allocation3 + $0x1b8] sm:$0xff] }
 0x2a4   :  { %v11071_v53 = vcombine.low %v227_v24, %v231_v25  ;;  %v255_v10 = vld [vmem:[#allocation3 + $0x278] sm:$0xff] }
 0x2a5   :  { %4625 = vmatpush1.bf16.msra.mxu0 %v11397_v35  ;;  %4666 = vmatpush1.bf16.msra.mxu1 %v11525_v36  ;;  %v11072_v35 = vcombine.high %v227_v24, %v231_v25  ;;  %v259_v17 = vld [vmem:[#allocation3 + $0x298] sm:$0xff] }
 0x2a6   :  { %4676 = vmatprep.subr.bf16.mxu0 %v11024_v38  ;;  %4717 = vmatprep.subr.bf16.mxu1 %v11152_v13  ;;  %v11200_v38 = vcombine.high %v355_v26, %v359_v28  ;;  %v235_v13 = vld [vmem:[#allocation3 + $0x1d8] sm:$0xff] }
 0x2a7   :  { %v263_v18 = vld [vmem:[#allocation3 + $0x2b8] sm:$0xff] }
 0x2a8   :  { %4627 = vmatmul.mubr.bf16.vlgmr.msra.gmra.mrb[28].mxu0 %v13488_v44  ;;  %4668 = vmatmul.mubr.bf16.vlgmr.msra.gmra.mrb[28].mxu1 %v13490_v48  ;;  %v387_v37 = vld [vmem:[#allocation3 + $0x698] sm:$0xff] }
 0x2a9   :  { %4677 = vmatpush1.bf16.msra.mxu0 %v11023_v47  ;;  %4718 = vmatpush1.bf16.msra.mxu1 %v11151_v49  ;;  %v363_v47 = vld [vmem:[#allocation3 + $0x5d8] sm:$0xff] }
 0x2aa   :  { %4678 = vmatprep.subr.bf16.mxu0 %v11032_v50  ;;  %4719 = vmatprep.subr.bf16.mxu1 %v11160_v51  ;;  %v367_v49 = vld [vmem:[#allocation3 + $0x5f8] sm:$0xff] }
 0x2ab   :  { %4708 = vmatprep.mubr.bf16.mxu0 %v13450_v27  ;;  %4749 = vmatprep.mubr.bf16.mxu1 %v13453_v29  ;;  %v11175_v27 = vcombine.low %v331_v0, %v335_v1  ;;  %v11184_v29 = vcombine.high %v339_v14, %v343_v12  ;;  %v375_v1 = vld [vmem:[#allocation3 + $0x638] sm:$0xff] }
 0x2ac   :  { %v379_v14 = vld [vmem:[#allocation3 + $0x658] sm:$0xff] }
 0x2ad   :  { %4679 = vmatpush1.bf16.msra.mxu0 %v11031_v56  ;;  %4720 = vmatpush1.bf16.msra.mxu1 %v11159_v57  ;;  %v11199_v56 = vcombine.low %v355_v26, %v359_v28  ;;  %v11080_v57 = vcombine.high %v235_v13, %v239_v42  ;;  %v383_v12 = vld [vmem:[#allocation3 + $0x678] sm:$0xff] }
 0x2ae   :  { %4680 = vmatprep.subr.bf16.mxu0 %v11040_v59  ;;  %4721 = vmatprep.subr.bf16.mxu1 %v11168_v60  ;;  %v391_v19 = vld [vmem:[#allocation3 + $0x6b8] sm:$0xff] }
 0x2af   :  { %v267_v24 = vld [vmem:[#allocation3 + $0x2d8] sm:$0xff] }
 0x2b0   :  { %v271_v25 = vld [vmem:[#allocation3 + $0x2f8] sm:$0xff] }
 0x2b1   :  { %4681 = vmatpush1.bf16.msra.mxu0 %v11039_v2  ;;  %4722 = vmatpush1.bf16.msra.mxu1 %v11167_v3  ;;  %v11079_v2 = vcombine.low %v235_v13, %v239_v42  ;;  %v11207_v3 = vcombine.low %v363_v47, %v367_v49  ;;  %v395_v26 = vld [vmem:[#allocation3 + $0x6d8] sm:$0xff] }
 0x2b2   :  { %4682 = vmatprep.subr.bf16.mxu0 %v11048_v6  ;;  %4723 = vmatprep.subr.bf16.mxu1 %v11176_v7  ;;  %v11088_v6 = vcombine.high %v243_v61, %v247_v62  ;;  %v399_v28 = vld [vmem:[#allocation3 + $0x6f8] sm:$0xff] }
 0x2b3   :  { %v279_v13 = vld [vmem:[#allocation3 + $0x338] sm:$0xff] }
 0x2b4   :  { %v403_v42 = vld [vmem:[#allocation3 + $0x718] sm:$0xff] }
 0x2b5   :  { %4683 = vmatpush1.bf16.msra.mxu0 %v11047_v33  ;;  %4724 = vmatpush1.bf16.msra.mxu1 %v11175_v27  ;;  %v11087_v33 = vcombine.low %v243_v61, %v247_v62  ;;  %v295_v61 = vld [vmem:[#allocation3 + $0x3b8] sm:$0xff] }
 0x2b6   :  { %4684 = vmatprep.subr.bf16.mxu0 %v11056_v16  ;;  %4725 = vmatprep.subr.bf16.mxu1 %v11184_v29  ;;  %v11096_v16 = vcombine.high %v251_v9, %v255_v10  ;;  %v11224_v29 = vcombine.high %v379_v14, %v383_v12  ;;  %v419_v62 = vld [vmem:[#allocation3 + $0x798] sm:$0xff] }
 0x2b9   :  { %4685 = vmatpush1.bf16.msra.mxu0 %v11055_v20  ;;  %4726 = vmatpush1.bf16.msra.mxu1 %v11183_v21  ;;  %v11095_v20 = vcombine.low %v251_v9, %v255_v10  ;;  %v11223_v21 = vcombine.low %v379_v14, %v383_v12  ;;  %v427_v9 = vld [vmem:[#allocation3 + $0x7d8] sm:$0xff] }
 0x2ba   :  { %4686 = vmatprep.subr.bf16.mxu0 %v11064_v22  ;;  %4727 = vmatprep.subr.bf16.mxu1 %v11192_v23  ;;  %v11104_v22 = vcombine.high %v259_v17, %v263_v18  ;;  %v11232_v23 = vcombine.high %v387_v37, %v391_v19  ;;  %v431_v10 = vld [vmem:[#allocation3 + $0x7f8] sm:$0xff] }
 0x2bb   :  { %v4382_v36 = vpop.f32.mrb[16].mxu0  ;;  %v4423_v46 = vpop.f32.mrb[16].mxu1 }
 0x2bc   :  { %v4383_v43 = vadd.f32 %v4382_v36, %v13500_v41  ;;  %v4384_v45 = vpop.f32.mrb[17].mxu0  ;;  %v4425_v52 = vpop.f32.mrb[17].mxu1  ;;  %v11208_v41 = vcombine.high %v363_v47, %v367_v49  ;;  %v11240_v36 = vcombine.high %v395_v26, %v399_v28 }
 0x2bd   :  { %v4385_v50 = vadd.f32 %v4384_v45, %v13502_v58  ;;  %v4386_v51 = vpop.f32.mrb[18].mxu0  ;;  %4687 = vmatpush1.bf16.msra.mxu0 %v11063_v31  ;;  %4728 = vmatpush1.bf16.msra.mxu1 %v11191_v34  ;;  %v4427_v59 = vpop.f32.mrb[18].mxu1  ;;  %v371_v58 = vld [vmem:[#allocation3 + $0x618] sm:$0xff]  ;;  %v11103_v31 = vcombine.low %v259_v17, %v263_v18  ;;  %v11231_v34 = vcombine.low %v387_v37, %v391_v19 }
 0x2be   :  { %v13542_v54 = vadd.f32 %v4423_v46, %v4383_v43  ;;  %v4387_v55 = vpop.f32.mrb[19].mxu0  ;;  %4688 = vmatprep.subr.bf16.mxu0 %v11072_v35  ;;  %4729 = vmatprep.subr.bf16.mxu1 %v11200_v38  ;;  %v4428_v0 = vpop.f32.mrb[19].mxu1  ;;  %v11216_v7 = vcombine.high %v371_v58, %v375_v1  ;;  %v11215_v27 = vcombine.low %v371_v58, %v375_v1  ;;  %v275_v38 = vld [vmem:[#allocation3 + $0x318] sm:$0xff] }
 0x2bf   :  { %v13544_v60 = vadd.f32 %v4425_v52, %v4385_v50  ;;  %v11112_v35 = vcombine.high %v267_v24, %v271_v25  ;;  %v407_v43 = vld [vmem:[#allocation3 + $0x738] sm:$0xff]  ;;  %v11111_v45 = vcombine.low %v267_v24, %v271_v25  ;;  %v11239_v46 = vcombine.low %v395_v26, %v399_v28 }
 0x2c0   :  { %v11120_v47 = vcombine.high %v275_v38, %v279_v13  ;;  %v11248_v49 = vcombine.high %v403_v42, %v407_v43  ;;  %v283_v50 = vld [vmem:[#allocation3 + $0x358] sm:$0xff]  ;;  %v11119_v55 = vcombine.low %v275_v38, %v279_v13  ;;  %v11271_v19 = vcombine.low %v427_v9, %v431_v10 }
 0x2c1   :  { %4689 = vmatpush1.bf16.msra.mxu0 %v11071_v53  ;;  %4730 = vmatpush1.bf16.msra.mxu1 %v11199_v56  ;;  %v287_v51 = vld [vmem:[#allocation3 + $0x378] sm:$0xff]  ;;  %v11247_v56 = vcombine.low %v403_v42, %v407_v43 }
 0x2c2   :  { %4690 = vmatprep.subr.bf16.mxu0 %v11080_v57  ;;  %4731 = vmatprep.subr.bf16.mxu1 %v11208_v41  ;;  %v411_v52 = vld [vmem:[#allocation3 + $0x758] sm:$0xff]  ;;  %v11128_v57 = vcombine.high %v283_v50, %v287_v51  ;;  %v11127_v58 = vcombine.low %v283_v50, %v287_v51 }
 0x2c3   :  { %v415_v53 = vld [vmem:[#allocation3 + $0x778] sm:$0xff] }
 0x2c4   :  { %v11256_v59 = vcombine.high %v411_v52, %v415_v53  ;;  %v291_v41 = vld [vmem:[#allocation3 + $0x398] sm:$0xff]  ;;  %v11255_v1 = vcombine.low %v411_v52, %v415_v53 }
 0x2c5   :  { %4691 = vmatpush1.bf16.msra.mxu0 %v11079_v2  ;;  %4732 = vmatpush1.bf16.msra.mxu1 %v11207_v3  ;;  %v423_v0 = vld [vmem:[#allocation3 + $0x7b8] sm:$0xff]  ;;  %v11136_v2 = vcombine.high %v291_v41, %v295_v61  ;;  %v11135_v14 = vcombine.low %v291_v41, %v295_v61 }
 0x2c6   :  { %4692 = vmatprep.subr.bf16.mxu0 %v11088_v6  ;;  %4733 = vmatprep.subr.bf16.mxu1 %v11216_v7  ;;  %v11264_v3 = vcombine.high %v419_v62, %v423_v0  ;;  %v299_v6 = vld [vmem:[#allocation3 + $0x3d8] sm:$0xff]  ;;  %v11263_v12 = vcombine.low %v419_v62, %v423_v0 }
 0x2c7   :  { %v303_v7 = vld [vmem:[#allocation3 + $0x3f8] sm:$0xff] }
 0x2c8   :  { %v563_v17 = vld [vmem:[#allocation3 + $0xc18] sm:$0xff]  ;;  %v11143_v37 = vcombine.low %v299_v6, %v303_v7 }
 0x2c9   :  { %4693 = vmatpush1.bf16.msra.mxu0 %v11087_v33  ;;  %4734 = vmatpush1.bf16.msra.mxu1 %v11215_v27  ;;  %v11144_v33 = vcombine.high %v299_v6, %v303_v7  ;;  %v11272_v27 = vcombine.high %v427_v9, %v431_v10  ;;  %v567_v18 = vld [vmem:[#allocation3 + $0xc38] sm:$0xff] }
 0x2ca   :  { %4694 = vmatprep.subr.bf16.mxu0 %v11096_v16  ;;  %4735 = vmatprep.subr.bf16.mxu1 %v11224_v29  ;;  %v435_v16 = vld [vmem:[#allocation3 + $0x818] sm:$0xff]  ;;  %v11407_v28 = vcombine.low %v563_v17, %v567_v18 }
 0x2cb   :  { %v439_v29 = vld [vmem:[#allocation3 + $0x838] sm:$0xff] }
 0x2cc   :  { %v571_v24 = vld [vmem:[#allocation3 + $0xc58] sm:$0xff]  ;;  %v11279_v26 = vcombine.low %v435_v16, %v439_v29 }
 0x2cd   :  { %4695 = vmatpush1.bf16.msra.mxu0 %v11095_v20  ;;  %4736 = vmatpush1.bf16.msra.mxu1 %v11223_v21  ;;  %v11280_v20 = vcombine.high %v435_v16, %v439_v29  ;;  %v11408_v21 = vcombine.high %v563_v17, %v567_v18  ;;  %v575_v25 = vld [vmem:[#allocation3 + $0xc78] sm:$0xff] }
 0x2ce   :  { %4696 = vmatprep.subr.bf16.mxu0 %v11104_v22  ;;  %4737 = vmatprep.subr.bf16.mxu1 %v11232_v23  ;;  %v443_v22 = vld [vmem:[#allocation3 + $0x858] sm:$0xff]  ;;  %v11415_v43 = vcombine.low %v571_v24, %v575_v25 }
 0x2cf   :  { %v447_v23 = vld [vmem:[#allocation3 + $0x878] sm:$0xff] }
 0x2d0   :  { %v579_v38 = vld [vmem:[#allocation3 + $0xc98] sm:$0xff]  ;;  %v11287_v42 = vcombine.low %v443_v22, %v447_v23 }
 0x2d1   :  { %4697 = vmatpush1.bf16.msra.mxu0 %v11103_v31  ;;  %4738 = vmatpush1.bf16.msra.mxu1 %v11231_v34  ;;  %v11288_v31 = vcombine.high %v443_v22, %v447_v23  ;;  %v11416_v34 = vcombine.high %v571_v24, %v575_v25  ;;  %v583_v13 = vld [vmem:[#allocation3 + $0xcb8] sm:$0xff] }
 0x2d2   :  { %4698 = vmatprep.subr.bf16.mxu0 %v11112_v35  ;;  %4739 = vmatprep.subr.bf16.mxu1 %v11240_v36  ;;  %v451_v35 = vld [vmem:[#allocation3 + $0x898] sm:$0xff] }
 0x2d3   :  { %v455_v36 = vld [vmem:[#allocation3 + $0x8b8] sm:$0xff] }
 0x2d4   :  { %v587_v50 = vld [vmem:[#allocation3 + $0xcd8] sm:$0xff] }
 0x2d5   :  { %4699 = vmatpush1.bf16.msra.mxu0 %v11111_v45  ;;  %4740 = vmatpush1.bf16.msra.mxu1 %v11239_v46  ;;  %v11296_v45 = vcombine.high %v451_v35, %v455_v36  ;;  %v11424_v46 = vcombine.high %v579_v38, %v583_v13  ;;  %v591_v51 = vld [vmem:[#allocation3 + $0xcf8] sm:$0xff] }
 0x2d6   :  { %4700 = vmatprep.subr.bf16.mxu0 %v11120_v47  ;;  %4741 = vmatprep.subr.bf16.mxu1 %v11248_v49  ;;  %v459_v47 = vld [vmem:[#allocation3 + $0x8d8] sm:$0xff]  ;;  %v11432_v53 = vcombine.high %v587_v50, %v591_v51 }
 0x2d7   :  { %v463_v49 = vld [vmem:[#allocation3 + $0x8f8] sm:$0xff] }
 0x2d8   :  { %v11304_v52 = vcombine.high %v459_v47, %v463_v49  ;;  %v11303_v41 = vcombine.low %v459_v47, %v463_v49  ;;  %v475_v62 = vld [vmem:[#allocation3 + $0x958] sm:$0xff] }
 0x2d9   :  { %4701 = vmatpush1.bf16.msra.mxu0 %v11119_v55  ;;  %4742 = vmatpush1.bf16.msra.mxu1 %v11247_v56  ;;  %v467_v55 = vld [vmem:[#allocation3 + $0x918] sm:$0xff] }
 0x2da   :  { %4702 = vmatprep.subr.bf16.mxu0 %v11128_v57  ;;  %4743 = vmatprep.subr.bf16.mxu1 %v11256_v59  ;;  %v471_v56 = vld [vmem:[#allocation3 + $0x938] sm:$0xff] }
 0x2db   :  { %v595_v57 = vld [vmem:[#allocation3 + $0xd18] sm:$0xff]  ;;  %v11312_v61 = vcombine.high %v467_v55, %v471_v56 }
 0x2dc   :  { %v599_v59 = vld [vmem:[#allocation3 + $0xd38] sm:$0xff] }
 0x2dd   :  { %4703 = vmatpush1.bf16.msra.mxu0 %v11127_v58  ;;  %4744 = vmatpush1.bf16.msra.mxu1 %v11255_v1  ;;  %v479_v0 = vld [vmem:[#allocation3 + $0x978] sm:$0xff] }
 0x2de   :  { %4704 = vmatprep.subr.bf16.mxu0 %v11136_v2  ;;  %4745 = vmatprep.subr.bf16.mxu1 %v11264_v3  ;;  %v603_v58 = vld [vmem:[#allocation3 + $0xd58] sm:$0xff]  ;;  %v11311_v2 = vcombine.low %v467_v55, %v471_v56  ;;  %v11439_v3 = vcombine.low %v595_v57, %v599_v59  ;;  %v11320_v6 = vcombine.high %v475_v62, %v479_v0 }
 0x2df   :  { %v607_v1 = vld [vmem:[#allocation3 + $0xd78] sm:$0xff] }
 0x2e0   :  { %v11448_v7 = vcombine.high %v603_v58, %v607_v1  ;;  %v483_v9 = vld [vmem:[#allocation3 + $0x998] sm:$0xff] }
 0x2e1   :  { %4705 = vmatpush1.bf16.msra.mxu0 %v11135_v14  ;;  %4746 = vmatpush1.bf16.msra.mxu1 %v11263_v12  ;;  %v487_v10 = vld [vmem:[#allocation3 + $0x9b8] sm:$0xff] }
 0x2e2   :  { %4706 = vmatprep.subr.bf16.mxu0 %v11144_v33  ;;  %4747 = vmatprep.subr.bf16.mxu1 %v11272_v27  ;;  %v611_v14 = vld [vmem:[#allocation3 + $0xd98] sm:$0xff]  ;;  %v11319_v33 = vcombine.low %v475_v62, %v479_v0  ;;  %v11447_v27 = vcombine.low %v603_v58, %v607_v1  ;;  %v11328_v16 = vcombine.high %v483_v9, %v487_v10 }
 0x2e3   :  { %v615_v12 = vld [vmem:[#allocation3 + $0xdb8] sm:$0xff] }
 0x2e4   :  { %v11456_v17 = vcombine.high %v611_v14, %v615_v12  ;;  %v491_v18 = vld [vmem:[#allocation3 + $0x9d8] sm:$0xff] }
 0x2e5   :  { %4707 = vmatpush1.bf16.msra.mxu0 %v11143_v37  ;;  %4748 = vmatpush1.bf16.msra.mxu1 %v11271_v19  ;;  %v495_v37 = vld [vmem:[#allocation3 + $0x9f8] sm:$0xff] }
 0x2e6   :  { %4758 = vmatprep.subr.bf16.mxu0 %v11280_v20  ;;  %4799 = vmatprep.subr.bf16.mxu1 %v11408_v21  ;;  %v619_v22 = vld [vmem:[#allocation3 + $0xdd8] sm:$0xff]  ;;  %v11335_v47 = vcombine.low %v491_v18, %v495_v37 }
 0x2e7   :  { %v623_v23 = vld [vmem:[#allocation3 + $0xdf8] sm:$0xff] }
 0x2e8   :  { %4709 = vmatmul.mubr.bf16.vlgmr.msra.gmra.mrb[32].mxu0 %v13470_v30  ;;  %4750 = vmatmul.mubr.bf16.vlgmr.msra.gmra.mrb[32].mxu1 %v13472_v32  ;;  %v11295_v30 = vcombine.low %v451_v35, %v455_v36  ;;  %v11423_v32 = vcombine.low %v579_v38, %v583_v13  ;;  %v11455_v35 = vcombine.low %v611_v14, %v615_v12 }
 0x2e9   :  { %4759 = vmatpush1.bf16.msra.mxu0 %v11279_v26  ;;  %4800 = vmatpush1.bf16.msra.mxu1 %v11407_v28  ;;  %v11327_v28 = vcombine.low %v483_v9, %v487_v10  ;;  %v11336_v36 = vcombine.high %v491_v18, %v495_v37  ;;  %v11463_v49 = vcombine.low %v619_v22, %v623_v23 }
 0x2ea   :  { %4760 = vmatprep.subr.bf16.mxu0 %v11288_v31  ;;  %4801 = vmatprep.subr.bf16.mxu1 %v11416_v34 }
 0x2eb   :  { %4790 = vmatprep.mubr.bf16.mxu0 %v13474_v39  ;;  %4831 = vmatprep.mubr.bf16.mxu1 %v13477_v40  ;;  %v11431_v39 = vcombine.low %v587_v50, %v591_v51  ;;  %v11440_v40 = vcombine.high %v595_v57, %v599_v59 }
 0x2ed   :  { %4761 = vmatpush1.bf16.msra.mxu0 %v11287_v42  ;;  %4802 = vmatpush1.bf16.msra.mxu1 %v11415_v43  ;;  %v499_v42 = vld [vmem:[#allocation3 + $0xa18] sm:$0xff] }
 0x2ee   :  { %4762 = vmatprep.subr.bf16.mxu0 %v11296_v45  ;;  %4803 = vmatprep.subr.bf16.mxu1 %v11424_v46  ;;  %v503_v43 = vld [vmem:[#allocation3 + $0xa38] sm:$0xff] }
 0x2ef   :  { %v631_v46 = vld [vmem:[#allocation3 + $0xe38] sm:$0xff]  ;;  %v11344_v50 = vcombine.high %v499_v42, %v503_v43  ;;  %v11343_v55 = vcombine.low %v499_v42, %v503_v43 }
 0x2f0   :  { %v675_v42 = vld [vmem:[#allocation3 + $0xf98] sm:$0xff] }
 0x2f1   :  { %4763 = vmatpush1.bf16.msra.mxu0 %v11295_v30  ;;  %4804 = vmatpush1.bf16.msra.mxu1 %v11423_v32  ;;  %v507_v30 = vld [vmem:[#allocation3 + $0xa58] sm:$0xff] }
 0x2f2   :  { %4764 = vmatprep.subr.bf16.mxu0 %v11304_v52  ;;  %4805 = vmatprep.subr.bf16.mxu1 %v11432_v53  ;;  %v511_v32 = vld [vmem:[#allocation3 + $0xa78] sm:$0xff] }
 0x2f3   :  { %v635_v52 = vld [vmem:[#allocation3 + $0xe58] sm:$0xff]  ;;  %v11352_v57 = vcombine.high %v507_v30, %v511_v32  ;;  %v11351_v62 = vcombine.low %v507_v30, %v511_v32 }
 0x2f4   :  { %v639_v53 = vld [vmem:[#allocation3 + $0xe78] sm:$0xff] }
 0x2f5   :  { %4765 = vmatpush1.bf16.msra.mxu0 %v11303_v41  ;;  %4806 = vmatpush1.bf16.msra.mxu1 %v11431_v39  ;;  %v11480_v59 = vcombine.high %v635_v52, %v639_v53  ;;  %v515_v41 = vld [vmem:[#allocation3 + $0xa98] sm:$0xff]  ;;  %v11479_v0 = vcombine.low %v635_v52, %v639_v53 }
 0x2f6   :  { %4766 = vmatprep.subr.bf16.mxu0 %v11312_v61  ;;  %4807 = vmatprep.subr.bf16.mxu1 %v11440_v40  ;;  %v519_v39 = vld [vmem:[#allocation3 + $0xab8] sm:$0xff] }
 0x2f7   :  { %v643_v61 = vld [vmem:[#allocation3 + $0xe98] sm:$0xff]  ;;  %v11360_v58 = vcombine.high %v515_v41, %v519_v39  ;;  %v11359_v9 = vcombine.low %v515_v41, %v519_v39  ;;  %v4910_v41 = vld [vmem:[#allocation8 + $0x20] sm:$0xff] }
 0x2f8   :  { %v647_v40 = vld [vmem:[#allocation3 + $0xeb8] sm:$0xff] }
 0x2f9   :  { %4767 = vmatpush1.bf16.msra.mxu0 %v11311_v2  ;;  %4808 = vmatpush1.bf16.msra.mxu1 %v11439_v3  ;;  %v11488_v1 = vcombine.high %v643_v61, %v647_v40  ;;  %v523_v2 = vld [vmem:[#allocation3 + $0xad8] sm:$0xff]  ;;  %v11487_v10 = vcombine.low %v643_v61, %v647_v40  ;;  %v4907_v61 = vld [vmem:[#allocation8 + $0x8] sm:$0xff] }
 0x2fa   :  { %4768 = vmatprep.subr.bf16.mxu0 %v11320_v6  ;;  %4809 = vmatprep.subr.bf16.mxu1 %v11448_v7  ;;  %v527_v3 = vld [vmem:[#allocation3 + $0xaf8] sm:$0xff]  ;;  %v4911_v40 = vld [vmem:[#allocation8 + $0x28] sm:$0xff] }
 0x2fb   :  { %v4464_v29 = vpop.f32.mrb[20].mxu0  ;;  %v4505_v21 = vpop.f32.mrb[20].mxu1  ;;  %v651_v6 = vld [vmem:[#allocation3 + $0xed8] sm:$0xff]  ;;  %v11368_v14 = vcombine.high %v523_v2, %v527_v3  ;;  %v11367_v18 = vcombine.low %v523_v2, %v527_v3  ;;  %v4914_v3 = vld [vmem:[#allocation8 + $0x40] sm:$0xff] }
 0x2fc   :  { %v4465_v19 = vadd.f32 %v4464_v29, %v13542_v54  ;;  %v4466_v20 = vpop.f32.mrb[21].mxu0  ;;  %v4507_v26 = vpop.f32.mrb[21].mxu1  ;;  %v11464_v54 = vcombine.high %v619_v22, %v623_v23  ;;  %v655_v7 = vld [vmem:[#allocation3 + $0xef8] sm:$0xff] }
 0x2fd   :  { %v4467_v24 = vadd.f32 %v4466_v20, %v13544_v60  ;;  %v4468_v25 = vpop.f32.mrb[22].mxu0  ;;  %4769 = vmatpush1.bf16.msra.mxu0 %v11319_v33  ;;  %4810 = vmatpush1.bf16.msra.mxu1 %v11447_v27  ;;  %v4509_v38 = vpop.f32.mrb[22].mxu1  ;;  %v627_v60 = vld [vmem:[#allocation3 + $0xe18] sm:$0xff]  ;;  %v11496_v12 = vcombine.high %v651_v6, %v655_v7  ;;  %v11495_v37 = vcombine.low %v651_v6, %v655_v7  ;;  %v4918_v6 = vld [vmem:[#allocation8 + $0x60] sm:$0xff] }
 0x2fe   :  { %v13552_v31 = vadd.f32 %v4505_v21, %v4465_v19  ;;  %v4469_v34 = vpop.f32.mrb[23].mxu0  ;;  %4770 = vmatprep.subr.bf16.mxu0 %v11328_v16  ;;  %4811 = vmatprep.subr.bf16.mxu1 %v11456_v17  ;;  %v4510_v45 = vpop.f32.mrb[23].mxu1  ;;  %v11472_v51 = vcombine.high %v627_v60, %v631_v46  ;;  %v11471_v56 = vcombine.low %v627_v60, %v631_v46  ;;  %v531_v33 = vld [vmem:[#allocation3 + $0xb18] sm:$0xff]  ;;  %v4842_v16 = vlaneseq }
 0x2ff   :  { %v13554_v13 = vadd.f32 %v4507_v26, %v4467_v24  ;;  %v535_v27 = vld [vmem:[#allocation3 + $0xb38] sm:$0xff]  ;;  %v13561_v45 = vld [vmem:[#allocation7] sm:$0xff] }
 0x300   :  { %v659_v29 = vld [vmem:[#allocation3 + $0xf18] sm:$0xff]  ;;  %v11376_v19 = vcombine.high %v531_v33, %v535_v27  ;;  %v13556_v23 = vshrl.u32 %v4842_v16, 7  ;;  %v11375_v26 = vcombine.low %v531_v33, %v535_v27  ;;  %v4926_v33 = vld [vmem:[#allocation8 + $0xa0] sm:$0xff] }
 0x301   :  { %4771 = vmatpush1.bf16.msra.mxu0 %v11327_v28  ;;  %4812 = vmatpush1.bf16.msra.mxu1 %v11455_v35  ;;  %v663_v17 = vld [vmem:[#allocation3 + $0xf38] sm:$0xff] }
 0x302   :  { %4772 = vmatprep.subr.bf16.mxu0 %v11336_v36  ;;  %4813 = vmatprep.subr.bf16.mxu1 %v11464_v54  ;;  %v11504_v20 = vcombine.high %v659_v29, %v663_v17  ;;  %v539_v21 = vld [vmem:[#allocation3 + $0xb58] sm:$0xff]  ;;  %v11503_v28 = vcombine.low %v659_v29, %v663_v17  ;;  %v13559_v54 = vsub.s32 1, %v13556_v23  ;;  %v4923_v29 = vld [vmem:[#allocation8 + $0x88] sm:$0xff] }
 0x303   :  { %v543_v22 = vld [vmem:[#allocation3 + $0xb78] sm:$0xff]  ;;  %v4927_v17 = vld [vmem:[#allocation8 + $0xa8] sm:$0xff] }
 0x304   :  { %v667_v24 = vld [vmem:[#allocation3 + $0xf58] sm:$0xff]  ;;  %v11384_v34 = vcombine.high %v539_v21, %v543_v22  ;;  %v11383_v60 = vcombine.low %v539_v21, %v543_v22  ;;  %v4849_v30 = vrot.slane %v13561_v45, %v13559_v54  ;;  %v4930_v21 = vld [vmem:[#allocation8 + $0xc0] sm:$0xff] }
 0x305   :  { %4773 = vmatpush1.bf16.msra.mxu0 %v11335_v47  ;;  %4814 = vmatpush1.bf16.msra.mxu1 %v11463_v49  ;;  %v671_v25 = vld [vmem:[#allocation3 + $0xf78] sm:$0xff]  ;;  %v4934_v22 = vld [vmem:[#allocation8 + $0xe0] sm:$0xff] }
 0x306   :  { %4774 = vmatprep.subr.bf16.mxu0 %v11344_v50  ;;  %4815 = vmatprep.subr.bf16.mxu1 %v11472_v51  ;;  %v11512_v35 = vcombine.high %v667_v24, %v671_v25  ;;  %v547_v36 = vld [vmem:[#allocation3 + $0xb98] sm:$0xff]  ;;  %v11511_v46 = vcombine.low %v667_v24, %v671_v25  ;;  %v4883_v39 = vadd.f32 %v4849_v30, %v13534_v5  ;;  %v4935_v24 = vld [vmem:[#allocation8 + $0xe8] sm:$0xff] }
 0x307   :  { %v551_v38 = vld [vmem:[#allocation3 + $0xbb8] sm:$0xff]  ;;  %v11531_v5 = vcombine.low %v4907_v61, %v4911_v40 }
 0x308   :  { %v679_v43 = vld [vmem:[#allocation3 + $0xfb8] sm:$0xff]  ;;  %v11392_v47 = vcombine.high %v547_v36, %v551_v38  ;;  %v11391_v53 = vcombine.low %v547_v36, %v551_v38  ;;  %v4891_v2 = vmax.f32 %v4883_v39, 0.0  ;;  %v4939_v36 = vld [vmem:[#allocation8 + $0x108] sm:$0xff] }
 0x309   :  { %4775 = vmatpush1.bf16.msra.mxu0 %v11343_v55  ;;  %4816 = vmatpush1.bf16.msra.mxu1 %v11471_v56  ;;  %v11520_v49 = vcombine.high %v675_v42, %v679_v43  ;;  %v555_v50 = vld [vmem:[#allocation3 + $0xbd8] sm:$0xff]  ;;  %v11519_v55 = vcombine.low %v675_v42, %v679_v43  ;;  %v4943_v38 = vld [vmem:[#allocation8 + $0x128] sm:$0xff]  ;;  %v11553_v42 = vcombine.low %v4930_v21, %v4934_v22 }
 0x30a   :  { %4776 = vmatprep.subr.bf16.mxu0 %v11352_v57  ;;  %4817 = vmatprep.subr.bf16.mxu1 %v11480_v59  ;;  %v559_v51 = vld [vmem:[#allocation3 + $0xbf8] sm:$0xff]  ;;  %v4906_v59 = vld [vmem:[#allocation8] sm:$0xff]  ;;  %v13566_v27 = vpack.c.bf16 %v4891_v2, %v4891_v2 }
 0x30b   :  { %v683_v32 = vld [vmem:[#allocation3 + $0xfd8] sm:$0xff]  ;;  %v11400_v56 = vcombine.high %v555_v50, %v559_v51  ;;  %v11529_v7 = vcombine.low %v4906_v59, %v4910_v41 }
 0x30c   :  { %v687_v52 = vld [vmem:[#allocation3 + $0xff8] sm:$0xff] }
 0x30d   :  { %4777 = vmatpush1.bf16.msra.mxu0 %v11351_v62  ;;  %4818 = vmatpush1.bf16.msra.mxu1 %v11479_v0  ;;  %v11528_v57 = vcombine.high %v683_v32, %v687_v52  ;;  %v11399_v62 = vcombine.low %v555_v50, %v559_v51  ;;  %v11527_v0 = vcombine.low %v683_v32, %v687_v52  ;;  %v4947_v50 = vld [vmem:[#allocation8 + $0x148] sm:$0xff] }
 0x30e   :  { %4778 = vmatprep.subr.bf16.mxu0 %v11360_v58  ;;  %4819 = vmatprep.subr.bf16.mxu1 %v11488_v1  ;;  %v11530_v58 = vcombine.high %v4906_v59, %v4910_v41  ;;  %v11532_v1 = vcombine.high %v4907_v61, %v4911_v40  ;;  %v4951_v51 = vld [vmem:[#allocation8 + $0x168] sm:$0xff]  ;;  %v11563_v32 = vcombine.low %v4939_v36, %v4943_v38 }
 0x30f   :  { %v4959_v59 = vld [vmem:[#allocation8 + $0x1a8] sm:$0xff]  ;;  %v11571_v39 = vcombine.low %v4947_v50, %v4951_v51 }
 0x311   :  { %4779 = vmatpush1.bf16.msra.mxu0 %v11359_v9  ;;  %4820 = vmatpush1.bf16.msra.mxu1 %v11487_v10  ;;  %v4915_v9 = vld [vmem:[#allocation8 + $0x48] sm:$0xff] }
 0x312   :  { %4780 = vmatprep.subr.bf16.mxu0 %v11368_v14  ;;  %4821 = vmatprep.subr.bf16.mxu1 %v11496_v12  ;;  %v4919_v10 = vld [vmem:[#allocation8 + $0x68] sm:$0xff]  ;;  %v11538_v14 = vcombine.high %v4914_v3, %v4918_v6  ;;  %v4922_v12 = vld [vmem:[#allocation8 + $0x80] sm:$0xff] }
 0x313   :  { %v11540_v16 = vcombine.high %v4915_v9, %v4919_v10  ;;  %v11545_v25 = vcombine.low %v4922_v12, %v4926_v33 }
 0x315   :  { %4781 = vmatpush1.bf16.msra.mxu0 %v11367_v18  ;;  %4822 = vmatpush1.bf16.msra.mxu1 %v11495_v37  ;;  %v11537_v18 = vcombine.low %v4914_v3, %v4918_v6  ;;  %v11539_v37 = vcombine.low %v4915_v9, %v4919_v10  ;;  %v4963_v6 = vld [vmem:[#allocation8 + $0x1c8] sm:$0xff] }
 0x316   :  { %4782 = vmatprep.subr.bf16.mxu0 %v11376_v19  ;;  %4823 = vmatprep.subr.bf16.mxu1 %v11504_v20  ;;  %v11546_v19 = vcombine.high %v4922_v12, %v4926_v33  ;;  %v11548_v20 = vcombine.high %v4923_v29, %v4927_v17 }
 0x319   :  { %4783 = vmatpush1.bf16.msra.mxu0 %v11375_v26  ;;  %4824 = vmatpush1.bf16.msra.mxu1 %v11503_v28  ;;  %v11554_v26 = vcombine.high %v4930_v21, %v4934_v22  ;;  %v4975_v21 = vld [vmem:[#allocation8 + $0x228] sm:$0xff] }
 0x31a   :  { %4784 = vmatprep.subr.bf16.mxu0 %v11384_v34  ;;  %4825 = vmatprep.subr.bf16.mxu1 %v11512_v35  ;;  %v4938_v34 = vld [vmem:[#allocation8 + $0x100] sm:$0xff] }
 0x31b   :  { %v4942_v35 = vld [vmem:[#allocation8 + $0x120] sm:$0xff] }
 0x31c   :  { %v11561_v30 = vcombine.low %v4938_v34, %v4942_v35 }
 0x31d   :  { %4785 = vmatpush1.bf16.msra.mxu0 %v11383_v60  ;;  %4826 = vmatpush1.bf16.msra.mxu1 %v11511_v46  ;;  %v11562_v60 = vcombine.high %v4938_v34, %v4942_v35  ;;  %v11564_v46 = vcombine.high %v4939_v36, %v4943_v38  ;;  %v4983_v34 = vld [vmem:[#allocation8 + $0x268] sm:$0xff] }
 0x31e   :  { %4786 = vmatprep.subr.bf16.mxu0 %v11392_v47  ;;  %4827 = vmatprep.subr.bf16.mxu1 %v11520_v49  ;;  %v4946_v47 = vld [vmem:[#allocation8 + $0x140] sm:$0xff] }
 0x31f   :  { %v4950_v49 = vld [vmem:[#allocation8 + $0x160] sm:$0xff] }
 0x320   :  { %v11570_v52 = vcombine.high %v4946_v47, %v4950_v49  ;;  %v11569_v41 = vcombine.low %v4946_v47, %v4950_v49  ;;  %v4991_v47 = vld [vmem:[#allocation8 + $0x2a8] sm:$0xff] }
 0x321   :  { %4787 = vmatpush1.bf16.msra.mxu0 %v11391_v53  ;;  %4828 = vmatpush1.bf16.msra.mxu1 %v11519_v55  ;;  %v11572_v53 = vcombine.high %v4947_v50, %v4951_v51  ;;  %v4954_v55 = vld [vmem:[#allocation8 + $0x180] sm:$0xff] }
 0x322   :  { %4788 = vmatprep.subr.bf16.mxu0 %v11400_v56  ;;  %4829 = vmatprep.subr.bf16.mxu1 %v11528_v57  ;;  %v4958_v56 = vld [vmem:[#allocation8 + $0x1a0] sm:$0xff]  ;;  %v4955_v57 = vld [vmem:[#allocation8 + $0x188] sm:$0xff] }
 0x323   :  { %v11578_v61 = vcombine.high %v4954_v55, %v4958_v56 }
 0x325   :  { %4789 = vmatpush1.bf16.msra.mxu0 %v11399_v62  ;;  %4830 = vmatpush1.bf16.msra.mxu1 %v11527_v0  ;;  %v11580_v62 = vcombine.high %v4955_v57, %v4959_v59  ;;  %v4962_v0 = vld [vmem:[#allocation8 + $0x1c0] sm:$0xff] }
 0x326   :  { %8020 = vmatprep.subr.bf16.mxu0 %v11530_v58  ;;  %8184 = vmatprep.subr.bf16.mxu1 %v11532_v1  ;;  %v4966_v58 = vld [vmem:[#allocation8 + $0x1e0] sm:$0xff] }
 0x327   :  { %v11585_v22 = vcombine.low %v4962_v0, %v4966_v58 }
 0x328   :  { %4791 = vmatmul.mubr.bf16.vlgmr.msra.gmra.mrb[36].mxu0 %v13488_v44  ;;  %4832 = vmatmul.mubr.bf16.vlgmr.msra.gmra.mrb[36].mxu1 %v13490_v48  ;;  %v4931_v44 = vld [vmem:[#allocation8 + $0xc8] sm:$0xff]  ;;  %v11547_v48 = vcombine.low %v4923_v29, %v4927_v17  ;;  %v11586_v29 = vcombine.high %v4962_v0, %v4966_v58 }
 0x329   :  { %8021 = vmatpush1.bf16.msra.mxu0 %v11529_v7  ;;  %8052 = vmatprep.mubr.bf16.mxu0 %v13566_v27  ;;  %v11556_v28 = vcombine.high %v4931_v44, %v4935_v24  ;;  %v11555_v43 = vcombine.low %v4931_v44, %v4935_v24  ;;  %v4967_v7 = vld [vmem:[#allocation8 + $0x1e8] sm:$0xff] }
 0x32a   :  { %8185 = vmatpush1.bf16.msra.mxu1 %v11531_v5  ;;  %8216 = vmatprep.mubr.bf16.mxu1 %v13566_v27  ;;  %v11587_v44 = vcombine.low %v4963_v6, %v4967_v7 }
 0x32b   :  { %8022 = vmatprep.subr.bf16.mxu0 %v11538_v14  ;;  %8186 = vmatprep.subr.bf16.mxu1 %v11540_v16  ;;  %v11577_v14 = vcombine.low %v4954_v55, %v4958_v56  ;;  %v11579_v16 = vcombine.low %v4955_v57, %v4959_v59  ;;  %v4999_v55 = vld [vmem:[#allocation8 + $0x2e8] sm:$0xff] }
 0x32d   :  { %8023 = vmatpush1.bf16.msra.mxu0 %v11537_v18 }
 0x32e   :  { %8187 = vmatpush1.bf16.msra.mxu1 %v11539_v37  ;;  %8024 = vmatprep.subr.bf16.mxu0 %v11546_v19  ;;  %v4970_v37 = vld [vmem:[#allocation8 + $0x200] sm:$0xff] }
 0x32f   :  { %8188 = vmatprep.subr.bf16.mxu1 %v11548_v20  ;;  %v4974_v19 = vld [vmem:[#allocation8 + $0x220] sm:$0xff] }
 0x330   :  { %v11594_v24 = vcombine.high %v4970_v37, %v4974_v19  ;;  %v11593_v35 = vcombine.low %v4970_v37, %v4974_v19  ;;  %v5019_v37 = vld [vmem:[#allocation8 + $0x388] sm:$0xff] }
 0x331   :  { %8025 = vmatpush1.bf16.msra.mxu0 %v11545_v25  ;;  %v5023_v19 = vld [vmem:[#allocation8 + $0x3a8] sm:$0xff] }
 0x332   :  { %8189 = vmatpush1.bf16.msra.mxu1 %v11547_v48  ;;  %8026 = vmatprep.subr.bf16.mxu0 %v11554_v26  ;;  %v4978_v48 = vld [vmem:[#allocation8 + $0x240] sm:$0xff] }
 0x333   :  { %8190 = vmatprep.subr.bf16.mxu1 %v11556_v28  ;;  %v4982_v26 = vld [vmem:[#allocation8 + $0x260] sm:$0xff]  ;;  %v4979_v28 = vld [vmem:[#allocation8 + $0x248] sm:$0xff] }
 0x334   :  { %v11602_v38 = vcombine.high %v4978_v48, %v4982_v26  ;;  %v11601_v49 = vcombine.low %v4978_v48, %v4982_v26  ;;  %v11603_v50 = vcombine.low %v4979_v28, %v4983_v34  ;;  %v5027_v26 = vld [vmem:[#allocation8 + $0x3c8] sm:$0xff] }
 0x335   :  { %8027 = vmatpush1.bf16.msra.mxu0 %v11553_v42  ;;  %v11604_v42 = vcombine.high %v4979_v28, %v4983_v34  ;;  %v5031_v28 = vld [vmem:[#allocation8 + $0x3e8] sm:$0xff] }
 0x336   :  { %8191 = vmatpush1.bf16.msra.mxu1 %v11555_v43  ;;  %8028 = vmatprep.subr.bf16.mxu0 %v11562_v60  ;;  %v4986_v43 = vld [vmem:[#allocation8 + $0x280] sm:$0xff] }
 0x337   :  { %8192 = vmatprep.subr.bf16.mxu1 %v11564_v46  ;;  %v4990_v60 = vld [vmem:[#allocation8 + $0x2a0] sm:$0xff]  ;;  %v4987_v46 = vld [vmem:[#allocation8 + $0x288] sm:$0xff] }
 0x338   :  { %v11610_v51 = vcombine.high %v4986_v43, %v4990_v60  ;;  %v11609_v56 = vcombine.low %v4986_v43, %v4990_v60  ;;  %v11611_v57 = vcombine.low %v4987_v46, %v4991_v47  ;;  %v5034_v43 = vld [vmem:[#allocation8 + $0x400] sm:$0xff] }
 0x339   :  { %8029 = vmatpush1.bf16.msra.mxu0 %v11561_v30  ;;  %v11612_v30 = vcombine.high %v4987_v46, %v4991_v47  ;;  %v5038_v60 = vld [vmem:[#allocation8 + $0x420] sm:$0xff]  ;;  %v5035_v47 = vld [vmem:[#allocation8 + $0x408] sm:$0xff] }
 0x33a   :  { %8193 = vmatpush1.bf16.msra.mxu1 %v11563_v32  ;;  %8030 = vmatprep.subr.bf16.mxu0 %v11570_v52  ;;  %v4994_v32 = vld [vmem:[#allocation8 + $0x2c0] sm:$0xff] }
 0x33b   :  { %v4546_v40 = vpop.f32.mrb[24].mxu0  ;;  %8194 = vmatprep.subr.bf16.mxu1 %v11572_v53  ;;  %v4587_v3 = vpop.f32.mrb[24].mxu1  ;;  %v4998_v52 = vld [vmem:[#allocation8 + $0x2e0] sm:$0xff]  ;;  %v4995_v53 = vld [vmem:[#allocation8 + $0x2c8] sm:$0xff] }
 0x33c   :  { %v4547_v1 = vadd.f32 %v4546_v40, %v13508_v4  ;;  %v4548_v2 = vpop.f32.mrb[25].mxu0  ;;  %v4589_v5 = vpop.f32.mrb[25].mxu1  ;;  %v11588_v4 = vcombine.high %v4963_v6, %v4967_v7  ;;  %v11618_v59 = vcombine.high %v4994_v32, %v4998_v52  ;;  %v5003_v40 = vld [vmem:[#allocation8 + $0x308] sm:$0xff]  ;;  %v11617_v0 = vcombine.low %v4994_v32, %v4998_v52  ;;  %v5014_v6 = vld [vmem:[#allocation8 + $0x360] sm:$0xff] }
 0x33d   :  { %v4549_v9 = vadd.f32 %v4548_v2, %v13510_v8  ;;  %v4550_v10 = vpop.f32.mrb[26].mxu0  ;;  %8031 = vmatpush1.bf16.msra.mxu0 %v11569_v41  ;;  %v4591_v17 = vpop.f32.mrb[26].mxu1  ;;  %v4971_v8 = vld [vmem:[#allocation8 + $0x208] sm:$0xff]  ;;  %v11620_v41 = vcombine.high %v4995_v53, %v4999_v55  ;;  %v11619_v58 = vcombine.low %v4995_v53, %v4999_v55  ;;  %v11658_v32 = vcombine.high %v5034_v43, %v5038_v60  ;;  %v5042_v53 = vld [vmem:[#allocation8 + $0x440] sm:$0xff] }
 0x33e   :  { %v13574_v12 = vadd.f32 %v4587_v3, %v4547_v1  ;;  %8195 = vmatpush1.bf16.msra.mxu1 %v11571_v39  ;;  %v4551_v33 = vpop.f32.mrb[27].mxu0  ;;  %8032 = vmatprep.subr.bf16.mxu0 %v11578_v61  ;;  %v4592_v20 = vpop.f32.mrb[27].mxu1  ;;  %v11596_v25 = vcombine.high %v4971_v8, %v4975_v21  ;;  %v11595_v36 = vcombine.low %v4971_v8, %v4975_v21  ;;  %v5002_v39 = vld [vmem:[#allocation8 + $0x300] sm:$0xff]  ;;  %v5011_v7 = vld [vmem:[#allocation8 + $0x348] sm:$0xff] }
 0x33f   :  { %v13576_v18 = vadd.f32 %v4589_v5, %v4549_v9  ;;  %8196 = vmatprep.subr.bf16.mxu1 %v11580_v62  ;;  %v5006_v61 = vld [vmem:[#allocation8 + $0x320] sm:$0xff]  ;;  %v5007_v62 = vld [vmem:[#allocation8 + $0x328] sm:$0xff]  ;;  %v13579_v5 = vsub.s32 0, %v13556_v23 }
 0x340   :  { %v11626_v1 = vcombine.high %v5002_v39, %v5006_v61  ;;  %v11628_v2 = vcombine.high %v5003_v40, %v5007_v62  ;;  %v5010_v3 = vld [vmem:[#allocation8 + $0x340] sm:$0xff]  ;;  %v5015_v9 = vld [vmem:[#allocation8 + $0x368] sm:$0xff]  ;;  %v11625_v10 = vcombine.low %v5002_v39, %v5006_v61 }
 0x341   :  { %8033 = vmatpush1.bf16.msra.mxu0 %v11577_v14  ;;  %v11627_v14 = vcombine.low %v5003_v40, %v5007_v62  ;;  %v11634_v33 = vcombine.high %v5010_v3, %v5014_v6  ;;  %v5022_v17 = vld [vmem:[#allocation8 + $0x3a0] sm:$0xff]  ;;  %v11633_v20 = vcombine.low %v5010_v3, %v5014_v6  ;;  %v4845_v8 = vrot.slane %v13561_v45, %v13579_v5 }
 0x342   :  { %8197 = vmatpush1.bf16.msra.mxu1 %v11579_v16  ;;  %8034 = vmatprep.subr.bf16.mxu0 %v11586_v29  ;;  %v11636_v16 = vcombine.high %v5011_v7, %v5015_v9  ;;  %v5018_v29 = vld [vmem:[#allocation8 + $0x380] sm:$0xff]  ;;  %v11635_v21 = vcombine.low %v5011_v7, %v5015_v9 }
 0x343   :  { %8198 = vmatprep.subr.bf16.mxu1 %v11588_v4  ;;  %v13582_v4 = vsub.s32 3, %v13556_v23  ;;  %v11641_v34 = vcombine.low %v5018_v29, %v5022_v17  ;;  %v5046_v55 = vld [vmem:[#allocation8 + $0x460] sm:$0xff] }
 0x344   :  { %v11666_v39 = vcombine.high %v5042_v53, %v5046_v55  ;;  %v5050_v61 = vld [vmem:[#allocation8 + $0x480] sm:$0xff] }
 0x345   :  { %8035 = vmatpush1.bf16.msra.mxu0 %v11585_v22  ;;  %v11642_v22 = vcombine.high %v5018_v29, %v5022_v17  ;;  %v4857_v48 = vrot.slane %v13561_v45, %v13582_v4  ;;  %v5054_v40 = vld [vmem:[#allocation8 + $0x4a0] sm:$0xff] }
 0x346   :  { %8199 = vmatpush1.bf16.msra.mxu1 %v11587_v44  ;;  %8036 = vmatprep.subr.bf16.mxu0 %v11594_v24  ;;  %v11644_v44 = vcombine.high %v5019_v37, %v5023_v19  ;;  %v5026_v24 = vld [vmem:[#allocation8 + $0x3c0] sm:$0xff]  ;;  %v11674_v6 = vcombine.high %v5050_v61, %v5054_v40 }
 0x347   :  { %8200 = vmatprep.subr.bf16.mxu1 %v11596_v25  ;;  %v5030_v25 = vld [vmem:[#allocation8 + $0x3e0] sm:$0xff]  ;;  %v4885_v46 = vadd.f32 %v4857_v48, %v13554_v13 }
 0x348   :  { %v5058_v9 = vld [vmem:[#allocation8 + $0x4c0] sm:$0xff] }
 0x349   :  { %8037 = vmatpush1.bf16.msra.mxu0 %v11593_v35  ;;  %v4882_v35 = vadd.f32 %v4845_v8, %v13532_v63  ;;  %v4893_v52 = vmax.f32 %v4885_v46, 0.0  ;;  %v5067_v8 = vld [vmem:[#allocation8 + $0x508] sm:$0xff]  ;;  %v5074_v48 = vld [vmem:[#allocation8 + $0x540] sm:$0xff] }
 0x34a   :  { %8201 = vmatpush1.bf16.msra.mxu1 %v11595_v36  ;;  %8038 = vmatprep.subr.bf16.mxu0 %v11602_v38  ;;  %v11643_v36 = vcombine.low %v5019_v37, %v5023_v19  ;;  %v11650_v38 = vcombine.high %v5026_v24, %v5030_v25  ;;  %v5066_v19 = vld [vmem:[#allocation8 + $0x500] sm:$0xff]  ;;  %v5083_v46 = vld [vmem:[#allocation8 + $0x588] sm:$0xff] }
 0x34b   :  { %8202 = vmatprep.subr.bf16.mxu1 %v11604_v42  ;;  %v11652_v42 = vcombine.high %v5027_v26, %v5031_v28  ;;  %v13592_v62 = vpack.c.bf16 %v4893_v52, %v4893_v52  ;;  %v5094_v52 = vld [vmem:[#allocation8 + $0x5e0] sm:$0xff] }
 0x34d   :  { %8039 = vmatpush1.bf16.msra.mxu0 %v11601_v49  ;;  %v5039_v49 = vld [vmem:[#allocation8 + $0x428] sm:$0xff] }
 0x34e   :  { %8203 = vmatpush1.bf16.msra.mxu1 %v11603_v50  ;;  %8040 = vmatprep.subr.bf16.mxu0 %v11610_v51  ;;  %v11649_v50 = vcombine.low %v5026_v24, %v5030_v25  ;;  %v4890_v51 = vmax.f32 %v4882_v35, 0.0  ;;  %v11660_v63 = vcombine.high %v5035_v47, %v5039_v49  ;;  %v11659_v13 = vcombine.low %v5035_v47, %v5039_v49  ;;  %v5087_v47 = vld [vmem:[#allocation8 + $0x5a8] sm:$0xff] }
 0x34f   :  { %8204 = vmatprep.subr.bf16.mxu1 %v11612_v30  ;;  %v11651_v30 = vcombine.low %v5027_v26, %v5031_v28  ;;  %v5078_v26 = vld [vmem:[#allocation8 + $0x560] sm:$0xff]  ;;  %v5075_v28 = vld [vmem:[#allocation8 + $0x548] sm:$0xff] }
 0x350   :  { %v11697_v49 = vcombine.low %v5074_v48, %v5078_v26 }
 0x351   :  { %8041 = vmatpush1.bf16.msra.mxu0 %v11609_v56  ;;  %v11657_v56 = vcombine.low %v5034_v43, %v5038_v60  ;;  %v5082_v43 = vld [vmem:[#allocation8 + $0x580] sm:$0xff] }
 0x352   :  { %8205 = vmatpush1.bf16.msra.mxu1 %v11611_v57  ;;  %8042 = vmatprep.subr.bf16.mxu0 %v11618_v59  ;;  %v5043_v57 = vld [vmem:[#allocation8 + $0x448] sm:$0xff]  ;;  %v5086_v60 = vld [vmem:[#allocation8 + $0x5a0] sm:$0xff] }
 0x353   :  { %8206 = vmatprep.subr.bf16.mxu1 %v11620_v41  ;;  %v5047_v59 = vld [vmem:[#allocation8 + $0x468] sm:$0xff]  ;;  %v13590_v41 = vpack.c.bf16 %v4890_v51, %v4890_v51  ;;  %v11706_v51 = vcombine.high %v5082_v43, %v5086_v60 }
 0x354   :  { %v11667_v3 = vcombine.low %v5043_v57, %v5047_v59 }
 0x355   :  { %8043 = vmatpush1.bf16.msra.mxu0 %v11617_v0  ;;  %v11668_v0 = vcombine.high %v5043_v57, %v5047_v59  ;;  %v5091_v57 = vld [vmem:[#allocation8 + $0x5c8] sm:$0xff] }
 0x356   :  { %8207 = vmatpush1.bf16.msra.mxu1 %v11619_v58  ;;  %8044 = vmatprep.subr.bf16.mxu0 %v11626_v1  ;;  %v5051_v58 = vld [vmem:[#allocation8 + $0x488] sm:$0xff] }
 0x357   :  { %8208 = vmatprep.subr.bf16.mxu1 %v11628_v2  ;;  %v5055_v1 = vld [vmem:[#allocation8 + $0x4a8] sm:$0xff]  ;;  %v11665_v2 = vcombine.low %v5042_v53, %v5046_v55 }
 0x358   :  { %v11676_v7 = vcombine.high %v5051_v58, %v5055_v1  ;;  %v11675_v29 = vcombine.low %v5051_v58, %v5055_v1  ;;  %v5095_v59 = vld [vmem:[#allocation8 + $0x5e8] sm:$0xff]  ;;  %v11707_v1 = vcombine.low %v5083_v46, %v5087_v47 }
 0x359   :  { %8045 = vmatpush1.bf16.msra.mxu0 %v11625_v10  ;;  %v5062_v10 = vld [vmem:[#allocation8 + $0x4e0] sm:$0xff] }
 0x35a   :  { %8209 = vmatpush1.bf16.msra.mxu1 %v11627_v14  ;;  %8046 = vmatprep.subr.bf16.mxu0 %v11634_v33  ;;  %v5059_v14 = vld [vmem:[#allocation8 + $0x4c8] sm:$0xff]  ;;  %v11682_v17 = vcombine.high %v5058_v9, %v5062_v10 }
 0x35b   :  { %8210 = vmatprep.subr.bf16.mxu1 %v11636_v16  ;;  %v5063_v33 = vld [vmem:[#allocation8 + $0x4e8] sm:$0xff]  ;;  %v11673_v16 = vcombine.low %v5050_v61, %v5054_v40  ;;  %v11705_v40 = vcombine.low %v5082_v43, %v5086_v60  ;;  %v5126_v43 = vld [vmem:[#allocation8 + $0x6e0] sm:$0xff] }
 0x35c   :  { %v11684_v37 = vcombine.high %v5059_v14, %v5063_v33  ;;  %v5123_v60 = vld [vmem:[#allocation8 + $0x6c8] sm:$0xff] }
 0x35d   :  { %8047 = vmatpush1.bf16.msra.mxu0 %v11633_v20  ;;  %v5070_v20 = vld [vmem:[#allocation8 + $0x520] sm:$0xff] }
 0x35e   :  { %8211 = vmatpush1.bf16.msra.mxu1 %v11635_v21  ;;  %8048 = vmatprep.subr.bf16.mxu0 %v11642_v22  ;;  %v5071_v21 = vld [vmem:[#allocation8 + $0x528] sm:$0xff]  ;;  %v11681_v22 = vcombine.low %v5058_v9, %v5062_v10  ;;  %v11690_v24 = vcombine.high %v5066_v19, %v5070_v20  ;;  %v11689_v35 = vcombine.low %v5066_v19, %v5070_v20  ;;  %v5102_v9 = vld [vmem:[#allocation8 + $0x620] sm:$0xff] }
 0x35f   :  { %8212 = vmatprep.subr.bf16.mxu1 %v11644_v44  ;;  %v11683_v44 = vcombine.low %v5059_v14, %v5063_v33  ;;  %v11692_v25 = vcombine.high %v5067_v8, %v5071_v21  ;;  %v5103_v14 = vld [vmem:[#allocation8 + $0x628] sm:$0xff]  ;;  %v5110_v19 = vld [vmem:[#allocation8 + $0x660] sm:$0xff] }
 0x360   :  { %v5107_v20 = vld [vmem:[#allocation8 + $0x648] sm:$0xff] }
 0x361   :  { %8049 = vmatpush1.bf16.msra.mxu0 %v11641_v34  ;;  %v5079_v34 = vld [vmem:[#allocation8 + $0x568] sm:$0xff] }
 0x362   :  { %8213 = vmatpush1.bf16.msra.mxu1 %v11643_v36  ;;  %8050 = vmatprep.subr.bf16.mxu0 %v11650_v38  ;;  %v11691_v36 = vcombine.low %v5067_v8, %v5071_v21  ;;  %v11698_v38 = vcombine.high %v5074_v48, %v5078_v26  ;;  %v5111_v8 = vld [vmem:[#allocation8 + $0x668] sm:$0xff]  ;;  %v5118_v48 = vld [vmem:[#allocation8 + $0x6a0] sm:$0xff] }
 0x363   :  { %8214 = vmatprep.subr.bf16.mxu1 %v11652_v42  ;;  %v11700_v42 = vcombine.high %v5075_v28, %v5079_v34  ;;  %v5115_v26 = vld [vmem:[#allocation8 + $0x688] sm:$0xff] }
 0x365   :  { %8051 = vmatpush1.bf16.msra.mxu0 %v11649_v50  ;;  %v11699_v50 = vcombine.low %v5075_v28, %v5079_v34  ;;  %v5119_v28 = vld [vmem:[#allocation8 + $0x6a8] sm:$0xff] }
 0x366   :  { %8215 = vmatpush1.bf16.msra.mxu1 %v11651_v30  ;;  %8061 = vmatprep.subr.bf16.mxu0 %v11658_v32  ;;  %v11708_v32 = vcombine.high %v5083_v46, %v5087_v47  ;;  %v5127_v46 = vld [vmem:[#allocation8 + $0x6e8] sm:$0xff] }
 0x367   :  { %8225 = vmatprep.subr.bf16.mxu1 %v11660_v63  ;;  %v5090_v63 = vld [vmem:[#allocation8 + $0x5c0] sm:$0xff] }
 0x368   :  { %8053 = vmatmul.mubr.bf16.vlgmr.msra.gmra.mrb[40].mxu0 %v13590_v41  ;;  %v11713_v33 = vcombine.low %v5090_v63, %v5094_v52 }
 0x369   :  { %8217 = vmatmul.mubr.bf16.vlgmr.msra.gmra.mrb[40].mxu1 %v13590_v41  ;;  %8062 = vmatpush1.bf16.msra.mxu0 %v11657_v56 }
 0x36a   :  { %8093 = vmatprep.mubr.bf16.mxu0 %v13592_v62  ;;  %8226 = vmatpush1.bf16.msra.mxu1 %v11659_v13 }
 0x36b   :  { %8257 = vmatprep.mubr.bf16.mxu1 %v13592_v62  ;;  %8063 = vmatprep.subr.bf16.mxu0 %v11666_v39 }
 0x36c   :  { %8227 = vmatprep.subr.bf16.mxu1 %v11668_v0 }
 0x36d   :  { %8064 = vmatpush1.bf16.msra.mxu0 %v11665_v2  ;;  %v11714_v2 = vcombine.high %v5090_v63, %v5094_v52  ;;  %v5131_v63 = vld [vmem:[#allocation8 + $0x708] sm:$0xff] }
 0x36e   :  { %8228 = vmatpush1.bf16.msra.mxu1 %v11667_v3  ;;  %8065 = vmatprep.subr.bf16.mxu0 %v11674_v6  ;;  %v5135_v52 = vld [vmem:[#allocation8 + $0x728] sm:$0xff] }
 0x36f   :  { %8229 = vmatprep.subr.bf16.mxu1 %v11676_v7  ;;  %v5098_v7 = vld [vmem:[#allocation8 + $0x600] sm:$0xff] }
 0x370   :  { %v11721_v21 = vcombine.low %v5098_v7, %v5102_v9 }
 0x371   :  { %8066 = vmatpush1.bf16.msra.mxu0 %v11673_v16  ;;  %v11715_v16 = vcombine.low %v5091_v57, %v5095_v59 }
 0x372   :  { %8230 = vmatpush1.bf16.msra.mxu1 %v11675_v29  ;;  %8067 = vmatprep.subr.bf16.mxu0 %v11682_v17  ;;  %v11722_v29 = vcombine.high %v5098_v7, %v5102_v9  ;;  %v5150_v7 = vld [vmem:[#allocation8 + $0x7a0] sm:$0xff]  ;;  %v4864_v9 = vsub.s32 5, %v13556_v23 }
 0x373   :  { %8231 = vmatprep.subr.bf16.mxu1 %v11684_v37  ;;  %v5106_v37 = vld [vmem:[#allocation8 + $0x640] sm:$0xff] }
 0x374   :  { %v11729_v34 = vcombine.low %v5106_v37, %v5110_v19 }
 0x375   :  { %8068 = vmatpush1.bf16.msra.mxu0 %v11681_v22 }
 0x376   :  { %8232 = vmatpush1.bf16.msra.mxu1 %v11683_v44  ;;  %8069 = vmatprep.subr.bf16.mxu0 %v11690_v24  ;;  %v11730_v44 = vcombine.high %v5106_v37, %v5110_v19  ;;  %v11732_v24 = vcombine.high %v5107_v20, %v5111_v8  ;;  %v5154_v37 = vld [vmem:[#allocation8 + $0x7c0] sm:$0xff] }
 0x377   :  { %8233 = vmatprep.subr.bf16.mxu1 %v11692_v25  ;;  %v5114_v25 = vld [vmem:[#allocation8 + $0x680] sm:$0xff] }
 0x378   :  { %v11737_v47 = vcombine.low %v5114_v25, %v5118_v48  ;;  %v5158_v19 = vld [vmem:[#allocation8 + $0x7e0] sm:$0xff] }
 0x379   :  { %8070 = vmatpush1.bf16.msra.mxu0 %v11689_v35  ;;  %v11731_v35 = vcombine.low %v5107_v20, %v5111_v8  ;;  %v4865_v20 = vrot.slane %v13561_v45, %v4864_v9  ;;  %v5155_v8 = vld [vmem:[#allocation8 + $0x7c8] sm:$0xff] }
 0x37a   :  { %8234 = vmatpush1.bf16.msra.mxu1 %v11691_v36  ;;  %8071 = vmatprep.subr.bf16.mxu0 %v11698_v38  ;;  %v11738_v36 = vcombine.high %v5114_v25, %v5118_v48  ;;  %v11740_v38 = vcombine.high %v5115_v26, %v5119_v28  ;;  %v11778_v25 = vcombine.high %v5154_v37, %v5158_v19 }
 0x37b   :  { %v4628_v30 = vpop.f32.mrb[28].mxu0  ;;  %8235 = vmatprep.subr.bf16.mxu1 %v11700_v42  ;;  %v4669_v56 = vpop.f32.mrb[28].mxu1  ;;  %v5122_v42 = vld [vmem:[#allocation8 + $0x6c0] sm:$0xff] }
 0x37c   :  { %v4629_v53 = vadd.f32 %v4628_v30, %v13574_v12  ;;  %v4630_v55 = vpop.f32.mrb[29].mxu0  ;;  %v4671_v61 = vpop.f32.mrb[29].mxu1  ;;  %v11716_v12 = vcombine.high %v5091_v57, %v5095_v59  ;;  %v5130_v30 = vld [vmem:[#allocation8 + $0x700] sm:$0xff]  ;;  %v11756_v57 = vcombine.high %v5131_v63, %v5135_v52 }
 0x37d   :  { %v4631_v13 = vadd.f32 %v4630_v55, %v13576_v18  ;;  %v4632_v39 = vpop.f32.mrb[30].mxu0  ;;  %8072 = vmatpush1.bf16.msra.mxu0 %v11697_v49  ;;  %v4673_v3 = vpop.f32.mrb[30].mxu1  ;;  %v5099_v18 = vld [vmem:[#allocation8 + $0x608] sm:$0xff]  ;;  %v11739_v49 = vcombine.low %v5115_v26, %v5119_v28  ;;  %v11747_v55 = vcombine.low %v5123_v60, %v5127_v46  ;;  %v5138_v59 = vld [vmem:[#allocation8 + $0x740] sm:$0xff] }
 0x37e   :  { %v13600_v0 = vadd.f32 %v4669_v56, %v4629_v53  ;;  %8236 = vmatpush1.bf16.msra.mxu1 %v11699_v50  ;;  %v4633_v58 = vpop.f32.mrb[31].mxu0  ;;  %8073 = vmatprep.subr.bf16.mxu0 %v11706_v51  ;;  %v4674_v10 = vpop.f32.mrb[31].mxu1  ;;  %v11724_v17 = vcombine.high %v5099_v18, %v5103_v14  ;;  %v11723_v22 = vcombine.low %v5099_v18, %v5103_v14  ;;  %v5139_v39 = vld [vmem:[#allocation8 + $0x748] sm:$0xff]  ;;  %v5162_v26 = vld [vmem:[#allocation8 + $0x800] sm:$0xff] }
 0x37f   :  { %v13602_v6 = vadd.f32 %v4671_v61, %v4631_v13  ;;  %8237 = vmatprep.subr.bf16.mxu1 %v11708_v32  ;;  %v11746_v50 = vcombine.high %v5122_v42, %v5126_v43  ;;  %v11748_v51 = vcombine.high %v5123_v60, %v5127_v46  ;;  %v5134_v32 = vld [vmem:[#allocation8 + $0x720] sm:$0xff]  ;;  %v11745_v53 = vcombine.low %v5122_v42, %v5126_v43  ;;  %v5143_v61 = vld [vmem:[#allocation8 + $0x768] sm:$0xff] }
 0x380   :  { %v11754_v56 = vcombine.high %v5130_v30, %v5134_v32  ;;  %v5142_v13 = vld [vmem:[#allocation8 + $0x760] sm:$0xff]  ;;  %v13605_v58 = vsub.s32 2, %v13556_v23  ;;  %v11764_v3 = vcombine.high %v5139_v39, %v5143_v61  ;;  %v5147_v10 = vld [vmem:[#allocation8 + $0x788] sm:$0xff] }
 0x381   :  { %8074 = vmatpush1.bf16.msra.mxu0 %v11705_v40  ;;  %v11753_v40 = vcombine.low %v5130_v30, %v5134_v32  ;;  %v5151_v18 = vld [vmem:[#allocation8 + $0x7a8] sm:$0xff]  ;;  %v11761_v14 = vcombine.low %v5138_v59, %v5142_v13  ;;  %v5166_v28 = vld [vmem:[#allocation8 + $0x820] sm:$0xff] }
 0x382   :  { %8238 = vmatpush1.bf16.msra.mxu1 %v11707_v1  ;;  %8075 = vmatprep.subr.bf16.mxu0 %v11714_v2  ;;  %v11755_v1 = vcombine.low %v5131_v63, %v5135_v52  ;;  %v11762_v2 = vcombine.high %v5138_v59, %v5142_v13  ;;  %v11786_v43 = vcombine.high %v5162_v26, %v5166_v28  ;;  %v5170_v46 = vld [vmem:[#allocation8 + $0x840] sm:$0xff] }
 0x383   :  { %8239 = vmatprep.subr.bf16.mxu1 %v11716_v12  ;;  %v5146_v12 = vld [vmem:[#allocation8 + $0x780] sm:$0xff] }
 0x384   :  { %v5178_v63 = vld [vmem:[#allocation8 + $0x880] sm:$0xff] }
 0x385   :  { %8076 = vmatpush1.bf16.msra.mxu0 %v11713_v33  ;;  %v4853_v33 = vrot.slane %v13561_v45, %v13605_v58  ;;  %v11777_v45 = vcombine.low %v5154_v37, %v5158_v19  ;;  %v5182_v52 = vld [vmem:[#allocation8 + $0x8a0] sm:$0xff] }
 0x386   :  { %8240 = vmatpush1.bf16.msra.mxu1 %v11715_v16  ;;  %8077 = vmatprep.subr.bf16.mxu0 %v11722_v29  ;;  %v11763_v16 = vcombine.low %v5139_v39, %v5143_v61  ;;  %v11770_v29 = vcombine.high %v5146_v12, %v5150_v7  ;;  %v11802_v39 = vcombine.high %v5178_v63, %v5182_v52 }
 0x387   :  { %8241 = vmatprep.subr.bf16.mxu1 %v11724_v17  ;;  %v11772_v17 = vcombine.high %v5147_v10, %v5151_v18 }
 0x389   :  { %8078 = vmatpush1.bf16.msra.mxu0 %v11721_v21  ;;  %v5159_v21 = vld [vmem:[#allocation8 + $0x7e8] sm:$0xff] }
 0x38a   :  { %8242 = vmatpush1.bf16.msra.mxu1 %v11723_v22  ;;  %8079 = vmatprep.subr.bf16.mxu0 %v11730_v44  ;;  %v11769_v22 = vcombine.low %v5146_v12, %v5150_v7  ;;  %v4884_v44 = vadd.f32 %v4853_v33, %v13552_v31  ;;  %v11780_v48 = vcombine.high %v5155_v8, %v5159_v21  ;;  %v5198_v33 = vld [vmem:[#allocation8 + $0x920] sm:$0xff] }
 0x38b   :  { %8243 = vmatprep.subr.bf16.mxu1 %v11732_v24  ;;  %v11771_v24 = vcombine.low %v5147_v10, %v5151_v18  ;;  %v11779_v42 = vcombine.low %v5155_v8, %v5159_v21  ;;  %v11801_v12 = vcombine.low %v5178_v63, %v5182_v52  ;;  %v5202_v8 = vld [vmem:[#allocation8 + $0x940] sm:$0xff] }
 0x38c   :  { %v5206_v21 = vld [vmem:[#allocation8 + $0x960] sm:$0xff] }
 0x38d   :  { %8080 = vmatpush1.bf16.msra.mxu0 %v11729_v34  ;;  %v4887_v34 = vadd.f32 %v4865_v20, %v13602_v6 }
 0x38e   :  { %8244 = vmatpush1.bf16.msra.mxu1 %v11731_v35  ;;  %8081 = vmatprep.subr.bf16.mxu0 %v11738_v36  ;;  %v5163_v35 = vld [vmem:[#allocation8 + $0x808] sm:$0xff] }
 0x38f   :  { %8245 = vmatprep.subr.bf16.mxu1 %v11740_v38  ;;  %v5167_v36 = vld [vmem:[#allocation8 + $0x828] sm:$0xff]  ;;  %v4892_v38 = vmax.f32 %v4884_v44, 0.0  ;;  %v4895_v60 = vmax.f32 %v4887_v34, 0.0  ;;  %v5214_v34 = vld [vmem:[#allocation8 + $0x9a0] sm:$0xff] }
 0x390   :  { %v11788_v31 = vcombine.high %v5163_v35, %v5167_v36  ;;  %v11787_v6 = vcombine.low %v5163_v35, %v5167_v36  ;;  %v5207_v44 = vld [vmem:[#allocation8 + $0x968] sm:$0xff] }
 0x391   :  { %8082 = vmatpush1.bf16.msra.mxu0 %v11737_v47  ;;  %v5174_v47 = vld [vmem:[#allocation8 + $0x860] sm:$0xff]  ;;  %v13615_v30 = vpack.c.bf16 %v4892_v38, %v4892_v38  ;;  %v5211_v35 = vld [vmem:[#allocation8 + $0x988] sm:$0xff] }
 0x392   :  { %8246 = vmatpush1.bf16.msra.mxu1 %v11739_v49  ;;  %8083 = vmatprep.subr.bf16.mxu0 %v11746_v50  ;;  %v11785_v49 = vcombine.low %v5162_v26, %v5166_v28  ;;  %v5171_v50 = vld [vmem:[#allocation8 + $0x848] sm:$0xff]  ;;  %v11794_v32 = vcombine.high %v5170_v46, %v5174_v47  ;;  %v11793_v59 = vcombine.low %v5170_v46, %v5174_v47  ;;  %v5210_v28 = vld [vmem:[#allocation8 + $0x980] sm:$0xff] }
 0x393   :  { %8247 = vmatprep.subr.bf16.mxu1 %v11748_v51  ;;  %v5175_v51 = vld [vmem:[#allocation8 + $0x868] sm:$0xff]  ;;  %v5222_v46 = vld [vmem:[#allocation8 + $0x9e0] sm:$0xff] }
 0x394   :  { %v11795_v13 = vcombine.low %v5171_v50, %v5175_v51  ;;  %v5215_v36 = vld [vmem:[#allocation8 + $0x9a8] sm:$0xff] }
 0x395   :  { %8084 = vmatpush1.bf16.msra.mxu0 %v11745_v53  ;;  %v13617_v53 = vpack.c.bf16 %v4895_v60, %v4895_v60  ;;  %v5218_v60 = vld [vmem:[#allocation8 + $0x9c0] sm:$0xff] }
 0x396   :  { %8248 = vmatpush1.bf16.msra.mxu1 %v11747_v55  ;;  %8085 = vmatprep.subr.bf16.mxu0 %v11754_v56  ;;  %v11796_v55 = vcombine.high %v5171_v50, %v5175_v51  ;;  %v5179_v56 = vld [vmem:[#allocation8 + $0x888] sm:$0xff] }
 0x397   :  { %8249 = vmatprep.subr.bf16.mxu1 %v11756_v57  ;;  %v5183_v57 = vld [vmem:[#allocation8 + $0x8a8] sm:$0xff] }
 0x398   :  { %v11804_v61 = vcombine.high %v5179_v56, %v5183_v57  ;;  %v11803_v7 = vcombine.low %v5179_v56, %v5183_v57  ;;  %v5219_v51 = vld [vmem:[#allocation8 + $0x9c8] sm:$0xff] }
 0x399   :  { %8086 = vmatpush1.bf16.msra.mxu0 %v11753_v40  ;;  %v5186_v40 = vld [vmem:[#allocation8 + $0x8c0] sm:$0xff] }
 0x39a   :  { %8250 = vmatpush1.bf16.msra.mxu1 %v11755_v1  ;;  %8087 = vmatprep.subr.bf16.mxu0 %v11762_v2  ;;  %v5190_v1 = vld [vmem:[#allocation8 + $0x8e0] sm:$0xff]  ;;  %v5187_v2 = vld [vmem:[#allocation8 + $0x8c8] sm:$0xff] }
 0x39b   :  { %8251 = vmatprep.subr.bf16.mxu1 %v11764_v3  ;;  %v5191_v3 = vld [vmem:[#allocation8 + $0x8e8] sm:$0xff]  ;;  %v11810_v10 = vcombine.high %v5186_v40, %v5190_v1 }
 0x39c   :  { %v11812_v18 = vcombine.high %v5187_v2, %v5191_v3  ;;  %v11811_v37 = vcombine.low %v5187_v2, %v5191_v3  ;;  %v5231_v3 = vld [vmem:[#allocation8 + $0xa28] sm:$0xff] }
 0x39d   :  { %8088 = vmatpush1.bf16.msra.mxu0 %v11761_v14  ;;  %v5194_v14 = vld [vmem:[#allocation8 + $0x900] sm:$0xff] }
 0x39e   :  { %8252 = vmatpush1.bf16.msra.mxu1 %v11763_v16  ;;  %8089 = vmatprep.subr.bf16.mxu0 %v11770_v29  ;;  %v5195_v16 = vld [vmem:[#allocation8 + $0x908] sm:$0xff]  ;;  %v11818_v19 = vcombine.high %v5194_v14, %v5198_v33 }
 0x39f   :  { %8253 = vmatprep.subr.bf16.mxu1 %v11772_v17  ;;  %v5199_v29 = vld [vmem:[#allocation8 + $0x928] sm:$0xff]  ;;  %v11809_v17 = vcombine.low %v5186_v40, %v5190_v1  ;;  %v5226_v40 = vld [vmem:[#allocation8 + $0xa00] sm:$0xff] }
 0x3a0   :  { %v11820_v20 = vcombine.high %v5195_v16, %v5199_v29  ;;  %v5230_v1 = vld [vmem:[#allocation8 + $0xa20] sm:$0xff] }
 0x3a1   :  { %8090 = vmatpush1.bf16.msra.mxu0 %v11769_v22  ;;  %v5203_v22 = vld [vmem:[#allocation8 + $0x948] sm:$0xff] }
 0x3a2   :  { %8254 = vmatpush1.bf16.msra.mxu1 %v11771_v24  ;;  %8091 = vmatprep.subr.bf16.mxu0 %v11778_v25  ;;  %v11817_v24 = vcombine.low %v5194_v14, %v5198_v33  ;;  %v11819_v25 = vcombine.low %v5195_v16, %v5199_v29  ;;  %v11828_v26 = vcombine.high %v5203_v22, %v5207_v44  ;;  %v5234_v14 = vld [vmem:[#allocation8 + $0xa40] sm:$0xff]  ;;  %v5235_v16 = vld [vmem:[#allocation8 + $0xa48] sm:$0xff] }
 0x3a3   :  { %8255 = vmatprep.subr.bf16.mxu1 %v11780_v48  ;;  %v11826_v48 = vcombine.high %v5202_v8, %v5206_v21  ;;  %v11827_v38 = vcombine.low %v5203_v22, %v5207_v44  ;;  %v5238_v33 = vld [vmem:[#allocation8 + $0xa60] sm:$0xff]  ;;  %v5239_v29 = vld [vmem:[#allocation8 + $0xa68] sm:$0xff] }
 0x3a4   :  { %v5243_v22 = vld [vmem:[#allocation8 + $0xa88] sm:$0xff] }
 0x3a5   :  { %8092 = vmatpush1.bf16.msra.mxu0 %v11777_v45  ;;  %v11825_v45 = vcombine.low %v5202_v8, %v5206_v21  ;;  %v5242_v8 = vld [vmem:[#allocation8 + $0xa80] sm:$0xff]  ;;  %v5247_v44 = vld [vmem:[#allocation8 + $0xaa8] sm:$0xff] }
 0x3a6   :  { %8256 = vmatpush1.bf16.msra.mxu1 %v11779_v42  ;;  %8102 = vmatprep.subr.bf16.mxu0 %v11786_v43  ;;  %v11834_v42 = vcombine.high %v5210_v28, %v5214_v34  ;;  %v5246_v21 = vld [vmem:[#allocation8 + $0xaa0] sm:$0xff] }
 0x3a7   :  { %8266 = vmatprep.subr.bf16.mxu1 %v11788_v31  ;;  %v11836_v31 = vcombine.high %v5211_v35, %v5215_v36 }
 0x3a8   :  { %8094 = vmatmul.mubr.bf16.vlgmr.msra.gmra.mrb[40].mxu0 %v13615_v30 }
 0x3a9   :  { %8258 = vmatmul.mubr.bf16.vlgmr.msra.gmra.mrb[40].mxu1 %v13615_v30  ;;  %8103 = vmatpush1.bf16.msra.mxu0 %v11785_v49 }
 0x3aa   :  { %8134 = vmatprep.mubr.bf16.mxu0 %v13617_v53  ;;  %8267 = vmatpush1.bf16.msra.mxu1 %v11787_v6  ;;  %v5223_v6 = vld [vmem:[#allocation8 + $0x9e8] sm:$0xff] }
 0x3ab   :  { %8298 = vmatprep.mubr.bf16.mxu1 %v13617_v53  ;;  %8104 = vmatprep.subr.bf16.mxu0 %v11794_v32 }
 0x3ac   :  { %8268 = vmatprep.subr.bf16.mxu1 %v11796_v55  ;;  %v11833_v55 = vcombine.low %v5210_v28, %v5214_v34  ;;  %v5250_v28 = vld [vmem:[#allocation8 + $0xac0] sm:$0xff] }
 0x3ad   :  { %8105 = vmatpush1.bf16.msra.mxu0 %v11793_v59  ;;  %v11835_v59 = vcombine.low %v5211_v35, %v5215_v36  ;;  %v5254_v34 = vld [vmem:[#allocation8 + $0xae0] sm:$0xff]  ;;  %v5251_v35 = vld [vmem:[#allocation8 + $0xac8] sm:$0xff] }
 0x3ae   :  { %8269 = vmatpush1.bf16.msra.mxu1 %v11795_v13  ;;  %8106 = vmatprep.subr.bf16.mxu0 %v11802_v39  ;;  %v11842_v13 = vcombine.high %v5218_v60, %v5222_v46  ;;  %v5255_v36 = vld [vmem:[#allocation8 + $0xae8] sm:$0xff] }
 0x3af   :  { %8270 = vmatprep.subr.bf16.mxu1 %v11804_v61 }
 0x3b1   :  { %8107 = vmatpush1.bf16.msra.mxu0 %v11801_v12  ;;  %v11841_v12 = vcombine.low %v5218_v60, %v5222_v46  ;;  %v5262_v60 = vld [vmem:[#allocation8 + $0xb20] sm:$0xff]  ;;  %v5259_v46 = vld [vmem:[#allocation8 + $0xb08] sm:$0xff] }
 0x3b2   :  { %8271 = vmatpush1.bf16.msra.mxu1 %v11803_v7  ;;  %8108 = vmatprep.subr.bf16.mxu0 %v11810_v10  ;;  %v11843_v7 = vcombine.low %v5219_v51, %v5223_v6  ;;  %v11850_v10 = vcombine.high %v5226_v40, %v5230_v1 }
 0x3b3   :  { %8272 = vmatprep.subr.bf16.mxu1 %v11812_v18 }
 0x3b5   :  { %8109 = vmatpush1.bf16.msra.mxu0 %v11809_v17  ;;  %v11849_v17 = vcombine.low %v5226_v40, %v5230_v1  ;;  %v5274_v40 = vld [vmem:[#allocation8 + $0xb80] sm:$0xff] }
 0x3b6   :  { %8273 = vmatpush1.bf16.msra.mxu1 %v11811_v37  ;;  %8110 = vmatprep.subr.bf16.mxu0 %v11818_v19  ;;  %v11858_v19 = vcombine.high %v5234_v14, %v5238_v33  ;;  %v5278_v1 = vld [vmem:[#allocation8 + $0xba0] sm:$0xff] }
 0x3b7   :  { %8274 = vmatprep.subr.bf16.mxu1 %v11820_v20  ;;  %v11860_v20 = vcombine.high %v5235_v16, %v5239_v29 }
 0x3b9   :  { %8111 = vmatpush1.bf16.msra.mxu0 %v11817_v24  ;;  %v11857_v24 = vcombine.low %v5234_v14, %v5238_v33  ;;  %v5282_v33 = vld [vmem:[#allocation8 + $0xbc0] sm:$0xff] }
 0x3ba   :  { %8275 = vmatpush1.bf16.msra.mxu1 %v11819_v25  ;;  %8112 = vmatprep.subr.bf16.mxu0 %v11826_v48  ;;  %v11859_v25 = vcombine.low %v5235_v16, %v5239_v29  ;;  %v11866_v48 = vcombine.high %v5242_v8, %v5246_v21  ;;  %v5286_v16 = vld [vmem:[#allocation8 + $0xbe0] sm:$0xff]  ;;  %v5283_v29 = vld [vmem:[#allocation8 + $0xbc8] sm:$0xff] }
 0x3bb   :  { %v4710_v43 = vpop.f32.mrb[32].mxu0  ;;  %8276 = vmatprep.subr.bf16.mxu1 %v11828_v26  ;;  %v4751_v50 = vpop.f32.mrb[32].mxu1  ;;  %v11868_v26 = vcombine.high %v5243_v22, %v5247_v44 }
 0x3bc   :  { %v4711_v47 = vadd.f32 %v4710_v43, %v13512_v11  ;;  %v4712_v49 = vpop.f32.mrb[33].mxu0  ;;  %v4753_v52 = vpop.f32.mrb[33].mxu1  ;;  %v11844_v11 = vcombine.high %v5219_v51, %v5223_v6  ;;  %v11876_v43 = vcombine.high %v5251_v35, %v5255_v36 }
 0x3bd   :  { %v4713_v32 = vadd.f32 %v4712_v49, %v13514_v15  ;;  %v4714_v63 = vpop.f32.mrb[34].mxu0  ;;  %8113 = vmatpush1.bf16.msra.mxu0 %v11825_v45  ;;  %v4755_v39 = vpop.f32.mrb[34].mxu1  ;;  %v5227_v15 = vld [vmem:[#allocation8 + $0xa08] sm:$0xff]  ;;  %v11865_v45 = vcombine.low %v5242_v8, %v5246_v21  ;;  %v11873_v49 = vcombine.low %v5250_v28, %v5254_v34  ;;  %v11906_v8 = vcombine.high %v5282_v33, %v5286_v16 }
 0x3be   :  { %v13625_v56 = vadd.f32 %v4751_v50, %v4711_v47  ;;  %8277 = vmatpush1.bf16.msra.mxu1 %v11827_v38  ;;  %v4715_v57 = vpop.f32.mrb[35].mxu0  ;;  %8114 = vmatprep.subr.bf16.mxu0 %v11834_v42  ;;  %v4756_v2 = vpop.f32.mrb[35].mxu1  ;;  %v11852_v18 = vcombine.high %v5227_v15, %v5231_v3  ;;  %v11851_v37 = vcombine.low %v5227_v15, %v5231_v3  ;;  %v5263_v47 = vld [vmem:[#allocation8 + $0xb28] sm:$0xff]  ;;  %v5270_v63 = vld [vmem:[#allocation8 + $0xb60] sm:$0xff] }
 0x3bf   :  { %v13627_v61 = vadd.f32 %v4753_v52, %v4713_v32  ;;  %8278 = vmatprep.subr.bf16.mxu1 %v11836_v31  ;;  %v11867_v38 = vcombine.low %v5243_v22, %v5247_v44  ;;  %v11874_v42 = vcombine.high %v5250_v28, %v5254_v34  ;;  %v5258_v31 = vld [vmem:[#allocation8 + $0xb00] sm:$0xff]  ;;  %v11875_v50 = vcombine.low %v5251_v35, %v5255_v36  ;;  %v5267_v52 = vld [vmem:[#allocation8 + $0xb48] sm:$0xff] }
 0x3c0   :  { %v11882_v51 = vcombine.high %v5258_v31, %v5262_v60  ;;  %v11884_v6 = vcombine.high %v5259_v46, %v5263_v47  ;;  %v5266_v32 = vld [vmem:[#allocation8 + $0xb40] sm:$0xff]  ;;  %v11881_v57 = vcombine.low %v5258_v31, %v5262_v60  ;;  %v5275_v2 = vld [vmem:[#allocation8 + $0xb88] sm:$0xff] }
 0x3c1   :  { %8115 = vmatpush1.bf16.msra.mxu0 %v11833_v55  ;;  %v5271_v55 = vld [vmem:[#allocation8 + $0xb68] sm:$0xff]  ;;  %v11890_v39 = vcombine.high %v5266_v32, %v5270_v63  ;;  %v11889_v3 = vcombine.low %v5266_v32, %v5270_v63  ;;  %v5290_v22 = vld [vmem:[#allocation8 + $0xc00] sm:$0xff] }
 0x3c2   :  { %8279 = vmatpush1.bf16.msra.mxu1 %v11835_v59  ;;  %8116 = vmatprep.subr.bf16.mxu0 %v11842_v13  ;;  %v4860_v59 = vsub.s32 4, %v13556_v23  ;;  %v11883_v13 = vcombine.low %v5259_v46, %v5263_v47  ;;  %v5279_v15 = vld [vmem:[#allocation8 + $0xba8] sm:$0xff]  ;;  %v5294_v44 = vld [vmem:[#allocation8 + $0xc20] sm:$0xff] }
 0x3c3   :  { %8280 = vmatprep.subr.bf16.mxu1 %v11844_v11  ;;  %v11892_v11 = vcombine.high %v5267_v52, %v5271_v55  ;;  %v11900_v14 = vcombine.high %v5275_v2, %v5279_v15  ;;  %v11914_v34 = vcombine.high %v5290_v22, %v5294_v44  ;;  %v5302_v36 = vld [vmem:[#allocation8 + $0xc60] sm:$0xff] }
 0x3c4   :  { %v5306_v47 = vld [vmem:[#allocation8 + $0xc80] sm:$0xff] }
 0x3c5   :  { %8117 = vmatpush1.bf16.msra.mxu0 %v11841_v12  ;;  %v13630_v12 = vld [vmem:[#allocation7] sm:$0xff] }
 0x3c6   :  { %8281 = vmatpush1.bf16.msra.mxu1 %v11843_v7  ;;  %8118 = vmatprep.subr.bf16.mxu0 %v11850_v10  ;;  %v4861_v7 = vrot.slane %v13630_v12, %v4860_v59  ;;  %v11891_v10 = vcombine.low %v5267_v52, %v5271_v55  ;;  %v5314_v55 = vld [vmem:[#allocation8 + $0xcc0] sm:$0xff] }
 0x3c7   :  { %8282 = vmatprep.subr.bf16.mxu1 %v11852_v18  ;;  %v11898_v18 = vcombine.high %v5274_v40, %v5278_v1 }
 0x3c9   :  { %8119 = vmatpush1.bf16.msra.mxu0 %v11849_v17  ;;  %v5287_v17 = vld [vmem:[#allocation8 + $0xbe8] sm:$0xff] }
 0x3ca   :  { %8283 = vmatpush1.bf16.msra.mxu1 %v11851_v37  ;;  %8120 = vmatprep.subr.bf16.mxu0 %v11858_v19  ;;  %v11897_v37 = vcombine.low %v5274_v40, %v5278_v1  ;;  %v4886_v19 = vadd.f32 %v4861_v7, %v13600_v0  ;;  %v11908_v21 = vcombine.high %v5283_v29, %v5287_v17  ;;  %v5298_v0 = vld [vmem:[#allocation8 + $0xc40] sm:$0xff]  ;;  %v5323_v7 = vld [vmem:[#allocation8 + $0xd08] sm:$0xff] }
 0x3cb   :  { %8284 = vmatprep.subr.bf16.mxu1 %v11860_v20  ;;  %v11899_v20 = vcombine.low %v5275_v2, %v5279_v15  ;;  %v11907_v28 = vcombine.low %v5283_v29, %v5287_v17  ;;  %v11922_v60 = vcombine.high %v5298_v0, %v5302_v36  ;;  %v5322_v15 = vld [vmem:[#allocation8 + $0xd00] sm:$0xff] }
 0x3cc   :  { %v5330_v29 = vld [vmem:[#allocation8 + $0xd40] sm:$0xff] }
 0x3cd   :  { %8121 = vmatpush1.bf16.msra.mxu0 %v11857_v24  ;;  %v5291_v24 = vld [vmem:[#allocation8 + $0xc08] sm:$0xff]  ;;  %v5334_v17 = vld [vmem:[#allocation8 + $0xd60] sm:$0xff] }
 0x3ce   :  { %8285 = vmatpush1.bf16.msra.mxu1 %v11859_v25  ;;  %8122 = vmatprep.subr.bf16.mxu0 %v11866_v48  ;;  %v5295_v25 = vld [vmem:[#allocation8 + $0xc28] sm:$0xff]  ;;  %v11905_v48 = vcombine.low %v5282_v33, %v5286_v16 }
 0x3cf   :  { %8286 = vmatprep.subr.bf16.mxu1 %v11868_v26  ;;  %v4894_v26 = vmax.f32 %v4886_v19, 0.0  ;;  %v11916_v35 = vcombine.high %v5291_v24, %v5295_v25  ;;  %v11915_v31 = vcombine.low %v5291_v24, %v5295_v25  ;;  %v5335_v19 = vld [vmem:[#allocation8 + $0xd68] sm:$0xff]  ;;  %v5342_v24 = vld [vmem:[#allocation8 + $0xda0] sm:$0xff] }
 0x3d0   :  { %v5339_v25 = vld [vmem:[#allocation8 + $0xd88] sm:$0xff] }
 0x3d1   :  { %8123 = vmatpush1.bf16.msra.mxu0 %v11865_v45  ;;  %v5299_v45 = vld [vmem:[#allocation8 + $0xc48] sm:$0xff] }
 0x3d2   :  { %8287 = vmatpush1.bf16.msra.mxu1 %v11867_v38  ;;  %8124 = vmatprep.subr.bf16.mxu0 %v11874_v42  ;;  %v5303_v38 = vld [vmem:[#allocation8 + $0xc68] sm:$0xff]  ;;  %v11913_v42 = vcombine.low %v5290_v22, %v5294_v44  ;;  %v5338_v44 = vld [vmem:[#allocation8 + $0xd80] sm:$0xff] }
 0x3d3   :  { %8288 = vmatprep.subr.bf16.mxu1 %v11876_v43  ;;  %v13636_v43 = vpack.c.bf16 %v4894_v26, %v4894_v26  ;;  %v11924_v46 = vcombine.high %v5299_v45, %v5303_v38  ;;  %v11923_v32 = vcombine.low %v5299_v45, %v5303_v38  ;;  %v11953_v26 = vcombine.low %v5330_v29, %v5334_v17  ;;  %v5346_v45 = vld [vmem:[#allocation8 + $0xdc0] sm:$0xff] }
 0x3d4   :  { %v5350_v38 = vld [vmem:[#allocation8 + $0xde0] sm:$0xff] }
 0x3d5   :  { %8125 = vmatpush1.bf16.msra.mxu0 %v11873_v49  ;;  %v5310_v49 = vld [vmem:[#allocation8 + $0xca0] sm:$0xff] }
 0x3d6   :  { %8289 = vmatpush1.bf16.msra.mxu1 %v11875_v50  ;;  %8126 = vmatprep.subr.bf16.mxu0 %v11882_v51  ;;  %v5307_v50 = vld [vmem:[#allocation8 + $0xc88] sm:$0xff]  ;;  %v11930_v63 = vcombine.high %v5306_v47, %v5310_v49 }
 0x3d7   :  { %8290 = vmatprep.subr.bf16.mxu1 %v11884_v6  ;;  %v5311_v51 = vld [vmem:[#allocation8 + $0xca8] sm:$0xff]  ;;  %v11921_v6 = vcombine.low %v5298_v0, %v5302_v36 }
 0x3d8   :  { %v11932_v52 = vcombine.high %v5307_v50, %v5311_v51  ;;  %v11931_v40 = vcombine.low %v5307_v50, %v5311_v51 }
 0x3d9   :  { %8127 = vmatpush1.bf16.msra.mxu0 %v11881_v57  ;;  %v5318_v57 = vld [vmem:[#allocation8 + $0xce0] sm:$0xff] }
 0x3da   :  { %8291 = vmatpush1.bf16.msra.mxu1 %v11883_v13  ;;  %8128 = vmatprep.subr.bf16.mxu0 %v11890_v39  ;;  %v5315_v13 = vld [vmem:[#allocation8 + $0xcc8] sm:$0xff]  ;;  %v11938_v1 = vcombine.high %v5314_v55, %v5318_v57 }
 0x3db   :  { %8292 = vmatprep.subr.bf16.mxu1 %v11892_v11  ;;  %v5319_v39 = vld [vmem:[#allocation8 + $0xce8] sm:$0xff]  ;;  %v11929_v11 = vcombine.low %v5306_v47, %v5310_v49 }
 0x3dc   :  { %v11940_v2 = vcombine.high %v5315_v13, %v5319_v39  ;;  %v5351_v47 = vld [vmem:[#allocation8 + $0xde8] sm:$0xff] }
 0x3dd   :  { %8129 = vmatpush1.bf16.msra.mxu0 %v11889_v3  ;;  %v5326_v3 = vld [vmem:[#allocation8 + $0xd20] sm:$0xff] }
 0x3de   :  { %8293 = vmatpush1.bf16.msra.mxu1 %v11891_v10  ;;  %8130 = vmatprep.subr.bf16.mxu0 %v11898_v18  ;;  %v5327_v10 = vld [vmem:[#allocation8 + $0xd28] sm:$0xff]  ;;  %v11937_v18 = vcombine.low %v5314_v55, %v5318_v57  ;;  %v11946_v33 = vcombine.high %v5322_v15, %v5326_v3  ;;  %v11970_v55 = vcombine.high %v5346_v45, %v5350_v38 }
 0x3df   :  { %8294 = vmatprep.subr.bf16.mxu1 %v11900_v14  ;;  %v11939_v14 = vcombine.low %v5315_v13, %v5319_v39  ;;  %v11948_v16 = vcombine.high %v5323_v7, %v5327_v10 }
 0x3e1   :  { %8131 = vmatpush1.bf16.msra.mxu0 %v11897_v37  ;;  %v5331_v37 = vld [vmem:[#allocation8 + $0xd48] sm:$0xff] }
 0x3e2   :  { %8295 = vmatpush1.bf16.msra.mxu1 %v11899_v20  ;;  %8132 = vmatprep.subr.bf16.mxu0 %v11906_v8  ;;  %v11945_v20 = vcombine.low %v5322_v15, %v5326_v3  ;;  %v11947_v8 = vcombine.low %v5323_v7, %v5327_v10  ;;  %v11956_v22 = vcombine.high %v5331_v37, %v5335_v19  ;;  %v5355_v15 = vld [vmem:[#allocation8 + $0xe08] sm:$0xff] }
 0x3e3   :  { %8296 = vmatprep.subr.bf16.mxu1 %v11908_v21  ;;  %v11954_v21 = vcombine.high %v5330_v29, %v5334_v17  ;;  %v5359_v3 = vld [vmem:[#allocation8 + $0xe28] sm:$0xff] }
 0x3e4   :  { %v5363_v29 = vld [vmem:[#allocation8 + $0xe48] sm:$0xff] }
 0x3e5   :  { %8133 = vmatpush1.bf16.msra.mxu0 %v11905_v48  ;;  %v5343_v48 = vld [vmem:[#allocation8 + $0xda8] sm:$0xff] }
 0x3e6   :  { %8297 = vmatpush1.bf16.msra.mxu1 %v11907_v28  ;;  %8143 = vmatprep.subr.bf16.mxu0 %v11914_v34  ;;  %v4872_v28 = vsub.s32 7, %v13556_v23  ;;  %v11955_v34 = vcombine.low %v5331_v37, %v5335_v19  ;;  %v11964_v36 = vcombine.high %v5339_v25, %v5343_v48  ;;  %v5367_v17 = vld [vmem:[#allocation8 + $0xe68] sm:$0xff] }
 0x3e7   :  { %8307 = vmatprep.subr.bf16.mxu1 %v11916_v35  ;;  %v11962_v35 = vcombine.high %v5338_v44, %v5342_v24 }
 0x3e8   :  { %8135 = vmatmul.mubr.bf16.vlgmr.msra.gmra.mrb[40].mxu0 %v13636_v43 }
 0x3e9   :  { %8299 = vmatmul.mubr.bf16.vlgmr.msra.gmra.mrb[40].mxu1 %v13636_v43  ;;  %8144 = vmatpush1.bf16.msra.mxu0 %v11913_v42 }
 0x3ea   :  { %8308 = vmatpush1.bf16.msra.mxu1 %v11915_v31  ;;  %8145 = vmatprep.subr.bf16.mxu0 %v11922_v60 }
 0x3eb   :  { %8309 = vmatprep.subr.bf16.mxu1 %v11924_v46  ;;  %v5347_v46 = vld [vmem:[#allocation8 + $0xdc8] sm:$0xff] }
 0x3ec   :  { %v11972_v39 = vcombine.high %v5347_v46, %v5351_v47  ;;  %v11971_v7 = vcombine.low %v5347_v46, %v5351_v47  ;;  %v5386_v47 = vld [vmem:[#allocation8 + $0xf00] sm:$0xff] }
 0x3ed   :  { %8146 = vmatpush1.bf16.msra.mxu0 %v11921_v6  ;;  %v4873_v6 = vrot.slane %v13630_v12, %v4872_v28 }
 0x3ee   :  { %8310 = vmatpush1.bf16.msra.mxu1 %v11923_v32  ;;  %8147 = vmatprep.subr.bf16.mxu0 %v11930_v63  ;;  %v11961_v32 = vcombine.low %v5338_v44, %v5342_v24  ;;  %v5374_v44 = vld [vmem:[#allocation8 + $0xea0] sm:$0xff]  ;;  %v5371_v24 = vld [vmem:[#allocation8 + $0xe88] sm:$0xff] }
 0x3ef   :  { %8311 = vmatprep.subr.bf16.mxu1 %v11932_v52 }
 0x3f1   :  { %8148 = vmatpush1.bf16.msra.mxu0 %v11929_v11  ;;  %v5358_v11 = vld [vmem:[#allocation8 + $0xe20] sm:$0xff] }
 0x3f2   :  { %8312 = vmatpush1.bf16.msra.mxu1 %v11931_v40  ;;  %8149 = vmatprep.subr.bf16.mxu0 %v11938_v1 }
 0x3f3   :  { %8313 = vmatprep.subr.bf16.mxu1 %v11940_v2  ;;  %v11969_v2 = vcombine.low %v5346_v45, %v5350_v38  ;;  %v5379_v45 = vld [vmem:[#allocation8 + $0xec8] sm:$0xff] }
 0x3f4   :  { %v5383_v38 = vld [vmem:[#allocation8 + $0xee8] sm:$0xff] }
 0x3f5   :  { %8150 = vmatpush1.bf16.msra.mxu0 %v11937_v18  ;;  %v12004_v46 = vcombine.high %v5379_v45, %v5383_v38 }
 0x3f6   :  { %8314 = vmatpush1.bf16.msra.mxu1 %v11939_v14  ;;  %8151 = vmatprep.subr.bf16.mxu0 %v11946_v33  ;;  %v5362_v14 = vld [vmem:[#allocation8 + $0xe40] sm:$0xff] }
 0x3f7   :  { %8315 = vmatprep.subr.bf16.mxu1 %v11948_v16  ;;  %v5366_v33 = vld [vmem:[#allocation8 + $0xe60] sm:$0xff]  ;;  %v11980_v16 = vcombine.high %v5355_v15, %v5359_v3 }
 0x3f9   :  { %8152 = vmatpush1.bf16.msra.mxu0 %v11945_v20  ;;  %v11979_v20 = vcombine.low %v5355_v15, %v5359_v3  ;;  %v5402_v15 = vld [vmem:[#allocation8 + $0xf80] sm:$0xff] }
 0x3fa   :  { %8316 = vmatpush1.bf16.msra.mxu1 %v11947_v8  ;;  %8153 = vmatprep.subr.bf16.mxu0 %v11954_v21  ;;  %v11986_v8 = vcombine.high %v5362_v14, %v5366_v33  ;;  %v11988_v21 = vcombine.high %v5363_v29, %v5367_v17  ;;  %v5406_v3 = vld [vmem:[#allocation8 + $0xfa0] sm:$0xff] }
 0x3fb   :  { %v4792_v0 = vpop.f32.mrb[36].mxu0  ;;  %8317 = vmatprep.subr.bf16.mxu1 %v11956_v22  ;;  %v4833_v60 = vpop.f32.mrb[36].mxu1  ;;  %v5370_v22 = vld [vmem:[#allocation8 + $0xe80] sm:$0xff] }
 0x3fc   :  { %v4793_v42 = vadd.f32 %v4792_v0, %v13625_v56  ;;  %v4794_v31 = vpop.f32.mrb[37].mxu0  ;;  %v4835_v51 = vpop.f32.mrb[37].mxu1  ;;  %v11963_v56 = vcombine.low %v5339_v25, %v5343_v48  ;;  %v5375_v25 = vld [vmem:[#allocation8 + $0xea8] sm:$0xff]  ;;  %v11985_v48 = vcombine.low %v5362_v14, %v5366_v33  ;;  %v5378_v0 = vld [vmem:[#allocation8 + $0xec0] sm:$0xff] }
 0x3fd   :  { %v4795_v49 = vadd.f32 %v4794_v31, %v13627_v61  ;;  %v4796_v50 = vpop.f32.mrb[38].mxu0  ;;  %8154 = vmatpush1.bf16.msra.mxu0 %v11953_v26  ;;  %v4837_v57 = vpop.f32.mrb[38].mxu1  ;;  %v5354_v61 = vld [vmem:[#allocation8 + $0xe00] sm:$0xff]  ;;  %v11987_v26 = vcombine.low %v5363_v29, %v5367_v17  ;;  %v11995_v31 = vcombine.low %v5371_v24, %v5375_v25 }
 0x3fe   :  { %v13646_v63 = vadd.f32 %v4833_v60, %v4793_v42  ;;  %8318 = vmatpush1.bf16.msra.mxu1 %v11955_v34  ;;  %v4797_v52 = vpop.f32.mrb[39].mxu0  ;;  %8155 = vmatprep.subr.bf16.mxu0 %v11962_v35  ;;  %v4838_v40 = vpop.f32.mrb[39].mxu1  ;;  %v11978_v10 = vcombine.high %v5354_v61, %v5358_v11  ;;  %v11977_v19 = vcombine.low %v5354_v61, %v5358_v11  ;;  %v5387_v50 = vld [vmem:[#allocation8 + $0xf08] sm:$0xff]  ;;  %v5398_v57 = vld [vmem:[#allocation8 + $0xf60] sm:$0xff]  ;;  %v4868_v11 = vsub.s32 6, %v13556_v23 }
 0x3ff   :  { %v4836_v13 = vadd.f32 %v4835_v51, %v4795_v49  ;;  %8319 = vmatprep.subr.bf16.mxu1 %v11964_v36  ;;  %v11994_v34 = vcombine.high %v5370_v22, %v5374_v44  ;;  %v11996_v35 = vcombine.high %v5371_v24, %v5375_v25  ;;  %v5382_v36 = vld [vmem:[#allocation8 + $0xee0] sm:$0xff]  ;;  %v11993_v42 = vcombine.low %v5370_v22, %v5374_v44  ;;  %v5391_v51 = vld [vmem:[#allocation8 + $0xf28] sm:$0xff]  ;;  %v4908_v25 = vld [vmem:[#allocation8 + $0x10] sm:$0xff] }
 0x400   :  { %v12002_v60 = vcombine.high %v5378_v0, %v5382_v36  ;;  %v5390_v49 = vld [vmem:[#allocation8 + $0xf20] sm:$0xff]  ;;  %v12011_v40 = vcombine.low %v5387_v50, %v5391_v51  ;;  %v4869_v14 = vrot.slane %v13630_v12, %v4868_v11 }
 0x401   :  { %v4889_v1 = vadd.f32 %v4873_v6, %v4836_v13  ;;  %8156 = vmatpush1.bf16.msra.mxu0 %v11961_v32  ;;  %v12001_v6 = vcombine.low %v5378_v0, %v5382_v36  ;;  %v12003_v32 = vcombine.low %v5379_v45, %v5383_v38  ;;  %v12010_v52 = vcombine.high %v5386_v47, %v5390_v49  ;;  %v5395_v13 = vld [vmem:[#allocation8 + $0xf48] sm:$0xff]  ;;  %v5410_v17 = vld [vmem:[#allocation8 + $0xfc0] sm:$0xff] }
 0x402   :  { %8320 = vmatpush1.bf16.msra.mxu1 %v11963_v56  ;;  %8157 = vmatprep.subr.bf16.mxu0 %v11970_v55  ;;  %v12012_v56 = vcombine.high %v5387_v50, %v5391_v51  ;;  %v5394_v55 = vld [vmem:[#allocation8 + $0xf40] sm:$0xff]  ;;  %v12009_v61 = vcombine.low %v5386_v47, %v5390_v49  ;;  %v4888_v22 = vadd.f32 %v4869_v14, %v13646_v63  ;;  %v4916_v63 = vld [vmem:[#allocation8 + $0x50] sm:$0xff] }
 0x403   :  { %v4897_v18 = vmax.f32 %v4889_v1, 0.0  ;;  %8321 = vmatprep.subr.bf16.mxu1 %v11972_v39  ;;  %v5399_v39 = vld [vmem:[#allocation8 + $0xf68] sm:$0xff]  ;;  %v12018_v1 = vcombine.high %v5394_v55, %v5398_v57  ;;  %v4924_v51 = vld [vmem:[#allocation8 + $0x90] sm:$0xff] }
 0x404   :  { %v12019_v33 = vcombine.low %v5395_v13, %v5399_v39  ;;  %v4896_v0 = vmax.f32 %v4888_v22, 0.0  ;;  %v4944_v14 = vld [vmem:[#allocation8 + $0x130] sm:$0xff]  ;;  %v4953_v22 = vld [vmem:[#allocation8 + $0x178] sm:$0xff] }
 0x405   :  { %v13648_v37 = vpack.c.bf16 %v4897_v18, %v4897_v18  ;;  %8158 = vmatpush1.bf16.msra.mxu0 %v11969_v2  ;;  %v12020_v2 = vcombine.high %v5395_v13, %v5399_v39  ;;  %v12017_v18 = vcombine.low %v5394_v55, %v5398_v57 }
 0x406   :  { %8322 = vmatpush1.bf16.msra.mxu1 %v11971_v7  ;;  %8159 = vmatprep.subr.bf16.mxu0 %v11978_v10  ;;  %v5403_v7 = vld [vmem:[#allocation8 + $0xf88] sm:$0xff]  ;;  %v13657_v47 = vpack.c.bf16 %v4896_v0, %v4896_v0 }
 0x407   :  { %8175 = vmatprep.mubr.bf16.mxu0 %v13648_v37  ;;  %8339 = vmatprep.mubr.bf16.mxu1 %v13648_v37  ;;  %v5407_v10 = vld [vmem:[#allocation8 + $0xfa8] sm:$0xff] }
 0x408   :  { %8323 = vmatprep.subr.bf16.mxu1 %v11980_v16  ;;  %v12026_v16 = vcombine.high %v5402_v15, %v5406_v3  ;;  %v12028_v29 = vcombine.high %v5403_v7, %v5407_v10  ;;  %v12027_v44 = vcombine.low %v5403_v7, %v5407_v10 }
 0x409   :  { %8160 = vmatpush1.bf16.msra.mxu0 %v11977_v19  ;;  %v5414_v19 = vld [vmem:[#allocation8 + $0xfe0] sm:$0xff] }
 0x40a   :  { %8324 = vmatpush1.bf16.msra.mxu1 %v11979_v20  ;;  %8161 = vmatprep.subr.bf16.mxu0 %v11986_v8  ;;  %v5411_v20 = vld [vmem:[#allocation8 + $0xfc8] sm:$0xff]  ;;  %v12034_v24 = vcombine.high %v5410_v17, %v5414_v19 }
 0x40b   :  { %8325 = vmatprep.subr.bf16.mxu1 %v11988_v21  ;;  %v5415_v8 = vld [vmem:[#allocation8 + $0xfe8] sm:$0xff]  ;;  %v12025_v21 = vcombine.low %v5402_v15, %v5406_v3 }
 0x40c   :  { %v12036_v12 = vcombine.high %v5411_v20, %v5415_v8  ;;  %v12035_v36 = vcombine.low %v5411_v20, %v5415_v8  ;;  %v4948_v20 = vld [vmem:[#allocation8 + $0x150] sm:$0xff] }
 0x40d   :  { %8162 = vmatpush1.bf16.msra.mxu0 %v11985_v48  ;;  %v4912_v48 = vld [vmem:[#allocation8 + $0x30] sm:$0xff] }
 0x40e   :  { %8326 = vmatpush1.bf16.msra.mxu1 %v11987_v26  ;;  %8163 = vmatprep.subr.bf16.mxu0 %v11994_v34  ;;  %v4909_v26 = vld [vmem:[#allocation8 + $0x18] sm:$0xff]  ;;  %v11534_v45 = vcombine.high %v4908_v25, %v4912_v48  ;;  %v4952_v8 = vld [vmem:[#allocation8 + $0x170] sm:$0xff] }
 0x40f   :  { %8327 = vmatprep.subr.bf16.mxu1 %v11996_v35  ;;  %v4913_v34 = vld [vmem:[#allocation8 + $0x38] sm:$0xff]  ;;  %v12033_v35 = vcombine.low %v5410_v17, %v5414_v19  ;;  %v11573_v0 = vcombine.low %v4948_v20, %v4952_v8 }
 0x410   :  { %v11536_v38 = vcombine.high %v4909_v26, %v4913_v34  ;;  %v11535_v49 = vcombine.low %v4909_v26, %v4913_v34  ;;  %v4960_v26 = vld [vmem:[#allocation8 + $0x1b0] sm:$0xff]  ;;  %v4957_v34 = vld [vmem:[#allocation8 + $0x198] sm:$0xff] }
 0x411   :  { %8164 = vmatpush1.bf16.msra.mxu0 %v11993_v42  ;;  %v4920_v42 = vld [vmem:[#allocation8 + $0x70] sm:$0xff] }
 0x412   :  { %8328 = vmatpush1.bf16.msra.mxu1 %v11995_v31  ;;  %8165 = vmatprep.subr.bf16.mxu0 %v12002_v60  ;;  %v11533_v31 = vcombine.low %v4908_v25, %v4912_v48  ;;  %v4917_v60 = vld [vmem:[#allocation8 + $0x58] sm:$0xff]  ;;  %v11542_v50 = vcombine.high %v4916_v63, %v4920_v42  ;;  %v11541_v55 = vcombine.low %v4916_v63, %v4920_v42  ;;  %v4956_v48 = vld [vmem:[#allocation8 + $0x190] sm:$0xff] }
 0x413   :  { %8329 = vmatprep.subr.bf16.mxu1 %v12004_v46  ;;  %v4921_v46 = vld [vmem:[#allocation8 + $0x78] sm:$0xff]  ;;  %v4964_v63 = vld [vmem:[#allocation8 + $0x1d0] sm:$0xff] }
 0x414   :  { %v11543_v57 = vcombine.low %v4917_v60, %v4921_v46  ;;  %v4968_v42 = vld [vmem:[#allocation8 + $0x1f0] sm:$0xff] }
 0x415   :  { %8166 = vmatpush1.bf16.msra.mxu0 %v12001_v6  ;;  %v4928_v6 = vld [vmem:[#allocation8 + $0xb0] sm:$0xff] }
 0x416   :  { %8330 = vmatpush1.bf16.msra.mxu1 %v12003_v32  ;;  %8167 = vmatprep.subr.bf16.mxu0 %v12010_v52  ;;  %v11544_v32 = vcombine.high %v4917_v60, %v4921_v46  ;;  %v4925_v52 = vld [vmem:[#allocation8 + $0x98] sm:$0xff]  ;;  %v11550_v13 = vcombine.high %v4924_v51, %v4928_v6  ;;  %v11549_v15 = vcombine.low %v4924_v51, %v4928_v6  ;;  %v4972_v6 = vld [vmem:[#allocation8 + $0x210] sm:$0xff] }
 0x417   :  { %8331 = vmatprep.subr.bf16.mxu1 %v12012_v56  ;;  %v4929_v56 = vld [vmem:[#allocation8 + $0xb8] sm:$0xff]  ;;  %v11581_v46 = vcombine.low %v4956_v48, %v4960_v26 }
 0x418   :  { %v11552_v39 = vcombine.high %v4925_v52, %v4929_v56  ;;  %v11551_v3 = vcombine.low %v4925_v52, %v4929_v56  ;;  %v4969_v60 = vld [vmem:[#allocation8 + $0x1f8] sm:$0xff] }
 0x419   :  { %8168 = vmatpush1.bf16.msra.mxu0 %v12009_v61  ;;  %v4932_v61 = vld [vmem:[#allocation8 + $0xd0] sm:$0xff]  ;;  %v4973_v52 = vld [vmem:[#allocation8 + $0x218] sm:$0xff] }
 0x41a   :  { %8332 = vmatpush1.bf16.msra.mxu1 %v12011_v40  ;;  %8169 = vmatprep.subr.bf16.mxu0 %v12018_v1  ;;  %v4936_v40 = vld [vmem:[#allocation8 + $0xf0] sm:$0xff]  ;;  %v4933_v1 = vld [vmem:[#allocation8 + $0xd8] sm:$0xff] }
 0x41b   :  { %8333 = vmatprep.subr.bf16.mxu1 %v12020_v2  ;;  %v4937_v2 = vld [vmem:[#allocation8 + $0xf8] sm:$0xff]  ;;  %v11558_v7 = vcombine.high %v4932_v61, %v4936_v40 }
 0x41c   :  { %v11560_v10 = vcombine.high %v4933_v1, %v4937_v2  ;;  %v4977_v56 = vld [vmem:[#allocation8 + $0x238] sm:$0xff] }
 0x41d   :  { %8170 = vmatpush1.bf16.msra.mxu0 %v12017_v18  ;;  %v4940_v18 = vld [vmem:[#allocation8 + $0x110] sm:$0xff] }
 0x41e   :  { %8334 = vmatpush1.bf16.msra.mxu1 %v12019_v33  ;;  %8171 = vmatprep.subr.bf16.mxu0 %v12026_v16  ;;  %v4941_v33 = vld [vmem:[#allocation8 + $0x118] sm:$0xff]  ;;  %v11566_v17 = vcombine.high %v4940_v18, %v4944_v14 }
 0x41f   :  { %8335 = vmatprep.subr.bf16.mxu1 %v12028_v29  ;;  %v4945_v16 = vld [vmem:[#allocation8 + $0x138] sm:$0xff]  ;;  %v11559_v29 = vcombine.low %v4933_v1, %v4937_v2 }
 0x420   :  { %v11568_v19 = vcombine.high %v4941_v33, %v4945_v16  ;;  %v4981_v1 = vld [vmem:[#allocation8 + $0x258] sm:$0xff] }
 0x421   :  { %8172 = vmatpush1.bf16.msra.mxu0 %v12025_v21  ;;  %v4949_v21 = vld [vmem:[#allocation8 + $0x158] sm:$0xff] }
 0x422   :  { %8336 = vmatpush1.bf16.msra.mxu1 %v12027_v44  ;;  %8173 = vmatprep.subr.bf16.mxu0 %v12034_v24  ;;  %v11565_v44 = vcombine.low %v4940_v18, %v4944_v14  ;;  %v11567_v24 = vcombine.low %v4941_v33, %v4945_v16  ;;  %v11576_v25 = vcombine.high %v4949_v21, %v4953_v22  ;;  %v4985_v2 = vld [vmem:[#allocation8 + $0x278] sm:$0xff]  ;;  %v4988_v18 = vld [vmem:[#allocation8 + $0x290] sm:$0xff] }
 0x423   :  { %8337 = vmatprep.subr.bf16.mxu1 %v12036_v12  ;;  %v11574_v12 = vcombine.high %v4948_v20, %v4952_v8  ;;  %v4992_v14 = vld [vmem:[#allocation8 + $0x2b0] sm:$0xff]  ;;  %v4989_v33 = vld [vmem:[#allocation8 + $0x298] sm:$0xff] }
 0x424   :  { %v4993_v16 = vld [vmem:[#allocation8 + $0x2b8] sm:$0xff]  ;;  %v4996_v20 = vld [vmem:[#allocation8 + $0x2d0] sm:$0xff] }
 0x425   :  { %8174 = vmatpush1.bf16.msra.mxu0 %v12033_v35  ;;  %v4961_v35 = vld [vmem:[#allocation8 + $0x1b8] sm:$0xff]  ;;  %v5000_v8 = vld [vmem:[#allocation8 + $0x2f0] sm:$0xff] }
 0x426   :  { %8338 = vmatpush1.bf16.msra.mxu1 %v12035_v36  ;;  %8348 = vmatprep.subr.bf16.mxu0 %v11534_v45  ;;  %v11575_v36 = vcombine.low %v4949_v21, %v4953_v22  ;;  %v11582_v45 = vcombine.high %v4956_v48, %v4960_v26  ;;  %v4997_v21 = vld [vmem:[#allocation8 + $0x2d8] sm:$0xff]  ;;  %v5004_v48 = vld [vmem:[#allocation8 + $0x310] sm:$0xff] }
 0x427   :  { %8512 = vmatprep.subr.bf16.mxu1 %v11536_v38  ;;  %v11584_v38 = vcombine.high %v4957_v34, %v4961_v35  ;;  %v5001_v22 = vld [vmem:[#allocation8 + $0x2f8] sm:$0xff]  ;;  %v5008_v26 = vld [vmem:[#allocation8 + $0x330] sm:$0xff] }
 0x428   :  { %8176 = vmatmul.mubr.bf16.vlgmr.msra.gmra.mrb[40].mxu0 %v13657_v47 }
 0x429   :  { %8340 = vmatmul.mubr.bf16.vlgmr.msra.gmra.mrb[40].mxu1 %v13657_v47  ;;  %8349 = vmatpush1.bf16.msra.mxu0 %v11533_v31  ;;  %v4965_v31 = vld [vmem:[#allocation8 + $0x1d8] sm:$0xff] }
 0x42a   :  { %8380 = vmatprep.mubr.bf16.mxu0 %v13566_v27  ;;  %8513 = vmatpush1.bf16.msra.mxu1 %v11535_v49  ;;  %v11583_v49 = vcombine.low %v4957_v34, %v4961_v35  ;;  %v11592_v51 = vcombine.high %v4965_v31, %v4969_v60  ;;  %v5005_v34 = vld [vmem:[#allocation8 + $0x318] sm:$0xff] }
 0x42b   :  { %8544 = vmatprep.mubr.bf16.mxu1 %v13566_v27  ;;  %8350 = vmatprep.subr.bf16.mxu0 %v11542_v50  ;;  %v11557_v27 = vcombine.low %v4932_v61, %v4936_v40  ;;  %v11590_v50 = vcombine.high %v4964_v63, %v4968_v42  ;;  %v4980_v61 = vld [vmem:[#allocation8 + $0x250] sm:$0xff]  ;;  %v5009_v35 = vld [vmem:[#allocation8 + $0x338] sm:$0xff] }
 0x42c   :  { %8514 = vmatprep.subr.bf16.mxu1 %v11544_v32  ;;  %v4976_v32 = vld [vmem:[#allocation8 + $0x230] sm:$0xff] }
 0x42d   :  { %8351 = vmatpush1.bf16.msra.mxu0 %v11541_v55  ;;  %v11589_v55 = vcombine.low %v4964_v63, %v4968_v42  ;;  %v4984_v40 = vld [vmem:[#allocation8 + $0x270] sm:$0xff] }
 0x42e   :  { %8515 = vmatpush1.bf16.msra.mxu1 %v11543_v57  ;;  %8352 = vmatprep.subr.bf16.mxu0 %v11550_v13  ;;  %v11591_v57 = vcombine.low %v4965_v31, %v4969_v60  ;;  %v11598_v13 = vcombine.high %v4972_v6, %v4976_v32  ;;  %v5012_v63 = vld [vmem:[#allocation8 + $0x350] sm:$0xff]  ;;  %v5013_v31 = vld [vmem:[#allocation8 + $0x358] sm:$0xff] }
 0x42f   :  { %8516 = vmatprep.subr.bf16.mxu1 %v11552_v39  ;;  %v11600_v39 = vcombine.high %v4973_v52, %v4977_v56  ;;  %v5016_v42 = vld [vmem:[#allocation8 + $0x370] sm:$0xff]  ;;  %v5017_v60 = vld [vmem:[#allocation8 + $0x378] sm:$0xff] }
 0x431   :  { %8353 = vmatpush1.bf16.msra.mxu0 %v11549_v15  ;;  %v11597_v15 = vcombine.low %v4972_v6, %v4976_v32  ;;  %v5020_v6 = vld [vmem:[#allocation8 + $0x390] sm:$0xff] }
 0x432   :  { %8517 = vmatpush1.bf16.msra.mxu1 %v11551_v3  ;;  %8354 = vmatprep.subr.bf16.mxu0 %v11558_v7  ;;  %v11599_v3 = vcombine.low %v4973_v52, %v4977_v56  ;;  %v11606_v7 = vcombine.high %v4980_v61, %v4984_v40  ;;  %v5024_v32 = vld [vmem:[#allocation8 + $0x3b0] sm:$0xff]  ;;  %v5021_v52 = vld [vmem:[#allocation8 + $0x398] sm:$0xff] }
 0x433   :  { %8518 = vmatprep.subr.bf16.mxu1 %v11560_v10  ;;  %v11608_v10 = vcombine.high %v4981_v1, %v4985_v2  ;;  %v5025_v56 = vld [vmem:[#allocation8 + $0x3b8] sm:$0xff] }
 0x435   :  { %8355 = vmatpush1.bf16.msra.mxu0 %v11557_v27  ;;  %v11605_v27 = vcombine.low %v4980_v61, %v4984_v40  ;;  %v5028_v61 = vld [vmem:[#allocation8 + $0x3d0] sm:$0xff] }
 0x436   :  { %8519 = vmatpush1.bf16.msra.mxu1 %v11559_v29  ;;  %8356 = vmatprep.subr.bf16.mxu0 %v11566_v17  ;;  %v11607_v29 = vcombine.low %v4981_v1, %v4985_v2  ;;  %v11614_v17 = vcombine.high %v4988_v18, %v4992_v14  ;;  %v5032_v40 = vld [vmem:[#allocation8 + $0x3f0] sm:$0xff]  ;;  %v5029_v1 = vld [vmem:[#allocation8 + $0x3d8] sm:$0xff] }
 0x437   :  { %8520 = vmatprep.subr.bf16.mxu1 %v11568_v19  ;;  %v11616_v19 = vcombine.high %v4989_v33, %v4993_v16  ;;  %v5033_v2 = vld [vmem:[#allocation8 + $0x3f8] sm:$0xff] }
 0x439   :  { %8357 = vmatpush1.bf16.msra.mxu0 %v11565_v44  ;;  %v11613_v44 = vcombine.low %v4988_v18, %v4992_v14  ;;  %v5036_v18 = vld [vmem:[#allocation8 + $0x410] sm:$0xff] }
 0x43a   :  { %8521 = vmatpush1.bf16.msra.mxu1 %v11567_v24  ;;  %8358 = vmatprep.subr.bf16.mxu0 %v11574_v12  ;;  %v11615_v24 = vcombine.low %v4989_v33, %v4993_v16  ;;  %v11622_v12 = vcombine.high %v4996_v20, %v5000_v8  ;;  %v5040_v14 = vld [vmem:[#allocation8 + $0x430] sm:$0xff]  ;;  %v5037_v33 = vld [vmem:[#allocation8 + $0x418] sm:$0xff] }
 0x43b   :  { %8522 = vmatprep.subr.bf16.mxu1 %v11576_v25  ;;  %v11624_v25 = vcombine.high %v4997_v21, %v5001_v22  ;;  %v5041_v16 = vld [vmem:[#allocation8 + $0x438] sm:$0xff] }
 0x43d   :  { %8359 = vmatpush1.bf16.msra.mxu0 %v11573_v0  ;;  %v11621_v0 = vcombine.low %v4996_v20, %v5000_v8  ;;  %v5044_v20 = vld [vmem:[#allocation8 + $0x450] sm:$0xff] }
 0x43e   :  { %8523 = vmatpush1.bf16.msra.mxu1 %v11575_v36  ;;  %8360 = vmatprep.subr.bf16.mxu0 %v11582_v45  ;;  %v11623_v36 = vcombine.low %v4997_v21, %v5001_v22  ;;  %v11630_v45 = vcombine.high %v5004_v48, %v5008_v26  ;;  %v5048_v8 = vld [vmem:[#allocation8 + $0x470] sm:$0xff]  ;;  %v11661_v21 = vcombine.low %v5036_v18, %v5040_v14  ;;  %v5045_v22 = vld [vmem:[#allocation8 + $0x458] sm:$0xff] }
 0x43f   :  { %8524 = vmatprep.subr.bf16.mxu1 %v11584_v38  ;;  %v11632_v38 = vcombine.high %v5005_v34, %v5009_v35 }
 0x441   :  { %8361 = vmatpush1.bf16.msra.mxu0 %v11581_v46  ;;  %v11629_v46 = vcombine.low %v5004_v48, %v5008_v26  ;;  %v5056_v48 = vld [vmem:[#allocation8 + $0x4b0] sm:$0xff] }
 0x442   :  { %8525 = vmatpush1.bf16.msra.mxu1 %v11583_v49  ;;  %8362 = vmatprep.subr.bf16.mxu0 %v11590_v50  ;;  %v11631_v49 = vcombine.low %v5005_v34, %v5009_v35  ;;  %v11638_v50 = vcombine.high %v5012_v63, %v5016_v42  ;;  %v5053_v34 = vld [vmem:[#allocation8 + $0x498] sm:$0xff] }
 0x443   :  { %8526 = vmatprep.subr.bf16.mxu1 %v11592_v51  ;;  %v11640_v51 = vcombine.high %v5013_v31, %v5017_v60  ;;  %v5057_v35 = vld [vmem:[#allocation8 + $0x4b8] sm:$0xff] }
 0x445   :  { %8363 = vmatpush1.bf16.msra.mxu0 %v11589_v55  ;;  %v11637_v55 = vcombine.low %v5012_v63, %v5016_v42  ;;  %v5060_v63 = vld [vmem:[#allocation8 + $0x4d0] sm:$0xff] }
 0x446   :  { %8527 = vmatpush1.bf16.msra.mxu1 %v11591_v57  ;;  %8364 = vmatprep.subr.bf16.mxu0 %v11598_v13  ;;  %v11639_v57 = vcombine.low %v5013_v31, %v5017_v60  ;;  %v11646_v13 = vcombine.high %v5020_v6, %v5024_v32  ;;  %v5064_v42 = vld [vmem:[#allocation8 + $0x4f0] sm:$0xff]  ;;  %v5061_v31 = vld [vmem:[#allocation8 + $0x4d8] sm:$0xff] }
 0x447   :  { %8528 = vmatprep.subr.bf16.mxu1 %v11600_v39  ;;  %v11648_v39 = vcombine.high %v5021_v52, %v5025_v56  ;;  %v5065_v60 = vld [vmem:[#allocation8 + $0x4f8] sm:$0xff] }
 0x449   :  { %8365 = vmatpush1.bf16.msra.mxu0 %v11597_v15  ;;  %v11645_v15 = vcombine.low %v5020_v6, %v5024_v32  ;;  %v5072_v6 = vld [vmem:[#allocation8 + $0x530] sm:$0xff]  ;;  %v5069_v32 = vld [vmem:[#allocation8 + $0x518] sm:$0xff] }
 0x44a   :  { %8529 = vmatpush1.bf16.msra.mxu1 %v11599_v3  ;;  %8366 = vmatprep.subr.bf16.mxu0 %v11606_v7  ;;  %v11647_v3 = vcombine.low %v5021_v52, %v5025_v56  ;;  %v11654_v7 = vcombine.high %v5028_v61, %v5032_v40  ;;  %v5073_v52 = vld [vmem:[#allocation8 + $0x538] sm:$0xff]  ;;  %v11687_v56 = vcombine.low %v5061_v31, %v5065_v60 }
 0x44b   :  { %8530 = vmatprep.subr.bf16.mxu1 %v11608_v10  ;;  %v11656_v10 = vcombine.high %v5029_v1, %v5033_v2 }
 0x44d   :  { %8367 = vmatpush1.bf16.msra.mxu0 %v11605_v27  ;;  %v11653_v27 = vcombine.low %v5028_v61, %v5032_v40  ;;  %v5077_v61 = vld [vmem:[#allocation8 + $0x558] sm:$0xff] }
 0x44e   :  { %8531 = vmatpush1.bf16.msra.mxu1 %v11607_v29  ;;  %8368 = vmatprep.subr.bf16.mxu0 %v11614_v17  ;;  %v11655_v29 = vcombine.low %v5029_v1, %v5033_v2  ;;  %v11662_v17 = vcombine.high %v5036_v18, %v5040_v14  ;;  %v5081_v40 = vld [vmem:[#allocation8 + $0x578] sm:$0xff]  ;;  %v11695_v2 = vcombine.low %v5069_v32, %v5073_v52 }
 0x44f   :  { %8532 = vmatprep.subr.bf16.mxu1 %v11616_v19  ;;  %v11664_v19 = vcombine.high %v5037_v33, %v5041_v16  ;;  %v5085_v18 = vld [vmem:[#allocation8 + $0x598] sm:$0xff] }
 0x450   :  { %v5089_v14 = vld [vmem:[#allocation8 + $0x5b8] sm:$0xff] }
 0x451   :  { %8369 = vmatpush1.bf16.msra.mxu0 %v11613_v44  ;;  %v5049_v44 = vld [vmem:[#allocation8 + $0x478] sm:$0xff] }
 0x452   :  { %8533 = vmatpush1.bf16.msra.mxu1 %v11615_v24  ;;  %8370 = vmatprep.subr.bf16.mxu0 %v11622_v12  ;;  %v11663_v24 = vcombine.low %v5037_v33, %v5041_v16  ;;  %v11670_v12 = vcombine.high %v5044_v20, %v5048_v8  ;;  %v11672_v26 = vcombine.high %v5045_v22, %v5049_v44 }
 0x453   :  { %8534 = vmatprep.subr.bf16.mxu1 %v11624_v25  ;;  %v5052_v25 = vld [vmem:[#allocation8 + $0x490] sm:$0xff]  ;;  %v11703_v16 = vcombine.low %v5077_v61, %v5081_v40 }
 0x455   :  { %8371 = vmatpush1.bf16.msra.mxu0 %v11621_v0  ;;  %v11669_v0 = vcombine.low %v5044_v20, %v5048_v8  ;;  %v5093_v20 = vld [vmem:[#allocation8 + $0x5d8] sm:$0xff] }
 0x456   :  { %8535 = vmatpush1.bf16.msra.mxu1 %v11623_v36  ;;  %8372 = vmatprep.subr.bf16.mxu0 %v11630_v45  ;;  %v11671_v36 = vcombine.low %v5045_v22, %v5049_v44  ;;  %v11678_v45 = vcombine.high %v5052_v25, %v5056_v48  ;;  %v5097_v8 = vld [vmem:[#allocation8 + $0x5f8] sm:$0xff]  ;;  %v11711_v22 = vcombine.low %v5085_v18, %v5089_v14 }
 0x457   :  { %8536 = vmatprep.subr.bf16.mxu1 %v11632_v38  ;;  %v11680_v38 = vcombine.high %v5053_v34, %v5057_v35 }
 0x459   :  { %8373 = vmatpush1.bf16.msra.mxu0 %v11629_v46  ;;  %v11677_v46 = vcombine.low %v5052_v25, %v5056_v48  ;;  %v5104_v25 = vld [vmem:[#allocation8 + $0x630] sm:$0xff]  ;;  %v5101_v48 = vld [vmem:[#allocation8 + $0x618] sm:$0xff] }
 0x45a   :  { %8537 = vmatpush1.bf16.msra.mxu1 %v11631_v49  ;;  %8374 = vmatprep.subr.bf16.mxu0 %v11638_v50  ;;  %v11686_v49 = vcombine.high %v5060_v63, %v5064_v42  ;;  %v11688_v50 = vcombine.high %v5061_v31, %v5065_v60 }
 0x45b   :  { %8538 = vmatprep.subr.bf16.mxu1 %v11640_v51  ;;  %v5068_v51 = vld [vmem:[#allocation8 + $0x510] sm:$0xff] }
 0x45c   :  { %v11693_v1 = vcombine.low %v5068_v51, %v5072_v6 }
 0x45d   :  { %8375 = vmatpush1.bf16.msra.mxu0 %v11637_v55  ;;  %v11694_v55 = vcombine.high %v5068_v51, %v5072_v6  ;;  %v5117_v51 = vld [vmem:[#allocation8 + $0x698] sm:$0xff] }
 0x45e   :  { %8539 = vmatpush1.bf16.msra.mxu1 %v11639_v57  ;;  %8376 = vmatprep.subr.bf16.mxu0 %v11646_v13  ;;  %v11696_v57 = vcombine.high %v5069_v32, %v5073_v52  ;;  %v5076_v13 = vld [vmem:[#allocation8 + $0x550] sm:$0xff]  ;;  %v5121_v6 = vld [vmem:[#allocation8 + $0x6b8] sm:$0xff] }
 0x45f   :  { %8540 = vmatprep.subr.bf16.mxu1 %v11648_v39  ;;  %v5080_v39 = vld [vmem:[#allocation8 + $0x570] sm:$0xff] }
 0x460   :  { %v11701_v33 = vcombine.low %v5076_v13, %v5080_v39 }
 0x461   :  { %8377 = vmatpush1.bf16.msra.mxu0 %v11645_v15  ;;  %v11702_v15 = vcombine.high %v5076_v13, %v5080_v39  ;;  %v5125_v13 = vld [vmem:[#allocation8 + $0x6d8] sm:$0xff] }
 0x462   :  { %8541 = vmatpush1.bf16.msra.mxu1 %v11647_v3  ;;  %8378 = vmatprep.subr.bf16.mxu0 %v11654_v7  ;;  %v11704_v3 = vcombine.high %v5077_v61, %v5081_v40  ;;  %v5084_v7 = vld [vmem:[#allocation8 + $0x590] sm:$0xff]  ;;  %v5129_v39 = vld [vmem:[#allocation8 + $0x6f8] sm:$0xff]  ;;  %v11743_v40 = vcombine.low %v5117_v51, %v5121_v6 }
 0x463   :  { %8542 = vmatprep.subr.bf16.mxu1 %v11656_v10  ;;  %v5088_v10 = vld [vmem:[#allocation8 + $0x5b0] sm:$0xff] }
 0x465   :  { %8379 = vmatpush1.bf16.msra.mxu0 %v11653_v27  ;;  %v11710_v27 = vcombine.high %v5084_v7, %v5088_v10 }
 0x466   :  { %8543 = vmatpush1.bf16.msra.mxu1 %v11655_v29  ;;  %8389 = vmatprep.subr.bf16.mxu0 %v11662_v17  ;;  %v11712_v29 = vcombine.high %v5085_v18, %v5089_v14  ;;  %v5092_v17 = vld [vmem:[#allocation8 + $0x5d0] sm:$0xff]  ;;  %v11751_v14 = vcombine.low %v5125_v13, %v5129_v39 }
 0x467   :  { %8553 = vmatprep.subr.bf16.mxu1 %v11664_v19  ;;  %v5096_v19 = vld [vmem:[#allocation8 + $0x5f0] sm:$0xff] }
 0x468   :  { %8381 = vmatmul.mubr.bf16.vlgmr.msra.gmra.mrb[44].mxu0 %v13590_v41  ;;  %v11718_v44 = vcombine.high %v5092_v17, %v5096_v19 }
 0x469   :  { %8545 = vmatmul.mubr.bf16.vlgmr.msra.gmra.mrb[44].mxu1 %v13590_v41  ;;  %8390 = vmatpush1.bf16.msra.mxu0 %v11661_v21  ;;  %v11679_v41 = vcombine.low %v5053_v34, %v5057_v35  ;;  %v11709_v21 = vcombine.low %v5084_v7, %v5088_v10  ;;  %v11717_v34 = vcombine.low %v5092_v17, %v5096_v19  ;;  %v5133_v7 = vld [vmem:[#allocation8 + $0x718] sm:$0xff] }
 0x46a   :  { %8421 = vmatprep.mubr.bf16.mxu0 %v13592_v62  ;;  %8554 = vmatpush1.bf16.msra.mxu1 %v11663_v24  ;;  %v11720_v24 = vcombine.high %v5093_v20, %v5097_v8  ;;  %v11719_v35 = vcombine.low %v5093_v20, %v5097_v8  ;;  %v5137_v10 = vld [vmem:[#allocation8 + $0x738] sm:$0xff] }
 0x46b   :  { %8585 = vmatprep.mubr.bf16.mxu1 %v13592_v62  ;;  %8391 = vmatprep.subr.bf16.mxu0 %v11670_v12  ;;  %v11685_v62 = vcombine.low %v5060_v63, %v5064_v42  ;;  %v5100_v12 = vld [vmem:[#allocation8 + $0x610] sm:$0xff]  ;;  %v5109_v63 = vld [vmem:[#allocation8 + $0x658] sm:$0xff]  ;;  %v11759_v8 = vcombine.low %v5133_v7, %v5137_v10 }
 0x46c   :  { %8555 = vmatprep.subr.bf16.mxu1 %v11672_v26  ;;  %v5105_v26 = vld [vmem:[#allocation8 + $0x638] sm:$0xff]  ;;  %v11725_v31 = vcombine.low %v5100_v12, %v5104_v25 }
 0x46d   :  { %8392 = vmatpush1.bf16.msra.mxu0 %v11669_v0  ;;  %v11726_v0 = vcombine.high %v5100_v12, %v5104_v25  ;;  %v5113_v42 = vld [vmem:[#allocation8 + $0x678] sm:$0xff]  ;;  %v11727_v60 = vcombine.low %v5101_v48, %v5105_v26 }
 0x46e   :  { %8556 = vmatpush1.bf16.msra.mxu1 %v11671_v36  ;;  %8393 = vmatprep.subr.bf16.mxu0 %v11678_v45  ;;  %v11728_v36 = vcombine.high %v5101_v48, %v5105_v26  ;;  %v5108_v45 = vld [vmem:[#allocation8 + $0x650] sm:$0xff]  ;;  %v11735_v52 = vcombine.low %v5109_v63, %v5113_v42  ;;  %v5141_v17 = vld [vmem:[#allocation8 + $0x758] sm:$0xff] }
 0x46f   :  { %8557 = vmatprep.subr.bf16.mxu1 %v11680_v38  ;;  %v5112_v38 = vld [vmem:[#allocation8 + $0x670] sm:$0xff]  ;;  %v5145_v19 = vld [vmem:[#allocation8 + $0x778] sm:$0xff] }
 0x470   :  { %v11733_v32 = vcombine.low %v5108_v45, %v5112_v38  ;;  %v5149_v12 = vld [vmem:[#allocation8 + $0x798] sm:$0xff]  ;;  %v11767_v26 = vcombine.low %v5141_v17, %v5145_v19 }
 0x471   :  { %8394 = vmatpush1.bf16.msra.mxu0 %v11677_v46  ;;  %v11734_v46 = vcombine.high %v5108_v45, %v5112_v38  ;;  %v5153_v25 = vld [vmem:[#allocation8 + $0x7b8] sm:$0xff] }
 0x472   :  { %8558 = vmatpush1.bf16.msra.mxu1 %v11679_v41  ;;  %8395 = vmatprep.subr.bf16.mxu0 %v11686_v49  ;;  %v11736_v41 = vcombine.high %v5109_v63, %v5113_v42  ;;  %v5116_v49 = vld [vmem:[#allocation8 + $0x690] sm:$0xff]  ;;  %v5157_v45 = vld [vmem:[#allocation8 + $0x7d8] sm:$0xff]  ;;  %v11775_v42 = vcombine.low %v5149_v12, %v5153_v25 }
 0x473   :  { %8559 = vmatprep.subr.bf16.mxu1 %v11688_v50  ;;  %v5120_v50 = vld [vmem:[#allocation8 + $0x6b0] sm:$0xff]  ;;  %v5161_v38 = vld [vmem:[#allocation8 + $0x7f8] sm:$0xff] }
 0x474   :  { %v11741_v61 = vcombine.low %v5116_v49, %v5120_v50 }
 0x475   :  { %8396 = vmatpush1.bf16.msra.mxu0 %v11685_v62  ;;  %v11742_v62 = vcombine.high %v5116_v49, %v5120_v50  ;;  %v5165_v49 = vld [vmem:[#allocation8 + $0x818] sm:$0xff] }
 0x476   :  { %8560 = vmatpush1.bf16.msra.mxu1 %v11687_v56  ;;  %8397 = vmatprep.subr.bf16.mxu0 %v11694_v55  ;;  %v11744_v56 = vcombine.high %v5117_v51, %v5121_v6  ;;  %v5124_v55 = vld [vmem:[#allocation8 + $0x6d0] sm:$0xff]  ;;  %v5169_v50 = vld [vmem:[#allocation8 + $0x838] sm:$0xff]  ;;  %v11783_v6 = vcombine.low %v5157_v45, %v5161_v38 }
 0x477   :  { %8561 = vmatprep.subr.bf16.mxu1 %v11696_v57  ;;  %v5128_v57 = vld [vmem:[#allocation8 + $0x6f0] sm:$0xff] }
 0x478   :  { %v11749_v18 = vcombine.low %v5124_v55, %v5128_v57 }
 0x479   :  { %8398 = vmatpush1.bf16.msra.mxu0 %v11693_v1  ;;  %v11750_v1 = vcombine.high %v5124_v55, %v5128_v57  ;;  %v5173_v57 = vld [vmem:[#allocation8 + $0x858] sm:$0xff] }
 0x47a   :  { %8562 = vmatpush1.bf16.msra.mxu1 %v11695_v2  ;;  %8399 = vmatprep.subr.bf16.mxu0 %v11702_v15  ;;  %v11752_v2 = vcombine.high %v5125_v13, %v5129_v39  ;;  %v5132_v15 = vld [vmem:[#allocation8 + $0x710] sm:$0xff]  ;;  %v5177_v13 = vld [vmem:[#allocation8 + $0x878] sm:$0xff]  ;;  %v11791_v39 = vcombine.low %v5165_v49, %v5169_v50 }
 0x47b   :  { %8563 = vmatprep.subr.bf16.mxu1 %v11704_v3  ;;  %v5136_v3 = vld [vmem:[#allocation8 + $0x730] sm:$0xff] }
 0x47c   :  { %v11757_v20 = vcombine.low %v5132_v15, %v5136_v3 }
 0x47d   :  { %8400 = vmatpush1.bf16.msra.mxu0 %v11701_v33  ;;  %v11758_v33 = vcombine.high %v5132_v15, %v5136_v3  ;;  %v5181_v15 = vld [vmem:[#allocation8 + $0x898] sm:$0xff] }
 0x47e   :  { %8564 = vmatpush1.bf16.msra.mxu1 %v11703_v16  ;;  %8401 = vmatprep.subr.bf16.mxu0 %v11710_v27  ;;  %v11760_v16 = vcombine.high %v5133_v7, %v5137_v10  ;;  %v5140_v27 = vld [vmem:[#allocation8 + $0x750] sm:$0xff]  ;;  %v5185_v3 = vld [vmem:[#allocation8 + $0x8b8] sm:$0xff]  ;;  %v11799_v10 = vcombine.low %v5173_v57, %v5177_v13 }
 0x47f   :  { %8565 = vmatprep.subr.bf16.mxu1 %v11712_v29  ;;  %v5144_v29 = vld [vmem:[#allocation8 + $0x770] sm:$0xff] }
 0x480   :  { %v11765_v48 = vcombine.low %v5140_v27, %v5144_v29 }
 0x481   :  { %8402 = vmatpush1.bf16.msra.mxu0 %v11709_v21  ;;  %v11766_v21 = vcombine.high %v5140_v27, %v5144_v29  ;;  %v5189_v27 = vld [vmem:[#allocation8 + $0x8d8] sm:$0xff] }
 0x482   :  { %8566 = vmatpush1.bf16.msra.mxu1 %v11711_v22  ;;  %8403 = vmatprep.subr.bf16.mxu0 %v11718_v44  ;;  %v11768_v22 = vcombine.high %v5141_v17, %v5145_v19  ;;  %v5148_v44 = vld [vmem:[#allocation8 + $0x790] sm:$0xff]  ;;  %v5193_v29 = vld [vmem:[#allocation8 + $0x8f8] sm:$0xff] }
 0x483   :  { %8567 = vmatprep.subr.bf16.mxu1 %v11720_v24  ;;  %v5152_v24 = vld [vmem:[#allocation8 + $0x7b0] sm:$0xff] }
 0x484   :  { %v11773_v63 = vcombine.low %v5148_v44, %v5152_v24 }
 0x485   :  { %8404 = vmatpush1.bf16.msra.mxu0 %v11717_v34  ;;  %v11774_v34 = vcombine.high %v5148_v44, %v5152_v24  ;;  %v5201_v44 = vld [vmem:[#allocation8 + $0x938] sm:$0xff]  ;;  %v11815_v24 = vcombine.low %v5189_v27, %v5193_v29 }
 0x486   :  { %8568 = vmatpush1.bf16.msra.mxu1 %v11719_v35  ;;  %8405 = vmatprep.subr.bf16.mxu0 %v11726_v0  ;;  %v11776_v35 = vcombine.high %v5149_v12, %v5153_v25  ;;  %v5156_v0 = vld [vmem:[#allocation8 + $0x7d0] sm:$0xff] }
 0x487   :  { %8569 = vmatprep.subr.bf16.mxu1 %v11728_v36  ;;  %v5160_v36 = vld [vmem:[#allocation8 + $0x7f0] sm:$0xff] }
 0x488   :  { %v11781_v51 = vcombine.low %v5156_v0, %v5160_v36 }
 0x489   :  { %8406 = vmatpush1.bf16.msra.mxu0 %v11725_v31  ;;  %v11782_v31 = vcombine.high %v5156_v0, %v5160_v36 }
 0x48a   :  { %8570 = vmatpush1.bf16.msra.mxu1 %v11727_v60  ;;  %8407 = vmatprep.subr.bf16.mxu0 %v11734_v46  ;;  %v11784_v60 = vcombine.high %v5157_v45, %v5161_v38  ;;  %v5164_v46 = vld [vmem:[#allocation8 + $0x810] sm:$0xff] }
 0x48b   :  { %8571 = vmatprep.subr.bf16.mxu1 %v11736_v41  ;;  %v5168_v41 = vld [vmem:[#allocation8 + $0x830] sm:$0xff] }
 0x48c   :  { %v11789_v55 = vcombine.low %v5164_v46, %v5168_v41 }
 0x48d   :  { %8408 = vmatpush1.bf16.msra.mxu0 %v11733_v32  ;;  %v11790_v32 = vcombine.high %v5164_v46, %v5168_v41 }
 0x48e   :  { %8572 = vmatpush1.bf16.msra.mxu1 %v11735_v52  ;;  %8409 = vmatprep.subr.bf16.mxu0 %v11742_v62  ;;  %v11792_v52 = vcombine.high %v5165_v49, %v5169_v50  ;;  %v5172_v62 = vld [vmem:[#allocation8 + $0x850] sm:$0xff] }
 0x48f   :  { %8573 = vmatprep.subr.bf16.mxu1 %v11744_v56  ;;  %v5176_v56 = vld [vmem:[#allocation8 + $0x870] sm:$0xff] }
 0x490   :  { %v11797_v7 = vcombine.low %v5172_v62, %v5176_v56 }
 0x491   :  { %8410 = vmatpush1.bf16.msra.mxu0 %v11741_v61  ;;  %v11798_v61 = vcombine.high %v5172_v62, %v5176_v56 }
 0x492   :  { %8574 = vmatpush1.bf16.msra.mxu1 %v11743_v40  ;;  %8411 = vmatprep.subr.bf16.mxu0 %v11750_v1  ;;  %v5180_v40 = vld [vmem:[#allocation8 + $0x890] sm:$0xff] }
 0x493   :  { %8575 = vmatprep.subr.bf16.mxu1 %v11752_v2  ;;  %v5184_v1 = vld [vmem:[#allocation8 + $0x8b0] sm:$0xff]  ;;  %v11800_v2 = vcombine.high %v5173_v57, %v5177_v13 }
 0x494   :  { %v11805_v17 = vcombine.low %v5180_v40, %v5184_v1  ;;  %v5228_v13 = vld [vmem:[#allocation8 + $0xa10] sm:$0xff] }
 0x495   :  { %8412 = vmatpush1.bf16.msra.mxu0 %v11749_v18  ;;  %v11806_v18 = vcombine.high %v5180_v40, %v5184_v1  ;;  %v5233_v40 = vld [vmem:[#allocation8 + $0xa38] sm:$0xff] }
 0x496   :  { %8576 = vmatpush1.bf16.msra.mxu1 %v11751_v14  ;;  %8413 = vmatprep.subr.bf16.mxu0 %v11758_v33  ;;  %v11808_v14 = vcombine.high %v5181_v15, %v5185_v3  ;;  %v5188_v33 = vld [vmem:[#allocation8 + $0x8d0] sm:$0xff] }
 0x497   :  { %8577 = vmatprep.subr.bf16.mxu1 %v11760_v16  ;;  %v5192_v16 = vld [vmem:[#allocation8 + $0x8f0] sm:$0xff] }
 0x498   :  { %v11814_v19 = vcombine.high %v5188_v33, %v5192_v16 }
 0x499   :  { %8414 = vmatpush1.bf16.msra.mxu0 %v11757_v20  ;;  %v11816_v20 = vcombine.high %v5189_v27, %v5193_v29 }
 0x49a   :  { %8578 = vmatpush1.bf16.msra.mxu1 %v11759_v8  ;;  %8415 = vmatprep.subr.bf16.mxu0 %v11766_v21  ;;  %v5196_v8 = vld [vmem:[#allocation8 + $0x910] sm:$0xff] }
 0x49b   :  { %8579 = vmatprep.subr.bf16.mxu1 %v11768_v22  ;;  %v5200_v21 = vld [vmem:[#allocation8 + $0x930] sm:$0xff]  ;;  %v5197_v22 = vld [vmem:[#allocation8 + $0x918] sm:$0xff] }
 0x49c   :  { %v11822_v12 = vcombine.high %v5196_v8, %v5200_v21  ;;  %v11824_v25 = vcombine.high %v5197_v22, %v5201_v44  ;;  %v11821_v0 = vcombine.low %v5196_v8, %v5200_v21  ;;  %v11823_v36 = vcombine.low %v5197_v22, %v5201_v44 }
 0x49d   :  { %8416 = vmatpush1.bf16.msra.mxu0 %v11765_v48  ;;  %v5204_v48 = vld [vmem:[#allocation8 + $0x950] sm:$0xff] }
 0x49e   :  { %8580 = vmatpush1.bf16.msra.mxu1 %v11767_v26  ;;  %8417 = vmatprep.subr.bf16.mxu0 %v11774_v34  ;;  %v5208_v26 = vld [vmem:[#allocation8 + $0x970] sm:$0xff]  ;;  %v5205_v34 = vld [vmem:[#allocation8 + $0x958] sm:$0xff] }
 0x49f   :  { %8581 = vmatprep.subr.bf16.mxu1 %v11776_v35  ;;  %v5209_v35 = vld [vmem:[#allocation8 + $0x978] sm:$0xff]  ;;  %v11830_v45 = vcombine.high %v5204_v48, %v5208_v26  ;;  %v11829_v46 = vcombine.low %v5204_v48, %v5208_v26 }
 0x4a0   :  { %v11832_v38 = vcombine.high %v5205_v34, %v5209_v35  ;;  %v11831_v41 = vcombine.low %v5205_v34, %v5209_v35 }
 0x4a1   :  { %8418 = vmatpush1.bf16.msra.mxu0 %v11773_v63  ;;  %v5212_v63 = vld [vmem:[#allocation8 + $0x990] sm:$0xff] }
 0x4a2   :  { %8582 = vmatpush1.bf16.msra.mxu1 %v11775_v42  ;;  %8419 = vmatprep.subr.bf16.mxu0 %v11782_v31  ;;  %v5216_v42 = vld [vmem:[#allocation8 + $0x9b0] sm:$0xff]  ;;  %v5213_v31 = vld [vmem:[#allocation8 + $0x998] sm:$0xff] }
 0x4a3   :  { %8583 = vmatprep.subr.bf16.mxu1 %v11784_v60  ;;  %v5217_v60 = vld [vmem:[#allocation8 + $0x9b8] sm:$0xff]  ;;  %v11838_v49 = vcombine.high %v5212_v63, %v5216_v42  ;;  %v11837_v62 = vcombine.low %v5212_v63, %v5216_v42 }
 0x4a4   :  { %v11840_v50 = vcombine.high %v5213_v31, %v5217_v60  ;;  %v11839_v56 = vcombine.low %v5213_v31, %v5217_v60 }
 0x4a5   :  { %8420 = vmatpush1.bf16.msra.mxu0 %v11781_v51  ;;  %v5220_v51 = vld [vmem:[#allocation8 + $0x9d0] sm:$0xff] }
 0x4a6   :  { %8584 = vmatpush1.bf16.msra.mxu1 %v11783_v6  ;;  %8430 = vmatprep.subr.bf16.mxu0 %v11790_v32  ;;  %v5224_v6 = vld [vmem:[#allocation8 + $0x9f0] sm:$0xff]  ;;  %v5221_v32 = vld [vmem:[#allocation8 + $0x9d8] sm:$0xff] }
 0x4a7   :  { %8594 = vmatprep.subr.bf16.mxu1 %v11792_v52  ;;  %v5225_v52 = vld [vmem:[#allocation8 + $0x9f8] sm:$0xff]  ;;  %v11845_v1 = vcombine.low %v5220_v51, %v5224_v6 }
 0x4a8   :  { %8422 = vmatmul.mubr.bf16.vlgmr.msra.gmra.mrb[44].mxu0 %v13615_v30  ;;  %v11848_v57 = vcombine.high %v5221_v32, %v5225_v52 }
 0x4a9   :  { %8586 = vmatmul.mubr.bf16.vlgmr.msra.gmra.mrb[44].mxu1 %v13615_v30  ;;  %8431 = vmatpush1.bf16.msra.mxu0 %v11789_v55  ;;  %v11807_v30 = vcombine.low %v5181_v15, %v5185_v3  ;;  %v11846_v55 = vcombine.high %v5220_v51, %v5224_v6 }
 0x4aa   :  { %8462 = vmatprep.mubr.bf16.mxu0 %v13617_v53  ;;  %8595 = vmatpush1.bf16.msra.mxu1 %v11791_v39  ;;  %v5232_v39 = vld [vmem:[#allocation8 + $0xa30] sm:$0xff] }
 0x4ab   :  { %8626 = vmatprep.mubr.bf16.mxu1 %v13617_v53  ;;  %8432 = vmatprep.subr.bf16.mxu0 %v11798_v61  ;;  %v11813_v53 = vcombine.low %v5188_v33, %v5192_v16  ;;  %v5229_v61 = vld [vmem:[#allocation8 + $0xa18] sm:$0xff]  ;;  %v11854_v15 = vcombine.high %v5228_v13, %v5232_v39  ;;  %v11853_v33 = vcombine.low %v5228_v13, %v5232_v39 }
 0x4ac   :  { %8596 = vmatprep.subr.bf16.mxu1 %v11800_v2  ;;  %v11847_v2 = vcombine.low %v5221_v32, %v5225_v52  ;;  %v11856_v3 = vcombine.high %v5229_v61, %v5233_v40  ;;  %v11855_v16 = vcombine.low %v5229_v61, %v5233_v40 }
 0x4ad   :  { %8433 = vmatpush1.bf16.msra.mxu0 %v11797_v7  ;;  %v5236_v7 = vld [vmem:[#allocation8 + $0xa50] sm:$0xff] }
 0x4ae   :  { %8597 = vmatpush1.bf16.msra.mxu1 %v11799_v10  ;;  %8434 = vmatprep.subr.bf16.mxu0 %v11806_v18  ;;  %v5240_v10 = vld [vmem:[#allocation8 + $0xa70] sm:$0xff]  ;;  %v5237_v18 = vld [vmem:[#allocation8 + $0xa58] sm:$0xff] }
 0x4af   :  { %8598 = vmatprep.subr.bf16.mxu1 %v11808_v14  ;;  %v5241_v14 = vld [vmem:[#allocation8 + $0xa78] sm:$0xff]  ;;  %v11862_v27 = vcombine.high %v5236_v7, %v5240_v10  ;;  %v11861_v8 = vcombine.low %v5236_v7, %v5240_v10 }
 0x4b0   :  { %v11864_v29 = vcombine.high %v5237_v18, %v5241_v14  ;;  %v11863_v21 = vcombine.low %v5237_v18, %v5241_v14 }
 0x4b1   :  { %8435 = vmatpush1.bf16.msra.mxu0 %v11805_v17  ;;  %v5244_v17 = vld [vmem:[#allocation8 + $0xa90] sm:$0xff] }
 0x4b2   :  { %8599 = vmatpush1.bf16.msra.mxu1 %v11807_v30  ;;  %8436 = vmatprep.subr.bf16.mxu0 %v11814_v19  ;;  %v5248_v30 = vld [vmem:[#allocation8 + $0xab0] sm:$0xff]  ;;  %v5245_v19 = vld [vmem:[#allocation8 + $0xa98] sm:$0xff] }
 0x4b3   :  { %8600 = vmatprep.subr.bf16.mxu1 %v11816_v20  ;;  %v5249_v20 = vld [vmem:[#allocation8 + $0xab8] sm:$0xff]  ;;  %v11870_v22 = vcombine.high %v5244_v17, %v5248_v30  ;;  %v11869_v48 = vcombine.low %v5244_v17, %v5248_v30 }
 0x4b4   :  { %v11872_v44 = vcombine.high %v5245_v19, %v5249_v20  ;;  %v11871_v26 = vcombine.low %v5245_v19, %v5249_v20 }
 0x4b5   :  { %8437 = vmatpush1.bf16.msra.mxu0 %v11813_v53  ;;  %v5252_v53 = vld [vmem:[#allocation8 + $0xad0] sm:$0xff] }
 0x4b6   :  { %8601 = vmatpush1.bf16.msra.mxu1 %v11815_v24  ;;  %8438 = vmatprep.subr.bf16.mxu0 %v11822_v12  ;;  %v5256_v24 = vld [vmem:[#allocation8 + $0xaf0] sm:$0xff]  ;;  %v5253_v12 = vld [vmem:[#allocation8 + $0xad8] sm:$0xff] }
 0x4b7   :  { %8602 = vmatprep.subr.bf16.mxu1 %v11824_v25  ;;  %v5257_v25 = vld [vmem:[#allocation8 + $0xaf8] sm:$0xff]  ;;  %v11878_v34 = vcombine.high %v5252_v53, %v5256_v24  ;;  %v11877_v63 = vcombine.low %v5252_v53, %v5256_v24 }
 0x4b8   :  { %v11880_v35 = vcombine.high %v5253_v12, %v5257_v25  ;;  %v11879_v42 = vcombine.low %v5253_v12, %v5257_v25  ;;  %v5305_v53 = vld [vmem:[#allocation8 + $0xc78] sm:$0xff]  ;;  %v5308_v25 = vld [vmem:[#allocation8 + $0xc90] sm:$0xff] }
 0x4b9   :  { %8439 = vmatpush1.bf16.msra.mxu0 %v11821_v0  ;;  %v5260_v0 = vld [vmem:[#allocation8 + $0xb10] sm:$0xff] }
 0x4ba   :  { %8603 = vmatpush1.bf16.msra.mxu1 %v11823_v36  ;;  %8440 = vmatprep.subr.bf16.mxu0 %v11830_v45  ;;  %v5264_v36 = vld [vmem:[#allocation8 + $0xb30] sm:$0xff]  ;;  %v5261_v45 = vld [vmem:[#allocation8 + $0xb18] sm:$0xff] }
 0x4bb   :  { %8604 = vmatprep.subr.bf16.mxu1 %v11832_v38  ;;  %v5265_v38 = vld [vmem:[#allocation8 + $0xb38] sm:$0xff]  ;;  %v11886_v31 = vcombine.high %v5260_v0, %v5264_v36  ;;  %v11885_v51 = vcombine.low %v5260_v0, %v5264_v36 }
 0x4bc   :  { %v11888_v60 = vcombine.high %v5261_v45, %v5265_v38  ;;  %v11887_v6 = vcombine.low %v5261_v45, %v5265_v38 }
 0x4bd   :  { %8441 = vmatpush1.bf16.msra.mxu0 %v11829_v46  ;;  %v5268_v46 = vld [vmem:[#allocation8 + $0xb50] sm:$0xff] }
 0x4be   :  { %8605 = vmatpush1.bf16.msra.mxu1 %v11831_v41  ;;  %8442 = vmatprep.subr.bf16.mxu0 %v11838_v49  ;;  %v5272_v41 = vld [vmem:[#allocation8 + $0xb70] sm:$0xff]  ;;  %v5269_v49 = vld [vmem:[#allocation8 + $0xb58] sm:$0xff] }
 0x4bf   :  { %8606 = vmatprep.subr.bf16.mxu1 %v11840_v50  ;;  %v5273_v50 = vld [vmem:[#allocation8 + $0xb78] sm:$0xff]  ;;  %v11894_v32 = vcombine.high %v5268_v46, %v5272_v41  ;;  %v11893_v13 = vcombine.low %v5268_v46, %v5272_v41 }
 0x4c0   :  { %v11896_v52 = vcombine.high %v5269_v49, %v5273_v50  ;;  %v11895_v39 = vcombine.low %v5269_v49, %v5273_v50  ;;  %v5324_v50 = vld [vmem:[#allocation8 + $0xd10] sm:$0xff] }
 0x4c1   :  { %8443 = vmatpush1.bf16.msra.mxu0 %v11837_v62  ;;  %v5276_v62 = vld [vmem:[#allocation8 + $0xb90] sm:$0xff] }
 0x4c2   :  { %8607 = vmatpush1.bf16.msra.mxu1 %v11839_v56  ;;  %8444 = vmatprep.subr.bf16.mxu0 %v11846_v55  ;;  %v5280_v56 = vld [vmem:[#allocation8 + $0xbb0] sm:$0xff]  ;;  %v5277_v55 = vld [vmem:[#allocation8 + $0xb98] sm:$0xff] }
 0x4c3   :  { %8608 = vmatprep.subr.bf16.mxu1 %v11848_v57  ;;  %v5281_v57 = vld [vmem:[#allocation8 + $0xbb8] sm:$0xff]  ;;  %v11902_v61 = vcombine.high %v5276_v62, %v5280_v56  ;;  %v11901_v7 = vcombine.low %v5276_v62, %v5280_v56 }
 0x4c4   :  { %v11904_v40 = vcombine.high %v5277_v55, %v5281_v57  ;;  %v11903_v10 = vcombine.low %v5277_v55, %v5281_v57  ;;  %v5332_v55 = vld [vmem:[#allocation8 + $0xd50] sm:$0xff] }
 0x4c5   :  { %8445 = vmatpush1.bf16.msra.mxu0 %v11845_v1  ;;  %v5284_v1 = vld [vmem:[#allocation8 + $0xbd0] sm:$0xff] }
 0x4c6   :  { %8609 = vmatpush1.bf16.msra.mxu1 %v11847_v2  ;;  %8446 = vmatprep.subr.bf16.mxu0 %v11854_v15  ;;  %v5288_v2 = vld [vmem:[#allocation8 + $0xbf0] sm:$0xff]  ;;  %v5285_v15 = vld [vmem:[#allocation8 + $0xbd8] sm:$0xff] }
 0x4c7   :  { %8610 = vmatprep.subr.bf16.mxu1 %v11856_v3  ;;  %v5289_v3 = vld [vmem:[#allocation8 + $0xbf8] sm:$0xff]  ;;  %v11910_v18 = vcombine.high %v5284_v1, %v5288_v2  ;;  %v11909_v17 = vcombine.low %v5284_v1, %v5288_v2  ;;  %v5336_v57 = vld [vmem:[#allocation8 + $0xd70] sm:$0xff] }
 0x4c8   :  { %v11912_v14 = vcombine.high %v5285_v15, %v5289_v3  ;;  %v11911_v30 = vcombine.low %v5285_v15, %v5289_v3  ;;  %v11958_v1 = vcombine.high %v5332_v55, %v5336_v57  ;;  %v5340_v15 = vld [vmem:[#allocation8 + $0xd90] sm:$0xff] }
 0x4c9   :  { %8447 = vmatpush1.bf16.msra.mxu0 %v11853_v33  ;;  %v5292_v33 = vld [vmem:[#allocation8 + $0xc10] sm:$0xff] }
 0x4ca   :  { %8611 = vmatpush1.bf16.msra.mxu1 %v11855_v16  ;;  %8448 = vmatprep.subr.bf16.mxu0 %v11862_v27  ;;  %v5296_v16 = vld [vmem:[#allocation8 + $0xc30] sm:$0xff]  ;;  %v5293_v27 = vld [vmem:[#allocation8 + $0xc18] sm:$0xff] }
 0x4cb   :  { %8612 = vmatprep.subr.bf16.mxu1 %v11864_v29  ;;  %v5297_v29 = vld [vmem:[#allocation8 + $0xc38] sm:$0xff]  ;;  %v11918_v19 = vcombine.high %v5292_v33, %v5296_v16  ;;  %v5344_v3 = vld [vmem:[#allocation8 + $0xdb0] sm:$0xff] }
 0x4cc   :  { %v11920_v20 = vcombine.high %v5293_v27, %v5297_v29  ;;  %v11919_v24 = vcombine.low %v5293_v27, %v5297_v29  ;;  %v5348_v29 = vld [vmem:[#allocation8 + $0xdd0] sm:$0xff] }
 0x4cd   :  { %8449 = vmatpush1.bf16.msra.mxu0 %v11861_v8  ;;  %v5300_v8 = vld [vmem:[#allocation8 + $0xc50] sm:$0xff] }
 0x4ce   :  { %8613 = vmatpush1.bf16.msra.mxu1 %v11863_v21  ;;  %8450 = vmatprep.subr.bf16.mxu0 %v11870_v22  ;;  %v5304_v21 = vld [vmem:[#allocation8 + $0xc70] sm:$0xff]  ;;  %v11917_v22 = vcombine.low %v5292_v33, %v5296_v16  ;;  %v11966_v33 = vcombine.high %v5340_v15, %v5344_v3 }
 0x4cf   :  { %8614 = vmatprep.subr.bf16.mxu1 %v11872_v44  ;;  %v5301_v44 = vld [vmem:[#allocation8 + $0xc58] sm:$0xff]  ;;  %v11926_v12 = vcombine.high %v5300_v8, %v5304_v21  ;;  %v11925_v0 = vcombine.low %v5300_v8, %v5304_v21 }
 0x4d0   :  { %v11927_v36 = vcombine.low %v5301_v44, %v5305_v53  ;;  %v5353_v8 = vld [vmem:[#allocation8 + $0xdf8] sm:$0xff] }
 0x4d1   :  { %8451 = vmatpush1.bf16.msra.mxu0 %v11869_v48  ;;  %v5312_v48 = vld [vmem:[#allocation8 + $0xcb0] sm:$0xff] }
 0x4d2   :  { %8615 = vmatpush1.bf16.msra.mxu1 %v11871_v26  ;;  %8452 = vmatprep.subr.bf16.mxu0 %v11878_v34  ;;  %v11928_v26 = vcombine.high %v5301_v44, %v5305_v53  ;;  %v5309_v34 = vld [vmem:[#allocation8 + $0xc98] sm:$0xff]  ;;  %v11934_v45 = vcombine.high %v5308_v25, %v5312_v48  ;;  %v11933_v46 = vcombine.low %v5308_v25, %v5312_v48 }
 0x4d3   :  { %8616 = vmatprep.subr.bf16.mxu1 %v11880_v35  ;;  %v5313_v35 = vld [vmem:[#allocation8 + $0xcb8] sm:$0xff]  ;;  %v11965_v44 = vcombine.low %v5340_v15, %v5344_v3 }
 0x4d4   :  { %v11936_v38 = vcombine.high %v5309_v34, %v5313_v35 }
 0x4d5   :  { %8453 = vmatpush1.bf16.msra.mxu0 %v11877_v63  ;;  %v5316_v63 = vld [vmem:[#allocation8 + $0xcd0] sm:$0xff] }
 0x4d6   :  { %8617 = vmatpush1.bf16.msra.mxu1 %v11879_v42  ;;  %8454 = vmatprep.subr.bf16.mxu0 %v11886_v31  ;;  %v5320_v42 = vld [vmem:[#allocation8 + $0xcf0] sm:$0xff]  ;;  %v5317_v31 = vld [vmem:[#allocation8 + $0xcd8] sm:$0xff] }
 0x4d7   :  { %8618 = vmatprep.subr.bf16.mxu1 %v11888_v60  ;;  %v5321_v60 = vld [vmem:[#allocation8 + $0xcf8] sm:$0xff]  ;;  %v11942_v41 = vcombine.high %v5316_v63, %v5320_v42 }
 0x4d8   :  { %v11944_v49 = vcombine.high %v5317_v31, %v5321_v60 }
 0x4d9   :  { %8455 = vmatpush1.bf16.msra.mxu0 %v11885_v51  ;;  %v5328_v51 = vld [vmem:[#allocation8 + $0xd30] sm:$0xff] }
 0x4da   :  { %8619 = vmatpush1.bf16.msra.mxu1 %v11887_v6  ;;  %8456 = vmatprep.subr.bf16.mxu0 %v11894_v32  ;;  %v5325_v6 = vld [vmem:[#allocation8 + $0xd18] sm:$0xff]  ;;  %v11950_v62 = vcombine.high %v5324_v50, %v5328_v51 }
 0x4db   :  { %8620 = vmatprep.subr.bf16.mxu1 %v11896_v52  ;;  %v5329_v32 = vld [vmem:[#allocation8 + $0xd38] sm:$0xff]  ;;  %v11943_v52 = vcombine.low %v5317_v31, %v5321_v60  ;;  %v5364_v31 = vld [vmem:[#allocation8 + $0xe50] sm:$0xff] }
 0x4dc   :  { %v11952_v56 = vcombine.high %v5325_v6, %v5329_v32  ;;  %v5368_v60 = vld [vmem:[#allocation8 + $0xe70] sm:$0xff] }
 0x4dd   :  { %8457 = vmatpush1.bf16.msra.mxu0 %v11893_v13  ;;  %v5333_v13 = vld [vmem:[#allocation8 + $0xd58] sm:$0xff] }
 0x4de   :  { %8621 = vmatpush1.bf16.msra.mxu1 %v11895_v39  ;;  %8458 = vmatprep.subr.bf16.mxu0 %v11902_v61  ;;  %v5337_v39 = vld [vmem:[#allocation8 + $0xd78] sm:$0xff]  ;;  %v11949_v61 = vcombine.low %v5324_v50, %v5328_v51  ;;  %v11990_v50 = vcombine.high %v5364_v31, %v5368_v60 }
 0x4df   :  { %8622 = vmatprep.subr.bf16.mxu1 %v11904_v40  ;;  %v11951_v40 = vcombine.low %v5325_v6, %v5329_v32  ;;  %v11960_v2 = vcombine.high %v5333_v13, %v5337_v39  ;;  %v5372_v6 = vld [vmem:[#allocation8 + $0xe90] sm:$0xff] }
 0x4e0   :  { %v5376_v32 = vld [vmem:[#allocation8 + $0xeb0] sm:$0xff] }
 0x4e1   :  { %8459 = vmatpush1.bf16.msra.mxu0 %v11901_v7  ;;  %v5341_v7 = vld [vmem:[#allocation8 + $0xd98] sm:$0xff] }
 0x4e2   :  { %8623 = vmatpush1.bf16.msra.mxu1 %v11903_v10  ;;  %8460 = vmatprep.subr.bf16.mxu0 %v11910_v18  ;;  %v5345_v10 = vld [vmem:[#allocation8 + $0xdb8] sm:$0xff]  ;;  %v11957_v18 = vcombine.low %v5332_v55, %v5336_v57  ;;  %v11998_v55 = vcombine.high %v5372_v6, %v5376_v32 }
 0x4e3   :  { %8624 = vmatprep.subr.bf16.mxu1 %v11912_v14  ;;  %v11959_v14 = vcombine.low %v5333_v13, %v5337_v39  ;;  %v11968_v27 = vcombine.high %v5341_v7, %v5345_v10  ;;  %v5380_v13 = vld [vmem:[#allocation8 + $0xed0] sm:$0xff] }
 0x4e4   :  { %v5384_v39 = vld [vmem:[#allocation8 + $0xef0] sm:$0xff] }
 0x4e5   :  { %8461 = vmatpush1.bf16.msra.mxu0 %v11909_v17  ;;  %v5352_v17 = vld [vmem:[#allocation8 + $0xdf0] sm:$0xff]  ;;  %v12006_v15 = vcombine.high %v5380_v13, %v5384_v39 }
 0x4e6   :  { %8625 = vmatpush1.bf16.msra.mxu1 %v11911_v30  ;;  %8471 = vmatprep.subr.bf16.mxu0 %v11918_v19  ;;  %v11974_v25 = vcombine.high %v5348_v29, %v5352_v17 }
 0x4e7   :  { %8635 = vmatprep.subr.bf16.mxu1 %v11920_v20  ;;  %v5349_v20 = vld [vmem:[#allocation8 + $0xdd8] sm:$0xff] }
 0x4e8   :  { %8463 = vmatmul.mubr.bf16.vlgmr.msra.gmra.mrb[44].mxu0 %v13636_v43 }
 0x4e9   :  { %8627 = vmatmul.mubr.bf16.vlgmr.msra.gmra.mrb[44].mxu1 %v13636_v43  ;;  %8472 = vmatpush1.bf16.msra.mxu0 %v11917_v22  ;;  %v11935_v43 = vcombine.low %v5309_v34, %v5313_v35  ;;  %v5356_v34 = vld [vmem:[#allocation8 + $0xe10] sm:$0xff] }
 0x4ea   :  { %8503 = vmatprep.mubr.bf16.mxu0 %v13648_v37  ;;  %8636 = vmatpush1.bf16.msra.mxu1 %v11919_v24  ;;  %v5360_v35 = vld [vmem:[#allocation8 + $0xe30] sm:$0xff] }
 0x4eb   :  { %8667 = vmatprep.mubr.bf16.mxu1 %v13648_v37  ;;  %8473 = vmatprep.subr.bf16.mxu0 %v11926_v12  ;;  %v11941_v37 = vcombine.low %v5316_v63, %v5320_v42  ;;  %v11967_v12 = vcombine.low %v5341_v7, %v5345_v10  ;;  %v11982_v63 = vcombine.high %v5356_v34, %v5360_v35  ;;  %v5388_v7 = vld [vmem:[#allocation8 + $0xf10] sm:$0xff] }
 0x4ec   :  { %8637 = vmatprep.subr.bf16.mxu1 %v11928_v26  ;;  %v11976_v26 = vcombine.high %v5349_v20, %v5353_v8  ;;  %v5392_v10 = vld [vmem:[#allocation8 + $0xf30] sm:$0xff] }
 0x4ed   :  { %8474 = vmatpush1.bf16.msra.mxu0 %v11925_v0  ;;  %v5357_v0 = vld [vmem:[#allocation8 + $0xe18] sm:$0xff] }
 0x4ee   :  { %8638 = vmatpush1.bf16.msra.mxu1 %v11927_v36  ;;  %8475 = vmatprep.subr.bf16.mxu0 %v11934_v45  ;;  %v5361_v36 = vld [vmem:[#allocation8 + $0xe38] sm:$0xff]  ;;  %v11973_v45 = vcombine.low %v5348_v29, %v5352_v17  ;;  %v12014_v29 = vcombine.high %v5388_v7, %v5392_v10 }
 0x4ef   :  { %8639 = vmatprep.subr.bf16.mxu1 %v11936_v38  ;;  %v11975_v38 = vcombine.low %v5349_v20, %v5353_v8  ;;  %v11984_v42 = vcombine.high %v5357_v0, %v5361_v36  ;;  %v5396_v20 = vld [vmem:[#allocation8 + $0xf50] sm:$0xff] }
 0x4f0   :  { %v5400_v8 = vld [vmem:[#allocation8 + $0xf70] sm:$0xff] }
 0x4f1   :  { %8476 = vmatpush1.bf16.msra.mxu0 %v11933_v46  ;;  %v5365_v46 = vld [vmem:[#allocation8 + $0xe58] sm:$0xff] }
 0x4f2   :  { %8640 = vmatpush1.bf16.msra.mxu1 %v11935_v43  ;;  %8477 = vmatprep.subr.bf16.mxu0 %v11942_v41  ;;  %v5369_v43 = vld [vmem:[#allocation8 + $0xe78] sm:$0xff]  ;;  %v11981_v41 = vcombine.low %v5356_v34, %v5360_v35 }
 0x4f3   :  { %8641 = vmatprep.subr.bf16.mxu1 %v11944_v49  ;;  %v11983_v49 = vcombine.low %v5357_v0, %v5361_v36  ;;  %v11992_v51 = vcombine.high %v5365_v46, %v5369_v43  ;;  %v5405_v34 = vld [vmem:[#allocation8 + $0xf98] sm:$0xff]  ;;  %v12021_v0 = vcombine.low %v5396_v20, %v5400_v8 }
 0x4f4   :  { %v5409_v35 = vld [vmem:[#allocation8 + $0xfb8] sm:$0xff] }
 0x4f5   :  { %8478 = vmatpush1.bf16.msra.mxu0 %v11941_v37  ;;  %v5373_v37 = vld [vmem:[#allocation8 + $0xe98] sm:$0xff] }
 0x4f6   :  { %8642 = vmatpush1.bf16.msra.mxu1 %v11943_v52  ;;  %8479 = vmatprep.subr.bf16.mxu0 %v11950_v62  ;;  %v5377_v52 = vld [vmem:[#allocation8 + $0xeb8] sm:$0xff]  ;;  %v11989_v62 = vcombine.low %v5364_v31, %v5368_v60 }
 0x4f7   :  { %8643 = vmatprep.subr.bf16.mxu1 %v11952_v56  ;;  %v11991_v56 = vcombine.low %v5365_v46, %v5369_v43  ;;  %v12000_v57 = vcombine.high %v5373_v37, %v5377_v52  ;;  %v5413_v31 = vld [vmem:[#allocation8 + $0xfd8] sm:$0xff]  ;;  %v13683_v46 = vld [vmem:[#allocation10] sm:$0xff] }
 0x4f8   :  { %v5417_v60 = vld [vmem:[#allocation8 + $0xff8] sm:$0xff] }
 0x4f9   :  { %8480 = vmatpush1.bf16.msra.mxu0 %v11949_v61  ;;  %v5381_v61 = vld [vmem:[#allocation8 + $0xed8] sm:$0xff] }
 0x4fa   :  { %8644 = vmatpush1.bf16.msra.mxu1 %v11951_v40  ;;  %8481 = vmatprep.subr.bf16.mxu0 %v11958_v1  ;;  %v5385_v40 = vld [vmem:[#allocation8 + $0xef8] sm:$0xff]  ;;  %v11997_v1 = vcombine.low %v5372_v6, %v5376_v32  ;;  %v12039_v32 = vcombine.low %v5413_v31, %v5417_v60 }
 0x4fb   :  { %v13675_v16 = vpop.f32.mrb[40].mxu0  ;;  %8645 = vmatprep.subr.bf16.mxu1 %v11960_v2  ;;  %v11999_v2 = vcombine.low %v5373_v37, %v5377_v52  ;;  %v12008_v3 = vcombine.high %v5381_v61, %v5385_v40  ;;  %v12613_v37 = vld [vmem:[#allocation11 + $0x4] ss:$16 sps:$4 sm:$0xff]   ;;  %v12616_v52 = vld [vmem:[#allocation11 + $0xc] ss:$16 sps:$4 sm:$0xff]  }
 0x4fc   :  { %v13677_v30 = vpop.f32.mrb[40].mxu1  ;;  %v13679_v19 = vpop.f32.mrb[41].mxu0 }
 0x4fd   :  { %v13681_v21 = vpop.f32.mrb[41].mxu1  ;;  %v8181_v22 = vpop.f32.mrb[42].mxu0  ;;  %8482 = vmatpush1.bf16.msra.mxu0 %v11957_v18  ;;  %v5389_v18 = vld [vmem:[#allocation8 + $0xf18] sm:$0xff] }
 0x4fe   :  { %v8345_v53 = vpop.f32.mrb[42].mxu1  ;;  %8646 = vmatpush1.bf16.msra.mxu1 %v11959_v14  ;;  %v8182_v24 = vpop.f32.mrb[43].mxu0  ;;  %8483 = vmatprep.subr.bf16.mxu0 %v11966_v33  ;;  %v5393_v14 = vld [vmem:[#allocation8 + $0xf38] sm:$0xff]  ;;  %v12005_v33 = vcombine.low %v5380_v13, %v5384_v39  ;;  %v12622_v39 = vld [vmem:[#allocation11 + $0x2c] ss:$16 sps:$4 sm:$0xff]  }
 0x4ff   :  { %v8346_v48 = vpop.f32.mrb[43].mxu1  ;;  %8647 = vmatprep.subr.bf16.mxu1 %v11968_v27  ;;  %v12007_v27 = vcombine.low %v5381_v61, %v5385_v40  ;;  %v12016_v17 = vcombine.high %v5389_v18, %v5393_v14  ;;  %v5397_v22 = vld [vmem:[#allocation8 + $0xf58] sm:$0xff]  ;;  %v12013_v53 = vcombine.low %v5388_v7, %v5392_v10  ;;  %v12015_v24 = vcombine.low %v5389_v18, %v5393_v14  ;;  %v12620_v40 = vld [vmem:[#allocation11 + $0x28] ss:$16 sps:$4 sm:$0xff]   ;;  %v12634_v7 = vld [vmem:[#allocation11 + $0x6c] ss:$16 sps:$4 sm:$0xff]  }
 0x500   :  { %v5404_v48 = vld [vmem:[#allocation8 + $0xf90] sm:$0xff]  ;;  %v12617_v61 = vld [vmem:[#allocation11 + $0x20] ss:$16 sps:$4 sm:$0xff]   ;;  %v12637_v18 = vld [vmem:[#allocation11 + $0x84] ss:$16 sps:$4 sm:$0xff]  }
 0x501   :  { %8484 = vmatpush1.bf16.msra.mxu0 %v11965_v44  ;;  %v5401_v44 = vld [vmem:[#allocation8 + $0xf78] sm:$0xff]  ;;  %v12632_v10 = vld [vmem:[#allocation11 + $0x68] ss:$16 sps:$4 sm:$0xff]   ;;  %v12640_v14 = vld [vmem:[#allocation11 + $0x8c] ss:$16 sps:$4 sm:$0xff]  }
 0x502   :  { %8648 = vmatpush1.bf16.msra.mxu1 %v11967_v12  ;;  %8485 = vmatprep.subr.bf16.mxu0 %v11974_v25  ;;  %v12022_v12 = vcombine.high %v5396_v20, %v5400_v8  ;;  %v12024_v25 = vcombine.high %v5397_v22, %v5401_v44  ;;  %v12023_v36 = vcombine.low %v5397_v22, %v5401_v44  ;;  %v12641_v20 = vld [vmem:[#allocation11 + $0xa0] ss:$16 sps:$4 sm:$0xff]   ;;  %v12644_v8 = vld [vmem:[#allocation11 + $0xa8] ss:$16 sps:$4 sm:$0xff]   ;;  %v12649_v22 = vld [vmem:[#allocation11 + $0xc4] ss:$16 sps:$4 sm:$0xff]  }
 0x503   :  { %8649 = vmatprep.subr.bf16.mxu1 %v11976_v26  ;;  %v5408_v26 = vld [vmem:[#allocation8 + $0xfb0] sm:$0xff] }
 0x504   :  { %v12029_v43 = vcombine.low %v5404_v48, %v5408_v26  ;;  %v12652_v44 = vld [vmem:[#allocation11 + $0xcc] ss:$16 sps:$4 sm:$0xff]  }
 0x505   :  { %8486 = vmatpush1.bf16.msra.mxu0 %v11973_v45  ;;  %v12030_v45 = vcombine.high %v5404_v48, %v5408_v26  ;;  %v12653_v48 = vld [vmem:[#allocation11 + $0xe0] ss:$16 sps:$4 sm:$0xff]   ;;  %v12656_v26 = vld [vmem:[#allocation11 + $0xe8] ss:$16 sps:$4 sm:$0xff]  }
 0x506   :  { %8650 = vmatpush1.bf16.msra.mxu1 %v11975_v38  ;;  %8487 = vmatprep.subr.bf16.mxu0 %v11982_v63  ;;  %v12032_v38 = vcombine.high %v5405_v34, %v5409_v35  ;;  %v5412_v63 = vld [vmem:[#allocation8 + $0xfd0] sm:$0xff] }
 0x507   :  { %8651 = vmatprep.subr.bf16.mxu1 %v11984_v42  ;;  %v5416_v42 = vld [vmem:[#allocation8 + $0xff0] sm:$0xff] }
 0x508   :  { %v12037_v6 = vcombine.low %v5412_v63, %v5416_v42 }
 0x509   :  { %8488 = vmatpush1.bf16.msra.mxu0 %v11981_v41  ;;  %v12031_v41 = vcombine.low %v5405_v34, %v5409_v35  ;;  %v12661_v34 = vld [vmem:[#allocation11 + $0x104] ss:$16 sps:$4 sm:$0xff]   ;;  %v12664_v35 = vld [vmem:[#allocation11 + $0x10c] ss:$16 sps:$4 sm:$0xff]  }
 0x50a   :  { %8652 = vmatpush1.bf16.msra.mxu1 %v11983_v49  ;;  %8489 = vmatprep.subr.bf16.mxu0 %v11990_v50  ;;  %v12038_v49 = vcombine.high %v5412_v63, %v5416_v42  ;;  %v12040_v50 = vcombine.high %v5413_v31, %v5417_v60  ;;  %v12665_v63 = vld [vmem:[#allocation11 + $0x120] ss:$16 sps:$4 sm:$0xff]   ;;  %v12668_v42 = vld [vmem:[#allocation11 + $0x128] ss:$16 sps:$4 sm:$0xff]   ;;  %v12673_v31 = vld [vmem:[#allocation11 + $0x144] ss:$16 sps:$4 sm:$0xff]  }
 0x50b   :  { %8653 = vmatprep.subr.bf16.mxu1 %v11992_v51  ;;  %v5427_v51 = vrot.slane %v13683_v46, %v13559_v54  ;;  %v12676_v60 = vld [vmem:[#allocation11 + $0x14c] ss:$16 sps:$4 sm:$0xff]  }
 0x50d   :  { %8490 = vmatpush1.bf16.msra.mxu0 %v11989_v62  ;;  %v12510_v62 = vadd.f32 %v13679_v19, %v5427_v51  ;;  %v12628_v19 = vld [vmem:[#allocation11 + $0x4c] ss:$16 sps:$4 sm:$0xff]   ;;  %v12677_v51 = vld [vmem:[#allocation11 + $0x160] ss:$16 sps:$4 sm:$0xff]  }
 0x50e   :  { %8654 = vmatpush1.bf16.msra.mxu1 %v11991_v56  ;;  %8491 = vmatprep.subr.bf16.mxu0 %v11998_v55  ;;  %v12611_v56 = vld [vmem:[#allocation11] ss:$16 sps:$4 sm:$0xff]   ;;  %v12614_v55 = vld [vmem:[#allocation11 + $0x8] ss:$16 sps:$4 sm:$0xff]  }
 0x50f   :  { %8655 = vmatprep.subr.bf16.mxu1 %v12000_v57  ;;  %v12619_v57 = vld [vmem:[#allocation11 + $0x24] ss:$16 sps:$4 sm:$0xff]   ;;  %v8677_v13 = vpack.c.bf16 %v12510_v62, %v12510_v62  ;;  %v12686_v62 = vld [vmem:[#allocation11 + $0x188] ss:$16 sps:$4 sm:$0xff]  }
 0x511   :  { %8492 = vmatpush1.bf16.msra.mxu0 %v11997_v1  ;;  %v12625_v1 = vld [vmem:[#allocation11 + $0x44] ss:$16 sps:$4 sm:$0xff]  }
 0x512   :  { %8656 = vmatpush1.bf16.msra.mxu1 %v11999_v2  ;;  %8493 = vmatprep.subr.bf16.mxu0 %v12006_v15  ;;  %v12623_v2 = vld [vmem:[#allocation11 + $0x40] ss:$16 sps:$4 sm:$0xff]   ;;  %v12626_v15 = vld [vmem:[#allocation11 + $0x48] ss:$16 sps:$4 sm:$0xff]  }
 0x513   :  { %8657 = vmatprep.subr.bf16.mxu1 %v12008_v3  ;;  %v12631_v3 = vld [vmem:[#allocation11 + $0x64] ss:$16 sps:$4 sm:$0xff]  }
 0x515   :  { %8494 = vmatpush1.bf16.msra.mxu0 %v12005_v33  ;;  %v12635_v33 = vld [vmem:[#allocation11 + $0x80] ss:$16 sps:$4 sm:$0xff]  }
 0x516   :  { %8658 = vmatpush1.bf16.msra.mxu1 %v12007_v27  ;;  %8495 = vmatprep.subr.bf16.mxu0 %v12014_v29  ;;  %v12638_v27 = vld [vmem:[#allocation11 + $0x88] ss:$16 sps:$4 sm:$0xff]   ;;  %v12643_v29 = vld [vmem:[#allocation11 + $0xa4] ss:$16 sps:$4 sm:$0xff]  }
 0x517   :  { %8659 = vmatprep.subr.bf16.mxu1 %v12016_v17  ;;  %v12646_v17 = vld [vmem:[#allocation11 + $0xac] ss:$16 sps:$4 sm:$0xff]  }
 0x519   :  { %8496 = vmatpush1.bf16.msra.mxu0 %v12013_v53  ;;  %v12647_v53 = vld [vmem:[#allocation11 + $0xc0] ss:$16 sps:$4 sm:$0xff]  }
 0x51a   :  { %8660 = vmatpush1.bf16.msra.mxu1 %v12015_v24  ;;  %8497 = vmatprep.subr.bf16.mxu0 %v12022_v12  ;;  %v12650_v24 = vld [vmem:[#allocation11 + $0xc8] ss:$16 sps:$4 sm:$0xff]   ;;  %v12655_v12 = vld [vmem:[#allocation11 + $0xe4] ss:$16 sps:$4 sm:$0xff]  }
 0x51b   :  { %8661 = vmatprep.subr.bf16.mxu1 %v12024_v25  ;;  %v12658_v25 = vld [vmem:[#allocation11 + $0xec] ss:$16 sps:$4 sm:$0xff]  }
 0x51d   :  { %8498 = vmatpush1.bf16.msra.mxu0 %v12021_v0  ;;  %v12659_v0 = vld [vmem:[#allocation11 + $0x100] ss:$16 sps:$4 sm:$0xff]  }
 0x51e   :  { %8662 = vmatpush1.bf16.msra.mxu1 %v12023_v36  ;;  %8499 = vmatprep.subr.bf16.mxu0 %v12030_v45  ;;  %v12662_v36 = vld [vmem:[#allocation11 + $0x108] ss:$16 sps:$4 sm:$0xff]   ;;  %v12667_v45 = vld [vmem:[#allocation11 + $0x124] ss:$16 sps:$4 sm:$0xff]  }
 0x51f   :  { %8663 = vmatprep.subr.bf16.mxu1 %v12032_v38  ;;  %v12670_v38 = vld [vmem:[#allocation11 + $0x12c] ss:$16 sps:$4 sm:$0xff]  }
 0x521   :  { %8500 = vmatpush1.bf16.msra.mxu0 %v12029_v43  ;;  %v12671_v43 = vld [vmem:[#allocation11 + $0x140] ss:$16 sps:$4 sm:$0xff]  }
 0x522   :  { %8664 = vmatpush1.bf16.msra.mxu1 %v12031_v41  ;;  %8501 = vmatprep.subr.bf16.mxu0 %v12038_v49  ;;  %v12674_v41 = vld [vmem:[#allocation11 + $0x148] ss:$16 sps:$4 sm:$0xff]   ;;  %v12679_v49 = vld [vmem:[#allocation11 + $0x164] ss:$16 sps:$4 sm:$0xff]  }
 0x523   :  { %8665 = vmatprep.subr.bf16.mxu1 %v12040_v50  ;;  %v12682_v50 = vld [vmem:[#allocation11 + $0x16c] ss:$16 sps:$4 sm:$0xff]  }
 0x525   :  { %8502 = vmatpush1.bf16.msra.mxu0 %v12037_v6  ;;  %v12680_v6 = vld [vmem:[#allocation11 + $0x168] ss:$16 sps:$4 sm:$0xff]  }
 0x526   :  { %8666 = vmatpush1.bf16.msra.mxu1 %v12039_v32  ;;  %10242 = vmatprep.subr.bf16.mxu0 %v12613_v37  ;;  %v12685_v32 = vld [vmem:[#allocation11 + $0x184] ss:$16 sps:$4 sm:$0xff]   ;;  %v12688_v37 = vld [vmem:[#allocation11 + $0x18c] ss:$16 sps:$4 sm:$0xff]  }
 0x527   :  { %10406 = vmatprep.subr.bf16.mxu1 %v12616_v52  ;;  %v12683_v52 = vld [vmem:[#allocation11 + $0x180] ss:$16 sps:$4 sm:$0xff]  }
 0x528   :  { %8504 = vmatmul.mubr.bf16.vlgmr.msra.gmra.mrb[44].mxu0 %v13657_v47 }
 0x529   :  { %8668 = vmatmul.mubr.bf16.vlgmr.msra.gmra.mrb[44].mxu1 %v13657_v47  ;;  %10243 = vmatpush1.bf16.msra.mxu0 %v12611_v56  ;;  %v12629_v47 = vld [vmem:[#allocation11 + $0x60] ss:$16 sps:$4 sm:$0xff]   ;;  %v12691_v56 = vld [vmem:[#allocation11 + $0x1a4] ss:$16 sps:$4 sm:$0xff]  }
 0x52a   :  { %10274 = vmatprep.mubr.bf16.mxu0 %v8677_v13  ;;  %10407 = vmatpush1.bf16.msra.mxu1 %v12614_v55  ;;  %v12694_v55 = vld [vmem:[#allocation11 + $0x1ac] ss:$16 sps:$4 sm:$0xff]  }
 0x52b   :  { %10438 = vmatprep.mubr.bf16.mxu1 %v8677_v13  ;;  %10244 = vmatprep.subr.bf16.mxu0 %v12619_v57  ;;  %v12689_v57 = vld [vmem:[#allocation11 + $0x1a0] ss:$16 sps:$4 sm:$0xff]   ;;  %v12692_v13 = vld [vmem:[#allocation11 + $0x1a8] ss:$16 sps:$4 sm:$0xff]  }
 0x52c   :  { %10408 = vmatprep.subr.bf16.mxu1 %v12622_v39  ;;  %v12697_v39 = vld [vmem:[#allocation11 + $0x1c4] ss:$16 sps:$4 sm:$0xff]  }
 0x52d   :  { %10245 = vmatpush1.bf16.msra.mxu0 %v12617_v61  ;;  %v12700_v61 = vld [vmem:[#allocation11 + $0x1cc] ss:$16 sps:$4 sm:$0xff]  }
 0x52e   :  { %10409 = vmatpush1.bf16.msra.mxu1 %v12620_v40  ;;  %10246 = vmatprep.subr.bf16.mxu0 %v12625_v1  ;;  %v12695_v40 = vld [vmem:[#allocation11 + $0x1c0] ss:$16 sps:$4 sm:$0xff]   ;;  %v5423_v1 = vrot.slane %v13683_v46, %v13579_v5 }
 0x52f   :  { %10410 = vmatprep.subr.bf16.mxu1 %v12628_v19  ;;  %v12698_v19 = vld [vmem:[#allocation11 + $0x1c8] ss:$16 sps:$4 sm:$0xff]  }
 0x531   :  { %10247 = vmatpush1.bf16.msra.mxu0 %v12623_v2  ;;  %v12703_v2 = vld [vmem:[#allocation11 + $0x1e4] ss:$16 sps:$4 sm:$0xff]  }
 0x532   :  { %10411 = vmatpush1.bf16.msra.mxu1 %v12626_v15  ;;  %10248 = vmatprep.subr.bf16.mxu0 %v12631_v3  ;;  %v12706_v15 = vld [vmem:[#allocation11 + $0x1ec] ss:$16 sps:$4 sm:$0xff]   ;;  %v5435_v3 = vrot.slane %v13683_v46, %v13582_v4 }
 0x533   :  { %10412 = vmatprep.subr.bf16.mxu1 %v12634_v7  ;;  %v12701_v7 = vld [vmem:[#allocation11 + $0x1e0] ss:$16 sps:$4 sm:$0xff]  }
 0x535   :  { %10249 = vmatpush1.bf16.msra.mxu0 %v12629_v47  ;;  %v12509_v47 = vadd.f32 %v13675_v16, %v5423_v1  ;;  %v12713_v16 = vld [vmem:[#allocation11 + $0x220] ss:$16 sps:$4 sm:$0xff]  }
 0x536   :  { %10413 = vmatpush1.bf16.msra.mxu1 %v12632_v10  ;;  %10250 = vmatprep.subr.bf16.mxu0 %v12637_v18  ;;  %v12704_v10 = vld [vmem:[#allocation11 + $0x1e8] ss:$16 sps:$4 sm:$0xff]   ;;  %v12709_v18 = vld [vmem:[#allocation11 + $0x204] ss:$16 sps:$4 sm:$0xff]   ;;  %v12767_v1 = vld [vmem:[#allocation11 + $0x340] ss:$16 sps:$4 sm:$0xff]  }
 0x537   :  { %10414 = vmatprep.subr.bf16.mxu1 %v12640_v14  ;;  %v12712_v14 = vld [vmem:[#allocation11 + $0x20c] ss:$16 sps:$4 sm:$0xff]  }
 0x539   :  { %10251 = vmatpush1.bf16.msra.mxu0 %v12635_v33  ;;  %v12512_v33 = vadd.f32 %v13681_v21, %v5435_v3  ;;  %v12724_v21 = vld [vmem:[#allocation11 + $0x24c] ss:$16 sps:$4 sm:$0xff]   ;;  %v12773_v3 = vld [vmem:[#allocation11 + $0x360] ss:$16 sps:$4 sm:$0xff]  }
 0x53a   :  { %10415 = vmatpush1.bf16.msra.mxu1 %v12638_v27  ;;  %10252 = vmatprep.subr.bf16.mxu0 %v12643_v29  ;;  %v12707_v27 = vld [vmem:[#allocation11 + $0x200] ss:$16 sps:$4 sm:$0xff]   ;;  %v8676_v29 = vpack.c.bf16 %v12509_v47, %v12509_v47  ;;  %v12781_v47 = vld [vmem:[#allocation11 + $0x384] ss:$16 sps:$4 sm:$0xff]  }
 0x53b   :  { %10416 = vmatprep.subr.bf16.mxu1 %v12646_v17  ;;  %v12710_v17 = vld [vmem:[#allocation11 + $0x208] ss:$16 sps:$4 sm:$0xff]  }
 0x53d   :  { %10253 = vmatpush1.bf16.msra.mxu0 %v12641_v20  ;;  %v12715_v20 = vld [vmem:[#allocation11 + $0x224] ss:$16 sps:$4 sm:$0xff]  }
 0x53e   :  { %10417 = vmatpush1.bf16.msra.mxu1 %v12644_v8  ;;  %10254 = vmatprep.subr.bf16.mxu0 %v12649_v22  ;;  %v8679_v8 = vpack.c.bf16 %v12512_v33, %v12512_v33  ;;  %v12718_v22 = vld [vmem:[#allocation11 + $0x22c] ss:$16 sps:$4 sm:$0xff]   ;;  %v12787_v33 = vld [vmem:[#allocation11 + $0x3a4] ss:$16 sps:$4 sm:$0xff]  }
 0x53f   :  { %10418 = vmatprep.subr.bf16.mxu1 %v12652_v44  ;;  %v12716_v44 = vld [vmem:[#allocation11 + $0x228] ss:$16 sps:$4 sm:$0xff]  }
 0x541   :  { %10255 = vmatpush1.bf16.msra.mxu0 %v12647_v53  ;;  %v12721_v53 = vld [vmem:[#allocation11 + $0x244] ss:$16 sps:$4 sm:$0xff]  }
 0x542   :  { %10419 = vmatpush1.bf16.msra.mxu1 %v12650_v24  ;;  %10256 = vmatprep.subr.bf16.mxu0 %v12655_v12  ;;  %v12719_v24 = vld [vmem:[#allocation11 + $0x240] ss:$16 sps:$4 sm:$0xff]   ;;  %v12722_v12 = vld [vmem:[#allocation11 + $0x248] ss:$16 sps:$4 sm:$0xff]  }
 0x543   :  { %10420 = vmatprep.subr.bf16.mxu1 %v12658_v25  ;;  %v12727_v25 = vld [vmem:[#allocation11 + $0x264] ss:$16 sps:$4 sm:$0xff]  }
 0x545   :  { %10257 = vmatpush1.bf16.msra.mxu0 %v12653_v48  ;;  %v12730_v48 = vld [vmem:[#allocation11 + $0x26c] ss:$16 sps:$4 sm:$0xff]  }
 0x546   :  { %10421 = vmatpush1.bf16.msra.mxu1 %v12656_v26  ;;  %10258 = vmatprep.subr.bf16.mxu0 %v12661_v34  ;;  %v12725_v26 = vld [vmem:[#allocation11 + $0x260] ss:$16 sps:$4 sm:$0xff]   ;;  %v12728_v34 = vld [vmem:[#allocation11 + $0x268] ss:$16 sps:$4 sm:$0xff]  }
 0x547   :  { %10422 = vmatprep.subr.bf16.mxu1 %v12664_v35  ;;  %v12733_v35 = vld [vmem:[#allocation11 + $0x284] ss:$16 sps:$4 sm:$0xff]  }
 0x549   :  { %10259 = vmatpush1.bf16.msra.mxu0 %v12659_v0  ;;  %v12736_v0 = vld [vmem:[#allocation11 + $0x28c] ss:$16 sps:$4 sm:$0xff]  }
 0x54a   :  { %10423 = vmatpush1.bf16.msra.mxu1 %v12662_v36  ;;  %10260 = vmatprep.subr.bf16.mxu0 %v12667_v45  ;;  %v12731_v36 = vld [vmem:[#allocation11 + $0x280] ss:$16 sps:$4 sm:$0xff]   ;;  %v12734_v45 = vld [vmem:[#allocation11 + $0x288] ss:$16 sps:$4 sm:$0xff]  }
 0x54b   :  { %10424 = vmatprep.subr.bf16.mxu1 %v12670_v38  ;;  %v12739_v38 = vld [vmem:[#allocation11 + $0x2a4] ss:$16 sps:$4 sm:$0xff]  }
 0x54d   :  { %10261 = vmatpush1.bf16.msra.mxu0 %v12665_v63  ;;  %v12742_v63 = vld [vmem:[#allocation11 + $0x2ac] ss:$16 sps:$4 sm:$0xff]  }
 0x54e   :  { %10425 = vmatpush1.bf16.msra.mxu1 %v12668_v42  ;;  %10262 = vmatprep.subr.bf16.mxu0 %v12673_v31  ;;  %v12737_v42 = vld [vmem:[#allocation11 + $0x2a0] ss:$16 sps:$4 sm:$0xff]   ;;  %v12740_v31 = vld [vmem:[#allocation11 + $0x2a8] ss:$16 sps:$4 sm:$0xff]  }
 0x54f   :  { %10426 = vmatprep.subr.bf16.mxu1 %v12676_v60  ;;  %v12745_v60 = vld [vmem:[#allocation11 + $0x2c4] ss:$16 sps:$4 sm:$0xff]  }
 0x551   :  { %10263 = vmatpush1.bf16.msra.mxu0 %v12671_v43  ;;  %v12748_v43 = vld [vmem:[#allocation11 + $0x2cc] ss:$16 sps:$4 sm:$0xff]  }
 0x552   :  { %10427 = vmatpush1.bf16.msra.mxu1 %v12674_v41  ;;  %10264 = vmatprep.subr.bf16.mxu0 %v12679_v49  ;;  %v12743_v41 = vld [vmem:[#allocation11 + $0x2c0] ss:$16 sps:$4 sm:$0xff]   ;;  %v12746_v49 = vld [vmem:[#allocation11 + $0x2c8] ss:$16 sps:$4 sm:$0xff]  }
 0x553   :  { %10428 = vmatprep.subr.bf16.mxu1 %v12682_v50  ;;  %v12751_v50 = vld [vmem:[#allocation11 + $0x2e4] ss:$16 sps:$4 sm:$0xff]  }
 0x555   :  { %10265 = vmatpush1.bf16.msra.mxu0 %v12677_v51  ;;  %v12754_v51 = vld [vmem:[#allocation11 + $0x2ec] ss:$16 sps:$4 sm:$0xff]  }
 0x556   :  { %10429 = vmatpush1.bf16.msra.mxu1 %v12680_v6  ;;  %10266 = vmatprep.subr.bf16.mxu0 %v12685_v32  ;;  %v12749_v6 = vld [vmem:[#allocation11 + $0x2e0] ss:$16 sps:$4 sm:$0xff]   ;;  %v12752_v32 = vld [vmem:[#allocation11 + $0x2e8] ss:$16 sps:$4 sm:$0xff]  }
 0x557   :  { %10430 = vmatprep.subr.bf16.mxu1 %v12688_v37  ;;  %v12757_v37 = vld [vmem:[#allocation11 + $0x304] ss:$16 sps:$4 sm:$0xff]  }
 0x559   :  { %10267 = vmatpush1.bf16.msra.mxu0 %v12683_v52  ;;  %v12760_v52 = vld [vmem:[#allocation11 + $0x30c] ss:$16 sps:$4 sm:$0xff]  }
 0x55a   :  { %10431 = vmatpush1.bf16.msra.mxu1 %v12686_v62  ;;  %10268 = vmatprep.subr.bf16.mxu0 %v12691_v56  ;;  %v12755_v62 = vld [vmem:[#allocation11 + $0x300] ss:$16 sps:$4 sm:$0xff]   ;;  %v12758_v56 = vld [vmem:[#allocation11 + $0x308] ss:$16 sps:$4 sm:$0xff]  }
 0x55b   :  { %10432 = vmatprep.subr.bf16.mxu1 %v12694_v55  ;;  %v12763_v55 = vld [vmem:[#allocation11 + $0x324] ss:$16 sps:$4 sm:$0xff]  }
 0x55d   :  { %10269 = vmatpush1.bf16.msra.mxu0 %v12689_v57  ;;  %v12766_v57 = vld [vmem:[#allocation11 + $0x32c] ss:$16 sps:$4 sm:$0xff]  }
 0x55e   :  { %10433 = vmatpush1.bf16.msra.mxu1 %v12692_v13  ;;  %10270 = vmatprep.subr.bf16.mxu0 %v12697_v39  ;;  %v12761_v13 = vld [vmem:[#allocation11 + $0x320] ss:$16 sps:$4 sm:$0xff]   ;;  %v12764_v39 = vld [vmem:[#allocation11 + $0x328] ss:$16 sps:$4 sm:$0xff]  }
 0x55f   :  { %10434 = vmatprep.subr.bf16.mxu1 %v12700_v61  ;;  %v12769_v61 = vld [vmem:[#allocation11 + $0x344] ss:$16 sps:$4 sm:$0xff]  }
 0x561   :  { %10271 = vmatpush1.bf16.msra.mxu0 %v12695_v40  ;;  %v12772_v40 = vld [vmem:[#allocation11 + $0x34c] ss:$16 sps:$4 sm:$0xff]  }
 0x562   :  { %10435 = vmatpush1.bf16.msra.mxu1 %v12698_v19  ;;  %10272 = vmatprep.subr.bf16.mxu0 %v12703_v2  ;;  %v12770_v19 = vld [vmem:[#allocation11 + $0x348] ss:$16 sps:$4 sm:$0xff]   ;;  %v12775_v2 = vld [vmem:[#allocation11 + $0x364] ss:$16 sps:$4 sm:$0xff]  }
 0x563   :  { %10436 = vmatprep.subr.bf16.mxu1 %v12706_v15  ;;  %v12778_v15 = vld [vmem:[#allocation11 + $0x36c] ss:$16 sps:$4 sm:$0xff]  }
 0x565   :  { %10273 = vmatpush1.bf16.msra.mxu0 %v12701_v7  ;;  %v12776_v7 = vld [vmem:[#allocation11 + $0x368] ss:$16 sps:$4 sm:$0xff]  }
 0x566   :  { %10437 = vmatpush1.bf16.msra.mxu1 %v12704_v10  ;;  %10283 = vmatprep.subr.bf16.mxu0 %v12709_v18  ;;  %v12784_v10 = vld [vmem:[#allocation11 + $0x38c] ss:$16 sps:$4 sm:$0xff]   ;;  %v12779_v18 = vld [vmem:[#allocation11 + $0x380] ss:$16 sps:$4 sm:$0xff]  }
 0x567   :  { %10447 = vmatprep.subr.bf16.mxu1 %v12712_v14  ;;  %v12782_v14 = vld [vmem:[#allocation11 + $0x388] ss:$16 sps:$4 sm:$0xff]  }
 0x568   :  { %10275 = vmatmul.mubr.bf16.vlgmr.msra.gmra.mrb[48].mxu0 %v8676_v29 }
 0x569   :  { %10439 = vmatmul.mubr.bf16.vlgmr.msra.gmra.mrb[48].mxu1 %v8676_v29  ;;  %10284 = vmatpush1.bf16.msra.mxu0 %v12707_v27  ;;  %v12790_v27 = vld [vmem:[#allocation11 + $0x3ac] ss:$16 sps:$4 sm:$0xff]   ;;  %v12785_v29 = vld [vmem:[#allocation11 + $0x3a0] ss:$16 sps:$4 sm:$0xff]  }
 0x56a   :  { %10315 = vmatprep.mubr.bf16.mxu0 %v8679_v8  ;;  %10448 = vmatpush1.bf16.msra.mxu1 %v12710_v17  ;;  %v12788_v17 = vld [vmem:[#allocation11 + $0x3a8] ss:$16 sps:$4 sm:$0xff]  }
 0x56b   :  { %10479 = vmatprep.mubr.bf16.mxu1 %v8679_v8  ;;  %10285 = vmatprep.subr.bf16.mxu0 %v12715_v20  ;;  %v12793_v20 = vld [vmem:[#allocation11 + $0x3c4] ss:$16 sps:$4 sm:$0xff]   ;;  %v12796_v8 = vld [vmem:[#allocation11 + $0x3cc] ss:$16 sps:$4 sm:$0xff]  }
 0x56c   :  { %10449 = vmatprep.subr.bf16.mxu1 %v12718_v22  ;;  %v12791_v22 = vld [vmem:[#allocation11 + $0x3c0] ss:$16 sps:$4 sm:$0xff]  }
 0x56d   :  { %10286 = vmatpush1.bf16.msra.mxu0 %v12713_v16  ;;  %v5431_v16 = vrot.slane %v13683_v46, %v13605_v58 }
 0x56e   :  { %10450 = vmatpush1.bf16.msra.mxu1 %v12716_v44  ;;  %10287 = vmatprep.subr.bf16.mxu0 %v12721_v53  ;;  %v12794_v44 = vld [vmem:[#allocation11 + $0x3c8] ss:$16 sps:$4 sm:$0xff]   ;;  %v12799_v53 = vld [vmem:[#allocation11 + $0x3e4] ss:$16 sps:$4 sm:$0xff]  }
 0x56f   :  { %10451 = vmatprep.subr.bf16.mxu1 %v12724_v21  ;;  %v12802_v21 = vld [vmem:[#allocation11 + $0x3ec] ss:$16 sps:$4 sm:$0xff]  }
 0x571   :  { %10288 = vmatpush1.bf16.msra.mxu0 %v12719_v24  ;;  %v12797_v24 = vld [vmem:[#allocation11 + $0x3e0] ss:$16 sps:$4 sm:$0xff]  }
 0x572   :  { %10452 = vmatpush1.bf16.msra.mxu1 %v12722_v12  ;;  %10289 = vmatprep.subr.bf16.mxu0 %v12727_v25  ;;  %v12511_v12 = vadd.f32 %v13677_v30, %v5431_v16  ;;  %v12800_v25 = vld [vmem:[#allocation11 + $0x3e8] ss:$16 sps:$4 sm:$0xff]   ;;  %v12869_v16 = vld [vmem:[#allocation11 + $0x560] ss:$16 sps:$4 sm:$0xff]  }
 0x573   :  { %10453 = vmatprep.subr.bf16.mxu1 %v12730_v48  ;;  %v12805_v48 = vld [vmem:[#allocation11 + $0x404] ss:$16 sps:$4 sm:$0xff]   ;;  %v12812_v30 = vld [vmem:[#allocation11 + $0x428] ss:$16 sps:$4 sm:$0xff]  }
 0x575   :  { %10290 = vmatpush1.bf16.msra.mxu0 %v12725_v26  ;;  %v12808_v26 = vld [vmem:[#allocation11 + $0x40c] ss:$16 sps:$4 sm:$0xff]  }
 0x576   :  { %10454 = vmatpush1.bf16.msra.mxu1 %v12728_v34  ;;  %10291 = vmatprep.subr.bf16.mxu0 %v12733_v35  ;;  %v12803_v34 = vld [vmem:[#allocation11 + $0x400] ss:$16 sps:$4 sm:$0xff]   ;;  %v8678_v35 = vpack.c.bf16 %v12511_v12, %v12511_v12  ;;  %v12878_v12 = vld [vmem:[#allocation11 + $0x588] ss:$16 sps:$4 sm:$0xff]  }
 0x577   :  { %10455 = vmatprep.subr.bf16.mxu1 %v12736_v0  ;;  %v12806_v0 = vld [vmem:[#allocation11 + $0x408] ss:$16 sps:$4 sm:$0xff]  }
 0x579   :  { %10292 = vmatpush1.bf16.msra.mxu0 %v12731_v36  ;;  %v12811_v36 = vld [vmem:[#allocation11 + $0x424] ss:$16 sps:$4 sm:$0xff]  }
 0x57a   :  { %10456 = vmatpush1.bf16.msra.mxu1 %v12734_v45  ;;  %10293 = vmatprep.subr.bf16.mxu0 %v12739_v38  ;;  %v12814_v45 = vld [vmem:[#allocation11 + $0x42c] ss:$16 sps:$4 sm:$0xff]   ;;  %v12809_v38 = vld [vmem:[#allocation11 + $0x420] ss:$16 sps:$4 sm:$0xff]  }
 0x57b   :  { %10457 = vmatprep.subr.bf16.mxu1 %v12742_v63  ;;  %v12817_v63 = vld [vmem:[#allocation11 + $0x444] ss:$16 sps:$4 sm:$0xff]  }
 0x57d   :  { %10294 = vmatpush1.bf16.msra.mxu0 %v12737_v42  ;;  %v12820_v42 = vld [vmem:[#allocation11 + $0x44c] ss:$16 sps:$4 sm:$0xff]  }
 0x57e   :  { %10458 = vmatpush1.bf16.msra.mxu1 %v12740_v31  ;;  %10295 = vmatprep.subr.bf16.mxu0 %v12745_v60  ;;  %v12815_v31 = vld [vmem:[#allocation11 + $0x440] ss:$16 sps:$4 sm:$0xff]   ;;  %v12818_v60 = vld [vmem:[#allocation11 + $0x448] ss:$16 sps:$4 sm:$0xff]  }
 0x57f   :  { %10459 = vmatprep.subr.bf16.mxu1 %v12748_v43  ;;  %v12823_v43 = vld [vmem:[#allocation11 + $0x464] ss:$16 sps:$4 sm:$0xff]  }
 0x581   :  { %10296 = vmatpush1.bf16.msra.mxu0 %v12743_v41  ;;  %v12826_v41 = vld [vmem:[#allocation11 + $0x46c] ss:$16 sps:$4 sm:$0xff]  }
 0x582   :  { %10460 = vmatpush1.bf16.msra.mxu1 %v12746_v49  ;;  %10297 = vmatprep.subr.bf16.mxu0 %v12751_v50  ;;  %v12821_v49 = vld [vmem:[#allocation11 + $0x460] ss:$16 sps:$4 sm:$0xff]   ;;  %v12824_v50 = vld [vmem:[#allocation11 + $0x468] ss:$16 sps:$4 sm:$0xff]  }
 0x583   :  { %10461 = vmatprep.subr.bf16.mxu1 %v12754_v51  ;;  %v12829_v51 = vld [vmem:[#allocation11 + $0x484] ss:$16 sps:$4 sm:$0xff]  }
 0x585   :  { %10298 = vmatpush1.bf16.msra.mxu0 %v12749_v6  ;;  %v12832_v6 = vld [vmem:[#allocation11 + $0x48c] ss:$16 sps:$4 sm:$0xff]  }
 0x586   :  { %10462 = vmatpush1.bf16.msra.mxu1 %v12752_v32  ;;  %10299 = vmatprep.subr.bf16.mxu0 %v12757_v37  ;;  %v12827_v32 = vld [vmem:[#allocation11 + $0x480] ss:$16 sps:$4 sm:$0xff]   ;;  %v12830_v37 = vld [vmem:[#allocation11 + $0x488] ss:$16 sps:$4 sm:$0xff]  }
 0x587   :  { %10463 = vmatprep.subr.bf16.mxu1 %v12760_v52  ;;  %v12835_v52 = vld [vmem:[#allocation11 + $0x4a4] ss:$16 sps:$4 sm:$0xff]  }
 0x589   :  { %10300 = vmatpush1.bf16.msra.mxu0 %v12755_v62  ;;  %v12838_v62 = vld [vmem:[#allocation11 + $0x4ac] ss:$16 sps:$4 sm:$0xff]  }
 0x58a   :  { %10464 = vmatpush1.bf16.msra.mxu1 %v12758_v56  ;;  %10301 = vmatprep.subr.bf16.mxu0 %v12763_v55  ;;  %v12833_v56 = vld [vmem:[#allocation11 + $0x4a0] ss:$16 sps:$4 sm:$0xff]   ;;  %v12836_v55 = vld [vmem:[#allocation11 + $0x4a8] ss:$16 sps:$4 sm:$0xff]  }
 0x58b   :  { %10465 = vmatprep.subr.bf16.mxu1 %v12766_v57  ;;  %v12841_v57 = vld [vmem:[#allocation11 + $0x4c4] ss:$16 sps:$4 sm:$0xff]  }
 0x58d   :  { %10302 = vmatpush1.bf16.msra.mxu0 %v12761_v13  ;;  %v12844_v13 = vld [vmem:[#allocation11 + $0x4cc] ss:$16 sps:$4 sm:$0xff]  }
 0x58e   :  { %10466 = vmatpush1.bf16.msra.mxu1 %v12764_v39  ;;  %10303 = vmatprep.subr.bf16.mxu0 %v12769_v61  ;;  %v12839_v39 = vld [vmem:[#allocation11 + $0x4c0] ss:$16 sps:$4 sm:$0xff]   ;;  %v12842_v61 = vld [vmem:[#allocation11 + $0x4c8] ss:$16 sps:$4 sm:$0xff]  }
 0x58f   :  { %10467 = vmatprep.subr.bf16.mxu1 %v12772_v40  ;;  %v12847_v40 = vld [vmem:[#allocation11 + $0x4e4] ss:$16 sps:$4 sm:$0xff]  }
 0x591   :  { %10304 = vmatpush1.bf16.msra.mxu0 %v12767_v1  ;;  %v12850_v1 = vld [vmem:[#allocation11 + $0x4ec] ss:$16 sps:$4 sm:$0xff]  }
 0x592   :  { %10468 = vmatpush1.bf16.msra.mxu1 %v12770_v19  ;;  %10305 = vmatprep.subr.bf16.mxu0 %v12775_v2  ;;  %v12845_v19 = vld [vmem:[#allocation11 + $0x4e0] ss:$16 sps:$4 sm:$0xff]   ;;  %v12848_v2 = vld [vmem:[#allocation11 + $0x4e8] ss:$16 sps:$4 sm:$0xff]  }
 0x593   :  { %10469 = vmatprep.subr.bf16.mxu1 %v12778_v15  ;;  %v12853_v15 = vld [vmem:[#allocation11 + $0x504] ss:$16 sps:$4 sm:$0xff]  }
 0x595   :  { %10306 = vmatpush1.bf16.msra.mxu0 %v12773_v3  ;;  %v12856_v3 = vld [vmem:[#allocation11 + $0x50c] ss:$16 sps:$4 sm:$0xff]  }
 0x596   :  { %10470 = vmatpush1.bf16.msra.mxu1 %v12776_v7  ;;  %10307 = vmatprep.subr.bf16.mxu0 %v12781_v47  ;;  %v12851_v7 = vld [vmem:[#allocation11 + $0x500] ss:$16 sps:$4 sm:$0xff]   ;;  %v12854_v47 = vld [vmem:[#allocation11 + $0x508] ss:$16 sps:$4 sm:$0xff]  }
 0x597   :  { %10471 = vmatprep.subr.bf16.mxu1 %v12784_v10  ;;  %v12859_v10 = vld [vmem:[#allocation11 + $0x524] ss:$16 sps:$4 sm:$0xff]  }
 0x599   :  { %10308 = vmatpush1.bf16.msra.mxu0 %v12779_v18  ;;  %v12862_v18 = vld [vmem:[#allocation11 + $0x52c] ss:$16 sps:$4 sm:$0xff]  }
 0x59a   :  { %10472 = vmatpush1.bf16.msra.mxu1 %v12782_v14  ;;  %10309 = vmatprep.subr.bf16.mxu0 %v12787_v33  ;;  %v12857_v14 = vld [vmem:[#allocation11 + $0x520] ss:$16 sps:$4 sm:$0xff]   ;;  %v12860_v33 = vld [vmem:[#allocation11 + $0x528] ss:$16 sps:$4 sm:$0xff]  }
 0x59b   :  { %10473 = vmatprep.subr.bf16.mxu1 %v12790_v27  ;;  %v12865_v27 = vld [vmem:[#allocation11 + $0x544] ss:$16 sps:$4 sm:$0xff]  }
 0x59d   :  { %10310 = vmatpush1.bf16.msra.mxu0 %v12785_v29  ;;  %v12868_v29 = vld [vmem:[#allocation11 + $0x54c] ss:$16 sps:$4 sm:$0xff]  }
 0x59e   :  { %10474 = vmatpush1.bf16.msra.mxu1 %v12788_v17  ;;  %10311 = vmatprep.subr.bf16.mxu0 %v12793_v20  ;;  %v12863_v17 = vld [vmem:[#allocation11 + $0x540] ss:$16 sps:$4 sm:$0xff]   ;;  %v12866_v20 = vld [vmem:[#allocation11 + $0x548] ss:$16 sps:$4 sm:$0xff]  }
 0x59f   :  { %10475 = vmatprep.subr.bf16.mxu1 %v12796_v8  ;;  %v12871_v8 = vld [vmem:[#allocation11 + $0x564] ss:$16 sps:$4 sm:$0xff]  }
 0x5a1   :  { %10312 = vmatpush1.bf16.msra.mxu0 %v12791_v22  ;;  %v12874_v22 = vld [vmem:[#allocation11 + $0x56c] ss:$16 sps:$4 sm:$0xff]  }
 0x5a2   :  { %10476 = vmatpush1.bf16.msra.mxu1 %v12794_v44  ;;  %10313 = vmatprep.subr.bf16.mxu0 %v12799_v53  ;;  %v12872_v44 = vld [vmem:[#allocation11 + $0x568] ss:$16 sps:$4 sm:$0xff]   ;;  %v12877_v53 = vld [vmem:[#allocation11 + $0x584] ss:$16 sps:$4 sm:$0xff]  }
 0x5a3   :  { %10477 = vmatprep.subr.bf16.mxu1 %v12802_v21  ;;  %v12880_v21 = vld [vmem:[#allocation11 + $0x58c] ss:$16 sps:$4 sm:$0xff]  }
 0x5a5   :  { %10314 = vmatpush1.bf16.msra.mxu0 %v12797_v24  ;;  %v12875_v24 = vld [vmem:[#allocation11 + $0x580] ss:$16 sps:$4 sm:$0xff]  }
 0x5a6   :  { %10478 = vmatpush1.bf16.msra.mxu1 %v12800_v25  ;;  %10324 = vmatprep.subr.bf16.mxu0 %v12805_v48  ;;  %v12883_v25 = vld [vmem:[#allocation11 + $0x5a4] ss:$16 sps:$4 sm:$0xff]   ;;  %v12886_v48 = vld [vmem:[#allocation11 + $0x5ac] ss:$16 sps:$4 sm:$0xff]  }
 0x5a7   :  { %10488 = vmatprep.subr.bf16.mxu1 %v12808_v26  ;;  %v12881_v26 = vld [vmem:[#allocation11 + $0x5a0] ss:$16 sps:$4 sm:$0xff]  }
 0x5a8   :  { %10316 = vmatmul.mubr.bf16.vlgmr.msra.gmra.mrb[48].mxu0 %v8678_v35 }
 0x5a9   :  { %10480 = vmatmul.mubr.bf16.vlgmr.msra.gmra.mrb[48].mxu1 %v8678_v35  ;;  %10325 = vmatpush1.bf16.msra.mxu0 %v12803_v34  ;;  %v12884_v34 = vld [vmem:[#allocation11 + $0x5a8] ss:$16 sps:$4 sm:$0xff]   ;;  %v12889_v35 = vld [vmem:[#allocation11 + $0x5c4] ss:$16 sps:$4 sm:$0xff]  }
 0x5aa   :  { %10489 = vmatpush1.bf16.msra.mxu1 %v12806_v0  ;;  %10326 = vmatprep.subr.bf16.mxu0 %v12811_v36  ;;  %v12892_v0 = vld [vmem:[#allocation11 + $0x5cc] ss:$16 sps:$4 sm:$0xff]   ;;  %v12887_v36 = vld [vmem:[#allocation11 + $0x5c0] ss:$16 sps:$4 sm:$0xff]  }
 0x5ab   :  { %10490 = vmatprep.subr.bf16.mxu1 %v12814_v45  ;;  %v12890_v45 = vld [vmem:[#allocation11 + $0x5c8] ss:$16 sps:$4 sm:$0xff]  }
 0x5ad   :  { %10327 = vmatpush1.bf16.msra.mxu0 %v12809_v38  ;;  %v12895_v38 = vld [vmem:[#allocation11 + $0x5e4] ss:$16 sps:$4 sm:$0xff]  }
 0x5ae   :  { %10491 = vmatpush1.bf16.msra.mxu1 %v12812_v30  ;;  %10328 = vmatprep.subr.bf16.mxu0 %v12817_v63  ;;  %v12898_v30 = vld [vmem:[#allocation11 + $0x5ec] ss:$16 sps:$4 sm:$0xff]   ;;  %v12893_v63 = vld [vmem:[#allocation11 + $0x5e0] ss:$16 sps:$4 sm:$0xff]  }
 0x5af   :  { %10492 = vmatprep.subr.bf16.mxu1 %v12820_v42  ;;  %v12896_v42 = vld [vmem:[#allocation11 + $0x5e8] ss:$16 sps:$4 sm:$0xff]  }
 0x5b1   :  { %10329 = vmatpush1.bf16.msra.mxu0 %v12815_v31  ;;  %v12901_v31 = vld [vmem:[#allocation11 + $0x604] ss:$16 sps:$4 sm:$0xff]  }
 0x5b2   :  { %10493 = vmatpush1.bf16.msra.mxu1 %v12818_v60  ;;  %10330 = vmatprep.subr.bf16.mxu0 %v12823_v43  ;;  %v12904_v60 = vld [vmem:[#allocation11 + $0x60c] ss:$16 sps:$4 sm:$0xff]   ;;  %v5439_v43 = vrot.slane %v13683_v46, %v4860_v59 }
 0x5b3   :  { %10494 = vmatprep.subr.bf16.mxu1 %v12826_v41  ;;  %v5443_v41 = vrot.slane %v13683_v46, %v4864_v9 }
 0x5b5   :  { %10331 = vmatpush1.bf16.msra.mxu0 %v12821_v49  ;;  %v5451_v49 = vrot.slane %v13683_v46, %v4872_v28  ;;  %v12910_v28 = vld [vmem:[#allocation11 + $0x62c] ss:$16 sps:$4 sm:$0xff]  }
 0x5b6   :  { %10495 = vmatpush1.bf16.msra.mxu1 %v12824_v50  ;;  %10332 = vmatprep.subr.bf16.mxu0 %v12829_v51 }
 0x5b7   :  { %10496 = vmatprep.subr.bf16.mxu1 %v12832_v6 }
 0x5b9   :  { %10333 = vmatpush1.bf16.msra.mxu0 %v12827_v32 }
 0x5ba   :  { %10497 = vmatpush1.bf16.msra.mxu1 %v12830_v37  ;;  %10334 = vmatprep.subr.bf16.mxu0 %v12835_v52 }
 0x5bb   :  { %10498 = vmatprep.subr.bf16.mxu1 %v12838_v62 }
 0x5bd   :  { %10335 = vmatpush1.bf16.msra.mxu0 %v12833_v56 }
 0x5be   :  { %10499 = vmatpush1.bf16.msra.mxu1 %v12836_v55  ;;  %10336 = vmatprep.subr.bf16.mxu0 %v12841_v57 }
 0x5bf   :  { %10500 = vmatprep.subr.bf16.mxu1 %v12844_v13 }
 0x5c1   :  { %10337 = vmatpush1.bf16.msra.mxu0 %v12839_v39  ;;  %v12899_v39 = vld [vmem:[#allocation11 + $0x600] ss:$16 sps:$4 sm:$0xff]  }
 0x5c2   :  { %10501 = vmatpush1.bf16.msra.mxu1 %v12842_v61  ;;  %10338 = vmatprep.subr.bf16.mxu0 %v12847_v40  ;;  %v12902_v61 = vld [vmem:[#allocation11 + $0x608] ss:$16 sps:$4 sm:$0xff]   ;;  %v12907_v40 = vld [vmem:[#allocation11 + $0x624] ss:$16 sps:$4 sm:$0xff]  }
 0x5c3   :  { %10502 = vmatprep.subr.bf16.mxu1 %v12850_v1  ;;  %v12905_v1 = vld [vmem:[#allocation11 + $0x620] ss:$16 sps:$4 sm:$0xff]  }
 0x5c5   :  { %10339 = vmatpush1.bf16.msra.mxu0 %v12845_v19  ;;  %v12908_v19 = vld [vmem:[#allocation11 + $0x628] ss:$16 sps:$4 sm:$0xff]  }
 0x5c6   :  { %10503 = vmatpush1.bf16.msra.mxu1 %v12848_v2  ;;  %10340 = vmatprep.subr.bf16.mxu0 %v12853_v15  ;;  %v12913_v2 = vld [vmem:[#allocation11 + $0x644] ss:$16 sps:$4 sm:$0xff]   ;;  %v12916_v15 = vld [vmem:[#allocation11 + $0x64c] ss:$16 sps:$4 sm:$0xff]  }
 0x5c7   :  { %10504 = vmatprep.subr.bf16.mxu1 %v12856_v3  ;;  %v12911_v3 = vld [vmem:[#allocation11 + $0x640] ss:$16 sps:$4 sm:$0xff]  }
 0x5c9   :  { %10341 = vmatpush1.bf16.msra.mxu0 %v12851_v7  ;;  %v12914_v7 = vld [vmem:[#allocation11 + $0x648] ss:$16 sps:$4 sm:$0xff]  }
 0x5ca   :  { %10505 = vmatpush1.bf16.msra.mxu1 %v12854_v47  ;;  %10342 = vmatprep.subr.bf16.mxu0 %v12859_v10  ;;  %v12919_v47 = vld [vmem:[#allocation11 + $0x664] ss:$16 sps:$4 sm:$0xff]   ;;  %v12922_v10 = vld [vmem:[#allocation11 + $0x66c] ss:$16 sps:$4 sm:$0xff]  }
 0x5cb   :  { %10506 = vmatprep.subr.bf16.mxu1 %v12862_v18  ;;  %v12917_v18 = vld [vmem:[#allocation11 + $0x660] ss:$16 sps:$4 sm:$0xff]  }
 0x5cd   :  { %10343 = vmatpush1.bf16.msra.mxu0 %v12857_v14  ;;  %v12920_v14 = vld [vmem:[#allocation11 + $0x668] ss:$16 sps:$4 sm:$0xff]  }
 0x5ce   :  { %10507 = vmatpush1.bf16.msra.mxu1 %v12860_v33  ;;  %10344 = vmatprep.subr.bf16.mxu0 %v12865_v27  ;;  %v12925_v33 = vld [vmem:[#allocation11 + $0x684] ss:$16 sps:$4 sm:$0xff]   ;;  %v12928_v27 = vld [vmem:[#allocation11 + $0x68c] ss:$16 sps:$4 sm:$0xff]  }
 0x5cf   :  { %10508 = vmatprep.subr.bf16.mxu1 %v12868_v29  ;;  %v12923_v29 = vld [vmem:[#allocation11 + $0x680] ss:$16 sps:$4 sm:$0xff]  }
 0x5d1   :  { %10345 = vmatpush1.bf16.msra.mxu0 %v12863_v17  ;;  %v12926_v17 = vld [vmem:[#allocation11 + $0x688] ss:$16 sps:$4 sm:$0xff]  }
 0x5d2   :  { %10509 = vmatpush1.bf16.msra.mxu1 %v12866_v20  ;;  %10346 = vmatprep.subr.bf16.mxu0 %v12871_v8  ;;  %v12931_v20 = vld [vmem:[#allocation11 + $0x6a4] ss:$16 sps:$4 sm:$0xff]   ;;  %v12934_v8 = vld [vmem:[#allocation11 + $0x6ac] ss:$16 sps:$4 sm:$0xff]  }
 0x5d3   :  { %10510 = vmatprep.subr.bf16.mxu1 %v12874_v22  ;;  %v12929_v22 = vld [vmem:[#allocation11 + $0x6a0] ss:$16 sps:$4 sm:$0xff]  }
 0x5d5   :  { %10347 = vmatpush1.bf16.msra.mxu0 %v12869_v16  ;;  %v12932_v16 = vld [vmem:[#allocation11 + $0x6a8] ss:$16 sps:$4 sm:$0xff]  }
 0x5d6   :  { %10511 = vmatpush1.bf16.msra.mxu1 %v12872_v44  ;;  %10348 = vmatprep.subr.bf16.mxu0 %v12877_v53  ;;  %v12937_v44 = vld [vmem:[#allocation11 + $0x6c4] ss:$16 sps:$4 sm:$0xff]   ;;  %v12940_v53 = vld [vmem:[#allocation11 + $0x6cc] ss:$16 sps:$4 sm:$0xff]  }
 0x5d7   :  { %10512 = vmatprep.subr.bf16.mxu1 %v12880_v21  ;;  %v12935_v21 = vld [vmem:[#allocation11 + $0x6c0] ss:$16 sps:$4 sm:$0xff]  }
 0x5d9   :  { %10349 = vmatpush1.bf16.msra.mxu0 %v12875_v24  ;;  %v12938_v24 = vld [vmem:[#allocation11 + $0x6c8] ss:$16 sps:$4 sm:$0xff]  }
 0x5da   :  { %10513 = vmatpush1.bf16.msra.mxu1 %v12878_v12  ;;  %10350 = vmatprep.subr.bf16.mxu0 %v12883_v25  ;;  %v12943_v12 = vld [vmem:[#allocation11 + $0x6e4] ss:$16 sps:$4 sm:$0xff]   ;;  %v12946_v25 = vld [vmem:[#allocation11 + $0x6ec] ss:$16 sps:$4 sm:$0xff]  }
 0x5db   :  { %10514 = vmatprep.subr.bf16.mxu1 %v12886_v48  ;;  %v12941_v48 = vld [vmem:[#allocation11 + $0x6e0] ss:$16 sps:$4 sm:$0xff]  }
 0x5dd   :  { %10351 = vmatpush1.bf16.msra.mxu0 %v12881_v26  ;;  %v12944_v26 = vld [vmem:[#allocation11 + $0x6e8] ss:$16 sps:$4 sm:$0xff]  }
 0x5de   :  { %10515 = vmatpush1.bf16.msra.mxu1 %v12884_v34  ;;  %10352 = vmatprep.subr.bf16.mxu0 %v12889_v35  ;;  %v12949_v34 = vld [vmem:[#allocation11 + $0x704] ss:$16 sps:$4 sm:$0xff]   ;;  %v12952_v35 = vld [vmem:[#allocation11 + $0x70c] ss:$16 sps:$4 sm:$0xff]  }
 0x5df   :  { %10516 = vmatprep.subr.bf16.mxu1 %v12892_v0  ;;  %v12947_v0 = vld [vmem:[#allocation11 + $0x700] ss:$16 sps:$4 sm:$0xff]  }
 0x5e1   :  { %10353 = vmatpush1.bf16.msra.mxu0 %v12887_v36  ;;  %v12950_v36 = vld [vmem:[#allocation11 + $0x708] ss:$16 sps:$4 sm:$0xff]  }
 0x5e2   :  { %10517 = vmatpush1.bf16.msra.mxu1 %v12890_v45  ;;  %10354 = vmatprep.subr.bf16.mxu0 %v12895_v38  ;;  %v12955_v45 = vld [vmem:[#allocation11 + $0x724] ss:$16 sps:$4 sm:$0xff]   ;;  %v12958_v38 = vld [vmem:[#allocation11 + $0x72c] ss:$16 sps:$4 sm:$0xff]  }
 0x5e3   :  { %10518 = vmatprep.subr.bf16.mxu1 %v12898_v30  ;;  %v12953_v30 = vld [vmem:[#allocation11 + $0x720] ss:$16 sps:$4 sm:$0xff]  }
 0x5e5   :  { %10355 = vmatpush1.bf16.msra.mxu0 %v12893_v63  ;;  %v12956_v63 = vld [vmem:[#allocation11 + $0x728] ss:$16 sps:$4 sm:$0xff]  }
 0x5e6   :  { %10519 = vmatpush1.bf16.msra.mxu1 %v12896_v42  ;;  %10365 = vmatprep.subr.bf16.mxu0 %v12901_v31  ;;  %v12961_v42 = vld [vmem:[#allocation11 + $0x744] ss:$16 sps:$4 sm:$0xff]   ;;  %v12964_v31 = vld [vmem:[#allocation11 + $0x74c] ss:$16 sps:$4 sm:$0xff]  }
 0x5e7   :  { %10529 = vmatprep.subr.bf16.mxu1 %v12904_v60  ;;  %v12959_v60 = vld [vmem:[#allocation11 + $0x740] ss:$16 sps:$4 sm:$0xff]  }
 0x5fb   :  { %v8505_v50 = vpop.f32.mrb[44].mxu0 }
 0x5fc   :  { %v12513_v51 = vadd.f32 %v8505_v50, %v5439_v43  ;;  %v13708_v6 = vpop.f32.mrb[44].mxu1  ;;  %v8507_v32 = vpop.f32.mrb[45].mxu0  ;;  %v12962_v43 = vld [vmem:[#allocation11 + $0x748] ss:$16 sps:$4 sm:$0xff]   ;;  %v12965_v50 = vld [vmem:[#allocation11 + $0x760] ss:$16 sps:$4 sm:$0xff]  }
 0x5fd   :  { %v12514_v37 = vadd.f32 %v8507_v32, %v5443_v41  ;;  %v8671_v52 = vpop.f32.mrb[45].mxu1  ;;  %v8509_v62 = vpop.f32.mrb[46].mxu0  ;;  %v12967_v41 = vld [vmem:[#allocation11 + $0x764] ss:$16 sps:$4 sm:$0xff]  }
 0x5fe   :  { %v12516_v56 = vadd.f32 %v8671_v52, %v5451_v49  ;;  %v8673_v55 = vpop.f32.mrb[46].mxu1  ;;  %v8510_v57 = vpop.f32.mrb[47].mxu0  ;;  %v8680_v9 = vpack.c.bf16 %v12513_v51, %v12513_v51  ;;  %v12970_v49 = vld [vmem:[#allocation11 + $0x76c] ss:$16 sps:$4 sm:$0xff]   ;;  %v12968_v51 = vld [vmem:[#allocation11 + $0x768] ss:$16 sps:$4 sm:$0xff]  }
 0x5ff   :  { %v8681_v59 = vpack.c.bf16 %v12514_v37, %v12514_v37  ;;  %v8674_v13 = vpop.f32.mrb[47].mxu1  ;;  %v12973_v32 = vld [vmem:[#allocation11 + $0x784] ss:$16 sps:$4 sm:$0xff]   ;;  %v12976_v37 = vld [vmem:[#allocation11 + $0x78c] ss:$16 sps:$4 sm:$0xff]  }
 0x600   :  { %v8683_v46 = vpack.c.bf16 %v12516_v56, %v12516_v56  ;;  %v12971_v52 = vld [vmem:[#allocation11 + $0x780] ss:$16 sps:$4 sm:$0xff]   ;;  %v12974_v62 = vld [vmem:[#allocation11 + $0x788] ss:$16 sps:$4 sm:$0xff]   ;;  %v12979_v56 = vld [vmem:[#allocation11 + $0x7a4] ss:$16 sps:$4 sm:$0xff]  }
 0x601   :  { %10356 = vmatprep.mubr.bf16.mxu0 %v8681_v59  ;;  %10520 = vmatprep.mubr.bf16.mxu1 %v8681_v59  ;;  %v12982_v55 = vld [vmem:[#allocation11 + $0x7ac] ss:$16 sps:$4 sm:$0xff]   ;;  %v12977_v57 = vld [vmem:[#allocation11 + $0x7a0] ss:$16 sps:$4 sm:$0xff]   ;;  %v12980_v59 = vld [vmem:[#allocation11 + $0x7a8] ss:$16 sps:$4 sm:$0xff]  }
 0x602   :  { %10357 = vmatmul.mubr.bf16.vlgmr.msra.gmra.mrb[48].mxu0 %v8680_v9  ;;  %10521 = vmatmul.mubr.bf16.vlgmr.msra.gmra.mrb[48].mxu1 %v8680_v9  ;;  %v12985_v13 = vld [vmem:[#allocation11 + $0x7c4] ss:$16 sps:$4 sm:$0xff]   ;;  %v12986_v9 = vld [vmem:[#allocation11 + $0x7c8] ss:$16 sps:$4 sm:$0xff]  }
 0x603   :  { %10366 = vmatpush1.bf16.msra.mxu0 %v12899_v39  ;;  %10530 = vmatpush1.bf16.msra.mxu1 %v12902_v61  ;;  %v12988_v39 = vld [vmem:[#allocation11 + $0x7cc] ss:$16 sps:$4 sm:$0xff]   ;;  %v12983_v61 = vld [vmem:[#allocation11 + $0x7c0] ss:$16 sps:$4 sm:$0xff]  }
 0x604   :  { %10397 = vmatprep.mubr.bf16.mxu0 %v8683_v46  ;;  %10561 = vmatprep.mubr.bf16.mxu1 %v8683_v46  ;;  %v12991_v46 = vld [vmem:[#allocation11 + $0x7e4] ss:$16 sps:$4 sm:$0xff]  }
 0x605   :  { %10367 = vmatprep.subr.bf16.mxu0 %v12907_v40  ;;  %10531 = vmatprep.subr.bf16.mxu1 %v12910_v28  ;;  %v13004_v40 = vld [vmem:[#allocation10] sm:$0xff] }
 0x606   :  { %v5447_v28 = vrot.slane %v13004_v40, %v4868_v11  ;;  %v10631_v40 = vld [vmem:[#allocation14 + $0x1c8] sm:$0xff] }
 0x607   :  { %10368 = vmatpush1.bf16.msra.mxu0 %v12905_v1  ;;  %10532 = vmatpush1.bf16.msra.mxu1 %v12908_v19  ;;  %v12994_v1 = vld [vmem:[#allocation11 + $0x7ec] ss:$16 sps:$4 sm:$0xff]   ;;  %v10590_v19 = vld [vmem:[#allocation14 + $0x80] sm:$0xff] }
 0x608   :  { %10369 = vmatprep.subr.bf16.mxu0 %v12913_v2  ;;  %10533 = vmatprep.subr.bf16.mxu1 %v12916_v15  ;;  %v10591_v2 = vld [vmem:[#allocation14 + $0x88] sm:$0xff]  ;;  %v10622_v15 = vld [vmem:[#allocation14 + $0x180] sm:$0xff] }
 0x609   :  { %v12421_v23 = vpack.c.bf16 %v10591_v2, %v10590_v19  ;;  %v10614_v19 = vld [vmem:[#allocation14 + $0x140] sm:$0xff] }
 0x60b   :  { %10370 = vmatpush1.bf16.msra.mxu0 %v12911_v3  ;;  %10534 = vmatpush1.bf16.msra.mxu1 %v12914_v7  ;;  %v10623_v3 = vld [vmem:[#allocation14 + $0x188] sm:$0xff] }
 0x60c   :  { %10371 = vmatprep.subr.bf16.mxu0 %v12919_v47  ;;  %10535 = vmatprep.subr.bf16.mxu1 %v12922_v10  ;;  %v12989_v7 = vld [vmem:[#allocation11 + $0x7e0] ss:$16 sps:$4 sm:$0xff]   ;;  %v12992_v47 = vld [vmem:[#allocation11 + $0x7e8] ss:$16 sps:$4 sm:$0xff]   ;;  %v12453_v11 = vpack.c.bf16 %v10623_v3, %v10622_v15 }
 0x60d   :  { %v10574_v10 = vld [vmem:[#allocation14] sm:$0xff]  ;;  %v10615_v15 = vld [vmem:[#allocation14 + $0x148] sm:$0xff] }
 0x60e   :  { %v12471_v3 = vpack.c.bf16 %v10615_v15, %v10614_v19  ;;  %v10788_v19 = vld [vmem:[%s13787_s11 + $0x18] sm:$0xff] }
 0x60f   :  { %10372 = vmatpush1.bf16.msra.mxu0 %v12917_v18  ;;  %10536 = vmatpush1.bf16.msra.mxu1 %v12920_v14  ;;  %v10575_v18 = vld [vmem:[#allocation14 + $0x8] sm:$0xff]  ;;  %v12515_v14 = vadd.f32 %v13708_v6, %v5447_v28 }
 0x610   :  { %10373 = vmatprep.subr.bf16.mxu0 %v12925_v33  ;;  %10537 = vmatprep.subr.bf16.mxu1 %v12928_v27  ;;  %v10606_v33 = vld [vmem:[#allocation14 + $0x100] sm:$0xff]  ;;  %v10607_v27 = vld [vmem:[#allocation14 + $0x108] sm:$0xff] }
 0x613   :  { %10374 = vmatpush1.bf16.msra.mxu0 %v12923_v29  ;;  %10538 = vmatpush1.bf16.msra.mxu1 %v12926_v17  ;;  %v10592_v29 = vld [vmem:[#allocation14 + $0x90] sm:$0xff]  ;;  %v10593_v17 = vld [vmem:[#allocation14 + $0x98] sm:$0xff] }
 0x614   :  { %10375 = vmatprep.subr.bf16.mxu0 %v12931_v20  ;;  %10539 = vmatprep.subr.bf16.mxu1 %v12934_v8  ;;  %v10624_v20 = vld [vmem:[#allocation14 + $0x190] sm:$0xff]  ;;  %v10625_v8 = vld [vmem:[#allocation14 + $0x198] sm:$0xff]  ;;  %v12425_v6 = vpack.c.bf16 %v10593_v17, %v10592_v29 }
 0x615   :  { %v10616_v29 = vld [vmem:[#allocation14 + $0x150] sm:$0xff]  ;;  %v10617_v17 = vld [vmem:[#allocation14 + $0x158] sm:$0xff] }
 0x617   :  { %10376 = vmatpush1.bf16.msra.mxu0 %v12929_v22  ;;  %10540 = vmatpush1.bf16.msra.mxu1 %v12932_v16  ;;  %v12423_v22 = vpack.c.bf16 %v10575_v18, %v10574_v10  ;;  %v12455_v16 = vpack.c.bf16 %v10607_v27, %v10606_v33  ;;  %v10632_v10 = vld [vmem:[#allocation14 + $0x1d0] sm:$0xff] }
 0x618   :  { %10377 = vmatprep.subr.bf16.mxu0 %v12937_v44  ;;  %10541 = vmatprep.subr.bf16.mxu1 %v12940_v53  ;;  %v10576_v44 = vld [vmem:[#allocation14 + $0x10] sm:$0xff]  ;;  %v10577_v53 = vld [vmem:[#allocation14 + $0x18] sm:$0xff] }
 0x61b   :  { %10378 = vmatpush1.bf16.msra.mxu0 %v12935_v21  ;;  %10542 = vmatpush1.bf16.msra.mxu1 %v12938_v24  ;;  %v8682_v21 = vpack.c.bf16 %v12515_v14, %v12515_v14  ;;  %v12457_v24 = vpack.c.bf16 %v10625_v8, %v10624_v20  ;;  %v10633_v14 = vld [vmem:[#allocation14 + $0x1d8] sm:$0xff]  ;;  %v12475_v20 = vpack.c.bf16 %v10617_v17, %v10616_v29  ;;  %v10602_v8 = vld [vmem:[#allocation14 + $0xe0] sm:$0xff] }
 0x61c   :  { %10379 = vmatprep.subr.bf16.mxu0 %v12943_v12  ;;  %10543 = vmatprep.subr.bf16.mxu1 %v12946_v25  ;;  %v10608_v12 = vld [vmem:[#allocation14 + $0x110] sm:$0xff]  ;;  %v10609_v25 = vld [vmem:[#allocation14 + $0x118] sm:$0xff]  ;;  %v12473_v33 = vpack.c.bf16 %v10633_v14, %v10632_v10  ;;  %v10792_v14 = vld [vmem:[%s13787_s11 + $0x38] sm:$0xff] }
 0x61d   :  { %v10795_v29 = vld [vmem:[%s13787_s11 + $0x50] sm:$0xff]  ;;  %v10796_v17 = vld [vmem:[%s13787_s11 + $0x58] sm:$0xff] }
 0x61f   :  { %10380 = vmatpush1.bf16.msra.mxu0 %v12941_v48  ;;  %10544 = vmatpush1.bf16.msra.mxu1 %v12944_v26  ;;  %v10594_v48 = vld [vmem:[#allocation14 + $0xa0] sm:$0xff]  ;;  %v10595_v26 = vld [vmem:[#allocation14 + $0xa8] sm:$0xff] }
 0x620   :  { %10381 = vmatprep.subr.bf16.mxu0 %v12949_v34  ;;  %10545 = vmatprep.subr.bf16.mxu1 %v12952_v35  ;;  %v10626_v34 = vld [vmem:[#allocation14 + $0x1a0] sm:$0xff]  ;;  %v10627_v35 = vld [vmem:[#allocation14 + $0x1a8] sm:$0xff] }
 0x623   :  { %10382 = vmatpush1.bf16.msra.mxu0 %v12947_v0  ;;  %10546 = vmatpush1.bf16.msra.mxu1 %v12950_v36  ;;  %v12427_v0 = vpack.c.bf16 %v10577_v53, %v10576_v44  ;;  %v12459_v36 = vpack.c.bf16 %v10609_v25, %v10608_v12  ;;  %v10635_v53 = vld [vmem:[#allocation14 + $0x1e8] sm:$0xff]  ;;  %v10618_v25 = vld [vmem:[#allocation14 + $0x160] sm:$0xff] }
 0x624   :  { %10383 = vmatprep.subr.bf16.mxu0 %v12955_v45  ;;  %10547 = vmatprep.subr.bf16.mxu1 %v12958_v38  ;;  %v10578_v45 = vld [vmem:[#allocation14 + $0x20] sm:$0xff]  ;;  %v10579_v38 = vld [vmem:[#allocation14 + $0x28] sm:$0xff] }
 0x627   :  { %10384 = vmatpush1.bf16.msra.mxu0 %v12953_v30  ;;  %10548 = vmatpush1.bf16.msra.mxu1 %v12956_v63  ;;  %v12429_v30 = vpack.c.bf16 %v10595_v26, %v10594_v48  ;;  %v12461_v63 = vpack.c.bf16 %v10627_v35, %v10626_v34  ;;  %v10619_v48 = vld [vmem:[#allocation14 + $0x168] sm:$0xff]  ;;  %v10604_v26 = vld [vmem:[#allocation14 + $0xf0] sm:$0xff]  ;;  %v10605_v35 = vld [vmem:[#allocation14 + $0xf8] sm:$0xff] }
 0x628   :  { %10385 = vmatprep.subr.bf16.mxu0 %v12961_v42  ;;  %10549 = vmatprep.subr.bf16.mxu1 %v12964_v31  ;;  %v10610_v42 = vld [vmem:[#allocation14 + $0x120] sm:$0xff]  ;;  %v10611_v31 = vld [vmem:[#allocation14 + $0x128] sm:$0xff]  ;;  %v12479_v34 = vpack.c.bf16 %v10619_v48, %v10618_v25 }
 0x629   :  { %v12297_v25 = vld [vmem:[#allocation16] ss:$0 sm:$0xff] }
 0x62b   :  { %10386 = vmatpush1.bf16.msra.mxu0 %v12959_v60  ;;  %10550 = vmatpush1.bf16.msra.mxu1 %v12962_v43  ;;  %v10596_v60 = vld [vmem:[#allocation14 + $0xb0] sm:$0xff]  ;;  %v10597_v43 = vld [vmem:[#allocation14 + $0xb8] sm:$0xff] }
 0x62c   :  { %10387 = vmatprep.subr.bf16.mxu0 %v12967_v41  ;;  %10551 = vmatprep.subr.bf16.mxu1 %v12970_v49  ;;  %v10628_v41 = vld [vmem:[#allocation14 + $0x1b0] sm:$0xff]  ;;  %v10629_v49 = vld [vmem:[#allocation14 + $0x1b8] sm:$0xff] }
 0x62f   :  { %10388 = vmatpush1.bf16.msra.mxu0 %v12965_v50  ;;  %10552 = vmatpush1.bf16.msra.mxu1 %v12968_v51  ;;  %v12431_v50 = vpack.c.bf16 %v10579_v38, %v10578_v45  ;;  %v12463_v51 = vpack.c.bf16 %v10611_v31, %v10610_v42  ;;  %v12449_v45 = vpack.c.bf16 %v10605_v35, %v10604_v26  ;;  %v10620_v42 = vld [vmem:[#allocation14 + $0x170] sm:$0xff] }
 0x630   :  { %10389 = vmatprep.subr.bf16.mxu0 %v12973_v32  ;;  %10553 = vmatprep.subr.bf16.mxu1 %v12976_v37  ;;  %v10580_v32 = vld [vmem:[#allocation14 + $0x30] sm:$0xff]  ;;  %v12433_v37 = vpack.c.bf16 %v10597_v43, %v10596_v60  ;;  %v10621_v60 = vld [vmem:[#allocation14 + $0x178] sm:$0xff] }
 0x631   :  { %v12483_v43 = vpack.c.bf16 %v10621_v60, %v10620_v42 }
 0x633   :  { %10390 = vmatpush1.bf16.msra.mxu0 %v12971_v52  ;;  %10554 = vmatpush1.bf16.msra.mxu1 %v12974_v62  ;;  %v12465_v52 = vpack.c.bf16 %v10629_v49, %v10628_v41  ;;  %v10581_v62 = vld [vmem:[#allocation14 + $0x38] sm:$0xff]  ;;  %v13228_v41 = vmov 0.0|0.0  }
 0x634   :  { %10391 = vmatprep.subr.bf16.mxu0 %v12979_v56  ;;  %10555 = vmatprep.subr.bf16.mxu1 %v12982_v55  ;;  %v10612_v56 = vld [vmem:[#allocation14 + $0x130] sm:$0xff]  ;;  %v10613_v55 = vld [vmem:[#allocation14 + $0x138] sm:$0xff] }
 0x635   :  { %v8940_v49 = vld [vmem:[#allocation13] sm:$0xf] }
 0x637   :  { %10392 = vmatpush1.bf16.msra.mxu0 %v12977_v57  ;;  %10556 = vmatpush1.bf16.msra.mxu1 %v12980_v59  ;;  %v12435_v57 = vpack.c.bf16 %v10581_v62, %v10580_v32  ;;  %v12467_v59 = vpack.c.bf16 %v10613_v55, %v10612_v56  ;;  %v8957_v32 = vrot.slane %v8940_v49, %v13582_v4 }
 0x638   :  { %10393 = vmatprep.subr.bf16.mxu0 %v12985_v13  ;;  %10557 = vmatprep.subr.bf16.mxu1 %v12988_v39  ;;  %v10598_v13 = vld [vmem:[#allocation14 + $0xc0] sm:$0xff]  ;;  %v10599_v39 = vld [vmem:[#allocation14 + $0xc8] sm:$0xff] }
 0x63b   :  { %10394 = vmatpush1.bf16.msra.mxu0 %v12983_v61  ;;  %10558 = vmatpush1.bf16.msra.mxu1 %v12986_v9  ;;  %v10630_v61 = vld [vmem:[#allocation14 + $0x1c0] sm:$0xff]  ;;  %v12437_v9 = vpack.c.bf16 %v10599_v39, %v10598_v13 }
 0x63c   :  { %10395 = vmatprep.subr.bf16.mxu0 %v12991_v46  ;;  %10559 = vmatprep.subr.bf16.mxu1 %v12994_v1  ;;  %v12469_v28 = vpack.c.bf16 %v10631_v40, %v10630_v61  ;;  %v10582_v46 = vld [vmem:[#allocation14 + $0x40] sm:$0xff]  ;;  %v10583_v1 = vld [vmem:[#allocation14 + $0x48] sm:$0xff] }
 0x63d   :  { %v12439_v2 = vpack.c.bf16 %v10583_v1, %v10582_v46  ;;  %v10787_v1 = vld [vmem:[%s13787_s11 + $0x10] sm:$0xff] }
 0x63f   :  { %10396 = vmatpush1.bf16.msra.mxu0 %v12989_v7  ;;  %10560 = vmatpush1.bf16.msra.mxu1 %v12992_v47  ;;  %v10600_v7 = vld [vmem:[#allocation14 + $0xd0] sm:$0xff]  ;;  %v10601_v47 = vld [vmem:[#allocation14 + $0xd8] sm:$0xff] }
 0x640   :  { %12422 = vmatprep.subr.bf16.mxu0 %v12421_v23  ;;  %12454 = vmatprep.subr.bf16.mxu1 %v12453_v11  ;;  %v12441_v18 = vpack.c.bf16 %v10601_v47, %v10600_v7  ;;  %v10584_v23 = vld [vmem:[#allocation14 + $0x50] sm:$0xff]  ;;  %v10585_v11 = vld [vmem:[#allocation14 + $0x58] sm:$0xff] }
 0x641   :  { %v12443_v27 = vpack.c.bf16 %v10585_v11, %v10584_v23  ;;  %v10789_v7 = vld [vmem:[%s13787_s11 + $0x20] sm:$0xff]  ;;  %v10790_v47 = vld [vmem:[%s13787_s11 + $0x28] sm:$0xff] }
 0x642   :  { %10398 = vmatmul.mubr.bf16.vlgmr.msra.gmra.mrb[48].mxu0 %v8682_v21  ;;  %10562 = vmatmul.mubr.bf16.vlgmr.msra.gmra.mrb[48].mxu1 %v8682_v21  ;;  %v10586_v21 = vld [vmem:[#allocation14 + $0x60] sm:$0xff]  ;;  %v12492_v10 = vpack.c.bf16 %v10790_v47, %v10789_v7  ;;  %v10793_v11 = vld [vmem:[%s13787_s11 + $0x40] sm:$0xff] }
 0x643   :  { %12424 = vmatpush3.bf16.msra.mxu0 %v12423_v22  ;;  %12456 = vmatpush3.bf16.msra.mxu1 %v12455_v16  ;;  %v10603_v22 = vld [vmem:[#allocation14 + $0xe8] sm:$0xff]  ;;  %v10634_v16 = vld [vmem:[#allocation14 + $0x1e0] sm:$0xff] }
 0x644   :  { %12426 = vmatprep.subr.bf16.mxu0 %v12425_v6  ;;  %12458 = vmatprep.subr.bf16.mxu1 %v12457_v24  ;;  %v12445_v44 = vpack.c.bf16 %v10603_v22, %v10602_v8  ;;  %v10587_v6 = vld [vmem:[#allocation14 + $0x68] sm:$0xff]  ;;  %v12477_v24 = vpack.c.bf16 %v10635_v53, %v10634_v16  ;;  %v10798_v22 = vld [vmem:[%s13787_s11 + $0x68] sm:$0xff] }
 0x645   :  { %v12447_v12 = vpack.c.bf16 %v10587_v6, %v10586_v21  ;;  %v10797_v8 = vld [vmem:[%s13787_s11 + $0x60] sm:$0xff]  ;;  %v10800_v53 = vld [vmem:[%s13787_s11 + $0x78] sm:$0xff]  ;;  %v13230_v6 = vmov 0.0  }
 0x646   :  { %v12504_v16 = vpack.c.bf16 %v10798_v22, %v10797_v8 }
 0x647   :  { %12428 = vmatpush3.bf16.msra.mxu0 %v12427_v0  ;;  %12460 = vmatpush3.bf16.msra.mxu1 %v12459_v36  ;;  %v10636_v0 = vld [vmem:[#allocation14 + $0x1f0] sm:$0xff]  ;;  %v10637_v36 = vld [vmem:[#allocation14 + $0x1f8] sm:$0xff] }
 0x648   :  { %12430 = vmatprep.subr.bf16.mxu0 %v12429_v30  ;;  %12462 = vmatprep.subr.bf16.mxu1 %v12461_v63  ;;  %v12481_v38 = vpack.c.bf16 %v10637_v36, %v10636_v0  ;;  %v10588_v30 = vld [vmem:[#allocation14 + $0x70] sm:$0xff]  ;;  %v10589_v63 = vld [vmem:[#allocation14 + $0x78] sm:$0xff] }
 0x649   :  { %v12451_v31 = vpack.c.bf16 %v10589_v63, %v10588_v30 }
 0x64b   :  { %12432 = vmatpush3.bf16.msra.mxu0 %v12431_v50  ;;  %12464 = vmatpush3.bf16.msra.mxu1 %v12463_v51  ;;  %v8945_v50 = vrot.slane %v8940_v49, %v13579_v5  ;;  %v8949_v51 = vrot.slane %v8940_v49, %v13559_v54  ;;  %v10785_v54 = vld [vmem:[%s13787_s11] sm:$0xff]  ;;  %v10786_v5 = vld [vmem:[%s13787_s11 + $0x8] sm:$0xff] }
 0x64c   :  { %12434 = vmatprep.subr.bf16.mxu0 %v12433_v37  ;;  %12466 = vmatprep.subr.bf16.mxu1 %v12465_v52  ;;  %v8953_v37 = vrot.slane %v8940_v49, %v13605_v58  ;;  %v12486_v58 = vpack.c.bf16 %v10786_v5, %v10785_v54 }
 0x64f   :  { %12436 = vmatpush3.bf16.msra.mxu0 %v12435_v57  ;;  %12468 = vmatpush3.bf16.msra.mxu1 %v12467_v59 }
 0x650   :  { %12438 = vmatprep.subr.bf16.mxu0 %v12437_v9  ;;  %12470 = vmatprep.subr.bf16.mxu1 %v12469_v28 }
 0x653   :  { %12440 = vmatpush3.bf16.msra.mxu0 %v12439_v2  ;;  %12472 = vmatpush3.bf16.msra.mxu1 %v12471_v3  ;;  %v12489_v3 = vpack.c.bf16 %v10788_v19, %v10787_v1 }
 0x654   :  { %12442 = vmatprep.subr.bf16.mxu0 %v12441_v18  ;;  %12474 = vmatprep.subr.bf16.mxu1 %v12473_v33  ;;  %v10791_v18 = vld [vmem:[%s13787_s11 + $0x30] sm:$0xff]  ;;  %v10794_v33 = vld [vmem:[%s13787_s11 + $0x48] sm:$0xff] }
 0x655   :  { %v12495_v23 = vpack.c.bf16 %v10792_v14, %v10791_v18 }
 0x657   :  { %12444 = vmatpush3.bf16.msra.mxu0 %v12443_v27  ;;  %12476 = vmatpush3.bf16.msra.mxu1 %v12475_v20  ;;  %v12498_v27 = vpack.c.bf16 %v10794_v33, %v10793_v11  ;;  %v12501_v20 = vpack.c.bf16 %v10796_v17, %v10795_v29 }
 0x658   :  { %12446 = vmatprep.subr.bf16.mxu0 %v12445_v44  ;;  %12478 = vmatprep.subr.bf16.mxu1 %v12477_v24  ;;  %v10799_v44 = vld [vmem:[%s13787_s11 + $0x70] sm:$0xff] }
 0x659   :  { %v12507_v21 = vpack.c.bf16 %v10800_v53, %v10799_v44 }
 0x65b   :  { %12448 = vmatpush3.bf16.msra.mxu0 %v12447_v12  ;;  %12480 = vmatpush3.bf16.msra.mxu1 %v12479_v34 }
 0x65c   :  { %12450 = vmatprep.subr.bf16.mxu0 %v12449_v45  ;;  %12482 = vmatprep.subr.bf16.mxu1 %v12481_v38  ;;  %v12298_v45 = vld [vmem:[#allocation2] ss:$0 sm:$0xff] }
 0x65f   :  { %12452 = vmatpush3.bf16.msra.mxu0 %v12451_v31  ;;  %12484 = vmatpush3.bf16.msra.mxu1 %v12483_v43 }
 0x660   :  { %12485 = vmatprep.subr.bf16.mxu0 %v13228_v41 }
 0x715   :  { %v10399_v52 = vpop.f32.mrb[48].mxu0  ;;  %v10563_v62 = vpop.f32.mrb[48].mxu1 }
 0x716   :  { %v12517_v56 = vadd.f32 %v10399_v52, %v8945_v50  ;;  %v10401_v55 = vpop.f32.mrb[49].mxu0  ;;  %v10565_v57 = vpop.f32.mrb[49].mxu1  ;;  %v12519_v9 = vadd.f32 %v10563_v62, %v8953_v37 }
 0x717   :  { %v12518_v59 = vadd.f32 %v10401_v55, %v8949_v51  ;;  %v12520_v13 = vadd.f32 %v10565_v57, %v8957_v32  ;;  %v10403_v39 = vpop.f32.mrb[50].mxu0  ;;  %v10567_v61 = vpop.f32.mrb[50].mxu1 }
 0x718   :  { %v10404_v40 = vpop.f32.mrb[51].mxu0  ;;  %v10568_v28 = vpop.f32.mrb[51].mxu1  ;;  %12995 = vtanh.f32 %v12517_v56 }
 0x719   :  { %12997 = vtanh.f32 %v12518_v59 }
 0x71a   :  { %12999 = vtanh.f32 %v12520_v13 }
 0x71b   :  { %13001 = vtanh.f32 %v12519_v9 }
 0x722   :  { %v12996_v4 = vpop.eup %12995 }
 0x723   :  { %v12998_v46 = vpop.eup %12997 }
 0x724   :  { %v13000_v2 = vpop.eup %12999  ;;  %10709 = vmatprep.mubr.f32.mxu0 %v12998_v46 }
 0x725   :  { %v13002_v15 = vpop.eup %13001  ;;  %10779 = vmatprep.mubr.f32.mxu1 %v13000_v2  ;;  %10710 = vmatmul.mubr.f32.vlgmr.msra.gmra.mrb[52].mxu0 %v12996_v4 }
 0x726   :  { %10780 = vmatmul.mubr.f32.vlgmr.msra.gmra.mrb[52].mxu1 %v13002_v15  ;;  %12487 = vmatpush3.bf16.msra.mxu0 %v12486_v58 }
 0x727   :  { %12488 = vmatprep.subr.bf16.mxu0 %v13228_v41  ;;  %12418 = vmatprep.mubr.msk.f32.mxu0 %vm13229_vm0, %v13230_v6 }
 0x72a   :  { %12490 = vmatpush3.bf16.msra.mxu0 %v12489_v3 }
 0x72b   :  { %12491 = vmatprep.subr.bf16.mxu0 %v13228_v41 }
 0x72e   :  { %12493 = vmatpush3.bf16.msra.mxu0 %v12492_v10 }
 0x72f   :  { %12494 = vmatprep.subr.bf16.mxu0 %v13228_v41 }
 0x732   :  { %12496 = vmatpush3.bf16.msra.mxu0 %v12495_v23 }
 0x733   :  { %12497 = vmatprep.subr.bf16.mxu0 %v13228_v41 }
 0x736   :  { %12499 = vmatpush3.bf16.msra.mxu0 %v12498_v27 }
 0x737   :  { %12500 = vmatprep.subr.bf16.mxu0 %v13228_v41 }
 0x73a   :  { %12502 = vmatpush3.bf16.msra.mxu0 %v12501_v20 }
 0x73b   :  { %12503 = vmatprep.subr.bf16.mxu0 %v13228_v41 }
 0x73e   :  { %12505 = vmatpush3.bf16.msra.mxu0 %v12504_v16 }
 0x73f   :  { %12506 = vmatprep.subr.bf16.mxu0 %v13228_v41 }
 0x742   :  { %12508 = vmatpush3.bf16.msra.mxu0 %v12507_v21 }
 0x7f8   :  { %v12331_v24 = vpop.f32.mrb[52].mxu0 }
 0x7f9   :  { %v12366_v12 = vpop.f32.mrb[52].mxu1  ;;  %v12332_v48 = vpop.f32.mrb[53].mxu0 }
 0x7fa   :  { %v12333_v26 = vadd.f32 %v12332_v48, %v12331_v24  ;;  %v12367_v34 = vpop.f32.mrb[53].mxu1 }
 0x7fb   :  { %v12368_v35 = vadd.f32 %v12367_v34, %v12366_v12 }
 0x7fc   :  { %v10712_v0 = vadd.f32 %v12333_v26, %v12297_v25 }
 0x7fe   :  { %v10782_v36 = vadd.f32 %v12368_v35, %v10712_v0 }
 0x800   :  { %12419 = vmatmul.mubr.f32.vlgmr.msra.gmra.mrb[54].mxu0 %v10782_v36 }
 0x8d3   :  { %v10874_v38 = vpop.f32.mrb[54].mxu0 }
 0x8d4   :  { %v10875_v30 = vadd.f32 %v12298_v45, %v10874_v38  ;;  %v12420_v63 = vpop.f32.mrb[55].mxu0 }
 0x8d6   :  { %10879 = vst.msk [vmem:[%s13789_s13] sm:$0xff] %vm10878_vm1, %v10875_v30 }
 0x8d7   :  { %10884 = vsyncpa [#allocation4], 1 }
 0x8d8   :  { %10885 = vsyncpa [#allocation6], 1 }
 0x8d9   :  { %10886 = vsyncpa [#allocation9], 1 }
 0x8da   :  { %10887 = vsyncpa [#allocation12], 1 }
 0x8db   :  { %10888 = vsyncpa [#allocation15], 1 }

</bundles_post_ra>
